<compile_context>
chip_gen: v7x
topology: tpu7x:2x2x1
jax: 0.10.0
libtpu: 0.0.40
codegen_flags: <defaults>
</compile_context>

<pallas_src>
import functools

import jax
import jax.numpy as jnp
from jax import lax
from jax.experimental import pallas as pl
from jax.experimental.pallas import tpu as pltpu


# ---------------------------------------------------------------------------
# Fused kernel
# ---------------------------------------------------------------------------
def _conv3x3_im2col(pad_ref, act_2d, w_ref, sh_ref, H, W):
    """3x3 'same' conv (+shift +ReLU) via im2col on a zero-haloed VMEM scratch.

    pad_ref : (H+2, Wpad, 32) scratch; halo is zero; interior written at
              [1:1+H, 8:8+W, :] (sublane-aligned column offset).
    act_2d  : (H*W, 32) activation value.
    w_ref   : (288, 32) weight ref, tap-major [(ky*3+kx)*32 + c], BN scale folded.
    sh_ref  : (1, 32) BN shift.
    """
    pad_ref[1:1 + H, 8:8 + W, :] = act_2d.reshape(H, W, 32)
    patches = jnp.concatenate(
        [pad_ref[ky:ky + H, 7 + kx:7 + kx + W, :].reshape(H * W, 32)
         for ky in range(3) for kx in range(3)],
        axis=-1)                                              # (H*W, 288)
    y = jnp.dot(patches, w_ref[...], preferred_element_type=jnp.float32)
    y = y + sh_ref[...]
    return jnp.maximum(y, 0.0)


def _inception_kernel(x_ref, w1_ref, sh1_ref, wp_ref, shp_ref,
                      w3_ref, sh3_ref, w32_ref, sh32_ref, w33_ref, sh33_ref,
                      o_ref, pad_ref, *, H, W):
    # Scratch is uninitialized and per-core (megacore): zero the halo buffer
    # each grid step.  Interior writes never touch the halo afterwards.
    pad_ref[...] = jnp.zeros_like(pad_ref)

    HW = H * W
    xf = x_ref[0].reshape(HW, 128)                            # (HW, 128)

    # ---- all four 1x1 convs in one wide MXU pass -------------------------
    # columns: [branch1x1 0:32 | branch1x1_2(pre-pool) 32:64 |
    #           branch3x3_reduce 64:96 | branch3x3_reduce_2 96:128]
    yw = jnp.dot(xf, w1_ref[...], preferred_element_type=jnp.float32)
    yw = yw + sh1_ref[...]          # pool slots & padded reduce slots carry 0
    b1 = jnp.maximum(yw[:, 0:32], 0.0)
    pool_pre = yw[:, 32:64]         # NO ReLU before the average pool
    b3r = jnp.maximum(yw[:, 64:96], 0.0)     # last 8 channels are zero padding
    b3r2 = jnp.maximum(yw[:, 96:128], 0.0)   # last 8 channels are zero padding

    # ---- branch1x1_2: avg_pool(3,1,1) expressed as an I/9 "3x3 conv" ------
    b1_2 = _conv3x3_im2col(pad_ref, pool_pre, wp_ref, shp_ref, H, W)

    # ---- branch3x3 (reduce -> 3x3) ----------------------------------------
    b3 = _conv3x3_im2col(pad_ref, b3r, w3_ref, sh3_ref, H, W)

    # ---- branch3x3_2 -> branch3x3_3 ---------------------------------------
    b3_2 = _conv3x3_im2col(pad_ref, b3r2, w32_ref, sh32_ref, H, W)
    b3_3 = _conv3x3_im2col(pad_ref, b3_2, w33_ref, sh33_ref, H, W)

    # ---- lane-dense 128-channel output (single unmasked store) ------------
    out = jnp.concatenate([b1, b1_2, b3, b3_3], axis=-1)      # (HW, 128)
    o_ref[0] = out.reshape(H, W, 128).astype(o_ref.dtype)


def inception_forward(x_nchw, kp):
    """Inception forward. Input/output NCHW, Cin = Cout = 128."""
    N, C, H, W = x_nchw.shape
    assert C == 128 and (H * W) % 8 == 0
    x_nhwc = jnp.transpose(x_nchw, (0, 2, 3, 1))              # -> NHWC

    pad_cols = ((W + 9 + 7) // 8) * 8                         # haloed scratch width

    def full(*shape):
        return pl.BlockSpec(shape, lambda n, _r=len(shape): (0,) * _r)

    out = pl.pallas_call(
        functools.partial(_inception_kernel, H=H, W=W),
        out_shape=jax.ShapeDtypeStruct((N, H, W, 128), x_nchw.dtype),
        grid_spec=pltpu.PrefetchScalarGridSpec(
            num_scalar_prefetch=0,
            grid=(N,),
            in_specs=[
                pl.BlockSpec((1, H, W, 128), lambda n: (n, 0, 0, 0)),
                full(128, 128), full(1, 128),        # merged 1x1 weights/shift
                full(288, 32), full(1, 32),          # avg-pool-as-conv
                full(288, 32), full(1, 32),          # branch3x3
                full(288, 32), full(1, 32),          # branch3x3_2
                full(288, 32), full(1, 32),          # branch3x3_3
            ],
            out_specs=pl.BlockSpec((1, H, W, 128), lambda n: (n, 0, 0, 0)),
            scratch_shapes=[pltpu.VMEM((H + 2, pad_cols, 32), jnp.float32)],
        ),
        compiler_params=pltpu.CompilerParams(
            dimension_semantics=("parallel",)),
    )(x_nhwc, kp["w1"], kp["sh1"], kp["wpool"], kp["shpool"],
      kp["w3"], kp["sh3"], kp["w3_2"], kp["sh3_2"], kp["w3_3"], kp["sh3_3"])
    return jnp.transpose(out, (0, 3, 1, 2))                   # -> NCHW


# ---------------------------------------------------------------------------
# Parameter construction (synthetic, eval-mode BN) + folding for the kernel
# ---------------------------------------------------------------------------
def make_params(key):
    def conv_bn(k, cin, cout, ksize):
        k1, k2, k3, k4, k5 = jax.random.split(k, 5)
        if ksize == 1:
            w = 0.1 * jax.random.normal(k1, (cin, cout), jnp.float32)
        else:
            w = 0.1 * jax.random.normal(k1, (3, 3, cin, cout), jnp.float32)
        return dict(
            w=w,
            gamma=1.0 + 0.1 * jax.random.normal(k2, (cout,), jnp.float32),
            beta=0.1 * jax.random.normal(k3, (cout,), jnp.float32),
            mean=0.1 * jax.random.normal(k4, (cout,), jnp.float32),
            var=jax.nn.softplus(jax.random.normal(k5, (cout,), jnp.float32)) + 0.5,
        )

    ks = jax.random.split(key, 7)
    return {
        "branch1x1": conv_bn(ks[0], 128, 32, 1),
        "branch1x1_2": conv_bn(ks[1], 128, 32, 1),
        "branch3x3_reduce": conv_bn(ks[2], 128, 24, 1),
        "branch3x3": conv_bn(ks[3], 24, 32, 3),
        "branch3x3_reduce_2": conv_bn(ks[4], 128, 24, 1),
        "branch3x3_2": conv_bn(ks[5], 24, 32, 3),
        "branch3x3_3": conv_bn(ks[6], 32, 32, 3),
    }


def fold_params(raw, eps=1e-5):
    def scale_shift(p):
        s = p["gamma"] / jnp.sqrt(p["var"] + eps)
        return s, p["beta"] - p["mean"] * s

    s_b1, sh_b1 = scale_shift(raw["branch1x1"])
    s_p, sh_p = scale_shift(raw["branch1x1_2"])
    s_r1, sh_r1 = scale_shift(raw["branch3x3_reduce"])
    s_r2, sh_r2 = scale_shift(raw["branch3x3_reduce_2"])

    def pad32(w):  # zero-pad (128, c) -> (128, 32)
        return jnp.pad(w, ((0, 0), (0, 32 - w.shape[1])))

    # merged 1x1 weight, BN scale folded, 24-wide reduces padded to 32 cols
    w1 = jnp.concatenate([
        raw["branch1x1"]["w"] * s_b1[None, :],
        raw["branch1x1_2"]["w"] * s_p[None, :],
        pad32(raw["branch3x3_reduce"]["w"] * s_r1[None, :]),
        pad32(raw["branch3x3_reduce_2"]["w"] * s_r2[None, :]),
    ], axis=1)                                                # (128, 128)
    sh1 = jnp.concatenate([
        sh_b1, jnp.zeros_like(sh_p),        # pool-branch shift added AFTER pooling
        jnp.pad(sh_r1, (0, 8)), jnp.pad(sh_r2, (0, 8)),
    ])[None, :]                                               # (1, 128)

    # avg_pool(3,1,1, count_include_pad=True) as an im2col "conv": each tap I/9
    wpool = jnp.tile(jnp.eye(32, dtype=jnp.float32) / 9.0, (9, 1))   # (288, 32)
    shpool = sh_p[None, :]

    def fold3x3(name, s, sh):
        w = raw[name]["w"] * s[None, None, None, :]           # (3,3,cin,32) HWIO
        cin = w.shape[2]
        if cin < 32:
            w = jnp.pad(w, ((0, 0), (0, 0), (0, 32 - cin), (0, 0)))
        return w.reshape(9 * 32, 32), sh[None, :]

    w3, sh3 = fold3x3("branch3x3", *scale_shift(raw["branch3x3"]))
    w3_2, sh3_2 = fold3x3("branch3x3_2", *scale_shift(raw["branch3x3_2"]))
    w3_3, sh3_3 = fold3x3("branch3x3_3", *scale_shift(raw["branch3x3_3"]))

    return dict(w1=w1, sh1=sh1, wpool=wpool, shpool=shpool,
                w3=w3, sh3=sh3, w3_2=w3_2, sh3_2=sh3_2, w3_3=w3_3, sh3_3=sh3_3)


# ---------------------------------------------------------------------------
# Pure-JAX reference (unfused, un-folded) for numerical validation
# ---------------------------------------------------------------------------
def _ref_basic_conv(x, p, pad, eps=1e-5):
    w = p["w"]
    if w.ndim == 2:
        w = w.reshape(1, 1, *w.shape)
    y = lax.conv_general_dilated(
        x, w, (1, 1), [(pad, pad), (pad, pad)],
        dimension_numbers=("NHWC", "HWIO", "NHWC"),
        precision=lax.Precision.HIGHEST)
    scale = p["gamma"] / jnp.sqrt(p["var"] + eps)
    shift = p["beta"] - p["mean"] * scale
    y = y * scale.reshape(1, 1, 1, -1) + shift.reshape(1, 1, 1, -1)
    return jnp.maximum(y, 0.0)


def _ref_avgpool3(x):
    xp = jnp.pad(x, ((0, 0), (1, 1), (1, 1), (0, 0)))
    H, W = x.shape[1], x.shape[2]
    s = sum(xp[:, dy:dy + H, dx:dx + W, :] for dy in range(3) for dx in range(3))
    return s / 9.0


def inception_reference(x_nchw, raw):
    x = jnp.transpose(x_nchw, (0, 2, 3, 1))
    b1 = _ref_basic_conv(x, raw["branch1x1"], 0)
    b1_2 = _ref_basic_conv(_ref_avgpool3(x), raw["branch1x1_2"], 0)
    b3 = _ref_basic_conv(
        _ref_basic_conv(x, raw["branch3x3_reduce"], 0), raw["branch3x3"], 1)
    b3_2 = _ref_basic_conv(
        _ref_basic_conv(x, raw["branch3x3_reduce_2"], 0), raw["branch3x3_2"], 1)
    b3_3 = _ref_basic_conv(b3_2, raw["branch3x3_3"], 1)
    out = jnp.concatenate([b1, b1_2, b3, b3_3], axis=-1)
    return jnp.transpose(out, (0, 3, 1, 2))


if __name__ == "__main__":
    key = jax.random.PRNGKey(0)
    kx, kparam = jax.random.split(key)
    x = jax.random.normal(kx, (2, 128, 16, 16), jnp.float32)   # NCHW, Cin=128
    raw = make_params(kparam)
    folded = fold_params(raw)

    fwd = jax.jit(inception_forward)
    out = jax.block_until_ready(fwd(x, folded))

    assert out.shape == (2, 128, 16, 16), out.shape
    assert bool(jnp.all(jnp.isfinite(out)))

    ref = jax.block_until_ready(inception_reference(x, raw))
    max_err = float(jnp.max(jnp.abs(out - ref)))
    assert bool(jnp.allclose(out, ref, atol=1e-3, rtol=1e-3)), max_err

    print("KERNEL_OK")
</pallas_src>

<mosaic_0001>
module attributes {stable_mosaic.version = 11 : i64} {
  func.func @_inception_kernel(%arg0: i32, %arg1: memref<1x16x16x128xf32, #tpu.memory_space<vmem>>, %arg2: memref<128x128xf32, #tpu.memory_space<vmem>>, %arg3: memref<1x128xf32, #tpu.memory_space<vmem>>, %arg4: memref<288x32xf32, #tpu.memory_space<vmem>>, %arg5: memref<1x32xf32, #tpu.memory_space<vmem>>, %arg6: memref<288x32xf32, #tpu.memory_space<vmem>>, %arg7: memref<1x32xf32, #tpu.memory_space<vmem>>, %arg8: memref<288x32xf32, #tpu.memory_space<vmem>>, %arg9: memref<1x32xf32, #tpu.memory_space<vmem>>, %arg10: memref<288x32xf32, #tpu.memory_space<vmem>>, %arg11: memref<1x32xf32, #tpu.memory_space<vmem>>, %arg12: memref<1x16x16x128xf32, #tpu.memory_space<vmem>>, %arg13: memref<18x32x32xf32, #tpu.memory_space<vmem>>) attributes {dimension_semantics = [#tpu.dimension_semantics<parallel>], iteration_bounds = array<i64: 2>, scalar_prefetch = 0 : i64, scratch_operands = 1 : i64, tpu.core_type = #tpu.core_type<tc>, window_params = [{transform_indices = @transform_0, window_bounds = array<i64: 1, 16, 16, 128>}, {pipeline_mode = #tpu.pipeline_mode<synchronous>, transform_indices = @transform_1, window_bounds = array<i64: 128, 128>}, {pipeline_mode = #tpu.pipeline_mode<synchronous>, transform_indices = @transform_2, window_bounds = array<i64: 1, 128>}, {pipeline_mode = #tpu.pipeline_mode<synchronous>, transform_indices = @transform_3, window_bounds = array<i64: 288, 32>}, {pipeline_mode = #tpu.pipeline_mode<synchronous>, transform_indices = @transform_4, window_bounds = array<i64: 1, 32>}, {pipeline_mode = #tpu.pipeline_mode<synchronous>, transform_indices = @transform_5, window_bounds = array<i64: 288, 32>}, {pipeline_mode = #tpu.pipeline_mode<synchronous>, transform_indices = @transform_6, window_bounds = array<i64: 1, 32>}, {pipeline_mode = #tpu.pipeline_mode<synchronous>, transform_indices = @transform_7, window_bounds = array<i64: 288, 32>}, {pipeline_mode = #tpu.pipeline_mode<synchronous>, transform_indices = @transform_8, window_bounds = array<i64: 1, 32>}, {pipeline_mode = #tpu.pipeline_mode<synchronous>, transform_indices = @transform_9, window_bounds = array<i64: 288, 32>}, {pipeline_mode = #tpu.pipeline_mode<synchronous>, transform_indices = @transform_10, window_bounds = array<i64: 1, 32>}, {transform_indices = @transform_11, window_bounds = array<i64: 1, 16, 16, 128>}]} {
    %cst = arith.constant 0.000000e+00 : f32
    %0 = vector.broadcast %cst : f32 to vector<18x32x32xf32>
    %c0 = arith.constant 0 : index
    %c0_0 = arith.constant 0 : index
    %c0_1 = arith.constant 0 : index
    %1 = vector.load %arg13[%c0, %c0_0, %c0_1] : memref<18x32x32xf32, #tpu.memory_space<vmem>>, vector<18x32x32xf32>
    tpu.vector_store %arg13[%c0, %c0_0, %c0_1], %0 {strides = array<i32>} : memref<18x32x32xf32, #tpu.memory_space<vmem>>, vector<18x32x32xf32>,
    %c0_2 = arith.constant 0 : index
    %c0_3 = arith.constant 0 : index
    %c0_4 = arith.constant 0 : index
    %c0_5 = arith.constant 0 : index
    %2 = vector.load %arg1[%c0_2, %c0_3, %c0_4, %c0_5] : memref<1x16x16x128xf32, #tpu.memory_space<vmem>>, vector<1x16x16x128xf32>
    %3 = vector.shape_cast %2 : vector<1x16x16x128xf32> to vector<16x16x128xf32>
    %4 = vector.shape_cast %3 : vector<16x16x128xf32> to vector<256x128xf32>
    %c0_6 = arith.constant 0 : index
    %c0_7 = arith.constant 0 : index
    %5 = vector.load %arg2[%c0_6, %c0_7] : memref<128x128xf32, #tpu.memory_space<vmem>>, vector<128x128xf32>
    %cst_8 = arith.constant dense<0.000000e+00> : vector<256x128xf32>
    %6 = tpu.matmul %4, %5, %cst_8 {dimension_numbers = #tpu.dot_dimension_numbers<[1], [0], [0], [1], [0, 0, 1, 1], [], []>} : vector<256x128xf32>, vector<128x128xf32>, vector<256x128xf32> -> vector<256x128xf32>
    %c0_9 = arith.constant 0 : index
    %c0_10 = arith.constant 0 : index
    %7 = vector.load %arg3[%c0_9, %c0_10] : memref<1x128xf32, #tpu.memory_space<vmem>>, vector<1x128xf32>
    %8 = vector.broadcast %7 : vector<1x128xf32> to vector<256x128xf32>
    %9 = arith.addf %6, %8 : vector<256x128xf32>
    %10 = vector.extract_strided_slice %9 {offsets = [0, 0], sizes = [256, 32], strides = [1, 1]} : vector<256x128xf32> to vector<256x32xf32>
    %cst_11 = arith.constant 0.000000e+00 : f32
    %11 = vector.broadcast %cst_11 : f32 to vector<256x32xf32>
    %12 = arith.maximumf %10, %11 : vector<256x32xf32>
    %13 = vector.extract_strided_slice %9 {offsets = [0, 32], sizes = [256, 32], strides = [1, 1]} : vector<256x128xf32> to vector<256x32xf32>
    %14 = vector.extract_strided_slice %9 {offsets = [0, 64], sizes = [256, 32], strides = [1, 1]} : vector<256x128xf32> to vector<256x32xf32>
    %cst_12 = arith.constant 0.000000e+00 : f32
    %15 = vector.broadcast %cst_12 : f32 to vector<256x32xf32>
    %16 = arith.maximumf %14, %15 : vector<256x32xf32>
    %17 = vector.extract_strided_slice %9 {offsets = [0, 96], sizes = [256, 32], strides = [1, 1]} : vector<256x128xf32> to vector<256x32xf32>
    %cst_13 = arith.constant 0.000000e+00 : f32
    %18 = vector.broadcast %cst_13 : f32 to vector<256x32xf32>
    %19 = arith.maximumf %17, %18 : vector<256x32xf32>
    %20 = vector.shape_cast %13 : vector<256x32xf32> to vector<16x16x32xf32>
    %c1 = arith.constant 1 : index
    %c8 = arith.constant 8 : index
    %c0_14 = arith.constant 0 : index
    %21 = vector.load %arg13[%c1, %c8, %c0_14] : memref<18x32x32xf32, #tpu.memory_space<vmem>>, vector<16x16x32xf32>
    tpu.vector_store %arg13[%c1, %c8, %c0_14], %20 {strides = array<i32>} : memref<18x32x32xf32, #tpu.memory_space<vmem>>, vector<16x16x32xf32>,
    %c0_15 = arith.constant 0 : index
    %c7 = arith.constant 7 : index
    %c0_16 = arith.constant 0 : index
    %22 = vector.load %arg13[%c0_15, %c7, %c0_16] : memref<18x32x32xf32, #tpu.memory_space<vmem>>, vector<16x16x32xf32>
    %23 = vector.shape_cast %22 : vector<16x16x32xf32> to vector<256x32xf32>
    %c0_17 = arith.constant 0 : index
    %c8_18 = arith.constant 8 : index
    %c0_19 = arith.constant 0 : index
    %24 = vector.load %arg13[%c0_17, %c8_18, %c0_19] : memref<18x32x32xf32, #tpu.memory_space<vmem>>, vector<16x16x32xf32>
    %25 = vector.shape_cast %24 : vector<16x16x32xf32> to vector<256x32xf32>
    %c0_20 = arith.constant 0 : index
    %c9 = arith.constant 9 : index
    %c0_21 = arith.constant 0 : index
    %26 = vector.load %arg13[%c0_20, %c9, %c0_21] : memref<18x32x32xf32, #tpu.memory_space<vmem>>, vector<16x16x32xf32>
    %27 = vector.shape_cast %26 : vector<16x16x32xf32> to vector<256x32xf32>
    %c1_22 = arith.constant 1 : index
    %c7_23 = arith.constant 7 : index
    %c0_24 = arith.constant 0 : index
    %28 = vector.load %arg13[%c1_22, %c7_23, %c0_24] : memref<18x32x32xf32, #tpu.memory_space<vmem>>, vector<16x16x32xf32>
    %29 = vector.shape_cast %28 : vector<16x16x32xf32> to vector<256x32xf32>
    %c1_25 = arith.constant 1 : index
    %c8_26 = arith.constant 8 : index
    %c0_27 = arith.constant 0 : index
    %30 = vector.load %arg13[%c1_25, %c8_26, %c0_27] : memref<18x32x32xf32, #tpu.memory_space<vmem>>, vector<16x16x32xf32>
    %31 = vector.shape_cast %30 : vector<16x16x32xf32> to vector<256x32xf32>
    %c1_28 = arith.constant 1 : index
    %c9_29 = arith.constant 9 : index
    %c0_30 = arith.constant 0 : index
    %32 = vector.load %arg13[%c1_28, %c9_29, %c0_30] : memref<18x32x32xf32, #tpu.memory_space<vmem>>, vector<16x16x32xf32>
    %33 = vector.shape_cast %32 : vector<16x16x32xf32> to vector<256x32xf32>
    %c2 = arith.constant 2 : index
    %c7_31 = arith.constant 7 : index
    %c0_32 = arith.constant 0 : index
    %34 = vector.load %arg13[%c2, %c7_31, %c0_32] : memref<18x32x32xf32, #tpu.memory_space<vmem>>, vector<16x16x32xf32>
    %35 = vector.shape_cast %34 : vector<16x16x32xf32> to vector<256x32xf32>
    %c2_33 = arith.constant 2 : index
    %c8_34 = arith.constant 8 : index
    %c0_35 = arith.constant 0 : index
    %36 = vector.load %arg13[%c2_33, %c8_34, %c0_35] : memref<18x32x32xf32, #tpu.memory_space<vmem>>, vector<16x16x32xf32>
    %37 = vector.shape_cast %36 : vector<16x16x32xf32> to vector<256x32xf32>
    %c2_36 = arith.constant 2 : index
    %c9_37 = arith.constant 9 : index
    %c0_38 = arith.constant 0 : index
    %38 = vector.load %arg13[%c2_36, %c9_37, %c0_38] : memref<18x32x32xf32, #tpu.memory_space<vmem>>, vector<16x16x32xf32>
    %39 = vector.shape_cast %38 : vector<16x16x32xf32> to vector<256x32xf32>
    %40 = tpu.concatenate %23, %25, %27, %29, %31, %33, %35, %37, %39 in 1 : vector<256x32xf32>, vector<256x32xf32>, vector<256x32xf32>, vector<256x32xf32>, vector<256x32xf32>, vector<256x32xf32>, vector<256x32xf32>, vector<256x32xf32>, vector<256x32xf32> -> vector<256x288xf32>
    %c0_39 = arith.constant 0 : index
    %c0_40 = arith.constant 0 : index
    %41 = vector.load %arg4[%c0_39, %c0_40] : memref<288x32xf32, #tpu.memory_space<vmem>>, vector<288x32xf32>
    %cst_41 = arith.constant dense<0.000000e+00> : vector<256x32xf32>
    %42 = tpu.matmul %40, %41, %cst_41 {dimension_numbers = #tpu.dot_dimension_numbers<[1], [0], [0], [1], [0, 0, 1, 1], [], []>} : vector<256x288xf32>, vector<288x32xf32>, vector<256x32xf32> -> vector<256x32xf32>
    %c0_42 = arith.constant 0 : index
    %c0_43 = arith.constant 0 : index
    %43 = vector.load %arg5[%c0_42, %c0_43] : memref<1x32xf32, #tpu.memory_space<vmem>>, vector<1x32xf32>
    %44 = vector.broadcast %43 : vector<1x32xf32> to vector<256x32xf32>
    %45 = arith.addf %42, %44 : vector<256x32xf32>
    %cst_44 = arith.constant 0.000000e+00 : f32
    %46 = vector.broadcast %cst_44 : f32 to vector<256x32xf32>
    %47 = arith.maximumf %45, %46 : vector<256x32xf32>
    %48 = vector.shape_cast %16 : vector<256x32xf32> to vector<16x16x32xf32>
    %c1_45 = arith.constant 1 : index
    %c8_46 = arith.constant 8 : index
    %c0_47 = arith.constant 0 : index
    %49 = vector.load %arg13[%c1_45, %c8_46, %c0_47] : memref<18x32x32xf32, #tpu.memory_space<vmem>>, vector<16x16x32xf32>
    tpu.vector_store %arg13[%c1_45, %c8_46, %c0_47], %48 {strides = array<i32>} : memref<18x32x32xf32, #tpu.memory_space<vmem>>, vector<16x16x32xf32>,
    %c0_48 = arith.constant 0 : index
    %c7_49 = arith.constant 7 : index
    %c0_50 = arith.constant 0 : index
    %50 = vector.load %arg13[%c0_48, %c7_49, %c0_50] : memref<18x32x32xf32, #tpu.memory_space<vmem>>, vector<16x16x32xf32>
    %51 = vector.shape_cast %50 : vector<16x16x32xf32> to vector<256x32xf32>
    %c0_51 = arith.constant 0 : index
    %c8_52 = arith.constant 8 : index
    %c0_53 = arith.constant 0 : index
    %52 = vector.load %arg13[%c0_51, %c8_52, %c0_53] : memref<18x32x32xf32, #tpu.memory_space<vmem>>, vector<16x16x32xf32>
    %53 = vector.shape_cast %52 : vector<16x16x32xf32> to vector<256x32xf32>
    %c0_54 = arith.constant 0 : index
    %c9_55 = arith.constant 9 : index
    %c0_56 = arith.constant 0 : index
    %54 = vector.load %arg13[%c0_54, %c9_55, %c0_56] : memref<18x32x32xf32, #tpu.memory_space<vmem>>, vector<16x16x32xf32>
    %55 = vector.shape_cast %54 : vector<16x16x32xf32> to vector<256x32xf32>
    %c1_57 = arith.constant 1 : index
    %c7_58 = arith.constant 7 : index
    %c0_59 = arith.constant 0 : index
    %56 = vector.load %arg13[%c1_57, %c7_58, %c0_59] : memref<18x32x32xf32, #tpu.memory_space<vmem>>, vector<16x16x32xf32>
    %57 = vector.shape_cast %56 : vector<16x16x32xf32> to vector<256x32xf32>
    %c1_60 = arith.constant 1 : index
    %c8_61 = arith.constant 8 : index
    %c0_62 = arith.constant 0 : index
    %58 = vector.load %arg13[%c1_60, %c8_61, %c0_62] : memref<18x32x32xf32, #tpu.memory_space<vmem>>, vector<16x16x32xf32>
    %59 = vector.shape_cast %58 : vector<16x16x32xf32> to vector<256x32xf32>
    %c1_63 = arith.constant 1 : index
    %c9_64 = arith.constant 9 : index
    %c0_65 = arith.constant 0 : index
    %60 = vector.load %arg13[%c1_63, %c9_64, %c0_65] : memref<18x32x32xf32, #tpu.memory_space<vmem>>, vector<16x16x32xf32>
    %61 = vector.shape_cast %60 : vector<16x16x32xf32> to vector<256x32xf32>
    %c2_66 = arith.constant 2 : index
    %c7_67 = arith.constant 7 : index
    %c0_68 = arith.constant 0 : index
    %62 = vector.load %arg13[%c2_66, %c7_67, %c0_68] : memref<18x32x32xf32, #tpu.memory_space<vmem>>, vector<16x16x32xf32>
    %63 = vector.shape_cast %62 : vector<16x16x32xf32> to vector<256x32xf32>
    %c2_69 = arith.constant 2 : index
    %c8_70 = arith.constant 8 : index
    %c0_71 = arith.constant 0 : index
    %64 = vector.load %arg13[%c2_69, %c8_70, %c0_71] : memref<18x32x32xf32, #tpu.memory_space<vmem>>, vector<16x16x32xf32>
    %65 = vector.shape_cast %64 : vector<16x16x32xf32> to vector<256x32xf32>
    %c2_72 = arith.constant 2 : index
    %c9_73 = arith.constant 9 : index
    %c0_74 = arith.constant 0 : index
    %66 = vector.load %arg13[%c2_72, %c9_73, %c0_74] : memref<18x32x32xf32, #tpu.memory_space<vmem>>, vector<16x16x32xf32>
    %67 = vector.shape_cast %66 : vector<16x16x32xf32> to vector<256x32xf32>
    %68 = tpu.concatenate %51, %53, %55, %57, %59, %61, %63, %65, %67 in 1 : vector<256x32xf32>, vector<256x32xf32>, vector<256x32xf32>, vector<256x32xf32>, vector<256x32xf32>, vector<256x32xf32>, vector<256x32xf32>, vector<256x32xf32>, vector<256x32xf32> -> vector<256x288xf32>
    %c0_75 = arith.constant 0 : index
    %c0_76 = arith.constant 0 : index
    %69 = vector.load %arg6[%c0_75, %c0_76] : memref<288x32xf32, #tpu.memory_space<vmem>>, vector<288x32xf32>
    %cst_77 = arith.constant dense<0.000000e+00> : vector<256x32xf32>
    %70 = tpu.matmul %68, %69, %cst_77 {dimension_numbers = #tpu.dot_dimension_numbers<[1], [0], [0], [1], [0, 0, 1, 1], [], []>} : vector<256x288xf32>, vector<288x32xf32>, vector<256x32xf32> -> vector<256x32xf32>
    %c0_78 = arith.constant 0 : index
    %c0_79 = arith.constant 0 : index
    %71 = vector.load %arg7[%c0_78, %c0_79] : memref<1x32xf32, #tpu.memory_space<vmem>>, vector<1x32xf32>
    %72 = vector.broadcast %71 : vector<1x32xf32> to vector<256x32xf32>
    %73 = arith.addf %70, %72 : vector<256x32xf32>
    %cst_80 = arith.constant 0.000000e+00 : f32
    %74 = vector.broadcast %cst_80 : f32 to vector<256x32xf32>
    %75 = arith.maximumf %73, %74 : vector<256x32xf32>
    %76 = vector.shape_cast %19 : vector<256x32xf32> to vector<16x16x32xf32>
    %c1_81 = arith.constant 1 : index
    %c8_82 = arith.constant 8 : index
    %c0_83 = arith.constant 0 : index
    %77 = vector.load %arg13[%c1_81, %c8_82, %c0_83] : memref<18x32x32xf32, #tpu.memory_space<vmem>>, vector<16x16x32xf32>
    tpu.vector_store %arg13[%c1_81, %c8_82, %c0_83], %76 {strides = array<i32>} : memref<18x32x32xf32, #tpu.memory_space<vmem>>, vector<16x16x32xf32>,
    %c0_84 = arith.constant 0 : index
    %c7_85 = arith.constant 7 : index
    %c0_86 = arith.constant 0 : index
    %78 = vector.load %arg13[%c0_84, %c7_85, %c0_86] : memref<18x32x32xf32, #tpu.memory_space<vmem>>, vector<16x16x32xf32>
    %79 = vector.shape_cast %78 : vector<16x16x32xf32> to vector<256x32xf32>
    %c0_87 = arith.constant 0 : index
    %c8_88 = arith.constant 8 : index
    %c0_89 = arith.constant 0 : index
    %80 = vector.load %arg13[%c0_87, %c8_88, %c0_89] : memref<18x32x32xf32, #tpu.memory_space<vmem>>, vector<16x16x32xf32>
    %81 = vector.shape_cast %80 : vector<16x16x32xf32> to vector<256x32xf32>
    %c0_90 = arith.constant 0 : index
    %c9_91 = arith.constant 9 : index
    %c0_92 = arith.constant 0 : index
    %82 = vector.load %arg13[%c0_90, %c9_91, %c0_92] : memref<18x32x32xf32, #tpu.memory_space<vmem>>, vector<16x16x32xf32>
    %83 = vector.shape_cast %82 : vector<16x16x32xf32> to vector<256x32xf32>
    %c1_93 = arith.constant 1 : index
    %c7_94 = arith.constant 7 : index
    %c0_95 = arith.constant 0 : index
    %84 = vector.load %arg13[%c1_93, %c7_94, %c0_95] : memref<18x32x32xf32, #tpu.memory_space<vmem>>, vector<16x16x32xf32>
    %85 = vector.shape_cast %84 : vector<16x16x32xf32> to vector<256x32xf32>
    %c1_96 = arith.constant 1 : index
    %c8_97 = arith.constant 8 : index
    %c0_98 = arith.constant 0 : index
    %86 = vector.load %arg13[%c1_96, %c8_97, %c0_98] : memref<18x32x32xf32, #tpu.memory_space<vmem>>, vector<16x16x32xf32>
    %87 = vector.shape_cast %86 : vector<16x16x32xf32> to vector<256x32xf32>
    %c1_99 = arith.constant 1 : index
    %c9_100 = arith.constant 9 : index
    %c0_101 = arith.constant 0 : index
    %88 = vector.load %arg13[%c1_99, %c9_100, %c0_101] : memref<18x32x32xf32, #tpu.memory_space<vmem>>, vector<16x16x32xf32>
    %89 = vector.shape_cast %88 : vector<16x16x32xf32> to vector<256x32xf32>
    %c2_102 = arith.constant 2 : index
    %c7_103 = arith.constant 7 : index
    %c0_104 = arith.constant 0 : index
    %90 = vector.load %arg13[%c2_102, %c7_103, %c0_104] : memref<18x32x32xf32, #tpu.memory_space<vmem>>, vector<16x16x32xf32>
    %91 = vector.shape_cast %90 : vector<16x16x32xf32> to vector<256x32xf32>
    %c2_105 = arith.constant 2 : index
    %c8_106 = arith.constant 8 : index
    %c0_107 = arith.constant 0 : index
    %92 = vector.load %arg13[%c2_105, %c8_106, %c0_107] : memref<18x32x32xf32, #tpu.memory_space<vmem>>, vector<16x16x32xf32>
    %93 = vector.shape_cast %92 : vector<16x16x32xf32> to vector<256x32xf32>
    %c2_108 = arith.constant 2 : index
    %c9_109 = arith.constant 9 : index
    %c0_110 = arith.constant 0 : index
    %94 = vector.load %arg13[%c2_108, %c9_109, %c0_110] : memref<18x32x32xf32, #tpu.memory_space<vmem>>, vector<16x16x32xf32>
    %95 = vector.shape_cast %94 : vector<16x16x32xf32> to vector<256x32xf32>
    %96 = tpu.concatenate %79, %81, %83, %85, %87, %89, %91, %93, %95 in 1 : vector<256x32xf32>, vector<256x32xf32>, vector<256x32xf32>, vector<256x32xf32>, vector<256x32xf32>, vector<256x32xf32>, vector<256x32xf32>, vector<256x32xf32>, vector<256x32xf32> -> vector<256x288xf32>
    %c0_111 = arith.constant 0 : index
    %c0_112 = arith.constant 0 : index
    %97 = vector.load %arg8[%c0_111, %c0_112] : memref<288x32xf32, #tpu.memory_space<vmem>>, vector<288x32xf32>
    %cst_113 = arith.constant dense<0.000000e+00> : vector<256x32xf32>
    %98 = tpu.matmul %96, %97, %cst_113 {dimension_numbers = #tpu.dot_dimension_numbers<[1], [0], [0], [1], [0, 0, 1, 1], [], []>} : vector<256x288xf32>, vector<288x32xf32>, vector<256x32xf32> -> vector<256x32xf32>
    %c0_114 = arith.constant 0 : index
    %c0_115 = arith.constant 0 : index
    %99 = vector.load %arg9[%c0_114, %c0_115] : memref<1x32xf32, #tpu.memory_space<vmem>>, vector<1x32xf32>
    %100 = vector.broadcast %99 : vector<1x32xf32> to vector<256x32xf32>
    %101 = arith.addf %98, %100 : vector<256x32xf32>
    %cst_116 = arith.constant 0.000000e+00 : f32
    %102 = vector.broadcast %cst_116 : f32 to vector<256x32xf32>
    %103 = arith.maximumf %101, %102 : vector<256x32xf32>
    %104 = vector.shape_cast %103 : vector<256x32xf32> to vector<16x16x32xf32>
    %c1_117 = arith.constant 1 : index
    %c8_118 = arith.constant 8 : index
    %c0_119 = arith.constant 0 : index
    %105 = vector.load %arg13[%c1_117, %c8_118, %c0_119] : memref<18x32x32xf32, #tpu.memory_space<vmem>>, vector<16x16x32xf32>
    tpu.vector_store %arg13[%c1_117, %c8_118, %c0_119], %104 {strides = array<i32>} : memref<18x32x32xf32, #tpu.memory_space<vmem>>, vector<16x16x32xf32>,
    %c0_120 = arith.constant 0 : index
    %c7_121 = arith.constant 7 : index
    %c0_122 = arith.constant 0 : index
    %106 = vector.load %arg13[%c0_120, %c7_121, %c0_122] : memref<18x32x32xf32, #tpu.memory_space<vmem>>, vector<16x16x32xf32>
    %107 = vector.shape_cast %106 : vector<16x16x32xf32> to vector<256x32xf32>
    %c0_123 = arith.constant 0 : index
    %c8_124 = arith.constant 8 : index
    %c0_125 = arith.constant 0 : index
    %108 = vector.load %arg13[%c0_123, %c8_124, %c0_125] : memref<18x32x32xf32, #tpu.memory_space<vmem>>, vector<16x16x32xf32>
    %109 = vector.shape_cast %108 : vector<16x16x32xf32> to vector<256x32xf32>
    %c0_126 = arith.constant 0 : index
    %c9_127 = arith.constant 9 : index
    %c0_128 = arith.constant 0 : index
    %110 = vector.load %arg13[%c0_126, %c9_127, %c0_128] : memref<18x32x32xf32, #tpu.memory_space<vmem>>, vector<16x16x32xf32>
    %111 = vector.shape_cast %110 : vector<16x16x32xf32> to vector<256x32xf32>
    %c1_129 = arith.constant 1 : index
    %c7_130 = arith.constant 7 : index
    %c0_131 = arith.constant 0 : index
    %112 = vector.load %arg13[%c1_129, %c7_130, %c0_131] : memref<18x32x32xf32, #tpu.memory_space<vmem>>, vector<16x16x32xf32>
    %113 = vector.shape_cast %112 : vector<16x16x32xf32> to vector<256x32xf32>
    %c1_132 = arith.constant 1 : index
    %c8_133 = arith.constant 8 : index
    %c0_134 = arith.constant 0 : index
    %114 = vector.load %arg13[%c1_132, %c8_133, %c0_134] : memref<18x32x32xf32, #tpu.memory_space<vmem>>, vector<16x16x32xf32>
    %115 = vector.shape_cast %114 : vector<16x16x32xf32> to vector<256x32xf32>
    %c1_135 = arith.constant 1 : index
    %c9_136 = arith.constant 9 : index
    %c0_137 = arith.constant 0 : index
    %116 = vector.load %arg13[%c1_135, %c9_136, %c0_137] : memref<18x32x32xf32, #tpu.memory_space<vmem>>, vector<16x16x32xf32>
    %117 = vector.shape_cast %116 : vector<16x16x32xf32> to vector<256x32xf32>
    %c2_138 = arith.constant 2 : index
    %c7_139 = arith.constant 7 : index
    %c0_140 = arith.constant 0 : index
    %118 = vector.load %arg13[%c2_138, %c7_139, %c0_140] : memref<18x32x32xf32, #tpu.memory_space<vmem>>, vector<16x16x32xf32>
    %119 = vector.shape_cast %118 : vector<16x16x32xf32> to vector<256x32xf32>
    %c2_141 = arith.constant 2 : index
    %c8_142 = arith.constant 8 : index
    %c0_143 = arith.constant 0 : index
    %120 = vector.load %arg13[%c2_141, %c8_142, %c0_143] : memref<18x32x32xf32, #tpu.memory_space<vmem>>, vector<16x16x32xf32>
    %121 = vector.shape_cast %120 : vector<16x16x32xf32> to vector<256x32xf32>
    %c2_144 = arith.constant 2 : index
    %c9_145 = arith.constant 9 : index
    %c0_146 = arith.constant 0 : index
    %122 = vector.load %arg13[%c2_144, %c9_145, %c0_146] : memref<18x32x32xf32, #tpu.memory_space<vmem>>, vector<16x16x32xf32>
    %123 = vector.shape_cast %122 : vector<16x16x32xf32> to vector<256x32xf32>
    %124 = tpu.concatenate %107, %109, %111, %113, %115, %117, %119, %121, %123 in 1 : vector<256x32xf32>, vector<256x32xf32>, vector<256x32xf32>, vector<256x32xf32>, vector<256x32xf32>, vector<256x32xf32>, vector<256x32xf32>, vector<256x32xf32>, vector<256x32xf32> -> vector<256x288xf32>
    %c0_147 = arith.constant 0 : index
    %c0_148 = arith.constant 0 : index
    %125 = vector.load %arg10[%c0_147, %c0_148] : memref<288x32xf32, #tpu.memory_space<vmem>>, vector<288x32xf32>
    %cst_149 = arith.constant dense<0.000000e+00> : vector<256x32xf32>
    %126 = tpu.matmul %124, %125, %cst_149 {dimension_numbers = #tpu.dot_dimension_numbers<[1], [0], [0], [1], [0, 0, 1, 1], [], []>} : vector<256x288xf32>, vector<288x32xf32>, vector<256x32xf32> -> vector<256x32xf32>
    %c0_150 = arith.constant 0 : index
    %c0_151 = arith.constant 0 : index
    %127 = vector.load %arg11[%c0_150, %c0_151] : memref<1x32xf32, #tpu.memory_space<vmem>>, vector<1x32xf32>
    %128 = vector.broadcast %127 : vector<1x32xf32> to vector<256x32xf32>
    %129 = arith.addf %126, %128 : vector<256x32xf32>
    %cst_152 = arith.constant 0.000000e+00 : f32
    %130 = vector.broadcast %cst_152 : f32 to vector<256x32xf32>
    %131 = arith.maximumf %129, %130 : vector<256x32xf32>
    %132 = tpu.concatenate %12, %47, %75, %131 in 1 : vector<256x32xf32>, vector<256x32xf32>, vector<256x32xf32>, vector<256x32xf32> -> vector<256x128xf32>
    %133 = vector.shape_cast %132 : vector<256x128xf32> to vector<16x16x128xf32>
    %c0_153 = arith.constant 0 : index
    %c0_154 = arith.constant 0 : index
    %c0_155 = arith.constant 0 : index
    %c0_156 = arith.constant 0 : index
    %134 = vector.load %arg12[%c0_153, %c0_154, %c0_155, %c0_156] : memref<1x16x16x128xf32, #tpu.memory_space<vmem>>, vector<1x16x16x128xf32>
    %135 = vector.shape_cast %134 : vector<1x16x16x128xf32> to vector<16x16x128xf32>
    %136 = vector.shape_cast %133 : vector<16x16x128xf32> to vector<1x16x16x128xf32>
    tpu.vector_store %arg12[%c0_153, %c0_154, %c0_155, %c0_156], %136 {strides = array<i32>} : memref<1x16x16x128xf32, #tpu.memory_space<vmem>>, vector<1x16x16x128xf32>,
    return
  }
  func.func @transform_0(%arg0: i32) -> (i32, i32, i32, i32) {
    %c0_i32 = arith.constant 0 : i32
    %c0_i32_0 = arith.constant 0 : i32
    %c0_i32_1 = arith.constant 0 : i32
    %c0_i32_2 = arith.constant 0 : i32
    return %arg0, %c0_i32, %c0_i32_0, %c0_i32_1 : i32, i32, i32, i32
  }
  func.func @transform_1(%arg0: i32) -> (i32, i32) {
    %c0_i32 = arith.constant 0 : i32
    %c0_i32_0 = arith.constant 0 : i32
    %c0_i32_1 = arith.constant 0 : i32
    return %c0_i32, %c0_i32_0 : i32, i32
  }
  func.func @transform_2(%arg0: i32) -> (i32, i32) {
    %c0_i32 = arith.constant 0 : i32
    %c0_i32_0 = arith.constant 0 : i32
    %c0_i32_1 = arith.constant 0 : i32
    return %c0_i32, %c0_i32_0 : i32, i32
  }
  func.func @transform_3(%arg0: i32) -> (i32, i32) {
    %c0_i32 = arith.constant 0 : i32
    %c0_i32_0 = arith.constant 0 : i32
    %c0_i32_1 = arith.constant 0 : i32
    return %c0_i32, %c0_i32_0 : i32, i32
  }
  func.func @transform_4(%arg0: i32) -> (i32, i32) {
    %c0_i32 = arith.constant 0 : i32
    %c0_i32_0 = arith.constant 0 : i32
    %c0_i32_1 = arith.constant 0 : i32
    return %c0_i32, %c0_i32_0 : i32, i32
  }
  func.func @transform_5(%arg0: i32) -> (i32, i32) {
    %c0_i32 = arith.constant 0 : i32
    %c0_i32_0 = arith.constant 0 : i32
    %c0_i32_1 = arith.constant 0 : i32
    return %c0_i32, %c0_i32_0 : i32, i32
  }
  func.func @transform_6(%arg0: i32) -> (i32, i32) {
    %c0_i32 = arith.constant 0 : i32
    %c0_i32_0 = arith.constant 0 : i32
    %c0_i32_1 = arith.constant 0 : i32
    return %c0_i32, %c0_i32_0 : i32, i32
  }
  func.func @transform_7(%arg0: i32) -> (i32, i32) {
    %c0_i32 = arith.constant 0 : i32
    %c0_i32_0 = arith.constant 0 : i32
    %c0_i32_1 = arith.constant 0 : i32
    return %c0_i32, %c0_i32_0 : i32, i32
  }
  func.func @transform_8(%arg0: i32) -> (i32, i32) {
    %c0_i32 = arith.constant 0 : i32
    %c0_i32_0 = arith.constant 0 : i32
    %c0_i32_1 = arith.constant 0 : i32
    return %c0_i32, %c0_i32_0 : i32, i32
  }
  func.func @transform_9(%arg0: i32) -> (i32, i32) {
    %c0_i32 = arith.constant 0 : i32
    %c0_i32_0 = arith.constant 0 : i32
    %c0_i32_1 = arith.constant 0 : i32
    return %c0_i32, %c0_i32_0 : i32, i32
  }
  func.func @transform_10(%arg0: i32) -> (i32, i32) {
    %c0_i32 = arith.constant 0 : i32
    %c0_i32_0 = arith.constant 0 : i32
    %c0_i32_1 = arith.constant 0 : i32
    return %c0_i32, %c0_i32_0 : i32, i32
  }
  func.func @transform_11(%arg0: i32) -> (i32, i32, i32, i32) {
    %c0_i32 = arith.constant 0 : i32
    %c0_i32_0 = arith.constant 0 : i32
    %c0_i32_1 = arith.constant 0 : i32
    %c0_i32_2 = arith.constant 0 : i32
    return %arg0, %c0_i32, %c0_i32_0, %c0_i32_1 : i32, i32, i32, i32
  }
}

</mosaic_0001>

<bundles_post_ra>
// kernel: inception_forward.1
= control target key start
LH: loop header
LB: loop body
LE: loop exit
PB: predicated region body
PF: predicated region fallthrough
CT: control target
= control target key end

     0   :  { %s18148_s0 = inlined_call_operand.vmem [shape: f32[2,16,16,128], index: 0, kind: input, shape index: {}]   ;;  %s18149_s1 = inlined_call_operand.vmem [shape: f32[128,128], index: 1, kind: input, shape index: {}]   ;;  %s18150_s2 = inlined_call_operand.vmem [shape: f32[1,128], index: 2, kind: input, shape index: {}]   ;;  %s18151_s3 = inlined_call_operand.vmem [shape: f32[288,32], index: 3, kind: input, shape index: {}]   ;;  %s18152_s4 = inlined_call_operand.vmem [shape: f32[1,32], index: 4, kind: input, shape index: {}]   ;;  %s18153_s5 = inlined_call_operand.vmem [shape: f32[288,32], index: 5, kind: input, shape index: {}]   ;;  %s18154_s6 = inlined_call_operand.vmem [shape: f32[1,32], index: 6, kind: input, shape index: {}]   ;;  %s18155_s7 = inlined_call_operand.vmem [shape: f32[288,32], index: 7, kind: input, shape index: {}]   ;;  %s18156_s8 = inlined_call_operand.vmem [shape: f32[1,32], index: 8, kind: input, shape index: {}]   ;;  %s18157_s9 = inlined_call_operand.vmem [shape: f32[288,32], index: 9, kind: input, shape index: {}]   ;;  %s18158_s10 = inlined_call_operand.vmem [shape: f32[1,32], index: 10, kind: input, shape index: {}]   ;;  %s18159_s11 = inlined_call_operand.hbm [shape: f32[2,16,16,128], index: 11, kind: output, shape index: {}]  }
   0x1   :  { %18339 = sst [smem:[#allocation127_spill]] %s18148_s0 }
   0x2   :  { %16 = vsyncpa [#allocation4], 0 }
   0x3   :  { %18 = vsyncpa [#allocation4 + $0x1], 0  ;;  %s12350_s17 = smov 0   ;;  %s12352_s18 = smov 0  }
   0x4   :  { %s12354_s19 = smov 0   ;;  %s12356_s20 = smov 0  }
   0x5 LB: > { %s12371_s21 = sadd.s32 4294967295, %s12280_s20   ;;  %s9318_s22 = sadd.s32 4294967294, %s12280_s20   ;;  %s12280_s20 = sphi %s12356_s20, %s18936_s20   ;;  %s12276_s19 = sphi %s12354_s19, %s18935_s19   ;;  %s12272_s18 = sphi %s12352_s18, %s18934_s18   ;;  %s12268_s17 = sphi %s12350_s17, %s18933_s17  }
   0x6   : > { %s12375_s23 = sadd.s32 1, %s12280_s20   ;;  %s267_s24 = sadd.s32 1, %s12276_s19 }
   0x7   : > { %s264_s25 = ssub.s32 %s12280_s20, %s12375_s23  ;;  %p277_p0 = scmp.ne.s32.totalorder %s12276_s19, %s12272_s18 }
   0x8   : > { %p265_p1 = scmp.eq.s32.totalorder %s264_s25, 0  ;;  %p278_p2 = scmp.eq.s32.totalorder %s12371_s21, 1 }
   0x9   : > { %p283_p3 = scmp.ne.s32.totalorder %s12272_s18, %s12268_s17  ;;  %p284_p4 = scmp.eq.s32.totalorder %s9318_s22, 1 }
   0xa   : > { %s12386_s26 = scalar_select %p265_p1, %s12276_s19, %s267_s24  }
   0xb   : > { %p12388_p5 = por %p278_p2, %p277_p0  ;;  %p12392_p6 = por %p284_p4, %p283_p3 }
   0xc   : > { %p9321_p7 = scmp.ge.s32.totalorder %s12280_s20, 1  ;;  %p340_p8 = scmp.lt.s32.totalorder %s12280_s20, 3 }
   0xe   : > { %p341_p9 = pnand %p9321_p7, %p340_p8 }
  0x10   : > { %344 = sbr.rel (%p341_p9) target bundleno = 2044 (0x7fc), region = 64 }
  0x17   : > { %v490_v0 = vld [vmem:[%s18149_s1] sm:$0xff]  ;;  %v491_v1 = vld [vmem:[%s18149_s1 + $0x8] sm:$0xff]  ;;  %v12407_v2 = vld [vmem:[%s18149_s1 + $0x10] sm:$0xff]  ;;  %p380_p10 = scmp.lt.s32.totalorder %s12371_s21, 1  ;;  %vm385_vm0 = vcmask 261120   ;;  %v12282_v5 = vmov 0.0  }
  0x18   : > { %v12410_v3 = vpack.c.bf16 %v491_v1, %v490_v0  ;;  %v12415_v4 = vld [vmem:[%s18149_s1 + $0x18] sm:$0xff]  ;;  %387 = vst.msk [vmem:[#allocation2 + $0x8] sm:$0xff] %vm385_vm0, %v12282_v5  ;;  %388 = vst.msk [vmem:[#allocation2 + $0x10] sm:$0xff] %vm385_vm0, %v12282_v5  ;;  %v494_v7 = vld [vmem:[%s18149_s1 + $0x20] sm:$0xff]  ;;  %s18342_s0 = sld [smem:[#allocation127_spill]]  ;;  %s12285_s25 = smov 96  }
  0x19   : > { %386 = vst.msk [vmem:[#allocation2] sm:$0xff] %vm385_vm0, %v12282_v5  ;;  %389 = vst.msk [vmem:[#allocation2 + $0x18] sm:$0xff] %vm385_vm0, %v12282_v5  ;;  %v9965_v6 = vpack.c.bf16 %v12415_v4, %v12407_v2  ;;  %v495_v8 = vld [vmem:[%s18149_s1 + $0x28] sm:$0xff]  ;;  %s381_s12 = scalar_select %p380_p10, %s12371_s21, 1  ;;  %v496_v10 = vld [vmem:[%s18149_s1 + $0x30] sm:$0xff]  ;;  %vm2020_vm1 = vcmask 523264  }
  0x1a   : > { %390 = vst.msk [vmem:[#allocation2 + $0x20] sm:$0xff] %vm385_vm0, %v12282_v5  ;;  %391 = vst.msk [vmem:[#allocation2 + $0x28] sm:$0xff] %vm385_vm0, %v12282_v5  ;;  %9962 = vmatprep.subr.bf16.mxu0 %v12410_v3  ;;  %v9969_v9 = vpack.c.bf16 %v495_v8, %v494_v7  ;;  %v497_v11 = vld [vmem:[%s18149_s1 + $0x38] sm:$0xff]  ;;  %v498_v14 = vld [vmem:[%s18149_s1 + $0x40] sm:$0xff]  ;;  %vm2053_vm2 = vcmask 785408   ;;  %s377_s15 = sand.u32 1, %s12272_s18  }
  0x1b   : > { %392 = vst.msk [vmem:[#allocation2 + $0x30] sm:$0xff] %vm385_vm0, %v12282_v5  ;;  %393 = vst.msk [vmem:[#allocation2 + $0x38] sm:$0xff] %vm385_vm0, %v12282_v5  ;;  %9964 = vmatpush3.bf16.msra.mxu0 %v12410_v3  ;;  %s9463_s13 = sshll.u32 %s381_s12, 8  ;;  %v9973_v13 = vpack.c.bf16 %v497_v11, %v496_v10  ;;  %v499_v15 = vld [vmem:[%s18149_s1 + $0x48] sm:$0xff]  ;;  %v500_v17 = vld [vmem:[%s18149_s1 + $0x50] sm:$0xff]  ;;  %s9322_s22 = sshll.u32 %s377_s15, 8 }
  0x1c   : > { %394 = vst.msk [vmem:[#allocation2 + $0x40] sm:$0xff] %vm385_vm0, %v12282_v5  ;;  %395 = vst.msk [vmem:[#allocation2 + $0x48] sm:$0xff] %vm385_vm0, %v12282_v5  ;;  %9966 = vmatprep.subr.bf16.mxu0 %v9965_v6  ;;  %v9977_v16 = vpack.c.bf16 %v499_v15, %v498_v14  ;;  %v501_v18 = vld [vmem:[%s18149_s1 + $0x58] sm:$0xff]  ;;  %v502_v19 = vld [vmem:[%s18149_s1 + $0x60] sm:$0xff] }
  0x1d   : > { %396 = vst.msk [vmem:[#allocation2 + $0x50] sm:$0xff] %vm385_vm0, %v12282_v5  ;;  %397 = vst.msk [vmem:[#allocation2 + $0x58] sm:$0xff] %vm385_vm0, %v12282_v5  ;;  %v9981_v21 = vpack.c.bf16 %v501_v18, %v500_v17  ;;  %v503_v25 = vld [vmem:[%s18149_s1 + $0x68] sm:$0xff]  ;;  %v504_v32 = vld [vmem:[%s18149_s1 + $0x70] sm:$0xff] }
  0x1e   : > { %398 = vst.msk [vmem:[#allocation2 + $0x60] sm:$0xff] %vm385_vm0, %v12282_v5  ;;  %399 = vst.msk [vmem:[#allocation2 + $0x68] sm:$0xff] %vm385_vm0, %v12282_v5  ;;  %s12577_s16 = scalar_lea.vmem %s18342_s0, %s9463_s13  ;;  %s12283_s13 = smov 32   ;;  %v9985_v31 = vpack.c.bf16 %v503_v25, %v502_v19  ;;  %v505_v33 = vld [vmem:[%s18149_s1 + $0x78] sm:$0xff]  ;;  %v2215_v7 = vld [vmem:[%s18151_s3 + $0x108] sm:$0xff] }
  0x1f   : > { %400 = vst.msk [vmem:[#allocation2 + $0x70] sm:$0xff] %vm385_vm0, %v12282_v5  ;;  %401 = vst.msk [vmem:[#allocation2 + $0x78] sm:$0xff] %vm385_vm0, %v12282_v5  ;;  %v458_v12 = vld [vmem:[%s12577_s16] sm:$0xff]  ;;  %9968 = vmatpush3.bf16.msra.mxu0 %v9965_v6  ;;  %v963_v20 = vld [vmem:[#allocation2 + $0x8] sm:$0xff]  ;;  %s12284_s0 = smov 64   ;;  %v9989_v34 = vpack.c.bf16 %v505_v33, %v504_v32 }
  0x20   : > { %402 = vst.msk [vmem:[#allocation2 + $0x80] sm:$0xff] %vm385_vm0, %v12282_v5  ;;  %403 = vst.msk [vmem:[#allocation2 + $0x88] sm:$0xff] %vm385_vm0, %v12282_v5  ;;  %9689 = vmatprep.mubr.f32.mxu0 %v458_v12  ;;  %9970 = vmatprep.subr.bf16.mxu0 %v9969_v9  ;;  %v964_v22 = vld [vmem:[#allocation2 + $0x10] sm:$0xff]  ;;  %v459_v35 = vld [vmem:[%s12577_s16 + $0x8] sm:$0xff] }
  0x21   : > { %404 = vst.msk [vmem:[#allocation2 + $0x90] sm:$0xff] %vm385_vm0, %v12282_v5  ;;  %405 = vst.msk [vmem:[#allocation2 + $0x98] sm:$0xff] %vm385_vm0, %v12282_v5  ;;  %v995_v23 = vld [vmem:[#allocation2 + $0x9] sm:$0xff]  ;;  %v996_v24 = vld [vmem:[#allocation2 + $0x11] sm:$0xff]  ;;  %v10295_v26 = vpack.i.bf16 %v964_v22, %v963_v20 }
  0x22   : > { %406 = vst.msk [vmem:[#allocation2 + $0xa0] sm:$0xff] %vm385_vm0, %v12282_v5  ;;  %407 = vst.msk [vmem:[#allocation2 + $0xa8] sm:$0xff] %vm385_vm0, %v12282_v5  ;;  %v10300_v30 = vpack.i.bf16 %v996_v24, %v995_v23  ;;  %v460_v36 = vld [vmem:[%s12577_s16 + $0x10] sm:$0xff]  ;;  %v461_v37 = vld [vmem:[%s12577_s16 + $0x18] sm:$0xff] }
  0x23   : > { %408 = vst.msk [vmem:[#allocation2 + $0xb0] sm:$0xff] %vm385_vm0, %v12282_v5  ;;  %409 = vst.msk [vmem:[#allocation2 + $0xb8] sm:$0xff] %vm385_vm0, %v12282_v5  ;;  %9972 = vmatpush3.bf16.msra.mxu0 %v9969_v9  ;;  %10296 = vrot.lane.b32.xlu0 %v10295_v26, %s12283_s13  ;;  %v462_v38 = vld [vmem:[%s12577_s16 + $0x20] sm:$0xff]  ;;  %v463_v39 = vld [vmem:[%s12577_s16 + $0x28] sm:$0xff] }
  0x24   : > { %410 = vst.msk [vmem:[#allocation2 + $0xc0] sm:$0xff] %vm385_vm0, %v12282_v5  ;;  %411 = vst.msk [vmem:[#allocation2 + $0xc8] sm:$0xff] %vm385_vm0, %v12282_v5  ;;  %9974 = vmatprep.subr.bf16.mxu0 %v9973_v13  ;;  %v464_v40 = vld [vmem:[%s12577_s16 + $0x30] sm:$0xff]  ;;  %v465_v41 = vld [vmem:[%s12577_s16 + $0x38] sm:$0xff] }
  0x25   : > { %412 = vst.msk [vmem:[#allocation2 + $0xd0] sm:$0xff] %vm385_vm0, %v12282_v5  ;;  %413 = vst.msk [vmem:[#allocation2 + $0xd8] sm:$0xff] %vm385_vm0, %v12282_v5  ;;  %v466_v42 = vld [vmem:[%s12577_s16 + $0x40] sm:$0xff]  ;;  %v467_v43 = vld [vmem:[%s12577_s16 + $0x48] sm:$0xff] }
  0x26   : > { %414 = vst.msk [vmem:[#allocation2 + $0xe0] sm:$0xff] %vm385_vm0, %v12282_v5  ;;  %415 = vst.msk [vmem:[#allocation2 + $0xe8] sm:$0xff] %vm385_vm0, %v12282_v5  ;;  %v468_v44 = vld [vmem:[%s12577_s16 + $0x50] sm:$0xff]  ;;  %v469_v45 = vld [vmem:[%s12577_s16 + $0x58] sm:$0xff] }
  0x27   : > { %416 = vst.msk [vmem:[#allocation2 + $0xf0] sm:$0xff] %vm385_vm0, %v12282_v5  ;;  %417 = vst.msk [vmem:[#allocation2 + $0xf8] sm:$0xff] %vm385_vm0, %v12282_v5  ;;  %9976 = vmatpush3.bf16.msra.mxu0 %v9973_v13  ;;  %10301 = vrot.lane.b32.xlu0 %v10300_v30, %s12284_s0  ;;  %v470_v46 = vld [vmem:[%s12577_s16 + $0x60] sm:$0xff]  ;;  %v471_v47 = vld [vmem:[%s12577_s16 + $0x68] sm:$0xff] }
  0x28   : > { %418 = vst.msk [vmem:[#allocation2 + $0x100] sm:$0xff] %vm385_vm0, %v12282_v5  ;;  %419 = vst.msk [vmem:[#allocation2 + $0x108] sm:$0xff] %vm385_vm0, %v12282_v5  ;;  %9978 = vmatprep.subr.bf16.mxu0 %v9977_v16  ;;  %v472_v48 = vld [vmem:[%s12577_s16 + $0x70] sm:$0xff]  ;;  %v473_v49 = vld [vmem:[%s12577_s16 + $0x78] sm:$0xff] }
  0x29   : > { %420 = vst.msk [vmem:[#allocation2 + $0x110] sm:$0xff] %vm385_vm0, %v12282_v5  ;;  %421 = vst.msk [vmem:[#allocation2 + $0x118] sm:$0xff] %vm385_vm0, %v12282_v5  ;;  %v474_v50 = vld [vmem:[%s12577_s16 + $0x80] sm:$0xff]  ;;  %v475_v51 = vld [vmem:[%s12577_s16 + $0x88] sm:$0xff] }
  0x2a   : > { %422 = vst.msk [vmem:[#allocation2 + $0x120] sm:$0xff] %vm385_vm0, %v12282_v5  ;;  %423 = vst.msk [vmem:[#allocation2 + $0x128] sm:$0xff] %vm385_vm0, %v12282_v5  ;;  %v476_v52 = vld [vmem:[%s12577_s16 + $0x90] sm:$0xff]  ;;  %v477_v53 = vld [vmem:[%s12577_s16 + $0x98] sm:$0xff] }
  0x2b   : > { %424 = vst.msk [vmem:[#allocation2 + $0x130] sm:$0xff] %vm385_vm0, %v12282_v5  ;;  %425 = vst.msk [vmem:[#allocation2 + $0x138] sm:$0xff] %vm385_vm0, %v12282_v5  ;;  %9980 = vmatpush3.bf16.msra.mxu0 %v9977_v16  ;;  %10316 = vrot.lane.b32.xlu0 %v10295_v26, %s12283_s13  ;;  %v478_v54 = vld [vmem:[%s12577_s16 + $0xa0] sm:$0xff]  ;;  %v479_v55 = vld [vmem:[%s12577_s16 + $0xa8] sm:$0xff] }
  0x2c   : > { %426 = vst.msk [vmem:[#allocation2 + $0x140] sm:$0xff] %vm385_vm0, %v12282_v5  ;;  %427 = vst.msk [vmem:[#allocation2 + $0x148] sm:$0xff] %vm385_vm0, %v12282_v5  ;;  %9982 = vmatprep.subr.bf16.mxu0 %v9981_v21  ;;  %v480_v56 = vld [vmem:[%s12577_s16 + $0xb0] sm:$0xff]  ;;  %v481_v57 = vld [vmem:[%s12577_s16 + $0xb8] sm:$0xff] }
  0x2d   : > { %428 = vst.msk [vmem:[#allocation2 + $0x150] sm:$0xff] %vm385_vm0, %v12282_v5  ;;  %429 = vst.msk [vmem:[#allocation2 + $0x158] sm:$0xff] %vm385_vm0, %v12282_v5  ;;  %v482_v58 = vld [vmem:[%s12577_s16 + $0xc0] sm:$0xff]  ;;  %v483_v59 = vld [vmem:[%s12577_s16 + $0xc8] sm:$0xff] }
  0x2e   : > { %430 = vst.msk [vmem:[#allocation2 + $0x160] sm:$0xff] %vm385_vm0, %v12282_v5  ;;  %431 = vst.msk [vmem:[#allocation2 + $0x168] sm:$0xff] %vm385_vm0, %v12282_v5  ;;  %v484_v60 = vld [vmem:[%s12577_s16 + $0xd0] sm:$0xff]  ;;  %v485_v61 = vld [vmem:[%s12577_s16 + $0xd8] sm:$0xff] }
  0x2f   : > { %432 = vst.msk [vmem:[#allocation2 + $0x170] sm:$0xff] %vm385_vm0, %v12282_v5  ;;  %433 = vst.msk [vmem:[#allocation2 + $0x178] sm:$0xff] %vm385_vm0, %v12282_v5  ;;  %9984 = vmatpush3.bf16.msra.mxu0 %v9981_v21  ;;  %10321 = vrot.lane.b32.xlu0 %v10300_v30, %s12284_s0  ;;  %v486_v62 = vld [vmem:[%s12577_s16 + $0xe0] sm:$0xff]  ;;  %v487_v63 = vld [vmem:[%s12577_s16 + $0xe8] sm:$0xff] }
  0x30   : > { %434 = vst.msk [vmem:[#allocation2 + $0x180] sm:$0xff] %vm385_vm0, %v12282_v5  ;;  %435 = vst.msk [vmem:[#allocation2 + $0x188] sm:$0xff] %vm385_vm0, %v12282_v5  ;;  %9986 = vmatprep.subr.bf16.mxu0 %v9985_v31  ;;  %v488_v0 = vld [vmem:[%s12577_s16 + $0xf0] sm:$0xff]  ;;  %v489_v1 = vld [vmem:[%s12577_s16 + $0xf8] sm:$0xff]  ;;  %s17961_s16 = scalar_lea.vmem [#allocation3], %s9322_s22 }
  0x31   : > { %436 = vst.msk [vmem:[#allocation2 + $0x190] sm:$0xff] %vm385_vm0, %v12282_v5  ;;  %437 = vst.msk [vmem:[#allocation2 + $0x198] sm:$0xff] %vm385_vm0, %v12282_v5  ;;  %v2214_v6 = vld [vmem:[%s18151_s3 + $0x100] sm:$0xff]  ;;  %v2216_v12 = vld [vmem:[%s18151_s3 + $0x110] sm:$0xff]  ;;  %s9256_s24 = sshll.u32 %s17961_s16, 4  ;;  %s18100_s24 = int_to_ptr.vmem [resolvable:$true] %s9256_s24 }
  0x32   : > { %438 = vst.msk [vmem:[#allocation2 + $0x1a0] sm:$0xff] %vm385_vm0, %v12282_v5  ;;  %439 = vst.msk [vmem:[#allocation2 + $0x1a8] sm:$0xff] %vm385_vm0, %v12282_v5  ;;  %v10041_v8 = vpack.c.bf16 %v2215_v7, %v2214_v6  ;;  %v2217_v13 = vld [vmem:[%s18151_s3 + $0x118] sm:$0xff]  ;;  %s12218_s14 = scalar_lea.vmem %s18100_s24, 4096 }
  0x33   : > { %440 = vst.msk [vmem:[#allocation2 + $0x1b0] sm:$0xff] %vm385_vm0, %v12282_v5  ;;  %441 = vst.msk [vmem:[#allocation2 + $0x1b8] sm:$0xff] %vm385_vm0, %v12282_v5  ;;  %9988 = vmatpush3.bf16.msra.mxu0 %v9985_v31  ;;  %v10045_v15 = vpack.c.bf16 %v2217_v13, %v2216_v12  ;;  %p12219_p11 = scmp.ne.s32.totalorder %s18100_s24, %s12218_s14 }
  0x34   : > { %442 = vst.msk [vmem:[#allocation2 + $0x1c0] sm:$0xff] %vm385_vm0, %v12282_v5  ;;  %443 = vst.msk [vmem:[#allocation2 + $0x1c8] sm:$0xff] %vm385_vm0, %v12282_v5  ;;  %9990 = vmatprep.subr.bf16.mxu0 %v9989_v34 }
  0x35   : > { %444 = vst.msk [vmem:[#allocation2 + $0x1d0] sm:$0xff] %vm385_vm0, %v12282_v5  ;;  %445 = vst.msk [vmem:[#allocation2 + $0x1d8] sm:$0xff] %vm385_vm0, %v12282_v5  ;;  %p12220_p12 = pnand %p12219_p11, %p12388_p5 }
  0x36   : > { %446 = vst.msk [vmem:[#allocation2 + $0x1e0] sm:$0xff] %vm385_vm0, %v12282_v5  ;;  %447 = vst.msk [vmem:[#allocation2 + $0x1e8] sm:$0xff] %vm385_vm0, %v12282_v5 }
  0x37   : > { %448 = vst.msk [vmem:[#allocation2 + $0x1f0] sm:$0xff] %vm385_vm0, %v12282_v5  ;;  %449 = vst.msk [vmem:[#allocation2 + $0x1f8] sm:$0xff] %vm385_vm0, %v12282_v5  ;;  %9992 = vmatpush3.bf16.msra.mxu0 %v9989_v34  ;;  %p12221_p13 = pneg %p12220_p12 }
  0x38   : > { %450 = vst.msk [vmem:[#allocation2 + $0x200] sm:$0xff] %vm385_vm0, %v12282_v5  ;;  %451 = vst.msk [vmem:[#allocation2 + $0x208] sm:$0xff] %vm385_vm0, %v12282_v5  ;;  %10042 = vmatprep.subr.bf16.mxu0 %v10041_v8 }
  0x39   : > { %452 = vst.msk [vmem:[#allocation2 + $0x210] sm:$0xff] %vm385_vm0, %v12282_v5  ;;  %453 = vst.msk [vmem:[#allocation2 + $0x218] sm:$0xff] %vm385_vm0, %v12282_v5 }
  0x3a   : > { %454 = vst.msk [vmem:[#allocation2 + $0x220] sm:$0xff] %vm385_vm0, %v12282_v5  ;;  %455 = vst.msk [vmem:[#allocation2 + $0x228] sm:$0xff] %vm385_vm0, %v12282_v5  ;;  %9690 = vmatmul.mubr.f32.vlgmr.msra.gmra.mrb[0].mxu0 %v459_v35 }
  0x3b   : > { %456 = vst.msk [vmem:[#allocation2 + $0x230] sm:$0xff] %vm385_vm0, %v12282_v5  ;;  %457 = vst.msk [vmem:[#allocation2 + $0x238] sm:$0xff] %vm385_vm0, %v12282_v5  ;;  %9692 = vmatprep.mubr.f32.mxu0 %v460_v36  ;;  %v12650_v5 = vld [vmem:[%s18150_s2] ss:$0 sm:$0xff]  ;;  %10044 = vmatpush3.bf16.msra.mxu0 %v10041_v8 }
  0x3c   : > { %10046 = vmatprep.subr.bf16.mxu0 %v10045_v15 }
  0x3e   : > { %9693 = vmatmul.mubr.f32.gmra.mrb[2].mxu0 %v461_v37 }
  0x3f   : > { %9695 = vmatprep.mubr.f32.mxu0 %v462_v38  ;;  %10048 = vmatpush3.bf16.msra.mxu0 %v10045_v15 }
  0x41   : > { %v1154_v27 = vld [vmem:[#allocation2 + $0x227] sm:$0xff] }
  0x42   : > { %v1155_v28 = vld [vmem:[#allocation2 + $0x22f] sm:$0xff]  ;;  %9696 = vmatmul.mubr.f32.gmra.mrb[4].mxu0 %v463_v39 }
  0x43   : > { %v10305_v29 = vpack.i.bf16 %v1155_v28, %v1154_v27  ;;  %9698 = vmatprep.mubr.f32.mxu0 %v464_v40  ;;  %v1186_v2 = vld [vmem:[#allocation2 + $0x228] sm:$0xff]  ;;  %v1187_v3 = vld [vmem:[#allocation2 + $0x230] sm:$0xff] }
  0x44   : > { %v10310_v4 = vpack.i.bf16 %v1187_v3, %v1186_v2 }
  0x45   : > { %10306 = vrot.lane.b32.xlu1 %v10305_v29, %s12284_s0 }
  0x46   : > { %9699 = vmatmul.mubr.f32.gmra.mrb[6].mxu0 %v465_v41 }
  0x47   : > { %9701 = vmatprep.mubr.f32.mxu0 %v466_v42 }
  0x49   : > { %10311 = vrot.lane.b32.xlu1 %v10310_v4, %s12285_s25 }
  0x4a   : > { %9702 = vmatmul.mubr.f32.gmra.mrb[8].mxu0 %v467_v43 }
  0x4b   : > { %9704 = vmatprep.mubr.f32.mxu0 %v468_v44 }
  0x4e   : > { %9705 = vmatmul.mubr.f32.gmra.mrb[10].mxu0 %v469_v45 }
  0x4f   : > { %9707 = vmatprep.mubr.f32.mxu0 %v470_v46 }
  0x52   : > { %9708 = vmatmul.mubr.f32.gmra.mrb[12].mxu0 %v471_v47 }
  0x53   : > { %9710 = vmatprep.mubr.f32.mxu0 %v472_v48 }
  0x56   : > { %9711 = vmatmul.mubr.f32.gmra.mrb[14].mxu0 %v473_v49 }
  0x57   : > { %9713 = vmatprep.mubr.f32.mxu0 %v474_v50 }
  0x5a   : > { %9714 = vmatmul.mubr.f32.gmra.mrb[16].mxu0 %v475_v51 }
  0x5b   : > { %9716 = vmatprep.mubr.f32.mxu0 %v476_v52 }
  0x5e   : > { %9717 = vmatmul.mubr.f32.gmra.mrb[18].mxu0 %v477_v53 }
  0x5f   : > { %9719 = vmatprep.mubr.f32.mxu0 %v478_v54 }
  0x62   : > { %9720 = vmatmul.mubr.f32.gmra.mrb[20].mxu0 %v479_v55 }
  0x63   : > { %9722 = vmatprep.mubr.f32.mxu0 %v480_v56 }
  0x66   : > { %9723 = vmatmul.mubr.f32.gmra.mrb[22].mxu0 %v481_v57 }
  0x67   : > { %9725 = vmatprep.mubr.f32.mxu0 %v482_v58 }
  0x6a   : > { %9726 = vmatmul.mubr.f32.gmra.mrb[24].mxu0 %v483_v59 }
  0x6b   : > { %9728 = vmatprep.mubr.f32.mxu0 %v484_v60 }
  0x6e   : > { %9729 = vmatmul.mubr.f32.gmra.mrb[26].mxu0 %v485_v61 }
  0x6f   : > { %9731 = vmatprep.mubr.f32.mxu0 %v486_v62 }
  0x72   : > { %9732 = vmatmul.mubr.f32.gmra.mrb[28].mxu0 %v487_v63 }
  0x73   : > { %9734 = vmatprep.mubr.f32.mxu0 %v488_v0 }
  0x76   : > { %9735 = vmatmul.mubr.f32.gmra.mrb[30].mxu0 %v489_v1 }
 0x10d   : > { %v9691_v9 = vpop.f32.mrb[0].mxu0 }
 0x10e   : > { %v585_v10 = vadd.f32 %v9691_v9, %v12650_v5  ;;  %v579_v11 = vpop.f32.mrb[1].mxu0 }
 0x10f   : > { %v580_v17 = vadd.f32 %v12650_v5, %v579_v11 }
 0x110   : > { %v12665_v14 = vmax.f32 %v585_v10, 0.0  ;;  %804 = vrot.lane.b32.xlu0 %v585_v10, %s12285_s25 }
 0x111   : > { %v9694_v16 = vpop.f32.mrb[2].mxu0  ;;  %v12673_v21 = vmax.f32 %v580_v17, 0.0 }
 0x112   : > { %18343 = vst [vmem:[#allocation6_spill] sm:$0xff] %v12665_v14  ;;  %2837 = vrot.lane.b32.xlu1 %v12665_v14, %s12284_s0  ;;  %v595_v18 = vadd.f32 %v9694_v16, %v12650_v5  ;;  %v589_v19 = vpop.f32.mrb[3].mxu0 }
 0x113   : > { %18344 = vst [vmem:[#allocation7_spill] sm:$0xff] %v12673_v21  ;;  %v590_v22 = vadd.f32 %v12650_v5, %v589_v19 }
 0x114   : > { %802 = vrot.lane.b32.xlu0 %v580_v17, %s12285_s25  ;;  %v12682_v27 = vmax.f32 %v595_v18, 0.0 }
 0x115   : > { %v9697_v20 = vpop.f32.mrb[4].mxu0  ;;  %v12679_v25 = vmax.f32 %v590_v22, 0.0 }
 0x116   : > { %808 = vrot.lane.b32.xlu1 %v595_v18, %s12285_s25  ;;  %v599_v23 = vpop.f32.mrb[5].mxu0  ;;  %18346 = vst [vmem:[#allocation9_spill] sm:$0xff] %v12682_v27  ;;  %v605_v30 = vadd.f32 %v9697_v20, %v12650_v5 }
 0x117   : > { %18345 = vst [vmem:[#allocation8_spill] sm:$0xff] %v12679_v25  ;;  %v600_v28 = vadd.f32 %v12650_v5, %v599_v23 }
 0x118   : > { %2835 = vrot.lane.b32.xlu0 %v12673_v21, %s12284_s0  ;;  %v12694_v35 = vmax.f32 %v605_v30, 0.0 }
 0x119   : > { %v9700_v24 = vpop.f32.mrb[6].mxu0  ;;  %v12690_v32 = vmax.f32 %v600_v28, 0.0 }
 0x11a   : > { %806 = vrot.lane.b32.xlu1 %v590_v22, %s12285_s25  ;;  %v609_v26 = vpop.f32.mrb[7].mxu0  ;;  %18348 = vst [vmem:[#allocation11_spill] sm:$0xff] %v12694_v35  ;;  %v615_v38 = vadd.f32 %v9700_v24, %v12650_v5 }
 0x11b   : > { %18347 = vst [vmem:[#allocation10_spill] sm:$0xff] %v12690_v32  ;;  %v610_v36 = vadd.f32 %v12650_v5, %v609_v26 }
 0x11c   : > { %2839 = vrot.lane.b32.xlu0 %v12679_v25, %s12284_s0  ;;  %v12706_v43 = vmax.f32 %v615_v38, 0.0 }
 0x11d   : > { %v9703_v29 = vpop.f32.mrb[8].mxu0  ;;  %v12702_v40 = vmax.f32 %v610_v36, 0.0 }
 0x11e   : > { %2841 = vrot.lane.b32.xlu1 %v12682_v27, %s12284_s0  ;;  %v619_v31 = vpop.f32.mrb[9].mxu0  ;;  %18350 = vst [vmem:[#allocation13_spill] sm:$0xff] %v12706_v43  ;;  %v625_v46 = vadd.f32 %v9703_v29, %v12650_v5 }
 0x11f   : > { %18349 = vst [vmem:[#allocation12_spill] sm:$0xff] %v12702_v40  ;;  %v620_v44 = vadd.f32 %v12650_v5, %v619_v31 }
 0x120   : > { %810 = vrot.lane.b32.xlu0 %v600_v28, %s12285_s25  ;;  %v12724_v55 = vmax.f32 %v625_v46, 0.0 }
 0x121   : > { %v9706_v33 = vpop.f32.mrb[10].mxu0  ;;  %v12718_v50 = vmax.f32 %v620_v44, 0.0 }
 0x122   : > { %812 = vrot.lane.b32.xlu1 %v605_v30, %s12285_s25  ;;  %v629_v34 = vpop.f32.mrb[11].mxu0  ;;  %18352 = vst [vmem:[#allocation15_spill] sm:$0xff] %v12724_v55  ;;  %v635_v58 = vadd.f32 %v9706_v33, %v12650_v5 }
 0x123   : > { %18351 = vst [vmem:[#allocation14_spill] sm:$0xff] %v12718_v50  ;;  %v630_v56 = vadd.f32 %v12650_v5, %v629_v34 }
 0x124   : > { %2843 = vrot.lane.b32.xlu0 %v12690_v32, %s12284_s0  ;;  %v12746_v3 = vmax.f32 %v635_v58, 0.0 }
 0x125   : > { %v9709_v37 = vpop.f32.mrb[12].mxu0  ;;  %v12736_v62 = vmax.f32 %v630_v56, 0.0 }
 0x126   : > { %2845 = vrot.lane.b32.xlu1 %v12694_v35, %s12284_s0  ;;  %v639_v39 = vpop.f32.mrb[13].mxu0  ;;  %18354 = vst [vmem:[#allocation17_spill] sm:$0xff] %v12746_v3  ;;  %v645_v7 = vadd.f32 %v9709_v37, %v12650_v5 }
 0x127   : > { %18353 = vst [vmem:[#allocation16_spill] sm:$0xff] %v12736_v62  ;;  %v640_v4 = vadd.f32 %v12650_v5, %v639_v39  ;;  %v2183_v39 = vld [vmem:[%s18151_s3 + $0x8] sm:$0xff] }
 0x128   : > { %814 = vrot.lane.b32.xlu0 %v610_v36, %s12285_s25  ;;  %v12770_v17 = vmax.f32 %v645_v7, 0.0 }
 0x129   : > { %v9712_v41 = vpop.f32.mrb[14].mxu0  ;;  %v12760_v11 = vmax.f32 %v640_v4, 0.0 }
 0x12a   : > { %816 = vrot.lane.b32.xlu1 %v615_v38, %s12285_s25  ;;  %v649_v42 = vpop.f32.mrb[15].mxu0  ;;  %18356 = vst [vmem:[#allocation19_spill] sm:$0xff] %v12770_v17  ;;  %v655_v20 = vadd.f32 %v9712_v41, %v12650_v5  ;;  %v2182_v38 = vld [vmem:[%s18151_s3] sm:$0xff] }
 0x12b   : > { %18355 = vst [vmem:[#allocation18_spill] sm:$0xff] %v12760_v11  ;;  %v650_v18 = vadd.f32 %v12650_v5, %v649_v42  ;;  %v9994_v41 = vpack.c.bf16 %v2183_v39, %v2182_v38  ;;  %v18160_v42 = vmov 0.0|0.0  }
 0x12c   : > { %2847 = vrot.lane.b32.xlu0 %v12702_v40, %s12284_s0  ;;  %v12794_v33 = vmax.f32 %v655_v20, 0.0  ;;  %9993 = vmatprep.subr.bf16.mxu1 %v18160_v42 }
 0x12d   : > { %v9715_v45 = vpop.f32.mrb[16].mxu0  ;;  %v12784_v26 = vmax.f32 %v650_v18, 0.0  ;;  %10049 = vmatprep.subr.bf16.mxu0 %v18160_v42  ;;  %9995 = vmatpush1.bf16.msra.mxu1 %v9994_v41 }
 0x12e   : > { %2849 = vrot.lane.b32.xlu1 %v12706_v43, %s12284_s0  ;;  %v12715_v47 = vadd.f32 %v9715_v45, %v12650_v5  ;;  %v659_v48 = vpop.f32.mrb[17].mxu0  ;;  %18358 = vst [vmem:[#allocation21_spill] sm:$0xff] %v12794_v33  ;;  %9996 = vmatprep.subr.bf16.mxu1 %v18160_v42  ;;  %v2184_v45 = vld [vmem:[%s18151_s3 + $0x10] sm:$0xff] }
 0x12f   : > { %v660_v49 = vadd.f32 %v12650_v5, %v659_v48  ;;  %18357 = vst [vmem:[#allocation20_spill] sm:$0xff] %v12784_v26 }
 0x130   : > { %818 = vrot.lane.b32.xlu0 %v620_v44, %s12285_s25  ;;  %v12806_v36 = vmax.f32 %v12715_v47, 0.0 }
 0x131   : > { %v9718_v51 = vpop.f32.mrb[18].mxu0  ;;  %v12800_v34 = vmax.f32 %v660_v49, 0.0 }
 0x132   : > { %820 = vrot.lane.b32.xlu1 %v625_v46, %s12285_s25  ;;  %v675_v52 = vadd.f32 %v9718_v51, %v12650_v5  ;;  %v669_v53 = vpop.f32.mrb[19].mxu0  ;;  %18360 = vst [vmem:[#allocation23_spill] sm:$0xff] %v12806_v36  ;;  %v2185_v46 = vld [vmem:[%s18151_s3 + $0x18] sm:$0xff]  ;;  %v2187_v51 = vld [vmem:[%s18151_s3 + $0x28] sm:$0xff] }
 0x133   : > { %v670_v54 = vadd.f32 %v12650_v5, %v669_v53  ;;  %18359 = vst [vmem:[#allocation22_spill] sm:$0xff] %v12800_v34 }
 0x134   : > { %2851 = vrot.lane.b32.xlu0 %v12718_v50, %s12284_s0  ;;  %v12816_v37 = vmax.f32 %v675_v52, 0.0 }
 0x135   : > { %v9721_v57 = vpop.f32.mrb[20].mxu0 }
 0x136   : > { %2853 = vrot.lane.b32.xlu1 %v12724_v55, %s12284_s0  ;;  %v12733_v59 = vadd.f32 %v9721_v57, %v12650_v5  ;;  %v679_v60 = vpop.f32.mrb[21].mxu0  ;;  %18362 = vst [vmem:[#allocation25_spill] sm:$0xff] %v12816_v37 }
 0x137   : > { %v680_v61 = vadd.f32 %v12650_v5, %v679_v60  ;;  %v2190_v60 = vld [vmem:[%s18151_s3 + $0x40] sm:$0xff] }
 0x138   : > { %822 = vrot.lane.b32.xlu0 %v630_v56, %s12285_s25  ;;  %v12843_v48 = vmax.f32 %v12733_v59, 0.0  ;;  %v2189_v56 = vld [vmem:[%s18151_s3 + $0x38] sm:$0xff] }
 0x139   : > { %v9724_v63 = vpop.f32.mrb[22].mxu0  ;;  %v12830_v44 = vmax.f32 %v680_v61, 0.0 }
 0x13a   : > { %824 = vrot.lane.b32.xlu1 %v635_v58, %s12285_s25  ;;  %v12741_v0 = vadd.f32 %v9724_v63, %v12650_v5  ;;  %v689_v1 = vpop.f32.mrb[23].mxu0  ;;  %18364 = vst [vmem:[#allocation27_spill] sm:$0xff] %v12843_v48 }
 0x13b   : > { %v12744_v2 = vadd.f32 %v12650_v5, %v689_v1  ;;  %18363 = vst [vmem:[#allocation26_spill] sm:$0xff] %v12830_v44  ;;  %v2192_v1 = vld [vmem:[%s18151_s3 + $0x50] sm:$0xff] }
 0x13c   : > { %2855 = vrot.lane.b32.xlu0 %v12736_v62, %s12284_s0  ;;  %v12871_v58 = vmax.f32 %v12741_v0, 0.0 }
 0x13d   : > { %v9727_v6 = vpop.f32.mrb[24].mxu0  ;;  %v12857_v53 = vmax.f32 %v12744_v2, 0.0 }
 0x13e   : > { %2857 = vrot.lane.b32.xlu1 %v12746_v3, %s12284_s0  ;;  %v12755_v8 = vadd.f32 %v9727_v6, %v12650_v5  ;;  %v699_v9 = vpop.f32.mrb[25].mxu0  ;;  %18366 = vst [vmem:[#allocation29_spill] sm:$0xff] %v12871_v58 }
 0x13f   : > { %v12758_v10 = vadd.f32 %v12650_v5, %v699_v9  ;;  %18365 = vst [vmem:[#allocation28_spill] sm:$0xff] %v12857_v53  ;;  %v2194_v9 = vld [vmem:[%s18151_s3 + $0x60] sm:$0xff] }
 0x140   : > { %826 = vrot.lane.b32.xlu0 %v640_v4, %s12285_s25 }
 0x141   : > { %v9730_v12 = vpop.f32.mrb[26].mxu0 }
 0x142   : > { %828 = vrot.lane.b32.xlu1 %v645_v7, %s12285_s25  ;;  %v12765_v13 = vadd.f32 %v9730_v12, %v12650_v5  ;;  %v709_v15 = vpop.f32.mrb[27].mxu0  ;;  %v12903_v7 = vmax.f32 %v12755_v8, 0.0 }
 0x143   : > { %v12768_v16 = vadd.f32 %v12650_v5, %v709_v15 }
 0x144   : > { %2859 = vrot.lane.b32.xlu0 %v12760_v11, %s12284_s0  ;;  %18368 = vst [vmem:[#allocation31_spill] sm:$0xff] %v12903_v7 }
 0x145   : > { %v9733_v19 = vpop.f32.mrb[28].mxu0 }
 0x146   : > { %2861 = vrot.lane.b32.xlu1 %v12770_v17, %s12284_s0  ;;  %v12779_v22 = vadd.f32 %v9733_v19, %v12650_v5  ;;  %v719_v23 = vpop.f32.mrb[29].mxu0  ;;  %v2196_v19 = vld [vmem:[%s18151_s3 + $0x70] sm:$0xff] }
 0x147   : > { %v12782_v24 = vadd.f32 %v12650_v5, %v719_v23 }
 0x148   : > { %830 = vrot.lane.b32.xlu0 %v650_v18, %s12285_s25  ;;  %v12923_v18 = vpop.permute.xlu1 %10306 }
 0x149   : > { %v9736_v28 = vpop.f32.mrb[30].mxu0  ;;  %18371 = vst [vmem:[#allocation34_spill] sm:$0xff] %v12923_v18  ;;  %v12953_v41 = vmax.f32 %v12782_v24, 0.0 }
 0x14a   : > { %832 = vrot.lane.b32.xlu1 %v655_v20, %s12285_s25  ;;  %v12789_v29 = vadd.f32 %v9736_v28, %v12650_v5  ;;  %v729_v30 = vpop.f32.mrb[31].mxu0  ;;  %v2197_v20 = vld [vmem:[%s18151_s3 + $0x78] sm:$0xff]  ;;  %v12935_v28 = vmax.f32 %v12765_v13, 0.0 }
 0x14b   : > { %v12792_v31 = vadd.f32 %v12650_v5, %v729_v30  ;;  %v12812_v5 = vmax.f32 %v670_v54, 0.0  ;;  %v10015_v23 = vpack.c.bf16 %v2197_v20, %v2196_v19  ;;  %v2199_v30 = vld [vmem:[%s18151_s3 + $0x88] sm:$0xff]  ;;  %18375 = vst [vmem:[#allocation38_spill] sm:$0xff] %v12953_v41 }
 0x14c   : > { %2863 = vrot.lane.b32.xlu0 %v12784_v26, %s12284_s0  ;;  %18372 = vst [vmem:[#allocation35_spill] sm:$0xff] %v12935_v28 }
 0x14d   : > { %18361 = vst [vmem:[#allocation24_spill] sm:$0xff] %v12812_v5 }
 0x14e   : > { %2865 = vrot.lane.b32.xlu1 %v12794_v33, %s12284_s0 }
 0x150   : > { %834 = vrot.lane.b32.xlu0 %v660_v49, %s12285_s25  ;;  %v2186_v49 = vld [vmem:[%s18151_s3 + $0x20] sm:$0xff] }
 0x152   : > { %836 = vrot.lane.b32.xlu1 %v12715_v47, %s12285_s25  ;;  %v9997_v47 = vpack.c.bf16 %v2185_v46, %v2184_v45  ;;  %v2200_v45 = vld [vmem:[%s18151_s3 + $0x90] sm:$0xff]  ;;  %v2201_v46 = vld [vmem:[%s18151_s3 + $0x98] sm:$0xff] }
 0x154   : > { %2867 = vrot.lane.b32.xlu0 %v12800_v34, %s12284_s0  ;;  %9998 = vmatpush1.bf16.msra.mxu1 %v9997_v47 }
 0x155   : > { %9999 = vmatprep.subr.bf16.mxu1 %v18160_v42 }
 0x156   : > { %2869 = vrot.lane.b32.xlu1 %v12806_v36, %s12284_s0 }
 0x158   : > { %838 = vrot.lane.b32.xlu0 %v670_v54, %s12285_s25  ;;  %v2188_v54 = vld [vmem:[%s18151_s3 + $0x30] sm:$0xff] }
 0x159   : > { %v10003_v57 = vpack.c.bf16 %v2189_v56, %v2188_v54  ;;  %v2203_v54 = vld [vmem:[%s18151_s3 + $0xa8] sm:$0xff] }
 0x15a   : > { %840 = vrot.lane.b32.xlu1 %v675_v52, %s12285_s25  ;;  %v10000_v52 = vpack.c.bf16 %v2187_v51, %v2186_v49  ;;  %v10021_v49 = vpack.c.bf16 %v2201_v46, %v2200_v45 }
 0x15c   : > { %2871 = vrot.lane.b32.xlu0 %v12812_v5, %s12284_s0  ;;  %10001 = vmatpush1.bf16.msra.mxu1 %v10000_v52  ;;  %v2202_v52 = vld [vmem:[%s18151_s3 + $0xa0] sm:$0xff] }
 0x15d   : > { %10002 = vmatprep.subr.bf16.mxu1 %v18160_v42  ;;  %v10024_v56 = vpack.c.bf16 %v2203_v54, %v2202_v52  ;;  %v2209_v52 = vld [vmem:[%s18151_s3 + $0xd8] sm:$0xff] }
 0x15e   : > { %2873 = vrot.lane.b32.xlu1 %v12816_v37, %s12284_s0 }
 0x160   : > { %842 = vrot.lane.b32.xlu0 %v680_v61, %s12285_s25  ;;  %10004 = vmatpush1.bf16.msra.mxu1 %v10003_v57  ;;  %v2191_v61 = vld [vmem:[%s18151_s3 + $0x48] sm:$0xff]  ;;  %v12983_v57 = vmax.f32 %v12792_v31, 0.0 }
 0x161   : > { %10005 = vmatprep.subr.bf16.mxu1 %v18160_v42  ;;  %v10006_v63 = vpack.c.bf16 %v2191_v61, %v2190_v60  ;;  %v2204_v61 = vld [vmem:[%s18151_s3 + $0xb0] sm:$0xff] }
 0x162   : > { %844 = vrot.lane.b32.xlu1 %v12733_v59, %s12285_s25  ;;  %v12875_v59 = vpop.permute.xlu0 %10296  ;;  %18377 = vst [vmem:[#allocation40_spill] sm:$0xff] %v12983_v57 }
 0x164   : > { %2875 = vrot.lane.b32.xlu0 %v12830_v44, %s12284_s0  ;;  %10007 = vmatpush1.bf16.msra.mxu1 %v10006_v63  ;;  %v2205_v63 = vld [vmem:[%s18151_s3 + $0xb8] sm:$0xff] }
 0x165   : > { %10008 = vmatprep.subr.bf16.mxu1 %v18160_v42 }
 0x166   : > { %2877 = vrot.lane.b32.xlu1 %v12843_v48, %s12284_s0  ;;  %v12900_v4 = vpop.permute.xlu0 %10301 }
 0x168   : > { %846 = vrot.lane.b32.xlu0 %v12744_v2, %s12285_s25  ;;  %v2193_v2 = vld [vmem:[%s18151_s3 + $0x58] sm:$0xff] }
 0x169   : > { %v10009_v6 = vpack.c.bf16 %v2193_v2, %v2192_v1  ;;  %v10027_v2 = vpack.c.bf16 %v2205_v63, %v2204_v61 }
 0x16a   : > { %848 = vrot.lane.b32.xlu1 %v12741_v0, %s12285_s25  ;;  %v12887_v0 = vmax.f32 %v12758_v10, 0.0  ;;  %v12919_v15 = vpop.permute.xlu0 %10316 }
 0x16b   : > { %10010 = vmatpush1.bf16.msra.mxu1 %v10009_v6  ;;  %18370 = vst [vmem:[#allocation33_spill] sm:$0xff] %v12919_v15 }
 0x16c   : > { %2879 = vrot.lane.b32.xlu0 %v12857_v53, %s12284_s0  ;;  %18367 = vst [vmem:[#allocation30_spill] sm:$0xff] %v12887_v0  ;;  %10011 = vmatprep.subr.bf16.mxu1 %v18160_v42 }
 0x16e   : > { %2881 = vrot.lane.b32.xlu1 %v12871_v58, %s12284_s0  ;;  %v12946_v38 = vpop.permute.xlu0 %10321 }
 0x16f   : > { %18373 = vst [vmem:[#allocation36_spill] sm:$0xff] %v12946_v38 }
 0x170   : > { %850 = vrot.lane.b32.xlu0 %v12758_v10, %s12285_s25  ;;  %v2195_v10 = vld [vmem:[%s18151_s3 + $0x68] sm:$0xff] }
 0x171   : > { %v10012_v12 = vpack.c.bf16 %v2195_v10, %v2194_v9  ;;  %v2206_v10 = vld [vmem:[%s18151_s3 + $0xc0] sm:$0xff] }
 0x172   : > { %852 = vrot.lane.b32.xlu1 %v12755_v8, %s12285_s25  ;;  %v12917_v8 = vmax.f32 %v12768_v16, 0.0 }
 0x173   : > { %10013 = vmatpush1.bf16.msra.mxu1 %v10012_v12 }
 0x174   : > { %2883 = vrot.lane.b32.xlu0 %v12887_v0, %s12284_s0  ;;  %18369 = vst [vmem:[#allocation32_spill] sm:$0xff] %v12917_v8  ;;  %10014 = vmatprep.subr.bf16.mxu1 %v18160_v42 }
 0x176   : > { %2885 = vrot.lane.b32.xlu1 %v12903_v7, %s12284_s0 }
 0x177   : > { %10016 = vmatpush1.bf16.msra.mxu1 %v10015_v23 }
 0x178   : > { %854 = vrot.lane.b32.xlu0 %v12768_v16, %s12285_s25  ;;  %10017 = vmatprep.subr.bf16.mxu1 %v18160_v42  ;;  %v2198_v16 = vld [vmem:[%s18151_s3 + $0x80] sm:$0xff] }
 0x179   : > { %v10018_v39 = vpack.c.bf16 %v2199_v30, %v2198_v16 }
 0x17a   : > { %856 = vrot.lane.b32.xlu1 %v12765_v13, %s12285_s25  ;;  %v12950_v13 = vpop.permute.xlu1 %10311 }
 0x17b   : > { %18374 = vst [vmem:[#allocation37_spill] sm:$0xff] %v12950_v13  ;;  %10019 = vmatpush1.bf16.msra.mxu1 %v10018_v39 }
 0x17c   : > { %2887 = vrot.lane.b32.xlu0 %v12917_v8, %s12284_s0  ;;  %10020 = vmatprep.subr.bf16.mxu1 %v18160_v42 }
 0x17e   : > { %2889 = vrot.lane.b32.xlu1 %v12935_v28, %s12284_s0 }
 0x17f   : > { %10022 = vmatpush1.bf16.msra.mxu1 %v10021_v49  ;;  %v2208_v49 = vld [vmem:[%s18151_s3 + $0xd0] sm:$0xff] }
 0x180   : > { %858 = vrot.lane.b32.xlu0 %v12782_v24, %s12285_s25  ;;  %v12968_v24 = vmax.f32 %v12779_v22, 0.0  ;;  %10023 = vmatprep.subr.bf16.mxu1 %v18160_v42 }
 0x182   : > { %v805_v47 = vpop.permute.xlu0 %804  ;;  %860 = vrot.lane.b32.xlu1 %v12779_v22, %s12285_s25  ;;  %18376 = vst [vmem:[#allocation39_spill] sm:$0xff] %v12968_v24 }
 0x183   : > { %900 = vst.msk [vmem:[#allocation2 + $0x30] sm:$0xff] %vm385_vm0, %v805_v47  ;;  %10025 = vmatpush1.bf16.msra.mxu1 %v10024_v56 }
 0x184   : > { %v2838_v51 = vpop.permute.xlu1 %2837  ;;  %2891 = vrot.lane.b32.xlu0 %v12953_v41, %s12284_s0  ;;  %10026 = vmatprep.subr.bf16.mxu1 %v18160_v42 }
 0x186   : > { %2893 = vrot.lane.b32.xlu1 %v12968_v24, %s12284_s0  ;;  %v803_v22 = vpop.permute.xlu0 %802 }
 0x187   : > { %899 = vst.msk [vmem:[#allocation2 + $0x28] sm:$0xff] %vm385_vm0, %v803_v22  ;;  %10028 = vmatpush1.bf16.msra.mxu1 %v10027_v2  ;;  %v10033_v22 = vpack.c.bf16 %v2209_v52, %v2208_v49 }
 0x188   : > { %v809_v60 = vpop.permute.xlu1 %808  ;;  %862 = vrot.lane.b32.xlu0 %v12792_v31, %s12285_s25  ;;  %v12998_v31 = vmax.f32 %v12789_v29, 0.0  ;;  %10029 = vmatprep.subr.bf16.mxu1 %v18160_v42 }
 0x189   : > { %902 = vst.msk [vmem:[#allocation2 + $0x50] sm:$0xff] %vm385_vm0, %v809_v60 }
 0x18a   : > { %864 = vrot.lane.b32.xlu1 %v12789_v29, %s12285_s25  ;;  %v2836_v1 = vpop.permute.xlu0 %2835  ;;  %18378 = vst [vmem:[#allocation41_spill] sm:$0xff] %v12998_v31  ;;  %v13002_v9 = vld [vmem:[#allocation2 + $0x30] sm:$0xff]  ;;  %v2207_v29 = vld [vmem:[%s18151_s3 + $0xc8] sm:$0xff] }
 0x18b   : > { %v10030_v16 = vpack.c.bf16 %v2207_v29, %v2206_v10  ;;  %v1092_v46 = vld [vmem:[#allocation2 + $0x31] sm:$0xff]  ;;  %v2210_v10 = vld [vmem:[%s18151_s3 + $0xe0] sm:$0xff]  ;;  %v2211_v29 = vld [vmem:[%s18151_s3 + $0xe8] sm:$0xff] }
 0x18c   : > { %v807_v6 = vpop.permute.xlu1 %806  ;;  %2895 = vrot.lane.b32.xlu0 %v12983_v57, %s12284_s0 }
 0x18d   : > { %901 = vst.msk [vmem:[#allocation2 + $0x48] sm:$0xff] %vm385_vm0, %v807_v6  ;;  %10031 = vmatpush1.bf16.msra.mxu1 %v10030_v16 }
 0x18e   : > { %v13012_v12 = vld [vmem:[#allocation2 + $0x27] sm:$0xff]  ;;  %v13014_v19 = vld [vmem:[#allocation2 + $0x2f] sm:$0xff]  ;;  %2897 = vrot.lane.b32.xlu1 %v12998_v31, %s12284_s0  ;;  %v2840_v23 = vpop.permute.xlu0 %2839  ;;  %10032 = vmatprep.subr.bf16.mxu1 %v18160_v42 }
 0x18f   : > { %v13016_v20 = vld [vmem:[#allocation2 + $0x28] sm:$0xff]  ;;  %v10335_v30 = vpack.i.bf16 %v13014_v19, %v13012_v12 }
 0x190   : > { %v10325_v39 = vpack.i.bf16 %v13002_v9, %v13016_v20  ;;  %v1091_v45 = vld [vmem:[#allocation2 + $0x29] sm:$0xff]  ;;  %v2842_v47 = vpop.permute.xlu1 %2841  ;;  %v1189_v60 = vld [vmem:[#allocation2 + $0x51] sm:$0xff] }
 0x191   : > { %2932 = vst.msk [vmem:[#allocation2 + $0x30] sm:$0xff] %vm385_vm0, %v2838_v51  ;;  %2931 = vst.msk [vmem:[#allocation2 + $0x28] sm:$0xff] %vm385_vm0, %v2836_v1  ;;  %10336 = vrot.lane.b32.xlu0 %v10335_v30, %s12285_s25  ;;  %v13035_v51 = vld [vmem:[#allocation2 + $0x50] sm:$0xff]  ;;  %v10340_v56 = vpack.i.bf16 %v1092_v46, %v1091_v45  ;;  %10034 = vmatpush1.bf16.msra.mxu1 %v10033_v22  ;;  %v10036_v30 = vpack.c.bf16 %v2211_v29, %v2210_v10 }
 0x192   : > { %10326 = vrot.lane.b32.xlu1 %v10325_v39, %s12283_s13  ;;  %v811_v54 = vpop.permute.xlu0 %810  ;;  %10035 = vmatprep.subr.bf16.mxu1 %v18160_v42 }
 0x193   : > { %903 = vst.msk [vmem:[#allocation2 + $0x68] sm:$0xff] %vm385_vm0, %v811_v54 }
 0x194   : > { %v13038_v61 = vld [vmem:[#allocation2 + $0x47] sm:$0xff]  ;;  %v13040_v63 = vld [vmem:[#allocation2 + $0x4f] sm:$0xff]  ;;  %v813_v2 = vpop.permute.xlu1 %812 }
 0x195   : > { %v13042_v1 = vld [vmem:[#allocation2 + $0x48] sm:$0xff]  ;;  %904 = vst.msk [vmem:[#allocation2 + $0x70] sm:$0xff] %vm385_vm0, %v813_v2  ;;  %10341 = vrot.lane.b32.xlu0 %v10340_v56, %s12283_s13  ;;  %v10355_v46 = vpack.i.bf16 %v13040_v63, %v13038_v61  ;;  %10037 = vmatpush1.bf16.msra.mxu1 %v10036_v30 }
 0x196   : > { %v1188_v6 = vld [vmem:[#allocation2 + $0x49] sm:$0xff]  ;;  %10331 = vrot.lane.b32.xlu1 %v10340_v56, %s12284_s0  ;;  %v2844_v16 = vpop.permute.xlu0 %2843  ;;  %v10345_v39 = vpack.i.bf16 %v13035_v51, %v13042_v1  ;;  %10038 = vmatprep.subr.bf16.mxu1 %v18160_v42 }
 0x197   : > { %9745 = vmatprep.mubr.msk.f32.mxu0 %vm385_vm0, %v1188_v6  ;;  %2933 = vst.msk [vmem:[#allocation2 + $0x48] sm:$0xff] %vm385_vm0, %v2840_v23  ;;  %2934 = vst.msk [vmem:[#allocation2 + $0x50] sm:$0xff] %vm385_vm0, %v2842_v47  ;;  %v2212_v23 = vld [vmem:[%s18151_s3 + $0xf0] sm:$0xff]  ;;  %v2213_v47 = vld [vmem:[%s18151_s3 + $0xf8] sm:$0xff]  ;;  %v10350_v56 = vpack.i.bf16 %v1189_v60, %v1188_v6  ;;  %v18381_v6 = vmov 0.0|0.0  }
 0x198   : > { %9746 = vmatmul.mubr.msk.f32.vlgmr.msra.gmra.mrb[32].mxu0 %vm385_vm0, %v1189_v60  ;;  %v2846_v45 = vpop.permute.xlu1 %2845  ;;  %v10039_v22 = vpack.c.bf16 %v2213_v47, %v2212_v23  ;;  %v3059_v31 = vld [vmem:[#allocation2 + $0x27] sm:$0xff]  ;;  %v3060_v24 = vld [vmem:[#allocation2 + $0x2f] sm:$0xff] }
 0x199   : > { %10346 = vrot.lane.b32.xlu0 %v10345_v39, %s12283_s13  ;;  %v2997_v41 = vld [vmem:[#allocation2 + $0x28] sm:$0xff]  ;;  %v3124_v0 = vld [vmem:[#allocation2 + $0x31] sm:$0xff] }
 0x19a   : > { %v13070_v49 = vld [vmem:[#allocation2 + $0x67] sm:$0xff]  ;;  %10356 = vrot.lane.b32.xlu1 %v10355_v46, %s12285_s25  ;;  %v815_v54 = vpop.permute.xlu0 %814  ;;  %10040 = vmatpush1.bf16.msra.mxu1 %v10039_v22 }
 0x19b   : > { %18379 = vst [vmem:[#allocation42_spill] sm:$0xff] %v13070_v49  ;;  %v13072_v52 = vld [vmem:[#allocation2 + $0x68] sm:$0xff]  ;;  %905 = vst.msk [vmem:[#allocation2 + $0x88] sm:$0xff] %vm385_vm0, %v815_v54  ;;  %10217 = vmatprep.subr.bf16.mxu1 %v18381_v6 }
 0x19c   : > { %v13076_v2 = vld [vmem:[#allocation2 + $0x6f] sm:$0xff]  ;;  %v817_v29 = vpop.permute.xlu1 %816 }
 0x19d   : > { %18380 = vst [vmem:[#allocation43_spill] sm:$0xff] %v13076_v2  ;;  %v13078_v10 = vld [vmem:[#allocation2 + $0x70] sm:$0xff]  ;;  %906 = vst.msk [vmem:[#allocation2 + $0x90] sm:$0xff] %vm385_vm0, %v817_v29  ;;  %10351 = vrot.lane.b32.xlu0 %v10350_v56, %s12284_s0 }
 0x19e   : > { %v1190_v30 = vld [vmem:[#allocation2 + $0x69] sm:$0xff]  ;;  %v1191_v42 = vld [vmem:[#allocation2 + $0x71] sm:$0xff]  ;;  %10361 = vrot.lane.b32.xlu1 %v10350_v56, %s12283_s13  ;;  %v2848_v60 = vpop.permute.xlu0 %2847  ;;  %v10375_v47 = vpack.i.bf16 %v13078_v10, %v13072_v52 }
 0x19f   : > { %9748 = vmatprep.mubr.msk.f32.mxu0 %vm385_vm0, %v1190_v30  ;;  %2935 = vst.msk [vmem:[#allocation2 + $0x68] sm:$0xff] %vm385_vm0, %v2844_v16  ;;  %2936 = vst.msk [vmem:[#allocation2 + $0x70] sm:$0xff] %vm385_vm0, %v2846_v45  ;;  %v10380_v15 = vpack.i.bf16 %v1191_v42, %v1190_v30  ;;  %v3123_v48 = vld [vmem:[#allocation2 + $0x29] sm:$0xff]  ;;  %v3126_v18 = vld [vmem:[#allocation2 + $0x51] sm:$0xff] }
 0x1a0   : > { %9749 = vmatmul.mubr.msk.f32.gmra.mrb[34].mxu0 %vm385_vm0, %v1191_v42  ;;  %v2850_v23 = vpop.permute.xlu1 %2849  ;;  %v10385_v42 = vpack.i.bf16 %v13076_v2, %v13070_v49  ;;  %v3062_v13 = vld [vmem:[#allocation2 + $0x4f] sm:$0xff] }
 0x1a1   : > { %10366 = vrot.lane.b32.xlu0 %v10355_v46, %s12284_s0  ;;  %v3125_v17 = vld [vmem:[#allocation2 + $0x49] sm:$0xff] }
 0x1a2   : > { %v13091_v54 = vld [vmem:[#allocation2 + $0x87] sm:$0xff]  ;;  %10376 = vrot.lane.b32.xlu1 %v10375_v47, %s12283_s13  ;;  %v819_v16 = vpop.permute.xlu0 %818  ;;  %v3000_v26 = vld [vmem:[#allocation2 + $0x50] sm:$0xff] }
 0x1a3   : > { %18382 = vst [vmem:[#allocation44_spill] sm:$0xff] %v13091_v54  ;;  %v13093_v22 = vld [vmem:[#allocation2 + $0x88] sm:$0xff]  ;;  %907 = vst.msk [vmem:[#allocation2 + $0xa8] sm:$0xff] %vm385_vm0, %v819_v16 }
 0x1a4   : > { %v13097_v56 = vld [vmem:[#allocation2 + $0x8f] sm:$0xff]  ;;  %v821_v29 = vpop.permute.xlu1 %820 }
 0x1a5   : > { %18383 = vst [vmem:[#allocation45_spill] sm:$0xff] %v13097_v56  ;;  %v13099_v45 = vld [vmem:[#allocation2 + $0x90] sm:$0xff]  ;;  %908 = vst.msk [vmem:[#allocation2 + $0xb0] sm:$0xff] %vm385_vm0, %v821_v29  ;;  %10371 = vrot.lane.b32.xlu0 %v10345_v39, %s12285_s25 }
 0x1a6   : > { %18384 = vst [vmem:[#allocation46_spill] sm:$0xff] %v13099_v45  ;;  %v13101_v38 = vld [vmem:[#allocation2 + $0x89] sm:$0xff]  ;;  %v13107_v46 = vld [vmem:[#allocation2 + $0x91] sm:$0xff]  ;;  %10381 = vrot.lane.b32.xlu1 %v10380_v15, %s12284_s0  ;;  %v2852_v16 = vpop.permute.xlu0 %2851 }
 0x1a7   : > { %9751 = vmatprep.mubr.msk.f32.mxu0 %vm385_vm0, %v13101_v38  ;;  %2937 = vst.msk [vmem:[#allocation2 + $0x88] sm:$0xff] %vm385_vm0, %v2848_v60  ;;  %2938 = vst.msk [vmem:[#allocation2 + $0x90] sm:$0xff] %vm385_vm0, %v2850_v23  ;;  %v3064_v35 = vld [vmem:[#allocation2 + $0x6f] sm:$0xff] }
 0x1a8   : > { %9752 = vmatmul.mubr.msk.f32.gmra.mrb[36].mxu0 %vm385_vm0, %v13107_v46  ;;  %v2854_v30 = vpop.permute.xlu1 %2853  ;;  %v3001_v27 = vld [vmem:[#allocation2 + $0x68] sm:$0xff]  ;;  %v3002_v40 = vld [vmem:[#allocation2 + $0x70] sm:$0xff] }
 0x1a9   : > { %10386 = vrot.lane.b32.xlu0 %v10385_v42, %s12285_s25 }
 0x1aa   : > { %v13117_v39 = vld [vmem:[#allocation2 + $0xa7] sm:$0xff]  ;;  %10396 = vrot.lane.b32.xlu1 %v10385_v42, %s12284_s0  ;;  %v823_v60 = vpop.permute.xlu0 %822 }
 0x1ab   : > { %18385 = vst [vmem:[#allocation47_spill] sm:$0xff] %v13117_v39  ;;  %v13119_v29 = vld [vmem:[#allocation2 + $0xa8] sm:$0xff]  ;;  %909 = vst.msk [vmem:[#allocation2 + $0xc8] sm:$0xff] %vm385_vm0, %v823_v60  ;;  %v2998_v60 = vld [vmem:[#allocation2 + $0x30] sm:$0xff] }
 0x1ac   : > { %18386 = vst [vmem:[#allocation48_spill] sm:$0xff] %v13119_v29  ;;  %v13123_v28 = vld [vmem:[#allocation2 + $0xaf] sm:$0xff]  ;;  %v825_v57 = vpop.permute.xlu1 %824 }
 0x1ad   : > { %18387 = vst [vmem:[#allocation49_spill] sm:$0xff] %v13123_v28  ;;  %v13125_v23 = vld [vmem:[#allocation2 + $0xb0] sm:$0xff]  ;;  %910 = vst.msk [vmem:[#allocation2 + $0xd0] sm:$0xff] %vm385_vm0, %v825_v57  ;;  %10391 = vrot.lane.b32.xlu0 %v10380_v15, %s12283_s13  ;;  %v10415_v57 = vpack.i.bf16 %v3060_v24, %v3059_v31  ;;  %v10405_v15 = vpack.i.bf16 %v2998_v60, %v2997_v41 }
 0x1ae   : > { %18388 = vst [vmem:[#allocation50_spill] sm:$0xff] %v13125_v23  ;;  %v13127_v7 = vld [vmem:[#allocation2 + $0xa9] sm:$0xff]  ;;  %v13133_v42 = vld [vmem:[#allocation2 + $0xb1] sm:$0xff]  ;;  %10401 = vrot.lane.b32.xlu1 %v10375_v47, %s12285_s25  ;;  %v2856_v58 = vpop.permute.xlu0 %2855 }
 0x1af   : > { %9754 = vmatprep.mubr.msk.f32.mxu0 %vm385_vm0, %v13127_v7  ;;  %2939 = vst.msk [vmem:[#allocation2 + $0xa8] sm:$0xff] %vm385_vm0, %v2852_v16  ;;  %2940 = vst.msk [vmem:[#allocation2 + $0xb0] sm:$0xff] %vm385_vm0, %v2854_v30  ;;  %v10420_v16 = vpack.i.bf16 %v3124_v0, %v3123_v48  ;;  %v10425_v0 = vpack.i.bf16 %v13099_v45, %v13093_v22 }
 0x1b0   : > { %9755 = vmatmul.mubr.msk.f32.gmra.mrb[38].mxu0 %vm385_vm0, %v13133_v42  ;;  %v2858_v8 = vpop.permute.xlu1 %2857 }
 0x1b1   : > { %10416 = vrot.lane.b32.xlu0 %v10415_v57, %s12285_s25  ;;  %v10435_v57 = vpack.i.bf16 %v13097_v56, %v13091_v54  ;;  %v3127_v54 = vld [vmem:[#allocation2 + $0x69] sm:$0xff] }
 0x1b2   : > { %v13141_v37 = vld [vmem:[#allocation2 + $0xc7] sm:$0xff]  ;;  %10406 = vrot.lane.b32.xlu1 %v10405_v15, %s12283_s13  ;;  %v827_v47 = vpop.permute.xlu0 %826 }
 0x1b3   : > { %18389 = vst [vmem:[#allocation51_spill] sm:$0xff] %v13141_v37  ;;  %v13143_v53 = vld [vmem:[#allocation2 + $0xc8] sm:$0xff]  ;;  %911 = vst.msk [vmem:[#allocation2 + $0xe8] sm:$0xff] %vm385_vm0, %v827_v47 }
 0x1b4   : > { %18390 = vst [vmem:[#allocation52_spill] sm:$0xff] %v13143_v53  ;;  %v13147_v36 = vld [vmem:[#allocation2 + $0xcf] sm:$0xff]  ;;  %v829_v24 = vpop.permute.xlu1 %828 }
 0x1b5   : > { %18391 = vst [vmem:[#allocation53_spill] sm:$0xff] %v13147_v36  ;;  %v13149_v30 = vld [vmem:[#allocation2 + $0xd0] sm:$0xff]  ;;  %912 = vst.msk [vmem:[#allocation2 + $0xf0] sm:$0xff] %vm385_vm0, %v829_v24  ;;  %10421 = vrot.lane.b32.xlu0 %v10420_v16, %s12283_s13 }
 0x1b6   : > { %18392 = vst [vmem:[#allocation54_spill] sm:$0xff] %v13149_v30  ;;  %v13151_v41 = vld [vmem:[#allocation2 + $0xc9] sm:$0xff]  ;;  %v13157_v31 = vld [vmem:[#allocation2 + $0xd1] sm:$0xff]  ;;  %10411 = vrot.lane.b32.xlu1 %v10420_v16, %s12284_s0  ;;  %v2860_v48 = vpop.permute.xlu0 %2859 }
 0x1b7   : > { %9757 = vmatprep.mubr.msk.f32.mxu0 %vm385_vm0, %v13151_v41  ;;  %2941 = vst.msk [vmem:[#allocation2 + $0xc8] sm:$0xff] %vm385_vm0, %v2856_v58  ;;  %2942 = vst.msk [vmem:[#allocation2 + $0xd0] sm:$0xff] %vm385_vm0, %v2858_v8  ;;  %v10430_v8 = vpack.i.bf16 %v13107_v46, %v13101_v38 }
 0x1b8   : > { %9758 = vmatmul.mubr.msk.f32.gmra.mrb[40].mxu0 %vm385_vm0, %v13157_v31  ;;  %v2862_v60 = vpop.permute.xlu1 %2861 }
 0x1b9   : > { %10426 = vrot.lane.b32.xlu0 %v10425_v0, %s12283_s13 }
 0x1ba   : > { %v13169_v15 = vld [vmem:[#allocation2 + $0xe7] sm:$0xff]  ;;  %10436 = vrot.lane.b32.xlu1 %v10435_v57, %s12285_s25  ;;  %v831_v47 = vpop.permute.xlu0 %830 }
 0x1bb   : > { %18393 = vst [vmem:[#allocation55_spill] sm:$0xff] %v13169_v15  ;;  %v13171_v58 = vld [vmem:[#allocation2 + $0xe8] sm:$0xff]  ;;  %913 = vst.msk [vmem:[#allocation2 + $0x108] sm:$0xff] %vm385_vm0, %v831_v47 }
 0x1bc   : > { %18394 = vst [vmem:[#allocation56_spill] sm:$0xff] %v13171_v58  ;;  %v13177_v16 = vld [vmem:[#allocation2 + $0xef] sm:$0xff]  ;;  %v833_v44 = vpop.permute.xlu1 %832  ;;  %v3061_v47 = vld [vmem:[#allocation2 + $0x47] sm:$0xff] }
 0x1bd   : > { %18395 = vst [vmem:[#allocation57_spill] sm:$0xff] %v13177_v16  ;;  %v13179_v24 = vld [vmem:[#allocation2 + $0xf0] sm:$0xff]  ;;  %914 = vst.msk [vmem:[#allocation2 + $0x110] sm:$0xff] %vm385_vm0, %v833_v44  ;;  %10431 = vrot.lane.b32.xlu0 %v10430_v8, %s12284_s0  ;;  %v10465_v46 = vpack.i.bf16 %v3062_v13, %v3061_v47 }
 0x1be   : > { %18396 = vst [vmem:[#allocation58_spill] sm:$0xff] %v13179_v24  ;;  %v13181_v33 = vld [vmem:[#allocation2 + $0xe9] sm:$0xff]  ;;  %v13187_v5 = vld [vmem:[#allocation2 + $0xf1] sm:$0xff]  ;;  %10441 = vrot.lane.b32.xlu1 %v10430_v8, %s12283_s13  ;;  %v2864_v38 = vpop.permute.xlu0 %2863 }
 0x1bf   : > { %9760 = vmatprep.mubr.msk.f32.mxu0 %vm385_vm0, %v13181_v33  ;;  %2943 = vst.msk [vmem:[#allocation2 + $0xe8] sm:$0xff] %vm385_vm0, %v2860_v48  ;;  %2944 = vst.msk [vmem:[#allocation2 + $0xf0] sm:$0xff] %vm385_vm0, %v2862_v60  ;;  %v2999_v8 = vld [vmem:[#allocation2 + $0x48] sm:$0xff] }
 0x1c0   : > { %9761 = vmatmul.mubr.msk.f32.gmra.mrb[42].mxu0 %vm385_vm0, %v13187_v5  ;;  %v2866_v44 = vpop.permute.xlu1 %2865 }
 0x1c1   : > { %10446 = vrot.lane.b32.xlu0 %v10435_v57, %s12284_s0  ;;  %v10470_v57 = vpack.i.bf16 %v3126_v18, %v3125_v17  ;;  %v10455_v17 = vpack.i.bf16 %v3000_v26, %v2999_v8  ;;  %v10480_v8 = vpack.i.bf16 %v13133_v42, %v13127_v7  ;;  %v10485_v7 = vpack.i.bf16 %v13123_v28, %v13117_v39 }
 0x1c2   : > { %v13195_v34 = vld [vmem:[#allocation2 + $0x107] sm:$0xff]  ;;  %10466 = vrot.lane.b32.xlu1 %v10465_v46, %s12285_s25  ;;  %v835_v48 = vpop.permute.xlu0 %834 }
 0x1c3   : > { %18397 = vst [vmem:[#allocation59_spill] sm:$0xff] %v13195_v34  ;;  %v13197_v3 = vld [vmem:[#allocation2 + $0x108] sm:$0xff]  ;;  %915 = vst.msk [vmem:[#allocation2 + $0x128] sm:$0xff] %vm385_vm0, %v835_v48 }
 0x1c4   : > { %18398 = vst [vmem:[#allocation60_spill] sm:$0xff] %v13197_v3  ;;  %v13201_v55 = vld [vmem:[#allocation2 + $0x10f] sm:$0xff]  ;;  %v837_v13 = vpop.permute.xlu1 %836 }
 0x1c5   : > { %18399 = vst [vmem:[#allocation61_spill] sm:$0xff] %v13201_v55  ;;  %v13203_v60 = vld [vmem:[#allocation2 + $0x110] sm:$0xff]  ;;  %916 = vst.msk [vmem:[#allocation2 + $0x130] sm:$0xff] %vm385_vm0, %v837_v13  ;;  %10451 = vrot.lane.b32.xlu0 %v10425_v0, %s12285_s25  ;;  %v10475_v0 = vpack.i.bf16 %v13125_v23, %v13119_v29  ;;  %v10505_v23 = vpack.i.bf16 %v3002_v40, %v3001_v27 }
 0x1c6   : > { %18400 = vst [vmem:[#allocation62_spill] sm:$0xff] %v13203_v60  ;;  %v13205_v47 = vld [vmem:[#allocation2 + $0x109] sm:$0xff]  ;;  %v13211_v46 = vld [vmem:[#allocation2 + $0x111] sm:$0xff]  ;;  %10471 = vrot.lane.b32.xlu1 %v10470_v57, %s12283_s13  ;;  %v2868_v48 = vpop.permute.xlu0 %2867 }
 0x1c7   : > { %9763 = vmatprep.mubr.msk.f32.mxu0 %vm385_vm0, %v13205_v47  ;;  %2945 = vst.msk [vmem:[#allocation2 + $0x108] sm:$0xff] %vm385_vm0, %v2864_v38  ;;  %2946 = vst.msk [vmem:[#allocation2 + $0x110] sm:$0xff] %vm385_vm0, %v2866_v44  ;;  %v3128_v29 = vld [vmem:[#allocation2 + $0x71] sm:$0xff] }
 0x1c8   : > { %9764 = vmatmul.mubr.msk.f32.gmra.mrb[44].mxu0 %vm385_vm0, %v13211_v46  ;;  %v2870_v18 = vpop.permute.xlu1 %2869 }
 0x1c9   : > { %10456 = vrot.lane.b32.xlu0 %v10455_v17, %s12283_s13 }
 0x1ca   : > { %v13221_v13 = vld [vmem:[#allocation2 + $0x127] sm:$0xff]  ;;  %10476 = vrot.lane.b32.xlu1 %v10475_v0, %s12283_s13  ;;  %v839_v38 = vpop.permute.xlu0 %838 }
 0x1cb   : > { %v13223_v11 = vld [vmem:[#allocation2 + $0x128] sm:$0xff]  ;;  %917 = vst.msk [vmem:[#allocation2 + $0x148] sm:$0xff] %vm385_vm0, %v839_v38 }
 0x1cc   : > { %v13227_v43 = vld [vmem:[#allocation2 + $0x12f] sm:$0xff]  ;;  %v841_v26 = vpop.permute.xlu1 %840 }
 0x1cd   : > { %v13229_v62 = vld [vmem:[#allocation2 + $0x130] sm:$0xff]  ;;  %918 = vst.msk [vmem:[#allocation2 + $0x150] sm:$0xff] %vm385_vm0, %v841_v26  ;;  %10461 = vrot.lane.b32.xlu0 %v10470_v57, %s12284_s0 }
 0x1ce   : > { %18401 = vst [vmem:[#allocation63_spill] sm:$0xff] %v13229_v62  ;;  %v13231_v44 = vld [vmem:[#allocation2 + $0x129] sm:$0xff]  ;;  %v13239_v17 = vld [vmem:[#allocation2 + $0x131] sm:$0xff]  ;;  %10481 = vrot.lane.b32.xlu1 %v10480_v8, %s12284_s0  ;;  %v2872_v38 = vpop.permute.xlu0 %2871 }
 0x1cf   : > { %9766 = vmatprep.mubr.msk.f32.mxu0 %vm385_vm0, %v13231_v44  ;;  %2947 = vst.msk [vmem:[#allocation2 + $0x128] sm:$0xff] %vm385_vm0, %v2868_v48  ;;  %2948 = vst.msk [vmem:[#allocation2 + $0x130] sm:$0xff] %vm385_vm0, %v2870_v18  ;;  %v3063_v48 = vld [vmem:[#allocation2 + $0x67] sm:$0xff] }
 0x1d0   : > { %9767 = vmatmul.mubr.msk.f32.gmra.mrb[46].mxu0 %vm385_vm0, %v13239_v17  ;;  %v2874_v42 = vpop.permute.xlu1 %2873 }
 0x1d1   : > { %10486 = vrot.lane.b32.xlu0 %v10485_v7, %s12285_s25 }
 0x1d2   : > { %v13249_v57 = vld [vmem:[#allocation2 + $0x147] sm:$0xff]  ;;  %10496 = vrot.lane.b32.xlu1 %v10485_v7, %s12284_s0  ;;  %v843_v26 = vpop.permute.xlu0 %842 }
 0x1d3   : > { %v13252_v50 = vld [vmem:[#allocation2 + $0x148] sm:$0xff]  ;;  %919 = vst.msk [vmem:[#allocation2 + $0x168] sm:$0xff] %vm385_vm0, %v843_v26 }
 0x1d4   : > { %v13255_v18 = vld [vmem:[#allocation2 + $0x147] sm:$0xff]  ;;  %v13259_v32 = vld [vmem:[#allocation2 + $0x14f] sm:$0xff]  ;;  %v845_v21 = vpop.permute.xlu1 %844 }
 0x1d5   : > { %v13257_v14 = vld [vmem:[#allocation2 + $0x148] sm:$0xff]  ;;  %v13261_v25 = vld [vmem:[#allocation2 + $0x150] sm:$0xff]  ;;  %920 = vst.msk [vmem:[#allocation2 + $0x170] sm:$0xff] %vm385_vm0, %v845_v21  ;;  %10491 = vrot.lane.b32.xlu0 %v10480_v8, %s12283_s13  ;;  %v10515_v8 = vpack.i.bf16 %v3064_v35, %v3063_v48  ;;  %v10520_v21 = vpack.i.bf16 %v3128_v29, %v3127_v54 }
 0x1d6   : > { %v13263_v6 = vld [vmem:[#allocation2 + $0x149] sm:$0xff]  ;;  %v13269_v7 = vld [vmem:[#allocation2 + $0x151] sm:$0xff]  ;;  %10501 = vrot.lane.b32.xlu1 %v10475_v0, %s12285_s25  ;;  %v2876_v39 = vpop.permute.xlu0 %2875 }
 0x1d7   : > { %9769 = vmatprep.mubr.msk.f32.mxu0 %vm385_vm0, %v13263_v6  ;;  %v13271_v26 = vld [vmem:[#allocation2 + $0x14f] sm:$0xff] }
 0x1d8   : > { %v13273_v28 = vld [vmem:[#allocation2 + $0x150] sm:$0xff]  ;;  %9770 = vmatmul.mubr.msk.f32.gmra.mrb[48].mxu0 %vm385_vm0, %v13269_v7  ;;  %2949 = vst.msk [vmem:[#allocation2 + $0x148] sm:$0xff] %vm385_vm0, %v2872_v38  ;;  %v2878_v56 = vpop.permute.xlu1 %2877 }
 0x1d9   : > { %2950 = vst.msk [vmem:[#allocation2 + $0x150] sm:$0xff] %vm385_vm0, %v2874_v42  ;;  %10516 = vrot.lane.b32.xlu0 %v10515_v8, %s12285_s25 }
 0x1da   : > { %v13283_v2 = vld [vmem:[#allocation2 + $0x167] sm:$0xff]  ;;  %10506 = vrot.lane.b32.xlu1 %v10505_v23, %s12283_s13  ;;  %v847_v0 = vpop.permute.xlu0 %846 }
 0x1db   : > { %18402 = vst [vmem:[#allocation64_spill] sm:$0xff] %v13283_v2  ;;  %v13286_v45 = vld [vmem:[#allocation2 + $0x168] sm:$0xff]  ;;  %921 = vst.msk [vmem:[#allocation2 + $0x188] sm:$0xff] %vm385_vm0, %v847_v0  ;;  %v10535_v2 = vpack.i.bf16 %v13147_v36, %v13141_v37 }
 0x1dc   : > { %18403 = vst [vmem:[#allocation65_spill] sm:$0xff] %v13286_v45  ;;  %v985_v38 = vld [vmem:[#allocation2 + $0x168] sm:$0xff]  ;;  %v13293_v27 = vld [vmem:[#allocation2 + $0x170] sm:$0xff]  ;;  %v849_v40 = vpop.permute.xlu1 %848 }
 0x1dd   : > { %v13289_v49 = vld [vmem:[#allocation2 + $0x167] sm:$0xff]  ;;  %v13291_v35 = vld [vmem:[#allocation2 + $0x16f] sm:$0xff]  ;;  %18405 = vst [vmem:[#allocation67_spill] sm:$0xff] %v13293_v27  ;;  %922 = vst.msk [vmem:[#allocation2 + $0x190] sm:$0xff] %vm385_vm0, %v849_v40  ;;  %10521 = vrot.lane.b32.xlu0 %v10520_v21, %s12283_s13 }
 0x1de   : > { %18404 = vst [vmem:[#allocation66_spill] sm:$0xff] %v13291_v35  ;;  %v13295_v42 = vld [vmem:[#allocation2 + $0x169] sm:$0xff]  ;;  %v13301_v23 = vld [vmem:[#allocation2 + $0x171] sm:$0xff]  ;;  %10511 = vrot.lane.b32.xlu1 %v10520_v21, %s12284_s0  ;;  %v2880_v29 = vpop.permute.xlu0 %2879  ;;  %v10525_v35 = vpack.i.bf16 %v13149_v30, %v13143_v53 }
 0x1df   : > { %9772 = vmatprep.mubr.msk.f32.mxu0 %vm385_vm0, %v13295_v42  ;;  %v986_v54 = vld [vmem:[#allocation2 + $0x170] sm:$0xff]  ;;  %v3065_v45 = vld [vmem:[#allocation2 + $0x87] sm:$0xff] }
 0x1e0   : > { %9773 = vmatmul.mubr.msk.f32.gmra.mrb[50].mxu0 %vm385_vm0, %v13301_v23  ;;  %v13306_v48 = vpack.i.bf16 %v986_v54, %v985_v38  ;;  %v13308_v8 = vld [vmem:[#allocation2 + $0x16f] sm:$0xff]  ;;  %v2882_v21 = vpop.permute.xlu1 %2881 }
 0x1e1   : > { %v13310_v0 = vld [vmem:[#allocation2 + $0x169] sm:$0xff]  ;;  %v13312_v40 = vld [vmem:[#allocation2 + $0x171] sm:$0xff]  ;;  %10526 = vrot.lane.b32.xlu0 %v10525_v35, %s12283_s13 }
 0x1e2   : > { %18406 = vst [vmem:[#allocation68_spill] sm:$0xff] %v13310_v0  ;;  %18407 = vst [vmem:[#allocation69_spill] sm:$0xff] %v13312_v40  ;;  %v13321_v38 = vld [vmem:[#allocation2 + $0x187] sm:$0xff]  ;;  %10536 = vrot.lane.b32.xlu1 %v10535_v2, %s12285_s25  ;;  %v851_v54 = vpop.permute.xlu0 %850 }
 0x1e3   : > { %2951 = vst.msk [vmem:[#allocation2 + $0x168] sm:$0xff] %vm385_vm0, %v2876_v39  ;;  %2952 = vst.msk [vmem:[#allocation2 + $0x170] sm:$0xff] %vm385_vm0, %v2878_v56  ;;  %v13324_v27 = vld [vmem:[#allocation2 + $0x188] sm:$0xff]  ;;  %v10530_v39 = vpack.i.bf16 %v13157_v31, %v13151_v41 }
 0x1e4   : > { %18408 = vst [vmem:[#allocation70_spill] sm:$0xff] %v13321_v38  ;;  %18409 = vst [vmem:[#allocation71_spill] sm:$0xff] %v13324_v27  ;;  %v3066_v56 = vld [vmem:[#allocation2 + $0x8f] sm:$0xff]  ;;  %v13329_v53 = vld [vmem:[#allocation2 + $0x187] sm:$0xff]  ;;  %v853_v38 = vpop.permute.xlu1 %852 }
 0x1e5   : > { %923 = vst.msk [vmem:[#allocation2 + $0x1a8] sm:$0xff] %vm385_vm0, %v851_v54  ;;  %v987_v30 = vld [vmem:[#allocation2 + $0x188] sm:$0xff]  ;;  %18410 = vst [vmem:[#allocation72_spill] sm:$0xff] %v13329_v53  ;;  %v13333_v37 = vld [vmem:[#allocation2 + $0x190] sm:$0xff]  ;;  %10531 = vrot.lane.b32.xlu0 %v10530_v39, %s12284_s0  ;;  %v10565_v0 = vpack.i.bf16 %v3066_v56, %v3065_v45 }
 0x1e6   : > { %v13331_v36 = vld [vmem:[#allocation2 + $0x18f] sm:$0xff]  ;;  %18412 = vst [vmem:[#allocation74_spill] sm:$0xff] %v13333_v37  ;;  %924 = vst.msk [vmem:[#allocation2 + $0x1b0] sm:$0xff] %vm385_vm0, %v853_v38  ;;  %10541 = vrot.lane.b32.xlu1 %v10530_v39, %s12283_s13  ;;  %v2884_v31 = vpop.permute.xlu0 %2883 }
 0x1e7   : > { %18411 = vst [vmem:[#allocation73_spill] sm:$0xff] %v13331_v36  ;;  %v1208_v40 = vld [vmem:[#allocation2 + $0x189] sm:$0xff]  ;;  %v1209_v54 = vld [vmem:[#allocation2 + $0x191] sm:$0xff] }
 0x1e8   : > { %9775 = vmatprep.mubr.msk.f32.mxu0 %vm385_vm0, %v1208_v40  ;;  %v988_v27 = vld [vmem:[#allocation2 + $0x190] sm:$0xff]  ;;  %v2886_v38 = vpop.permute.xlu1 %2885 }
 0x1e9   : > { %v13338_v41 = vld [vmem:[#allocation2 + $0x18f] sm:$0xff]  ;;  %9776 = vmatmul.mubr.msk.f32.gmra.mrb[52].mxu0 %vm385_vm0, %v1209_v54  ;;  %v13342_v36 = vpack.i.bf16 %v988_v27, %v987_v30  ;;  %10546 = vrot.lane.b32.xlu0 %v10535_v2, %s12284_s0 }
 0x1ea   : > { %18413 = vst [vmem:[#allocation75_spill] sm:$0xff] %v13338_v41  ;;  %v13344_v37 = vld [vmem:[#allocation2 + $0x189] sm:$0xff]  ;;  %v13346_v53 = vld [vmem:[#allocation2 + $0x191] sm:$0xff]  ;;  %10566 = vrot.lane.b32.xlu1 %v10565_v0, %s12285_s25  ;;  %v855_v30 = vpop.permute.xlu0 %854 }
 0x1eb   : > { %18414 = vst [vmem:[#allocation76_spill] sm:$0xff] %v13342_v36  ;;  %18415 = vst [vmem:[#allocation77_spill] sm:$0xff] %v13344_v37  ;;  %v3129_v40 = vld [vmem:[#allocation2 + $0x89] sm:$0xff]  ;;  %v3130_v41 = vld [vmem:[#allocation2 + $0x91] sm:$0xff] }
 0x1ec   : > { %18416 = vst [vmem:[#allocation78_spill] sm:$0xff] %v13346_v53  ;;  %2953 = vst.msk [vmem:[#allocation2 + $0x188] sm:$0xff] %vm385_vm0, %v2880_v29  ;;  %v13351_v39 = vld [vmem:[#allocation2 + $0x1a7] sm:$0xff]  ;;  %v3004_v54 = vld [vmem:[#allocation2 + $0x90] sm:$0xff]  ;;  %v857_v2 = vpop.permute.xlu1 %856  ;;  %v10570_v36 = vpack.i.bf16 %v3130_v41, %v3129_v40 }
 0x1ed   : > { %2954 = vst.msk [vmem:[#allocation2 + $0x190] sm:$0xff] %vm385_vm0, %v2882_v21  ;;  %18417 = vst [vmem:[#allocation79_spill] sm:$0xff] %v13351_v39  ;;  %v3003_v27 = vld [vmem:[#allocation2 + $0x88] sm:$0xff]  ;;  %v13361_v21 = vld [vmem:[#allocation2 + $0x1b0] sm:$0xff]  ;;  %10551 = vrot.lane.b32.xlu0 %v10525_v35, %s12285_s25 }
 0x1ee   : > { %v13354_v37 = vld [vmem:[#allocation2 + $0x1a8] sm:$0xff]  ;;  %925 = vst.msk [vmem:[#allocation2 + $0x1c8] sm:$0xff] %vm385_vm0, %v855_v30  ;;  %18421 = vst [vmem:[#allocation83_spill] sm:$0xff] %v13361_v21  ;;  %v1211_v0 = vld [vmem:[#allocation2 + $0x1b1] sm:$0xff]  ;;  %10571 = vrot.lane.b32.xlu1 %v10570_v36, %s12283_s13  ;;  %v2888_v30 = vpop.permute.xlu0 %2887  ;;  %v10555_v40 = vpack.i.bf16 %v3004_v54, %v3003_v27 }
 0x1ef   : > { %18418 = vst [vmem:[#allocation80_spill] sm:$0xff] %v13354_v37  ;;  %v989_v29 = vld [vmem:[#allocation2 + $0x1a8] sm:$0xff]  ;;  %926 = vst.msk [vmem:[#allocation2 + $0x1d0] sm:$0xff] %vm385_vm0, %v857_v2  ;;  %v990_v39 = vld [vmem:[#allocation2 + $0x1b0] sm:$0xff]  ;;  %v10575_v2 = vpack.i.bf16 %v13179_v24, %v13171_v58 }
 0x1f0   : > { %v13357_v53 = vld [vmem:[#allocation2 + $0x1a7] sm:$0xff]  ;;  %v13359_v45 = vld [vmem:[#allocation2 + $0x1af] sm:$0xff]  ;;  %v2890_v35 = vpop.permute.xlu1 %2889 }
 0x1f1   : > { %18419 = vst [vmem:[#allocation81_spill] sm:$0xff] %v13357_v53  ;;  %18420 = vst [vmem:[#allocation82_spill] sm:$0xff] %v13359_v45  ;;  %v1210_v56 = vld [vmem:[#allocation2 + $0x1a9] sm:$0xff]  ;;  %v13370_v45 = vpack.i.bf16 %v990_v39, %v989_v29  ;;  %v13372_v21 = vld [vmem:[#allocation2 + $0x1b1] sm:$0xff]  ;;  %10556 = vrot.lane.b32.xlu0 %v10555_v40, %s12283_s13  ;;  %v10580_v40 = vpack.i.bf16 %v13187_v5, %v13181_v33  ;;  %v10585_v33 = vpack.i.bf16 %v13177_v16, %v13169_v15 }
 0x1f2   : > { %9778 = vmatprep.mubr.msk.f32.mxu0 %vm385_vm0, %v1210_v56  ;;  %v13366_v37 = vld [vmem:[#allocation2 + $0x1a9] sm:$0xff]  ;;  %18423 = vst [vmem:[#allocation85_spill] sm:$0xff] %v13372_v21  ;;  %10576 = vrot.lane.b32.xlu1 %v10575_v2, %s12283_s13  ;;  %v859_v56 = vpop.permute.xlu0 %858 }
 0x1f3   : > { %18422 = vst [vmem:[#allocation84_spill] sm:$0xff] %v13366_v37  ;;  %9779 = vmatmul.mubr.msk.f32.gmra.mrb[54].mxu0 %vm385_vm0, %v1211_v0  ;;  %v13374_v41 = vld [vmem:[#allocation2 + $0x1af] sm:$0xff]  ;;  %927 = vst.msk [vmem:[#allocation2 + $0x1e8] sm:$0xff] %vm385_vm0, %v859_v56 }
 0x1f4   : > { %18424 = vst [vmem:[#allocation86_spill] sm:$0xff] %v13374_v41  ;;  %2955 = vst.msk [vmem:[#allocation2 + $0x1a8] sm:$0xff] %vm385_vm0, %v2884_v31  ;;  %v861_v0 = vpop.permute.xlu1 %860  ;;  %v3005_v16 = vld [vmem:[#allocation2 + $0xa8] sm:$0xff]  ;;  %v3006_v15 = vld [vmem:[#allocation2 + $0xb0] sm:$0xff] }
 0x1f5   : > { %2956 = vst.msk [vmem:[#allocation2 + $0x1b0] sm:$0xff] %vm385_vm0, %v2886_v38  ;;  %v13382_v39 = vld [vmem:[#allocation2 + $0x1c7] sm:$0xff]  ;;  %928 = vst.msk [vmem:[#allocation2 + $0x1f0] sm:$0xff] %vm385_vm0, %v861_v0  ;;  %10561 = vrot.lane.b32.xlu0 %v10570_v36, %s12284_s0  ;;  %v932_v37 = vld [vmem:[#allocation2 + $0xf] sm:$0xff] }
 0x1f6   : > { %18425 = vst [vmem:[#allocation87_spill] sm:$0xff] %v13382_v39  ;;  %v13384_v29 = vld [vmem:[#allocation2 + $0x1c8] sm:$0xff]  ;;  %v13391_v38 = vld [vmem:[#allocation2 + $0x1d0] sm:$0xff]  ;;  %10581 = vrot.lane.b32.xlu1 %v10580_v40, %s12284_s0 }
 0x1f7   : > { %18426 = vst [vmem:[#allocation88_spill] sm:$0xff] %v13384_v29  ;;  %v991_v27 = vld [vmem:[#allocation2 + $0x1c8] sm:$0xff]  ;;  %18429 = vst [vmem:[#allocation91_spill] sm:$0xff] %v13391_v38  ;;  %v1213_v39 = vld [vmem:[#allocation2 + $0x1d1] sm:$0xff] }
 0x1f8   : > { %v13387_v54 = vld [vmem:[#allocation2 + $0x1c7] sm:$0xff]  ;;  %v13389_v31 = vld [vmem:[#allocation2 + $0x1cf] sm:$0xff]  ;;  %v2894_v36 = vpop.permute.xlu1 %2893 }
 0x1f9   : > { %18427 = vst [vmem:[#allocation89_spill] sm:$0xff] %v13387_v54  ;;  %18428 = vst [vmem:[#allocation90_spill] sm:$0xff] %v13389_v31  ;;  %v1212_v24 = vld [vmem:[#allocation2 + $0x1c9] sm:$0xff]  ;;  %v2892_v31 = vpop.permute.xlu0 %2891  ;;  %v13408_v0 = vld [vmem:[#allocation2 + $0x1d1] sm:$0xff]  ;;  %10586 = vrot.lane.b32.xlu0 %v10585_v33, %s12285_s25 }
 0x1fa   : > { %9781 = vmatprep.mubr.msk.f32.mxu0 %vm385_vm0, %v1212_v24  ;;  %v992_v56 = vld [vmem:[#allocation2 + $0x1d0] sm:$0xff]  ;;  %18433 = vst [vmem:[#allocation95_spill] sm:$0xff] %v13408_v0  ;;  %v13413_v24 = vld [vmem:[#allocation2 + $0x1e7] sm:$0xff]  ;;  %10596 = vrot.lane.b32.xlu1 %v10585_v33, %s12284_s0 }
 0x1fb   : > { %v13398_v29 = vld [vmem:[#allocation2 + $0x1cf] sm:$0xff]  ;;  %9782 = vmatmul.mubr.msk.f32.gmra.mrb[56].mxu0 %vm385_vm0, %v1213_v39  ;;  %v13402_v38 = vpack.i.bf16 %v992_v56, %v991_v27  ;;  %18434 = vst [vmem:[#allocation96_spill] sm:$0xff] %v13413_v24  ;;  %v3067_v27 = vld [vmem:[#allocation2 + $0xa7] sm:$0xff] }
 0x1fc   : > { %18430 = vst [vmem:[#allocation92_spill] sm:$0xff] %v13398_v29  ;;  %v13406_v5 = vld [vmem:[#allocation2 + $0x1c9] sm:$0xff]  ;;  %v1215_v33 = vld [vmem:[#allocation2 + $0x1f1] sm:$0xff] }
 0x1fd   : > { %18431 = vst [vmem:[#allocation93_spill] sm:$0xff] %v13402_v38  ;;  %18432 = vst [vmem:[#allocation94_spill] sm:$0xff] %v13406_v5  ;;  %v863_v39 = vpop.permute.xlu0 %862  ;;  %v3068_v56 = vld [vmem:[#allocation2 + $0xaf] sm:$0xff]  ;;  %v13419_v5 = vld [vmem:[#allocation2 + $0x1e7] sm:$0xff]  ;;  %v865_v38 = vpop.permute.xlu1 %864  ;;  %10591 = vrot.lane.b32.xlu0 %v10580_v40, %s12283_s13 }
 0x1fe   : > { %2957 = vst.msk [vmem:[#allocation2 + $0x1c8] sm:$0xff] %vm385_vm0, %v2888_v30  ;;  %2958 = vst.msk [vmem:[#allocation2 + $0x1d0] sm:$0xff] %vm385_vm0, %v2890_v35  ;;  %v13416_v58 = vld [vmem:[#allocation2 + $0x1e8] sm:$0xff]  ;;  %v13423_v35 = vld [vmem:[#allocation2 + $0x1f0] sm:$0xff]  ;;  %10601 = vrot.lane.b32.xlu1 %v10575_v2, %s12285_s25 }
 0x1ff   : > { %18435 = vst [vmem:[#allocation97_spill] sm:$0xff] %v13416_v58  ;;  %929 = vst.msk [vmem:[#allocation2 + $0x208] sm:$0xff] %vm385_vm0, %v863_v39  ;;  %v993_v0 = vld [vmem:[#allocation2 + $0x1e8] sm:$0xff]  ;;  %v994_v58 = vld [vmem:[#allocation2 + $0x1f0] sm:$0xff] }
 0x200   : > { %18436 = vst [vmem:[#allocation98_spill] sm:$0xff] %v13419_v5  ;;  %v13421_v30 = vld [vmem:[#allocation2 + $0x1ef] sm:$0xff]  ;;  %18438 = vst [vmem:[#allocation100_spill] sm:$0xff] %v13423_v35 }
 0x201   : > { %18437 = vst [vmem:[#allocation99_spill] sm:$0xff] %v13421_v30  ;;  %v1214_v24 = vld [vmem:[#allocation2 + $0x1e9] sm:$0xff]  ;;  %930 = vst.msk [vmem:[#allocation2 + $0x210] sm:$0xff] %vm385_vm0, %v865_v38  ;;  %v2896_v5 = vpop.permute.xlu0 %2895  ;;  %v13432_v30 = vpack.i.bf16 %v994_v58, %v993_v0  ;;  %v13434_v35 = vld [vmem:[#allocation2 + $0x1f1] sm:$0xff]  ;;  %v10615_v38 = vpack.i.bf16 %v3068_v56, %v3067_v27  ;;  %v2898_v40 = vpop.permute.xlu1 %2897 }
 0x202   : > { %9784 = vmatprep.mubr.msk.f32.mxu0 %vm385_vm0, %v1214_v24  ;;  %v13428_v39 = vld [vmem:[#allocation2 + $0x1e9] sm:$0xff]  ;;  %18441 = vst [vmem:[#allocation103_spill] sm:$0xff] %v13434_v35  ;;  %v10605_v24 = vpack.i.bf16 %v3006_v15, %v3005_v16  ;;  %v10299_v35 = vunpack.i.h.bf16 %v12875_v59 }
 0x203   : > { %18439 = vst [vmem:[#allocation101_spill] sm:$0xff] %v13428_v39  ;;  %9785 = vmatmul.mubr.msk.f32.gmra.mrb[58].mxu0 %vm385_vm0, %v1215_v33  ;;  %18440 = vst [vmem:[#allocation102_spill] sm:$0xff] %v13432_v30  ;;  %v13436_v29 = vld [vmem:[#allocation2 + $0x1ef] sm:$0xff]  ;;  %10616 = vrot.lane.b32.xlu0 %v10615_v38, %s12285_s25 }
 0x204   : > { %18442 = vst [vmem:[#allocation104_spill] sm:$0xff] %v13436_v29  ;;  %2959 = vst.msk [vmem:[#allocation2 + $0x1e8] sm:$0xff] %vm385_vm0, %v2892_v31  ;;  %v3131_v54 = vld [vmem:[#allocation2 + $0xa9] sm:$0xff]  ;;  %v3132_v39 = vld [vmem:[#allocation2 + $0xb1] sm:$0xff]  ;;  %10606 = vrot.lane.b32.xlu1 %v10605_v24, %s12283_s13 }
 0x205   : > { %2960 = vst.msk [vmem:[#allocation2 + $0x1f0] sm:$0xff] %vm385_vm0, %v2894_v36  ;;  %v13444_v58 = vpop.permute.xlu0 %10336  ;;  %v10620_v0 = vpack.i.bf16 %v3132_v39, %v3131_v54  ;;  %v13452_v36 = vpop.permute.xlu1 %10326  ;;  %v3008_v29 = vld [vmem:[#allocation2 + $0xd0] sm:$0xff] }
 0x206   : > { %v13442_v2 = vld [vmem:[#allocation2 + $0x208] sm:$0xff] }
 0x207   : > { %18443 = vst [vmem:[#allocation105_spill] sm:$0xff] %v13442_v2  ;;  %v13446_v33 = vld [vmem:[#allocation2 + $0x207] sm:$0xff]  ;;  %10621 = vrot.lane.b32.xlu0 %v10620_v0, %s12283_s13 }
 0x208   : > { %18444 = vst [vmem:[#allocation106_spill] sm:$0xff] %v13446_v33  ;;  %v13448_v27 = vld [vmem:[#allocation2 + $0x208] sm:$0xff]  ;;  %v13450_v31 = vld [vmem:[#allocation2 + $0x210] sm:$0xff]  ;;  %10611 = vrot.lane.b32.xlu1 %v10620_v0, %s12284_s0  ;;  %v10635_v0 = vpack.i.bf16 %v13201_v55, %v13195_v34 }
 0x209   : > { %18445 = vst [vmem:[#allocation107_spill] sm:$0xff] %v13448_v27  ;;  %18446 = vst [vmem:[#allocation108_spill] sm:$0xff] %v13450_v31  ;;  %v1216_v15 = vld [vmem:[#allocation2 + $0x209] sm:$0xff]  ;;  %v1217_v16 = vld [vmem:[#allocation2 + $0x211] sm:$0xff]  ;;  %v10342_v39 = vpop.permute.xlu0 %10341  ;;  %v10625_v31 = vpack.i.bf16 %v13203_v60, %v13197_v3  ;;  %v13472_v2 = vpop.permute.xlu1 %10331 }
 0x20a   : > { %9787 = vmatprep.mubr.msk.f32.mxu0 %vm385_vm0, %v1216_v15  ;;  %v13456_v56 = vld [vmem:[#allocation2 + $0x20f] sm:$0xff]  ;;  %v3069_v15 = vld [vmem:[#allocation2 + $0xc7] sm:$0xff]  ;;  %v10343_v33 = vunpack.i.l.bf16 %v10342_v39 }
 0x20b   : > { %18447 = vst [vmem:[#allocation109_spill] sm:$0xff] %v13456_v56  ;;  %v13458_v38 = vld [vmem:[#allocation2 + $0x210] sm:$0xff]  ;;  %9788 = vmatmul.mubr.msk.f32.gmra.mrb[60].mxu0 %vm385_vm0, %v1217_v16  ;;  %10626 = vrot.lane.b32.xlu0 %v10625_v31, %s12283_s13  ;;  %v10298_v56 = vunpack.i.l.bf16 %v12875_v59 }
 0x20c   : > { %18448 = vst [vmem:[#allocation110_spill] sm:$0xff] %v13458_v38  ;;  %v13460_v24 = vld [vmem:[#allocation2 + $0x209] sm:$0xff]  ;;  %v13464_v54 = vld [vmem:[#allocation2 + $0x211] sm:$0xff]  ;;  %10636 = vrot.lane.b32.xlu1 %v10635_v0, %s12285_s25 }
 0x20d   : > { %18449 = vst [vmem:[#allocation111_spill] sm:$0xff] %v13460_v24  ;;  %18450 = vst [vmem:[#allocation112_spill] sm:$0xff] %v13464_v54  ;;  %v13478_v16 = vpop.permute.xlu0 %10346  ;;  %v13482_v54 = vpop.permute.xlu1 %10356  ;;  %v3133_v27 = vld [vmem:[#allocation2 + $0xc9] sm:$0xff]  ;;  %v3134_v38 = vld [vmem:[#allocation2 + $0xd1] sm:$0xff] }
 0x20e   : > { %2961 = vst.msk [vmem:[#allocation2 + $0x208] sm:$0xff] %vm385_vm0, %v2896_v5  ;;  %2962 = vst.msk [vmem:[#allocation2 + $0x210] sm:$0xff] %vm385_vm0, %v2898_v40  ;;  %v10630_v5 = vpack.i.bf16 %v13211_v46, %v13205_v47  ;;  %v3070_v40 = vld [vmem:[#allocation2 + $0xcf] sm:$0xff]  ;;  %v931_v46 = vld [vmem:[#allocation2 + $0x7] sm:$0xff]  ;;  %v10670_v3 = vpack.i.bf16 %v3134_v38, %v3133_v27 }
 0x20f   : > { %v10665_v34 = vpack.i.bf16 %v3070_v40, %v3069_v15  ;;  %v10303_v15 = vunpack.i.l.bf16 %v12900_v4  ;;  %v10338_v40 = vunpack.i.l.bf16 %v13444_v58 }
 0x210   : > { %10631 = vrot.lane.b32.xlu0 %v10630_v5, %s12284_s0  ;;  %10641 = vrot.lane.b32.xlu1 %v10630_v5, %s12283_s13  ;;  %v3007_v5 = vld [vmem:[#allocation2 + $0xc8] sm:$0xff] }
 0x211   : > { %v13486_v24 = vpop.permute.xlu0 %10351  ;;  %v13488_v55 = vpop.permute.xlu1 %10361  ;;  %v10655_v27 = vpack.i.bf16 %v3008_v29, %v3007_v5  ;;  %v10339_v5 = vunpack.i.h.bf16 %v13444_v58  ;;  %v10328_v58 = vunpack.i.l.bf16 %v13452_v36 }
 0x214   : > { %10646 = vrot.lane.b32.xlu0 %v10635_v0, %s12284_s0  ;;  %10666 = vrot.lane.b32.xlu1 %v10665_v34, %s12285_s25  ;;  %v10344_v0 = vunpack.i.h.bf16 %v10342_v39  ;;  %v1988_v34 = vsel %vm385_vm0, %v931_v46, %v10298_v56  ;;  %v2086_v39 = vsel %vm385_vm0, %v13016_v20, %v10343_v33 }
 0x215   : > { %v10367_v47 = vpop.permute.xlu0 %10366  ;;  %v13493_v60 = vpop.permute.xlu1 %10376 }
 0x216   : > { %v10368_v30 = vunpack.i.l.bf16 %v10367_v47  ;;  %v10369_v41 = vunpack.i.h.bf16 %v10367_v47  ;;  %v10304_v47 = vunpack.i.h.bf16 %v12900_v4  ;;  %v2087_v46 = vsel %vm385_vm0, %v13002_v9, %v10344_v0 }
 0x217   : > { %v1989_v4 = vsel %vm385_vm0, %v932_v37, %v10299_v35  ;;  %v10363_v9 = vunpack.i.l.bf16 %v13488_v55  ;;  %v10333_v37 = vunpack.i.l.bf16 %v13472_v2  ;;  %v10364_v35 = vunpack.i.h.bf16 %v13488_v55 }
 0x218   : > { %10651 = vrot.lane.b32.xlu0 %v10625_v31, %s12285_s25  ;;  %10671 = vrot.lane.b32.xlu1 %v10670_v3, %s12283_s13  ;;  %v10675_v31 = vpack.i.bf16 %v13229_v62, %v13223_v11  ;;  %v2118_v56 = vsel %vm2020_vm1, %v2086_v39, %v10368_v30  ;;  %v2119_v30 = vsel %vm2020_vm1, %v2087_v46, %v10369_v41  ;;  %v10329_v55 = vunpack.i.h.bf16 %v13452_v36 }
 0x219   : > { %v10372_v53 = vpop.permute.xlu0 %10371  ;;  %v13501_v59 = vpop.permute.xlu1 %10381  ;;  %v2022_v41 = vsel %vm2020_vm1, %v1989_v4, %v10304_v47  ;;  %v10359_v36 = vunpack.i.h.bf16 %v13482_v54 }
 0x21a   : > { %v10374_v38 = vunpack.i.h.bf16 %v10372_v53  ;;  %v10373_v21 = vunpack.i.l.bf16 %v10372_v53  ;;  %v2021_v53 = vsel %vm2020_vm1, %v1988_v34, %v10303_v15  ;;  %v10680_v15 = vpack.i.bf16 %v13239_v17, %v13231_v44 }
 0x21b   : > { %v2054_v20 = vsel %vm2053_vm2, %v2021_v53, %v10338_v40  ;;  %v2055_v44 = vsel %vm2053_vm2, %v2022_v41, %v10339_v5  ;;  %v10685_v17 = vpack.i.bf16 %v13227_v43, %v13221_v13  ;;  %v10334_v53 = vunpack.i.h.bf16 %v13472_v2  ;;  %v3072_v2 = vld [vmem:[#allocation2 + $0xef] sm:$0xff] }
 0x21c   : > { %10656 = vrot.lane.b32.xlu0 %v10655_v27, %s12283_s13  ;;  %10676 = vrot.lane.b32.xlu1 %v10675_v31, %s12283_s13  ;;  %v2150_v29 = vsel %vm2053_vm2, %v2118_v56, %v10373_v21  ;;  %v2151_v21 = vsel %vm2053_vm2, %v2119_v30, %v10374_v38  ;;  %v2088_v56 = vsel %vm385_vm0, %v13042_v1, %v10363_v9  ;;  %v3009_v9 = vld [vmem:[#allocation2 + $0xe8] sm:$0xff] }
 0x21d   : > { %v13516_v62 = vpop.permute.xlu0 %10386  ;;  %2385 = vmatprep.mubr.f32.mxu1 %v2150_v29  ;;  %v10397_v33 = vpop.permute.xlu1 %10396  ;;  %v1990_v29 = vsel %vm385_vm0, %v13012_v12, %v10328_v58  ;;  %v2089_v1 = vsel %vm385_vm0, %v13035_v51, %v10364_v35  ;;  %v3010_v58 = vld [vmem:[#allocation2 + $0xf0] sm:$0xff]  ;;  %v1991_v51 = vsel %vm385_vm0, %v13014_v19, %v10329_v55  ;;  %v10730_v55 = vpack.i.bf16 %v13269_v7, %v13263_v6 }
 0x21e   : > { %2386 = vmatmul.mubr.f32.vlgmr.msra.gmra.mrb[0].mxu1 %v2054_v20  ;;  %v10398_v0 = vunpack.i.l.bf16 %v10397_v33  ;;  %v10399_v40 = vunpack.i.h.bf16 %v10397_v33  ;;  %v2023_v20 = vsel %vm2020_vm1, %v1990_v29, %v10333_v37  ;;  %v3071_v33 = vld [vmem:[#allocation2 + $0xe7] sm:$0xff]  ;;  %v2024_v41 = vsel %vm2020_vm1, %v1991_v51, %v10334_v53 }
 0x21f   : > { %2390 = vmatprep.mubr.f32.mxu1 %v2151_v21  ;;  %v10705_v35 = vpack.i.bf16 %v3010_v58, %v3009_v9  ;;  %v10348_v53 = vunpack.i.l.bf16 %v13478_v16 }
 0x220   : > { %10661 = vrot.lane.b32.xlu0 %v10670_v3, %s12284_s0  ;;  %10681 = vrot.lane.b32.xlu1 %v10680_v15, %s12284_s0  ;;  %v10358_v3 = vunpack.i.l.bf16 %v13482_v54  ;;  %v2120_v47 = vsel %vm2020_vm1, %v2088_v56, %v10398_v0  ;;  %v2121_v12 = vsel %vm2020_vm1, %v2089_v1, %v10399_v40  ;;  %v10715_v0 = vpack.i.bf16 %v3072_v2, %v3071_v33  ;;  %v3074_v1 = vld [vmem:[#allocation2 + $0x10f] sm:$0xff] }
 0x221   : > { %v13531_v34 = vpop.permute.xlu0 %10391  ;;  %v10402_v27 = vpop.permute.xlu1 %10401  ;;  %v10745_v33 = vpack.i.bf16 %v13271_v26, %v13255_v18  ;;  %v10354_v18 = vunpack.i.h.bf16 %v13486_v24 }
 0x222   : > { %2391 = vmatmul.mubr.f32.gmra.mrb[2].mxu1 %v2055_v44  ;;  %v10404_v38 = vunpack.i.h.bf16 %v10402_v27  ;;  %v10403_v39 = vunpack.i.l.bf16 %v10402_v27  ;;  %v2056_v4 = vsel %vm2053_vm2, %v2023_v20, %v10358_v3  ;;  %v3135_v44 = vld [vmem:[#allocation2 + $0xe9] sm:$0xff]  ;;  %v10725_v27 = vpack.i.bf16 %v13261_v25, %v13252_v50 }
 0x223   : > { %v3073_v20 = vld [vmem:[#allocation2 + $0x107] sm:$0xff] }
 0x224   : > { %10686 = vrot.lane.b32.xlu0 %v10685_v17, %s12285_s25  ;;  %10696 = vrot.lane.b32.xlu1 %v10685_v17, %s12284_s0  ;;  %v2152_v5 = vsel %vm2053_vm2, %v2120_v47, %v10403_v39  ;;  %v2153_v21 = vsel %vm2053_vm2, %v2121_v12, %v10404_v38  ;;  %v3136_v17 = vld [vmem:[#allocation2 + $0xf1] sm:$0xff]  ;;  %v10735_v39 = vpack.i.bf16 %v13259_v32, %v13249_v57  ;;  %v10393_v47 = vunpack.i.l.bf16 %v13531_v34 }
 0x225   : > { %v13546_v46 = vpop.permute.xlu0 %10416  ;;  %v13553_v30 = vpop.permute.xlu1 %10406  ;;  %2395 = vmatprep.mubr.f32.mxu1 %v2152_v5  ;;  %v10720_v19 = vpack.i.bf16 %v3136_v17, %v3135_v44  ;;  %v10388_v12 = vunpack.i.l.bf16 %v13516_v62  ;;  %v10765_v58 = vpack.i.bf16 %v3074_v1, %v3073_v20 }
 0x226   : > { %2396 = vmatmul.mubr.f32.gmra.mrb[4].mxu1 %v2056_v4  ;;  %v10394_v4 = vunpack.i.h.bf16 %v13531_v34  ;;  %v2090_v51 = vsel %vm385_vm0, %v13072_v52, %v10393_v47 }
 0x227   : > { %2400 = vmatprep.mubr.f32.mxu1 %v2153_v21 }
 0x228   : > { %10691 = vrot.lane.b32.xlu0 %v10680_v15, %s12283_s13  ;;  %10701 = vrot.lane.b32.xlu1 %v10675_v31, %s12285_s25  ;;  %v2057_v15 = vsel %vm2053_vm2, %v2024_v41, %v10359_v36  ;;  %v10353_v36 = vunpack.i.l.bf16 %v13486_v24  ;;  %v1992_v41 = vsel %vm385_vm0, %v13038_v61, %v10348_v53  ;;  %v2091_v52 = vsel %vm385_vm0, %v13078_v10, %v10394_v4 }
 0x229   : > { %v13562_v54 = vpop.permute.xlu0 %10421  ;;  %v13565_v37 = vpop.permute.xlu1 %10411  ;;  %v18454_v10 = vpack.i.bf16 %v13273_v28, %v13257_v14  ;;  %v10378_v4 = vunpack.i.l.bf16 %v13493_v60 }
 0x22a   : > { %2401 = vmatmul.mubr.f32.gmra.mrb[6].mxu1 %v2057_v15  ;;  %v3137_v15 = vld [vmem:[#allocation2 + $0x109] sm:$0xff]  ;;  %v2025_v44 = vsel %vm2020_vm1, %v1992_v41, %v10353_v36 }
 0x22b   : > { %v2058_v61 = vsel %vm2053_vm2, %v2025_v44, %v10388_v12  ;;  %v18456_v41 = vld [vmem:[#allocation68_spill] sm:$0xff] }
 0x22c   : > { %10716 = vrot.lane.b32.xlu0 %v10715_v0, %s12285_s25  ;;  %10706 = vrot.lane.b32.xlu1 %v10705_v35, %s12283_s13  ;;  %v10349_v0 = vunpack.i.h.bf16 %v13478_v16  ;;  %v3138_v35 = vld [vmem:[#allocation2 + $0x111] sm:$0xff]  ;;  %v10389_v16 = vunpack.i.h.bf16 %v13516_v62 }
 0x22d   : > { %v13570_v31 = vpop.permute.xlu0 %10426  ;;  %v13572_v3 = vpop.permute.xlu1 %10436 }
 0x22e   : > { %v1993_v62 = vsel %vm385_vm0, %v13040_v63, %v10349_v0  ;;  %v10780_v63 = vpack.i.bf16 %v13301_v23, %v13295_v42  ;;  %v10438_v42 = vunpack.i.l.bf16 %v13572_v3 }
 0x22f   : > { %v2026_v47 = vsel %vm2020_vm1, %v1993_v62, %v10354_v18  ;;  %v10384_v18 = vunpack.i.h.bf16 %v13501_v59 }
 0x230   : > { %10721 = vrot.lane.b32.xlu0 %v10720_v19, %s12283_s13  ;;  %10711 = vrot.lane.b32.xlu1 %v10720_v19, %s12284_s0 }
 0x231   : > { %v13576_v40 = vpop.permute.xlu0 %10431  ;;  %v13580_v38 = vpop.permute.xlu1 %10441 }
 0x232   : > { %v10443_v36 = vunpack.i.l.bf16 %v13580_v38 }
 0x234   : > { %10726 = vrot.lane.b32.xlu0 %v10725_v27, %s12283_s13  ;;  %10736 = vrot.lane.b32.xlu1 %v10735_v39, %s12285_s25  ;;  %v10770_v39 = vpack.i.bf16 %v3138_v35, %v3137_v15  ;;  %v2092_v0 = vsel %vm385_vm0, %v13093_v22, %v10443_v36  ;;  %v18457_v15 = vld [vmem:[#allocation69_spill] sm:$0xff] }
 0x235   : > { %v10447_v56 = vpop.permute.xlu0 %10446  ;;  %v13589_v29 = vpop.permute.xlu1 %10466 }
 0x236   : > { %18451 = vst [vmem:[#allocation113_spill] sm:$0xff] %v13589_v29  ;;  %v10448_v5 = vunpack.i.l.bf16 %v10447_v56  ;;  %v10449_v6 = vunpack.i.h.bf16 %v10447_v56  ;;  %v3011_v56 = vld [vmem:[#allocation2 + $0x108] sm:$0xff] }
 0x238   : > { %10731 = vrot.lane.b32.xlu0 %v10730_v55, %s12284_s0  ;;  %10741 = vrot.lane.b32.xlu1 %v10730_v55, %s12283_s13  ;;  %v2122_v34 = vsel %vm2020_vm1, %v2090_v51, %v10448_v5  ;;  %v2123_v19 = vsel %vm2020_vm1, %v2091_v52, %v10449_v6  ;;  %v3012_v55 = vld [vmem:[#allocation2 + $0x110] sm:$0xff]  ;;  %v2059_v5 = vsel %vm2053_vm2, %v2026_v47, %v10389_v16  ;;  %v10383_v6 = vunpack.i.l.bf16 %v13501_v59  ;;  %v18460_v52 = vld [vmem:[#allocation46_spill] sm:$0xff] }
 0x239   : > { %v10452_v7 = vpop.permute.xlu0 %10451  ;;  %v13599_v9 = vpop.permute.xlu1 %10471  ;;  %v10755_v20 = vpack.i.bf16 %v3012_v55, %v3011_v56  ;;  %v10439_v16 = vunpack.i.h.bf16 %v13572_v3  ;;  %v3076_v59 = vld [vmem:[#allocation2 + $0x12f] sm:$0xff] }
 0x23a   : > { %v10454_v2 = vunpack.i.h.bf16 %v10452_v7  ;;  %v10453_v21 = vunpack.i.l.bf16 %v10452_v7  ;;  %18452 = vst [vmem:[#allocation114_spill] sm:$0xff] %v13599_v9  ;;  %v10444_v7 = vunpack.i.h.bf16 %v13580_v38  ;;  %v3013_v55 = vld [vmem:[#allocation2 + $0x128] sm:$0xff] }
 0x23b   : > { %v18462_v3 = vld [vmem:[#allocation43_spill] sm:$0xff] }
 0x23c   : > { %10746 = vrot.lane.b32.xlu0 %v10745_v33, %s12284_s0  ;;  %10766 = vrot.lane.b32.xlu1 %v10765_v58, %s12285_s25  ;;  %v2154_v26 = vsel %vm2053_vm2, %v2122_v34, %v10453_v21  ;;  %v2155_v24 = vsel %vm2053_vm2, %v2123_v19, %v10454_v2  ;;  %v10785_v2 = vpack.i.bf16 %v13308_v8, %v13289_v49  ;;  %v10379_v34 = vunpack.i.h.bf16 %v13493_v60  ;;  %v18458_v8 = vld [vmem:[#allocation42_spill] sm:$0xff]  ;;  %v3088_v9 = vld [vmem:[#allocation2 + $0x1ef] sm:$0xff] }
 0x23d   : > { %v13615_v17 = vpop.permute.xlu0 %10456  ;;  %2405 = vmatprep.mubr.f32.mxu1 %v2154_v26  ;;  %v13619_v27 = vpop.permute.xlu1 %10476  ;;  %v10790_v49 = vpack.i.bf16 %v18457_v15, %v18456_v41  ;;  %v1994_v35 = vsel %vm385_vm0, %v18458_v8, %v10378_v4  ;;  %v2093_v60 = vsel %vm385_vm0, %v18460_v52, %v10444_v7  ;;  %v3139_v4 = vld [vmem:[#allocation2 + $0x129] sm:$0xff]  ;;  %v10428_v8 = vunpack.i.l.bf16 %v13570_v31 }
 0x23e   : > { %18453 = vst [vmem:[#allocation115_spill] sm:$0xff] %v13615_v17  ;;  %2406 = vmatmul.mubr.f32.gmra.mrb[8].mxu1 %v2058_v61  ;;  %v2027_v22 = vsel %vm2020_vm1, %v1994_v35, %v10383_v6  ;;  %v1995_v62 = vsel %vm385_vm0, %v18462_v3, %v10379_v34  ;;  %v18468_v34 = vld [vmem:[#allocation77_spill] sm:$0xff]  ;;  %v13710_v35 = vld [vmem:[#allocation2 + $0x14f] sm:$0xff]  ;;  %v10429_v3 = vunpack.i.h.bf16 %v13570_v31 }
 0x23f   : > { %2410 = vmatprep.mubr.f32.mxu1 %v2155_v24  ;;  %v2060_v19 = vsel %vm2053_vm2, %v2027_v22, %v10438_v42  ;;  %v10433_v22 = vunpack.i.l.bf16 %v13576_v40 }
 0x240   : > { %10751 = vrot.lane.b32.xlu0 %v18454_v10, %s12285_s25  ;;  %10771 = vrot.lane.b32.xlu1 %v10770_v39, %s12283_s13  ;;  %v3014_v10 = vld [vmem:[#allocation2 + $0x130] sm:$0xff] }
 0x241   : > { %v13630_v53 = vpop.permute.xlu0 %10461  ;;  %v13633_v1 = vpop.permute.xlu1 %10481  ;;  %v10805_v36 = vpack.i.bf16 %v3014_v10, %v3013_v55  ;;  %v18473_v55 = vld [vmem:[#allocation48_spill] sm:$0xff] }
 0x242   : > { %18455 = vst [vmem:[#allocation116_spill] sm:$0xff] %v13630_v53  ;;  %2411 = vmatmul.mubr.f32.gmra.mrb[10].mxu1 %v2059_v5 }
 0x244   : > { %10756 = vrot.lane.b32.xlu0 %v10755_v20, %s12283_s13  ;;  %10776 = vrot.lane.b32.xlu1 %v13306_v48, %s12283_s13  ;;  %v2028_v20 = vsel %vm2020_vm1, %v1995_v62, %v10384_v18  ;;  %v18474_v62 = vld [vmem:[#allocation44_spill] sm:$0xff] }
 0x245   : > { %v13638_v14 = vpop.permute.xlu0 %10486  ;;  %v10497_v28 = vpop.permute.xlu1 %10496 }
 0x246   : > { %v10498_v12 = vunpack.i.l.bf16 %v10497_v28  ;;  %v10499_v23 = vunpack.i.h.bf16 %v10497_v28 }
 0x248   : > { %10761 = vrot.lane.b32.xlu0 %v10770_v39, %s12284_s0  ;;  %10781 = vrot.lane.b32.xlu1 %v10780_v63, %s12284_s0  ;;  %v2124_v38 = vsel %vm2020_vm1, %v2092_v0, %v10498_v12  ;;  %v2125_v24 = vsel %vm2020_vm1, %v2093_v60, %v10499_v23  ;;  %v3075_v39 = vld [vmem:[#allocation2 + $0x127] sm:$0xff]  ;;  %v2061_v63 = vsel %vm2053_vm2, %v2028_v20, %v10439_v16  ;;  %v3140_v12 = vld [vmem:[#allocation2 + $0x131] sm:$0xff]  ;;  %v10488_v60 = vunpack.i.l.bf16 %v13638_v14 }
 0x249   : > { %v13648_v33 = vpop.permute.xlu0 %10491  ;;  %v10502_v21 = vpop.permute.xlu1 %10501  ;;  %v10815_v5 = vpack.i.bf16 %v3076_v59, %v3075_v39  ;;  %v10820_v6 = vpack.i.bf16 %v3140_v12, %v3139_v4  ;;  %v18465_v23 = vld [vmem:[#allocation72_spill] sm:$0xff] }
 0x24a   : > { %v10504_v58 = vunpack.i.h.bf16 %v10502_v21  ;;  %v10503_v51 = vunpack.i.l.bf16 %v10502_v21  ;;  %v18466_v21 = vld [vmem:[#allocation75_spill] sm:$0xff]  ;;  %v10493_v15 = vunpack.i.l.bf16 %v13648_v33  ;;  %18471 = vst [vmem:[#allocation72_spill] sm:$0xff] %v13710_v35  ;;  %v10494_v52 = vunpack.i.h.bf16 %v13648_v33 }
 0x24b   : > { %v3141_v20 = vld [vmem:[#allocation2 + $0x149] sm:$0xff] }
 0x24c   : > { %10786 = vrot.lane.b32.xlu0 %v10785_v2, %s12285_s25  ;;  %10796 = vrot.lane.b32.xlu1 %v10785_v2, %s12284_s0  ;;  %v2156_v44 = vsel %vm2053_vm2, %v2124_v38, %v10503_v51  ;;  %v2157_v56 = vsel %vm2053_vm2, %v2125_v24, %v10504_v58  ;;  %v10835_v58 = vpack.i.bf16 %v18466_v21, %v18465_v23  ;;  %v18467_v51 = vld [vmem:[#allocation76_spill] sm:$0xff]  ;;  %v18469_v38 = vld [vmem:[#allocation78_spill] sm:$0xff]  ;;  %v10489_v23 = vunpack.i.h.bf16 %v13638_v14  ;;  %v18477_v14 = vld [vmem:[#allocation45_spill] sm:$0xff] }
 0x24d   : > { %v13664_v26 = vpop.permute.xlu0 %10516  ;;  %v13671_v61 = vpop.permute.xlu1 %10506  ;;  %2415 = vmatprep.mubr.f32.mxu1 %v2156_v44  ;;  %v10830_v41 = vpack.i.bf16 %v18469_v38, %v18468_v34  ;;  %v3077_v44 = vld [vmem:[#allocation2 + $0x147] sm:$0xff]  ;;  %v2094_v10 = vsel %vm385_vm0, %v18473_v55, %v10493_v15  ;;  %v3016_v15 = vld [vmem:[#allocation2 + $0x150] sm:$0xff] }
 0x24e   : > { %18459 = vst [vmem:[#allocation68_spill] sm:$0xff] %v13664_v26  ;;  %18461 = vst [vmem:[#allocation69_spill] sm:$0xff] %v13671_v61  ;;  %2416 = vmatmul.mubr.f32.gmra.mrb[12].mxu1 %v2060_v19 }
 0x24f   : > { %2420 = vmatprep.mubr.f32.mxu1 %v2157_v56  ;;  %v10865_v56 = vpack.i.bf16 %v13710_v35, %v3077_v44 }
 0x250   : > { %10791 = vrot.lane.b32.xlu0 %v10790_v49, %s12283_s13  ;;  %10801 = vrot.lane.b32.xlu1 %v13306_v48, %s12285_s25 }
 0x251   : > { %v13681_v47 = vpop.permute.xlu0 %10521  ;;  %v13684_v28 = vpop.permute.xlu1 %10511 }
 0x252   : > { %18463 = vst [vmem:[#allocation42_spill] sm:$0xff] %v13681_v47  ;;  %18464 = vst [vmem:[#allocation46_spill] sm:$0xff] %v13684_v28  ;;  %2421 = vmatmul.mubr.f32.gmra.mrb[14].mxu1 %v2061_v63  ;;  %v3142_v63 = vld [vmem:[#allocation2 + $0x151] sm:$0xff]  ;;  %v18518_v47 = vld [vmem:[#allocation62_spill] sm:$0xff] }
 0x253   : > { %v10870_v38 = vpack.i.bf16 %v3142_v63, %v3141_v20  ;;  %v18481_v63 = vld [vmem:[#allocation81_spill] sm:$0xff] }
 0x254   : > { %10816 = vrot.lane.b32.xlu0 %v10815_v5, %s12285_s25  ;;  %10806 = vrot.lane.b32.xlu1 %v10805_v36, %s12283_s13  ;;  %v1996_v5 = vsel %vm385_vm0, %v18474_v62, %v10428_v8  ;;  %v10434_v36 = vunpack.i.h.bf16 %v13576_v40  ;;  %v1997_v8 = vsel %vm385_vm0, %v18477_v14, %v10429_v3  ;;  %v10478_v3 = vunpack.i.l.bf16 %v13619_v27  ;;  %v18484_v14 = vld [vmem:[#allocation47_spill] sm:$0xff] }
 0x255   : > { %v13689_v48 = vpop.permute.xlu0 %10526  ;;  %v13691_v7 = vpop.permute.xlu1 %10536  ;;  %v2029_v12 = vsel %vm2020_vm1, %v1996_v5, %v10433_v22  ;;  %v10483_v62 = vunpack.i.l.bf16 %v13633_v1 }
 0x258   : > { %10821 = vrot.lane.b32.xlu0 %v10820_v6, %s12283_s13  ;;  %10811 = vrot.lane.b32.xlu1 %v10820_v6, %s12284_s0  ;;  %v18475_v6 = vld [vmem:[#allocation50_spill] sm:$0xff] }
 0x259   : > { %v13695_v2 = vpop.permute.xlu0 %10531  ;;  %v13697_v42 = vpop.permute.xlu1 %10541  ;;  %v2095_v31 = vsel %vm385_vm0, %v18475_v6, %v10494_v52 }
 0x25a   : > { %v10544_v5 = vunpack.i.h.bf16 %v13697_v42 }
 0x25c   : > { %10826 = vrot.lane.b32.xlu0 %v18467_v51, %s12283_s13  ;;  %10836 = vrot.lane.b32.xlu1 %v10835_v58, %s12285_s25 }
 0x25d   : > { %v10547_v0 = vpop.permute.xlu0 %10546  ;;  %v13707_v49 = vpop.permute.xlu1 %10566 }
 0x25e   : > { %18470 = vst [vmem:[#allocation43_spill] sm:$0xff] %v13707_v49  ;;  %v10548_v18 = vunpack.i.l.bf16 %v10547_v0  ;;  %v10549_v16 = vunpack.i.h.bf16 %v10547_v0 }
 0x260   : > { %10831 = vrot.lane.b32.xlu0 %v10830_v41, %s12284_s0  ;;  %10841 = vrot.lane.b32.xlu1 %v10830_v41, %s12283_s13  ;;  %v2126_v33 = vsel %vm2020_vm1, %v2094_v10, %v10548_v18  ;;  %v2127_v0 = vsel %vm2020_vm1, %v2095_v31, %v10549_v16  ;;  %v3015_v41 = vld [vmem:[#allocation2 + $0x148] sm:$0xff]  ;;  %v2030_v18 = vsel %vm2020_vm1, %v1997_v8, %v10434_v36  ;;  %v10543_v10 = vunpack.i.l.bf16 %v13697_v42  ;;  %v18482_v36 = vld [vmem:[#allocation86_spill] sm:$0xff] }
 0x261   : > { %v10552_v19 = vpop.permute.xlu0 %10551  ;;  %v13717_v59 = vpop.permute.xlu1 %10571  ;;  %v2063_v22 = vsel %vm2053_vm2, %v2030_v18, %v10489_v23  ;;  %v10855_v52 = vpack.i.bf16 %v3016_v15, %v3015_v41  ;;  %v10479_v42 = vunpack.i.h.bf16 %v13619_v27  ;;  %v1998_v8 = vsel %vm385_vm0, %v18484_v14, %v10478_v3 }
 0x262   : > { %v10554_v24 = vunpack.i.h.bf16 %v10552_v19  ;;  %v10553_v39 = vunpack.i.l.bf16 %v10552_v19  ;;  %18472 = vst [vmem:[#allocation75_spill] sm:$0xff] %v13717_v59  ;;  %v10484_v18 = vunpack.i.h.bf16 %v13633_v1 }
 0x264   : > { %10846 = vrot.lane.b32.xlu0 %v10835_v58, %s12284_s0  ;;  %10866 = vrot.lane.b32.xlu1 %v10865_v56, %s12285_s25  ;;  %v2158_v4 = vsel %vm2053_vm2, %v2126_v33, %v10553_v39  ;;  %v2062_v58 = vsel %vm2053_vm2, %v2029_v12, %v10488_v60  ;;  %v2159_v40 = vsel %vm2053_vm2, %v2127_v0, %v10554_v24  ;;  %v18479_v39 = vld [vmem:[#allocation84_spill] sm:$0xff]  ;;  %v18480_v56 = vld [vmem:[#allocation85_spill] sm:$0xff]  ;;  %v10538_v12 = vunpack.i.l.bf16 %v13691_v7 }
 0x265   : > { %v13734_v21 = vpop.permute.xlu0 %10556  ;;  %2425 = vmatprep.mubr.f32.mxu1 %v2158_v4  ;;  %v13738_v34 = vpop.permute.xlu1 %10576  ;;  %v10880_v55 = vpack.i.bf16 %v18480_v56, %v18479_v39  ;;  %v10885_v4 = vpack.i.bf16 %v18482_v36, %v18481_v63  ;;  %v18486_v39 = vld [vmem:[#allocation54_spill] sm:$0xff]  ;;  %v3017_v36 = vld [vmem:[#allocation2 + $0x168] sm:$0xff] }
 0x266   : > { %18476 = vst [vmem:[#allocation76_spill] sm:$0xff] %v13734_v21  ;;  %2426 = vmatmul.mubr.f32.gmra.mrb[16].mxu1 %v2062_v58  ;;  %v2097_v27 = vsel %vm385_vm0, %v18486_v39, %v10544_v5  ;;  %v13793_v56 = vld [vmem:[#allocation2 + $0x167] sm:$0xff]  ;;  %v3018_v5 = vld [vmem:[#allocation2 + $0x170] sm:$0xff] }
 0x267   : > { %2430 = vmatprep.mubr.f32.mxu1 %v2159_v40  ;;  %v18483_v40 = vld [vmem:[#allocation52_spill] sm:$0xff]  ;;  %18487 = vst [vmem:[#allocation48_spill] sm:$0xff] %v13793_v56 }
 0x268   : > { %10851 = vrot.lane.b32.xlu0 %v18467_v51, %s12285_s25  ;;  %10871 = vrot.lane.b32.xlu1 %v10870_v38, %s12283_s13  ;;  %v18494_v39 = vld [vmem:[#allocation92_spill] sm:$0xff] }
 0x269   : > { %v13747_v44 = vpop.permute.xlu0 %10561  ;;  %v13750_v60 = vpop.permute.xlu1 %10581 }
 0x26a   : > { %18478 = vst [vmem:[#allocation77_spill] sm:$0xff] %v13747_v44  ;;  %2431 = vmatmul.mubr.f32.gmra.mrb[18].mxu1 %v2063_v22 }
 0x26b   : > { %v13753_v16 = vpop.f32.mrb[32].mxu0 }
 0x26c   : > { %10856 = vrot.lane.b32.xlu0 %v10855_v52, %s12283_s13  ;;  %10876 = vrot.lane.b32.xlu1 %v13370_v45, %s12283_s13  ;;  %v13757_v51 = vpop.f32.mrb[33].mxu0 }
 0x26d   : > { %v13759_v19 = vpop.permute.xlu0 %10586  ;;  %v10597_v24 = vpop.permute.xlu1 %10596 }
 0x26e   : > { %v10598_v33 = vunpack.i.l.bf16 %v10597_v24  ;;  %v10599_v6 = vunpack.i.h.bf16 %v10597_v24  ;;  %v2031_v24 = vsel %vm2020_vm1, %v1998_v8, %v10483_v62 }
 0x26f   : > { %v2064_v1 = vsel %vm2053_vm2, %v2031_v24, %v10538_v12  ;;  %v18493_v24 = vld [vmem:[#allocation89_spill] sm:$0xff] }
 0x270   : > { %10861 = vrot.lane.b32.xlu0 %v10870_v38, %s12284_s0  ;;  %10881 = vrot.lane.b32.xlu1 %v10880_v55, %s12284_s0  ;;  %v2096_v38 = vsel %vm385_vm0, %v18483_v40, %v10543_v10  ;;  %v13795_v10 = vld [vmem:[#allocation2 + $0x16f] sm:$0xff]  ;;  %v2129_v3 = vsel %vm2020_vm1, %v2097_v27, %v10599_v6  ;;  %v10935_v27 = vpack.i.bf16 %v18494_v39, %v18493_v24  ;;  %v10588_v24 = vunpack.i.l.bf16 %v13759_v19 }
 0x271   : > { %v13769_v20 = vpop.permute.xlu0 %10591  ;;  %v10602_v31 = vpop.permute.xlu1 %10601  ;;  %v2128_v15 = vsel %vm2020_vm1, %v2096_v38, %v10598_v33  ;;  %18488 = vst [vmem:[#allocation44_spill] sm:$0xff] %v13795_v10  ;;  %v10539_v33 = vunpack.i.h.bf16 %v13691_v7  ;;  %v10915_v12 = vpack.i.bf16 %v13795_v10, %v13793_v56  ;;  %v3143_v40 = vld [vmem:[#allocation2 + $0x169] sm:$0xff]  ;;  %v3144_v38 = vld [vmem:[#allocation2 + $0x171] sm:$0xff] }
 0x272   : > { %v10604_v23 = vunpack.i.h.bf16 %v10602_v31  ;;  %v10603_v58 = vunpack.i.l.bf16 %v10602_v31  ;;  %v10920_v14 = vpack.i.bf16 %v3144_v38, %v3143_v40  ;;  %v10533_v38 = vunpack.i.l.bf16 %v13695_v2 }
 0x273   : > { %v13774_v0 = vpop.f32.mrb[34].mxu0 }
 0x274   : > { %10886 = vrot.lane.b32.xlu0 %v10885_v4, %s12285_s25  ;;  %v13780_v41 = vpop.f32.mrb[35].mxu0  ;;  %10896 = vrot.lane.b32.xlu1 %v10885_v4, %s12284_s0  ;;  %v2160_v52 = vsel %vm2053_vm2, %v2128_v15, %v10603_v58  ;;  %v2161_v62 = vsel %vm2053_vm2, %v2129_v3, %v10604_v23  ;;  %v18490_v4 = vld [vmem:[#allocation49_spill] sm:$0xff]  ;;  %v10905_v58 = vpack.i.bf16 %v3018_v5, %v3017_v36  ;;  %v18496_v36 = vld [vmem:[#allocation94_spill] sm:$0xff]  ;;  %v18497_v5 = vld [vmem:[#allocation95_spill] sm:$0xff] }
 0x275   : > { %v13787_v22 = vpop.permute.xlu0 %10616  ;;  %2435 = vmatprep.mubr.f32.mxu1 %v2160_v52  ;;  %v1999_v7 = vsel %vm385_vm0, %v18490_v4, %v10479_v42  ;;  %v10930_v4 = vpack.i.bf16 %v18497_v5, %v18496_v36 }
 0x276   : > { %18485 = vst [vmem:[#allocation78_spill] sm:$0xff] %v13787_v22  ;;  %v13798_v63 = vpop.permute.xlu1 %10606  ;;  %2436 = vmatmul.mubr.f32.gmra.mrb[20].mxu1 %v2064_v1  ;;  %v2032_v6 = vsel %vm2020_vm1, %v1999_v7, %v10484_v18  ;;  %v18495_v1 = vld [vmem:[#allocation93_spill] sm:$0xff]  ;;  %v10593_v7 = vunpack.i.l.bf16 %v13769_v20 }
 0x277   : > { %18489 = vst [vmem:[#allocation50_spill] sm:$0xff] %v13798_v63  ;;  %2440 = vmatprep.mubr.f32.mxu1 %v2161_v62  ;;  %v2065_v23 = vsel %vm2053_vm2, %v2032_v6, %v10539_v33  ;;  %v10528_v6 = vunpack.i.l.bf16 %v13689_v48  ;;  %v10529_v63 = vunpack.i.h.bf16 %v13689_v48  ;;  %v3146_v22 = vld [vmem:[#allocation2 + $0x191] sm:$0xff] }
 0x278   : > { %10891 = vrot.lane.b32.xlu0 %v10880_v55, %s12283_s13  ;;  %10901 = vrot.lane.b32.xlu1 %v13370_v45, %s12285_s25 }
 0x279   : > { %v13808_v31 = vpop.permute.xlu0 %10621 }
 0x27a   : > { %18491 = vst [vmem:[#allocation45_spill] sm:$0xff] %v13808_v31  ;;  %v13813_v55 = vpop.permute.xlu1 %10611  ;;  %2441 = vmatmul.mubr.f32.gmra.mrb[22].mxu1 %v2065_v23  ;;  %v13847_v23 = vld [vmem:[#allocation2 + $0x187] sm:$0xff] }
 0x27b   : > { %18492 = vst [vmem:[#allocation84_spill] sm:$0xff] %v13813_v55  ;;  %v13816_v15 = vpop.f32.mrb[36].mxu0  ;;  %18499 = vst [vmem:[#allocation81_spill] sm:$0xff] %v13847_v23 }
 0x27c   : > { %10916 = vrot.lane.b32.xlu0 %v10915_v12, %s12285_s25  ;;  %v13819_v45 = vpop.f32.mrb[37].mxu0  ;;  %10906 = vrot.lane.b32.xlu1 %v10905_v58, %s12283_s13  ;;  %v13849_v58 = vld [vmem:[#allocation2 + $0x18f] sm:$0xff] }
 0x27d   : > { %v13822_v42 = vpop.permute.xlu0 %10626  ;;  %18500 = vst [vmem:[#allocation86_spill] sm:$0xff] %v13849_v58  ;;  %v10965_v35 = vpack.i.bf16 %v13849_v58, %v13847_v23 }
 0x27e   : > { %v13824_v8 = vpop.permute.xlu1 %10636 }
 0x280   : > { %10921 = vrot.lane.b32.xlu0 %v10920_v14, %s12283_s13  ;;  %10911 = vrot.lane.b32.xlu1 %v10920_v14, %s12284_s0  ;;  %v10594_v14 = vunpack.i.h.bf16 %v13769_v20 }
 0x282   : > { %v13828_v18 = vpop.permute.xlu0 %10631  ;;  %v13830_v52 = vpop.permute.xlu1 %10641 }
 0x283   : > { %v13834_v33 = vpop.f32.mrb[38].mxu0 }
 0x284   : > { %10926 = vrot.lane.b32.xlu0 %v18495_v1, %s12283_s13  ;;  %v13838_v3 = vpop.f32.mrb[39].mxu0  ;;  %10936 = vrot.lane.b32.xlu1 %v10935_v27, %s12285_s25 }
 0x286   : > { %v10647_v62 = vpop.permute.xlu0 %10646  ;;  %v13844_v12 = vpop.permute.xlu1 %10666 }
 0x287   : > { %18498 = vst [vmem:[#allocation85_spill] sm:$0xff] %v13844_v12  ;;  %v10648_v40 = vunpack.i.l.bf16 %v10647_v62  ;;  %v10649_v39 = vunpack.i.h.bf16 %v10647_v62  ;;  %v18502_v12 = vld [vmem:[#allocation56_spill] sm:$0xff]  ;;  %v18503_v62 = vld [vmem:[#allocation51_spill] sm:$0xff] }
 0x288   : > { %10931 = vrot.lane.b32.xlu0 %v10930_v4, %s12284_s0  ;;  %10941 = vrot.lane.b32.xlu1 %v10930_v4, %s12283_s13  ;;  %v2098_v55 = vsel %vm385_vm0, %v18502_v12, %v10593_v7  ;;  %v2000_v4 = vsel %vm385_vm0, %v18503_v62, %v10528_v6  ;;  %v18504_v12 = vld [vmem:[#allocation58_spill] sm:$0xff] }
 0x289   : > { %v2130_v20 = vsel %vm2020_vm1, %v2098_v55, %v10648_v40  ;;  %v2033_v48 = vsel %vm2020_vm1, %v2000_v4, %v10533_v38  ;;  %v10589_v55 = vunpack.i.h.bf16 %v13759_v19  ;;  %v3020_v38 = vld [vmem:[#allocation2 + $0x190] sm:$0xff]  ;;  %v18506_v19 = vld [vmem:[#allocation53_spill] sm:$0xff] }
 0x28a   : > { %v10652_v36 = vpop.permute.xlu0 %10651  ;;  %v13856_v56 = vpop.permute.xlu1 %10671  ;;  %v2066_v6 = vsel %vm2053_vm2, %v2033_v48, %v10588_v24  ;;  %v18509_v48 = vld [vmem:[#allocation101_spill] sm:$0xff] }
 0x28b   : > { %v10654_v5 = vunpack.i.h.bf16 %v10652_v36  ;;  %v10653_v10 = vunpack.i.l.bf16 %v10652_v36  ;;  %18501 = vst [vmem:[#allocation52_spill] sm:$0xff] %v13856_v56  ;;  %v13863_v31 = vpop.f32.mrb[40].mxu0  ;;  %v3145_v36 = vld [vmem:[#allocation2 + $0x189] sm:$0xff]  ;;  %v10534_v56 = vunpack.i.h.bf16 %v13695_v2 }
 0x28c   : > { %10946 = vrot.lane.b32.xlu0 %v10935_v27, %s12284_s0  ;;  %v13870_v44 = vpop.f32.mrb[41].mxu0  ;;  %10966 = vrot.lane.b32.xlu1 %v10965_v35, %s12285_s25  ;;  %v2099_v27 = vsel %vm385_vm0, %v18504_v12, %v10594_v14  ;;  %v2001_v14 = vsel %vm385_vm0, %v18506_v19, %v10529_v63  ;;  %v18508_v63 = vld [vmem:[#allocation102_spill] sm:$0xff]  ;;  %v18510_v12 = vld [vmem:[#allocation103_spill] sm:$0xff] }
 0x28d   : > { %v2162_v7 = vsel %vm2053_vm2, %v2130_v20, %v10653_v10  ;;  %v2131_v2 = vsel %vm2020_vm1, %v2099_v27, %v10649_v39  ;;  %v10970_v10 = vpack.i.bf16 %v3146_v22, %v3145_v36  ;;  %v3019_v20 = vld [vmem:[#allocation2 + $0x188] sm:$0xff]  ;;  %v2034_v24 = vsel %vm2020_vm1, %v2001_v14, %v10534_v56  ;;  %v18511_v19 = vld [vmem:[#allocation98_spill] sm:$0xff]  ;;  %v18512_v14 = vld [vmem:[#allocation104_spill] sm:$0xff] }
 0x28e   : > { %v13878_v40 = vpop.permute.xlu0 %10656  ;;  %2445 = vmatprep.mubr.f32.mxu1 %v2162_v7  ;;  %v13882_v62 = vpop.permute.xlu1 %10676  ;;  %v2163_v35 = vsel %vm2053_vm2, %v2131_v2, %v10654_v5  ;;  %v2067_v4 = vsel %vm2053_vm2, %v2034_v24, %v10589_v55  ;;  %v13894_v7 = vpack.i.bf16 %v3020_v38, %v3019_v20  ;;  %v10980_v27 = vpack.i.bf16 %v18510_v12, %v18509_v48 }
 0x28f   : > { %18505 = vst [vmem:[#allocation47_spill] sm:$0xff] %v13878_v40  ;;  %2446 = vmatmul.mubr.f32.gmra.mrb[24].mxu1 %v2066_v6  ;;  %v10643_v55 = vunpack.i.l.bf16 %v13830_v52  ;;  %v10578_v6 = vunpack.i.l.bf16 %v13738_v34  ;;  %v10644_v20 = vunpack.i.h.bf16 %v13830_v52  ;;  %v10985_v24 = vpack.i.bf16 %v18512_v14, %v18511_v19  ;;  %v4211_v52 = vld [vmem:[%s18153_s5] sm:$0xff]  ;;  %v4212_v19 = vld [vmem:[%s18153_s5 + $0x8] sm:$0xff] }
 0x290   : > { %10951 = vrot.lane.b32.xlu0 %v18495_v1, %s12285_s25  ;;  %2450 = vmatprep.mubr.f32.mxu1 %v2163_v35  ;;  %v10583_v35 = vunpack.i.l.bf16 %v13750_v60 }
 0x291   : > { %10971 = vrot.lane.b32.xlu1 %v10970_v10, %s12283_s13 }
 0x292   : > { %v13891_v39 = vpop.permute.xlu0 %10661  ;;  %v13896_v22 = vpop.permute.xlu1 %10681 }
 0x293   : > { %18507 = vst [vmem:[#allocation54_spill] sm:$0xff] %v13891_v39  ;;  %2451 = vmatmul.mubr.f32.gmra.mrb[26].mxu1 %v2067_v4  ;;  %v13898_v5 = vpop.f32.mrb[42].mxu0  ;;  %v10638_v4 = vunpack.i.l.bf16 %v13824_v8  ;;  %v18514_v39 = vld [vmem:[#allocation60_spill] sm:$0xff] }
 0x294   : > { %10956 = vrot.lane.b32.xlu0 %v13894_v7, %s12283_s13  ;;  %v13902_v1 = vpop.f32.mrb[43].mxu0  ;;  %v2100_v40 = vsel %vm385_vm0, %v18514_v39, %v10643_v55  ;;  %v10050_v39 = vpack.c.bf16 %v4212_v19, %v4211_v52  ;;  %v10584_v55 = vunpack.i.h.bf16 %v13750_v60 }
 0x295   : > { %10976 = vrot.lane.b32.xlu1 %v18508_v63, %s12283_s13 }
 0x296   : > { %v13906_v56 = vpop.permute.xlu0 %10686  ;;  %v10697_v36 = vpop.permute.xlu1 %10696  ;;  %10051 = vmatpush1.bf16.msra.mxu0 %v10050_v39  ;;  %10233 = vmatpush1.bf16.msra.mxu1 %v10050_v39 }
 0x297   : > { %v10698_v2 = vunpack.i.l.bf16 %v10697_v36  ;;  %v10699_v48 = vunpack.i.h.bf16 %v10697_v36  ;;  %v10579_v36 = vunpack.i.h.bf16 %v13738_v34  ;;  %v2101_v34 = vsel %vm385_vm0, %v18518_v47, %v10644_v20 }
 0x298   : > { %10961 = vrot.lane.b32.xlu0 %v10970_v10, %s12284_s0 }
 0x299   : > { %10981 = vrot.lane.b32.xlu1 %v10980_v27, %s12284_s0 }
 0x29a   : > { %v13916_v38 = vpop.permute.xlu0 %10691  ;;  %v10702_v12 = vpop.permute.xlu1 %10701 }
 0x29b   : > { %v10704_v58 = vunpack.i.h.bf16 %v10702_v12  ;;  %v10703_v10 = vunpack.i.l.bf16 %v10702_v12  ;;  %v13921_v23 = vpop.f32.mrb[44].mxu0  ;;  %v2132_v12 = vsel %vm2020_vm1, %v2100_v40, %v10698_v2  ;;  %v13950_v40 = vld [vmem:[#allocation2 + $0x1b0] sm:$0xff]  ;;  %v2133_v2 = vsel %vm2020_vm1, %v2101_v34, %v10699_v48  ;;  %v18529_v34 = vld [vmem:[#allocation106_spill] sm:$0xff] }
 0x29c   : > { %18513 = vst [vmem:[#allocation49_spill] sm:$0xff] %v13921_v23  ;;  %10986 = vrot.lane.b32.xlu0 %v10985_v24, %s12285_s25  ;;  %v13933_v14 = vpop.f32.mrb[45].mxu0  ;;  %v18516_v23 = vld [vmem:[#allocation55_spill] sm:$0xff]  ;;  %18521 = vst [vmem:[#allocation95_spill] sm:$0xff] %v13950_v40  ;;  %v18525_v48 = vmov 0.0|0.0  }
 0x29d   : > { %18515 = vst [vmem:[#allocation89_spill] sm:$0xff] %v13933_v14  ;;  %10996 = vrot.lane.b32.xlu1 %v10985_v24, %s12284_s0  ;;  %v2002_v21 = vsel %vm385_vm0, %v18516_v23, %v10578_v6  ;;  %v2164_v49 = vsel %vm2053_vm2, %v2132_v12, %v10703_v10  ;;  %v13946_v14 = vld [vmem:[#allocation2 + $0x1a7] sm:$0xff]  ;;  %v13948_v24 = vld [vmem:[#allocation2 + $0x1af] sm:$0xff]  ;;  %v10639_v23 = vunpack.i.h.bf16 %v13824_v8  ;;  %v2165_v47 = vsel %vm2053_vm2, %v2133_v2, %v10704_v58 }
 0x29e   : > { %v13940_v59 = vpop.permute.xlu0 %10716  ;;  %v2035_v28 = vsel %vm2020_vm1, %v2002_v21, %v10583_v35  ;;  %18519 = vst [vmem:[#allocation93_spill] sm:$0xff] %v13946_v14  ;;  %18520 = vst [vmem:[#allocation94_spill] sm:$0xff] %v13948_v24  ;;  %v13953_v6 = vpop.permute.xlu1 %10706  ;;  %2455 = vmatprep.mubr.f32.mxu1 %v2164_v49  ;;  %v13959_v21 = vld [vmem:[#allocation2 + $0x1a8] sm:$0xff]  ;;  %v4213_v35 = vld [vmem:[%s18153_s5 + $0x10] sm:$0xff]  ;;  %v13975_v58 = vpack.i.bf16 %v13948_v24, %v13946_v14  ;;  %10052 = vmatprep.subr.bf16.mxu0 %v18525_v48 }
 0x29f   : > { %18517 = vst [vmem:[#allocation92_spill] sm:$0xff] %v13940_v59  ;;  %18522 = vst [vmem:[#allocation56_spill] sm:$0xff] %v13953_v6  ;;  %v2068_v60 = vsel %vm2053_vm2, %v2035_v28, %v10638_v4  ;;  %v4214_v49 = vld [vmem:[%s18153_s5 + $0x18] sm:$0xff]  ;;  %v11005_v52 = vpack.i.bf16 %v13950_v40, %v13959_v21  ;;  %10218 = vmatprep.subr.bf16.mxu1 %v18525_v48  ;;  %v4215_v2 = vld [vmem:[%s18153_s5 + $0x20] sm:$0xff] }
 0x2a0   : > { %10991 = vrot.lane.b32.xlu0 %v10980_v27, %s12283_s13  ;;  %2456 = vmatmul.mubr.f32.gmra.mrb[28].mxu1 %v2068_v60  ;;  %v18523_v28 = vld [vmem:[#allocation57_spill] sm:$0xff]  ;;  %v10053_v27 = vpack.c.bf16 %v4214_v49, %v4213_v35  ;;  %v1218_v24 = vld [vmem:[#allocation2 + $0x229] sm:$0xff] }
 0x2a1   : > { %11001 = vrot.lane.b32.xlu1 %v18508_v63, %s12285_s25  ;;  %2460 = vmatprep.mubr.f32.mxu1 %v2165_v47  ;;  %v2003_v8 = vsel %vm385_vm0, %v18523_v28, %v10579_v36  ;;  %v3053_v36 = vld [vmem:[#allocation2 + $0x1a9] sm:$0xff]  ;;  %v3054_v12 = vld [vmem:[#allocation2 + $0x1b1] sm:$0xff] }
 0x2a2   : > { %v13971_v20 = vpop.permute.xlu0 %10721  ;;  %v2036_v4 = vsel %vm2020_vm1, %v2003_v8, %v10584_v55  ;;  %v13979_v10 = vpop.permute.xlu1 %10711  ;;  %10054 = vmatpush1.bf16.msra.mxu0 %v10053_v27  ;;  %v4216_v47 = vld [vmem:[%s18153_s5 + $0x28] sm:$0xff]  ;;  %10234 = vmatpush1.bf16.msra.mxu1 %v10053_v27  ;;  %v14005_v49 = vpack.i.bf16 %v3054_v12, %v3053_v36  ;;  %v4217_v27 = vld [vmem:[%s18153_s5 + $0x30] sm:$0xff] }
 0x2a3   : > { %18524 = vst [vmem:[#allocation51_spill] sm:$0xff] %v13971_v20  ;;  %18526 = vst [vmem:[#allocation58_spill] sm:$0xff] %v13979_v10  ;;  %v2069_v63 = vsel %vm2053_vm2, %v2036_v4, %v10639_v23  ;;  %v13985_v19 = vpop.f32.mrb[46].mxu0  ;;  %10055 = vmatprep.subr.bf16.mxu0 %v18525_v48  ;;  %v18530_v23 = vld [vmem:[#allocation109_spill] sm:$0xff]  ;;  %v10056_v28 = vpack.c.bf16 %v4216_v47, %v4215_v2  ;;  %10219 = vmatprep.subr.bf16.mxu1 %v18525_v48  ;;  %v18535_v2 = vld [vmem:[#allocation107_spill] sm:$0xff] }
 0x2a4   : > { %18527 = vst [vmem:[#allocation53_spill] sm:$0xff] %v13985_v19  ;;  %11016 = vrot.lane.b32.xlu0 %v13975_v58, %s12285_s25  ;;  %2461 = vmatmul.mubr.f32.gmra.mrb[30].mxu1 %v2069_v63  ;;  %v13989_v55 = vpop.f32.mrb[47].mxu0  ;;  %v11030_v60 = vpack.i.bf16 %v18530_v23, %v18529_v34  ;;  %v4218_v4 = vld [vmem:[%s18153_s5 + $0x38] sm:$0xff]  ;;  %v14020_v63 = vld [vmem:[#allocation2 + $0x1c8] sm:$0xff]  ;;  %v18534_v23 = vld [vmem:[#allocation110_spill] sm:$0xff] }
 0x2a5   : > { %18528 = vst [vmem:[#allocation102_spill] sm:$0xff] %v13989_v55  ;;  %11006 = vrot.lane.b32.xlu1 %v11005_v52, %s12283_s13  ;;  %18531 = vst [vmem:[#allocation101_spill] sm:$0xff] %v14020_v63  ;;  %v14022_v52 = vld [vmem:[#allocation2 + $0x1d0] sm:$0xff]  ;;  %v10059_v12 = vpack.c.bf16 %v4218_v4, %v4217_v27  ;;  %v18536_v47 = vpack.i.bf16 %v18534_v23, %v18535_v2  ;;  %v4220_v27 = vld [vmem:[%s18153_s5 + $0x48] sm:$0xff]  ;;  %9790 = vmatprep.mubr.msk.f32.mxu0 %vm385_vm0, %v1218_v24  ;;  %v10633_v24 = vunpack.i.l.bf16 %v13828_v18 }
 0x2a6   : > { %v13993_v39 = vpop.permute.xlu0 %10726  ;;  %v14003_v35 = vpop.permute.xlu1 %10736  ;;  %10057 = vmatpush1.bf16.msra.mxu0 %v10056_v28  ;;  %10235 = vmatpush1.bf16.msra.mxu1 %v10056_v28  ;;  %18532 = vst [vmem:[#allocation103_spill] sm:$0xff] %v14022_v52  ;;  %v1219_v14 = vld [vmem:[#allocation2 + $0x231] sm:$0xff]  ;;  %v4219_v28 = vld [vmem:[%s18153_s5 + $0x40] sm:$0xff]  ;;  %v14046_v23 = vpack.i.bf16 %v14022_v52, %v14020_v63  ;;  %v3055_v2 = vld [vmem:[#allocation2 + $0x1c9] sm:$0xff] }
 0x2a7   : > { %10058 = vmatprep.subr.bf16.mxu0 %v18525_v48  ;;  %10220 = vmatprep.subr.bf16.mxu1 %v18525_v48  ;;  %v18540_v6 = vld [vmem:[#allocation112_spill] sm:$0xff]  ;;  %v3085_v19 = vld [vmem:[#allocation2 + $0x1c7] sm:$0xff] }
 0x2a8   : > { %11031 = vrot.lane.b32.xlu0 %v11030_v60, %s12284_s0  ;;  %v3056_v20 = vld [vmem:[#allocation2 + $0x1d1] sm:$0xff]  ;;  %9791 = vmatmul.mubr.msk.f32.gmra.mrb[62].mxu0 %vm385_vm0, %v1219_v14  ;;  %v10694_v14 = vunpack.i.h.bf16 %v13916_v38 }
 0x2a9   : > { %11011 = vrot.lane.b32.xlu1 %v14005_v49, %s12284_s0  ;;  %v3086_v55 = vld [vmem:[#allocation2 + $0x1cf] sm:$0xff] }
 0x2aa   : > { %v14011_v8 = vpop.permute.xlu0 %10731  ;;  %v14024_v36 = vpop.permute.xlu1 %10741  ;;  %10060 = vmatpush1.bf16.msra.mxu0 %v10059_v12  ;;  %10236 = vmatpush1.bf16.msra.mxu1 %v10059_v12  ;;  %v10688_v12 = vunpack.i.l.bf16 %v13906_v56  ;;  %v14074_v61 = vpack.i.bf16 %v3086_v55, %v3085_v19 }
 0x2ab   : > { %v14027_v34 = vpop.f32.mrb[48].mxu0  ;;  %10061 = vmatprep.subr.bf16.mxu0 %v18525_v48  ;;  %10221 = vmatprep.subr.bf16.mxu1 %v18525_v48 }
 0x2ac   : > { %18533 = vst [vmem:[#allocation98_spill] sm:$0xff] %v14027_v34  ;;  %11036 = vrot.lane.b32.xlu0 %v18536_v47, %s12285_s25  ;;  %v14036_v40 = vpop.f32.mrb[49].mxu0  ;;  %v10062_v47 = vpack.c.bf16 %v4220_v27, %v4219_v28  ;;  %v10628_v34 = vunpack.i.l.bf16 %v13822_v42  ;;  %v4221_v28 = vld [vmem:[%s18153_s5 + $0x50] sm:$0xff] }
 0x2ad   : > { %18537 = vst [vmem:[#allocation104_spill] sm:$0xff] %v14036_v40  ;;  %11021 = vrot.lane.b32.xlu1 %v11030_v60, %s12285_s25  ;;  %v10693_v60 = vunpack.i.l.bf16 %v13916_v38  ;;  %v18539_v40 = vld [vmem:[#allocation111_spill] sm:$0xff] }
 0x2ae   : > { %v14042_v4 = vpop.permute.xlu0 %10746  ;;  %v14052_v10 = vpop.permute.xlu1 %10766  ;;  %v11025_v59 = vpack.i.bf16 %v18540_v6, %v18539_v40  ;;  %v4222_v40 = vld [vmem:[%s18153_s5 + $0x58] sm:$0xff]  ;;  %10063 = vmatpush1.bf16.msra.mxu0 %v10062_v47  ;;  %v18542_v38 = vld [vmem:[#allocation59_spill] sm:$0xff]  ;;  %10237 = vmatpush1.bf16.msra.mxu1 %v10062_v47 }
 0x2af   : > { %18538 = vst [vmem:[#allocation60_spill] sm:$0xff] %v14052_v10  ;;  %v10748_v52 = vunpack.i.l.bf16 %v14042_v4  ;;  %v10065_v6 = vpack.c.bf16 %v4222_v40, %v4221_v28  ;;  %v10749_v27 = vunpack.i.h.bf16 %v14042_v4  ;;  %v14072_v10 = vpack.i.bf16 %v3056_v20, %v3055_v2  ;;  %10064 = vmatprep.subr.bf16.mxu0 %v18525_v48  ;;  %v3087_v40 = vld [vmem:[#allocation2 + $0x1e7] sm:$0xff]  ;;  %v3026_v2 = vld [vmem:[#allocation2 + $0x1f0] sm:$0xff]  ;;  %10222 = vmatprep.subr.bf16.mxu1 %v18525_v48 }
 0x2b0   : > { %11041 = vrot.lane.b32.xlu0 %v14046_v23, %s12283_s13  ;;  %v2004_v28 = vsel %vm385_vm0, %v18542_v38, %v10628_v34  ;;  %v3025_v4 = vld [vmem:[#allocation2 + $0x1e8] sm:$0xff]  ;;  %v10629_v20 = vunpack.i.h.bf16 %v13822_v42  ;;  %v10634_v42 = vunpack.i.h.bf16 %v13828_v18  ;;  %v10689_v38 = vunpack.i.h.bf16 %v13906_v56  ;;  %v18547_v56 = vld [vmem:[#allocation61_spill] sm:$0xff] }
 0x2b1   : > { %11026 = vrot.lane.b32.xlu1 %v11025_v59, %s12283_s13  ;;  %v2102_v59 = vsel %vm385_vm0, %v13223_v11, %v10693_v60  ;;  %v4223_v11 = vld [vmem:[%s18153_s5 + $0x60] sm:$0xff]  ;;  %v4224_v34 = vld [vmem:[%s18153_s5 + $0x68] sm:$0xff]  ;;  %v14109_v18 = vpack.i.bf16 %v3088_v9, %v3087_v40  ;;  %v4226_v40 = vld [vmem:[%s18153_s5 + $0x78] sm:$0xff] }
 0x2b2   : > { %v10752_v63 = vpop.permute.xlu0 %10751  ;;  %v14077_v17 = vpop.permute.xlu1 %10771  ;;  %v2134_v55 = vsel %vm2020_vm1, %v2102_v59, %v10748_v52  ;;  %v18545_v60 = vld [vmem:[#allocation63_spill] sm:$0xff]  ;;  %10066 = vmatpush1.bf16.msra.mxu0 %v10065_v6  ;;  %v10068_v59 = vpack.c.bf16 %v4224_v34, %v4223_v11  ;;  %v2005_v9 = vsel %vm385_vm0, %v18547_v56, %v10629_v20  ;;  %10238 = vmatpush1.bf16.msra.mxu1 %v10065_v6  ;;  %v4227_v6 = vld [vmem:[%s18153_s5 + $0x80] sm:$0xff] }
 0x2b3   : > { %v10754_v26 = vunpack.i.h.bf16 %v10752_v63  ;;  %v10753_v53 = vunpack.i.l.bf16 %v10752_v63  ;;  %18541 = vst [vmem:[#allocation55_spill] sm:$0xff] %v14077_v17  ;;  %v14084_v19 = vpop.f32.mrb[50].mxu0  ;;  %v2037_v63 = vsel %vm2020_vm1, %v2004_v28, %v10633_v24  ;;  %v2103_v24 = vsel %vm385_vm0, %v18545_v60, %v10694_v14  ;;  %10067 = vmatprep.subr.bf16.mxu0 %v18525_v48  ;;  %10223 = vmatprep.subr.bf16.mxu1 %v18525_v48  ;;  %v3156_v60 = vld [vmem:[#allocation2 + $0x4f] sm:$0xff] }
 0x2b4   : > { %18543 = vst [vmem:[#allocation62_spill] sm:$0xff] %v14084_v19  ;;  %11046 = vrot.lane.b32.xlu0 %v14072_v10, %s12284_s0  ;;  %v14098_v47 = vpop.f32.mrb[51].mxu0  ;;  %v2070_v19 = vsel %vm2053_vm2, %v2037_v63, %v10688_v12  ;;  %v14116_v14 = vpack.i.bf16 %v3026_v2, %v3025_v4  ;;  %v3058_v12 = vld [vmem:[#allocation2 + $0x1f1] sm:$0xff] }
 0x2b5   : > { %18544 = vst [vmem:[#allocation57_spill] sm:$0xff] %v14098_v47  ;;  %11051 = vrot.lane.b32.xlu1 %v14074_v61, %s12285_s25  ;;  %v2166_v52 = vsel %vm2053_vm2, %v2134_v55, %v10753_v53  ;;  %v2135_v47 = vsel %vm2020_vm1, %v2103_v24, %v10749_v27  ;;  %v3057_v55 = vld [vmem:[#allocation2 + $0x1e9] sm:$0xff] }
 0x2b6   : > { %v14106_v28 = vpop.permute.xlu0 %10756  ;;  %2465 = vmatprep.mubr.f32.mxu1 %v2166_v52  ;;  %v14113_v17 = vpop.permute.xlu1 %10776  ;;  %v2167_v53 = vsel %vm2053_vm2, %v2135_v47, %v10754_v26  ;;  %v4225_v27 = vld [vmem:[%s18153_s5 + $0x70] sm:$0xff]  ;;  %v2038_v26 = vsel %vm2020_vm1, %v2005_v9, %v10634_v42  ;;  %10069 = vmatpush1.bf16.msra.mxu0 %v10068_v59  ;;  %v11060_v2 = vpack.i.bf16 %v3058_v12, %v3057_v55  ;;  %v4228_v47 = vld [vmem:[%s18153_s5 + $0x88] sm:$0xff]  ;;  %v10683_v9 = vunpack.i.l.bf16 %v13896_v22 }
 0x2b7   : > { %18546 = vst [vmem:[#allocation106_spill] sm:$0xff] %v14106_v28  ;;  %2466 = vmatmul.mubr.f32.gmra.mrb[32].mxu1 %v2070_v19  ;;  %v10071_v4 = vpack.c.bf16 %v4226_v40, %v4225_v27  ;;  %v2071_v20 = vsel %vm2053_vm2, %v2038_v26, %v10689_v38  ;;  %10070 = vmatprep.subr.bf16.mxu0 %v18525_v48  ;;  %v10678_v38 = vunpack.i.l.bf16 %v13882_v62  ;;  %v3089_v55 = vld [vmem:[#allocation2 + $0x207] sm:$0xff]  ;;  %v3090_v56 = vld [vmem:[#allocation2 + $0x20f] sm:$0xff]  ;;  %v10744_v27 = vunpack.i.h.bf16 %v14024_v36 }
 0x2b8   : > { %11066 = vrot.lane.b32.xlu0 %v14109_v18, %s12285_s25  ;;  %2470 = vmatprep.mubr.f32.mxu1 %v2167_v53  ;;  %v10074_v24 = vpack.c.bf16 %v4228_v47, %v4227_v6  ;;  %v10743_v53 = vunpack.i.l.bf16 %v14024_v36  ;;  %v4230_v6 = vld [vmem:[%s18153_s5 + $0x98] sm:$0xff]  ;;  %v14172_v36 = vpack.i.bf16 %v3090_v56, %v3089_v55  ;;  %v4231_v55 = vld [vmem:[%s18153_s5 + $0xa0] sm:$0xff]  ;;  %v4232_v56 = vld [vmem:[%s18153_s5 + $0xa8] sm:$0xff] }
 0x2b9   : > { %11056 = vrot.lane.b32.xlu1 %v14116_v14, %s12283_s13  ;;  %10239 = vmatpush1.bf16.msra.mxu1 %v10068_v59  ;;  %v3159_v59 = vld [vmem:[#allocation2 + $0x87] sm:$0xff] }
 0x2ba   : > { %v14131_v19 = vpop.permute.xlu0 %10761  ;;  %v14135_v63 = vpop.permute.xlu1 %10781  ;;  %10072 = vmatpush1.bf16.msra.mxu0 %v10071_v4  ;;  %10224 = vmatprep.subr.bf16.mxu1 %v18525_v48  ;;  %v2104_v29 = vsel %vm385_vm0, %v13252_v50, %v10743_v53 }
 0x2bb   : > { %18548 = vst [vmem:[#allocation109_spill] sm:$0xff] %v14131_v19  ;;  %2471 = vmatmul.mubr.f32.gmra.mrb[34].mxu1 %v2071_v20  ;;  %10073 = vmatprep.subr.bf16.mxu0 %v18525_v48  ;;  %v3160_v20 = vld [vmem:[#allocation2 + $0x8f] sm:$0xff] }
 0x2bc   : > { %v14138_v11 = vpop.f32.mrb[52].mxu0  ;;  %11071 = vrot.lane.b32.xlu0 %v14005_v49, %s12283_s13  ;;  %v3155_v49 = vld [vmem:[#allocation2 + $0x47] sm:$0xff]  ;;  %v11105_v53 = vpack.i.bf16 %v3160_v20, %v3159_v59  ;;  %v3164_v20 = vld [vmem:[#allocation2 + $0xcf] sm:$0xff] }
 0x2bd   : > { %18549 = vst [vmem:[#allocation110_spill] sm:$0xff] %v14138_v11  ;;  %v14142_v34 = vpop.f32.mrb[53].mxu0  ;;  %11061 = vrot.lane.b32.xlu1 %v11060_v2, %s12284_s0  ;;  %v11095_v26 = vpack.i.bf16 %v3156_v60, %v3155_v49  ;;  %10240 = vmatpush1.bf16.msra.mxu1 %v10071_v4  ;;  %v2006_v4 = vsel %vm385_vm0, %v13221_v13, %v10678_v38  ;;  %v10684_v38 = vunpack.i.h.bf16 %v13896_v22  ;;  %v3163_v59 = vld [vmem:[#allocation2 + $0xc7] sm:$0xff] }
 0x2be   : > { %18550 = vst [vmem:[#allocation107_spill] sm:$0xff] %v14142_v34  ;;  %v14145_v42 = vpop.permute.xlu0 %10786  ;;  %v10797_v52 = vpop.permute.xlu1 %10796  ;;  %10075 = vmatpush1.bf16.msra.mxu0 %v10074_v24  ;;  %v3153_v34 = vld [vmem:[#allocation2 + $0x209] sm:$0xff]  ;;  %10225 = vmatprep.subr.bf16.mxu1 %v18525_v48  ;;  %v2039_v13 = vsel %vm2020_vm1, %v2006_v4, %v10683_v9 }
 0x2bf   : > { %v10798_v12 = vunpack.i.l.bf16 %v10797_v52  ;;  %10076 = vmatprep.subr.bf16.mxu0 %v18525_v48  ;;  %v10799_v47 = vunpack.i.h.bf16 %v10797_v52  ;;  %v3154_v52 = vld [vmem:[#allocation2 + $0x211] sm:$0xff] }
 0x2c0   : > { %11081 = vrot.lane.b32.xlu0 %v11060_v2, %s12283_s13  ;;  %v4229_v2 = vld [vmem:[%s18153_s5 + $0x90] sm:$0xff] }
 0x2c1   : > { %11076 = vrot.lane.b32.xlu1 %v14072_v10, %s12283_s13  ;;  %v10738_v10 = vunpack.i.l.bf16 %v14003_v35  ;;  %v10077_v49 = vpack.c.bf16 %v4230_v6, %v4229_v2  ;;  %v2136_v50 = vsel %vm2020_vm1, %v2104_v29, %v10798_v12  ;;  %10241 = vmatpush1.bf16.msra.mxu1 %v10074_v24  ;;  %v11090_v12 = vpack.i.bf16 %v3154_v52, %v3153_v34  ;;  %v3158_v24 = vld [vmem:[#allocation2 + $0x6f] sm:$0xff]  ;;  %v4234_v34 = vld [vmem:[%s18153_s5 + $0xb8] sm:$0xff] }
 0x2c2   : > { %v14162_v40 = vpop.permute.xlu0 %10791  ;;  %v10802_v11 = vpop.permute.xlu1 %10801  ;;  %10226 = vmatprep.subr.bf16.mxu1 %v18525_v48 }
 0x2c3   : > { %v10804_v60 = vunpack.i.h.bf16 %v10802_v11  ;;  %v10803_v19 = vunpack.i.l.bf16 %v10802_v11  ;;  %v10679_v11 = vunpack.i.h.bf16 %v13882_v62  ;;  %10078 = vmatpush1.bf16.msra.mxu0 %v10077_v49  ;;  %v2105_v62 = vsel %vm385_vm0, %v13261_v25, %v10744_v27 }
 0x2c4   : > { %11096 = vrot.lane.b32.xlu0 %v11095_v26, %s12284_s0  ;;  %10079 = vmatprep.subr.bf16.mxu0 %v18525_v48  ;;  %v2072_v9 = vsel %vm2053_vm2, %v2039_v13, %v10738_v10  ;;  %v2137_v22 = vsel %vm2020_vm1, %v2105_v62, %v10799_v47  ;;  %v11115_v47 = vpack.i.bf16 %v3164_v20, %v3163_v59  ;;  %v3162_v13 = vld [vmem:[#allocation2 + $0xaf] sm:$0xff] }
 0x2c5   : > { %11086 = vrot.lane.b32.xlu1 %v14172_v36, %s12285_s25  ;;  %v2168_v6 = vsel %vm2053_vm2, %v2136_v50, %v10803_v19  ;;  %v3157_v19 = vld [vmem:[#allocation2 + $0x67] sm:$0xff]  ;;  %v2169_v25 = vsel %vm2053_vm2, %v2137_v22, %v10804_v60  ;;  %v2007_v27 = vsel %vm385_vm0, %v13227_v43, %v10679_v11  ;;  %10242 = vmatpush1.bf16.msra.mxu1 %v10077_v49  ;;  %v3172_v59 = vld [vmem:[#allocation2 + $0x14f] sm:$0xff] }
 0x2c6   : > { %v14175_v28 = vpop.f32.mrb[54].mxu0  ;;  %v14196_v26 = vpop.permute.xlu0 %10816  ;;  %2475 = vmatprep.mubr.f32.mxu1 %v2168_v6  ;;  %v2040_v60 = vsel %vm2020_vm1, %v2007_v27, %v10684_v38  ;;  %v3167_v50 = vld [vmem:[#allocation2 + $0x107] sm:$0xff]  ;;  %10227 = vmatprep.subr.bf16.mxu1 %v18525_v48 }
 0x2c7   : > { %18551 = vst [vmem:[#allocation111_spill] sm:$0xff] %v14175_v28  ;;  %v14189_v2 = vpop.f32.mrb[55].mxu0  ;;  %v10080_v28 = vpack.c.bf16 %v4232_v56, %v4231_v55  ;;  %v14203_v29 = vpop.permute.xlu1 %10806  ;;  %2476 = vmatmul.mubr.f32.gmra.mrb[36].mxu1 %v2072_v9  ;;  %v11100_v56 = vpack.i.bf16 %v3158_v24, %v3157_v19  ;;  %v3161_v11 = vld [vmem:[#allocation2 + $0xa7] sm:$0xff] }
 0x2c8   : > { %18552 = vst [vmem:[#allocation112_spill] sm:$0xff] %v14189_v2  ;;  %v10739_v2 = vunpack.i.h.bf16 %v14003_v35  ;;  %11106 = vrot.lane.b32.xlu0 %v11105_v53, %s12284_s0  ;;  %v4233_v35 = vld [vmem:[%s18153_s5 + $0xb0] sm:$0xff]  ;;  %2480 = vmatprep.mubr.f32.mxu1 %v2169_v25  ;;  %v4235_v6 = vld [vmem:[%s18153_s5 + $0xc0] sm:$0xff]  ;;  %v4236_v62 = vld [vmem:[%s18153_s5 + $0xc8] sm:$0xff] }
 0x2c9   : > { %11091 = vrot.lane.b32.xlu1 %v11090_v12, %s12283_s13  ;;  %10081 = vmatpush1.bf16.msra.mxu0 %v10080_v28  ;;  %v10083_v4 = vpack.c.bf16 %v4234_v34, %v4233_v35  ;;  %v3168_v53 = vld [vmem:[#allocation2 + $0x10f] sm:$0xff]  ;;  %v11110_v12 = vpack.i.bf16 %v3162_v13, %v3161_v11  ;;  %v3171_v22 = vld [vmem:[#allocation2 + $0x147] sm:$0xff]  ;;  %v10086_v20 = vpack.c.bf16 %v4236_v62, %v4235_v6  ;;  %v4238_v34 = vld [vmem:[%s18153_s5 + $0xd8] sm:$0xff] }
 0x2ca   : > { %v14219_v10 = vpop.permute.xlu0 %10821  ;;  %v2073_v55 = vsel %vm2053_vm2, %v2040_v60, %v10739_v2  ;;  %10082 = vmatprep.subr.bf16.mxu0 %v18525_v48  ;;  %v11125_v2 = vpack.i.bf16 %v3168_v53, %v3167_v50  ;;  %10243 = vmatpush1.bf16.msra.mxu1 %v10080_v28  ;;  %v3165_v19 = vld [vmem:[#allocation2 + $0xe7] sm:$0xff]  ;;  %v3166_v25 = vld [vmem:[#allocation2 + $0xef] sm:$0xff]  ;;  %v11135_v35 = vpack.i.bf16 %v3172_v59, %v3171_v22  ;;  %v10793_v22 = vunpack.i.l.bf16 %v14162_v40 }
 0x2cb   : > { %v14222_v52 = vpop.permute.xlu1 %10811  ;;  %2481 = vmatmul.mubr.f32.gmra.mrb[38].mxu1 %v2073_v55  ;;  %10228 = vmatprep.subr.bf16.mxu1 %v18525_v48  ;;  %v4237_v28 = vld [vmem:[%s18153_s5 + $0xd0] sm:$0xff]  ;;  %v3175_v60 = vld [vmem:[#allocation2 + $0x187] sm:$0xff] }
 0x2cc   : > { %11116 = vrot.lane.b32.xlu0 %v11115_v47, %s12284_s0  ;;  %v11120_v47 = vpack.i.bf16 %v3166_v25, %v3165_v19  ;;  %v3176_v55 = vld [vmem:[#allocation2 + $0x18f] sm:$0xff]  ;;  %v10089_v50 = vpack.c.bf16 %v4238_v34, %v4237_v28  ;;  %v3173_v25 = vld [vmem:[#allocation2 + $0x167] sm:$0xff] }
 0x2cd   : > { %11101 = vrot.lane.b32.xlu1 %v11100_v56, %s12284_s0  ;;  %10084 = vmatpush1.bf16.msra.mxu0 %v10083_v4  ;;  %v3169_v56 = vld [vmem:[#allocation2 + $0x127] sm:$0xff]  ;;  %v3170_v11 = vld [vmem:[#allocation2 + $0x12f] sm:$0xff]  ;;  %v11145_v62 = vpack.i.bf16 %v3176_v55, %v3175_v60  ;;  %v10733_v60 = vunpack.i.l.bf16 %v14011_v8  ;;  %v10794_v55 = vunpack.i.h.bf16 %v14162_v40  ;;  %v10729_v40 = vunpack.i.h.bf16 %v13993_v39 }
 0x2ce   : > { %v14227_v43 = vpop.f32.mrb[56].mxu0  ;;  %v14233_v49 = vpop.permute.xlu0 %10826  ;;  %10085 = vmatprep.subr.bf16.mxu0 %v18525_v48  ;;  %10244 = vmatpush1.bf16.msra.mxu1 %v10083_v4  ;;  %v4239_v4 = vld [vmem:[%s18153_s5 + $0xe0] sm:$0xff]  ;;  %v4240_v13 = vld [vmem:[%s18153_s5 + $0xe8] sm:$0xff]  ;;  %v11130_v19 = vpack.i.bf16 %v3170_v11, %v3169_v56  ;;  %v10788_v56 = vunpack.i.l.bf16 %v14145_v42 }
 0x2cf   : > { %18553 = vst [vmem:[#allocation59_spill] sm:$0xff] %v14227_v43  ;;  %v14230_v38 = vpop.f32.mrb[57].mxu0  ;;  %v14241_v9 = vpop.permute.xlu1 %10836  ;;  %10229 = vmatprep.subr.bf16.mxu1 %v18525_v48  ;;  %v3174_v34 = vld [vmem:[#allocation2 + $0x16f] sm:$0xff] }
 0x2d0   : > { %18554 = vst [vmem:[#allocation63_spill] sm:$0xff] %v14230_v38  ;;  %11126 = vrot.lane.b32.xlu0 %v11125_v2, %s12284_s0  ;;  %v11140_v43 = vpack.i.bf16 %v3174_v34, %v3173_v25  ;;  %v18558_v38 = vld [vmem:[#allocation65_spill] sm:$0xff]  ;;  %v10734_v25 = vunpack.i.h.bf16 %v14011_v8 }
 0x2d1   : > { %11111 = vrot.lane.b32.xlu1 %v11110_v12, %s12284_s0  ;;  %10087 = vmatpush1.bf16.msra.mxu0 %v10086_v20  ;;  %v10092_v12 = vpack.c.bf16 %v4240_v13, %v4239_v4 }
 0x2d2   : > { %v14247_v24 = vpop.permute.xlu0 %10831  ;;  %10088 = vmatprep.subr.bf16.mxu0 %v18525_v48  ;;  %10245 = vmatpush1.bf16.msra.mxu1 %v10086_v20  ;;  %v4241_v20 = vld [vmem:[%s18153_s5 + $0xf0] sm:$0xff] }
 0x2d3   : > { %v14255_v27 = vpop.permute.xlu1 %10841  ;;  %10230 = vmatprep.subr.bf16.mxu1 %v18525_v48 }
 0x2d4   : > { %11136 = vrot.lane.b32.xlu0 %v11135_v35, %s12284_s0  ;;  %v10728_v35 = vunpack.i.l.bf16 %v13993_v39 }
 0x2d5   : > { %11121 = vrot.lane.b32.xlu1 %v11120_v47, %s12284_s0  ;;  %10090 = vmatpush1.bf16.msra.mxu0 %v10089_v50  ;;  %v4242_v47 = vld [vmem:[%s18153_s5 + $0xf8] sm:$0xff] }
 0x2d6   : > { %v14259_v53 = vpop.f32.mrb[58].mxu0  ;;  %v10847_v6 = vpop.permute.xlu0 %10846  ;;  %10091 = vmatprep.subr.bf16.mxu0 %v18525_v48  ;;  %v10095_v13 = vpack.c.bf16 %v4242_v47, %v4241_v20  ;;  %10246 = vmatpush1.bf16.msra.mxu1 %v10089_v50 }
 0x2d7   : > { %18555 = vst [vmem:[#allocation61_spill] sm:$0xff] %v14259_v53  ;;  %v14268_v2 = vpop.f32.mrb[59].mxu0  ;;  %v14272_v59 = vpop.permute.xlu1 %10866  ;;  %v10848_v28 = vunpack.i.l.bf16 %v10847_v6  ;;  %v10849_v11 = vunpack.i.h.bf16 %v10847_v6  ;;  %10231 = vmatprep.subr.bf16.mxu1 %v18525_v48  ;;  %v2008_v6 = vsel %vm385_vm0, %v13249_v57, %v10728_v35  ;;  %v3188_v35 = vld [vmem:[#allocation2 + $0x50] sm:$0xff] }
 0x2d8   : > { %18556 = vst [vmem:[#allocation117_spill] sm:$0xff] %v14268_v2  ;;  %18557 = vst [vmem:[#allocation118_spill] sm:$0xff] %v14272_v59  ;;  %11146 = vrot.lane.b32.xlu0 %v11145_v62, %s12284_s0  ;;  %v2106_v59 = vsel %vm385_vm0, %v18558_v38, %v10793_v22  ;;  %v2041_v39 = vsel %vm2020_vm1, %v2008_v6, %v10733_v60  ;;  %v18561_v22 = vld [vmem:[#allocation67_spill] sm:$0xff] }
 0x2d9   : > { %11131 = vrot.lane.b32.xlu1 %v11130_v19, %s12284_s0  ;;  %10093 = vmatpush1.bf16.msra.mxu0 %v10092_v12  ;;  %v2138_v50 = vsel %vm2020_vm1, %v2106_v59, %v10848_v28  ;;  %v2107_v20 = vsel %vm385_vm0, %v18561_v22, %v10794_v55  ;;  %v2074_v57 = vsel %vm2053_vm2, %v2041_v39, %v10788_v56  ;;  %v3195_v6 = vld [vmem:[#allocation2 + $0xc8] sm:$0xff]  ;;  %v3190_v22 = vld [vmem:[#allocation2 + $0x70] sm:$0xff] }
 0x2da   : > { %v10852_v4 = vpop.permute.xlu0 %10851  ;;  %10094 = vmatprep.subr.bf16.mxu0 %v18525_v48  ;;  %v2139_v8 = vsel %vm2020_vm1, %v2107_v20, %v10849_v11  ;;  %10247 = vmatpush1.bf16.msra.mxu1 %v10092_v12  ;;  %v3185_v11 = vld [vmem:[#allocation2 + $0x227] sm:$0xff]  ;;  %v10778_v20 = vunpack.i.l.bf16 %v14113_v17 }
 0x2db   : > { %v10854_v62 = vunpack.i.h.bf16 %v10852_v4  ;;  %v10853_v53 = vunpack.i.l.bf16 %v10852_v4  ;;  %v14288_v2 = vpop.permute.xlu1 %10871  ;;  %v3186_v4 = vld [vmem:[#allocation2 + $0x22f] sm:$0xff]  ;;  %10232 = vmatprep.subr.bf16.mxu1 %v18525_v48 }
 0x2dc   : > { %11156 = vrot.lane.b32.xlu0 %v14074_v61, %s12284_s0  ;;  %v10789_v61 = vunpack.i.h.bf16 %v14145_v42  ;;  %v2009_v42 = vsel %vm385_vm0, %v13259_v32, %v10729_v40  ;;  %v3192_v32 = vld [vmem:[#allocation2 + $0x90] sm:$0xff]  ;;  %v3189_v39 = vld [vmem:[#allocation2 + $0x68] sm:$0xff] }
 0x2dd   : > { %11141 = vrot.lane.b32.xlu1 %v11140_v43, %s12284_s0  ;;  %v2170_v38 = vsel %vm2053_vm2, %v2138_v50, %v10853_v53  ;;  %10096 = vmatpush1.bf16.msra.mxu0 %v10095_v13  ;;  %v2171_v43 = vsel %vm2053_vm2, %v2139_v8, %v10854_v62  ;;  %v3187_v53 = vld [vmem:[#allocation2 + $0x48] sm:$0xff]  ;;  %v2042_v28 = vsel %vm2020_vm1, %v2009_v42, %v10734_v25  ;;  %v3196_v25 = vld [vmem:[#allocation2 + $0xd0] sm:$0xff] }
 0x2de   : > { %v14295_v19 = vpop.f32.mrb[60].mxu0  ;;  %v14311_v47 = vpop.permute.xlu0 %10856  ;;  %2485 = vmatprep.mubr.f32.mxu1 %v2170_v38  ;;  %v2075_v55 = vsel %vm2053_vm2, %v2042_v28, %v10789_v61  ;;  %v11175_v56 = vpack.i.bf16 %v3188_v35, %v3187_v53  ;;  %v3191_v62 = vld [vmem:[#allocation2 + $0x88] sm:$0xff]  ;;  %10248 = vmatpush1.bf16.msra.mxu1 %v10095_v13  ;;  %v10843_v38 = vunpack.i.l.bf16 %v14255_v27  ;;  %v10844_v13 = vunpack.i.h.bf16 %v14255_v27  ;;  %v3200_v53 = vld [vmem:[#allocation2 + $0x110] sm:$0xff] }
 0x2df   : > { %18559 = vst [vmem:[#allocation65_spill] sm:$0xff] %v14295_v19  ;;  %v14303_v34 = vpop.f32.mrb[61].mxu0  ;;  %18562 = vst [vmem:[#allocation67_spill] sm:$0xff] %v14311_v47  ;;  %v14315_v59 = vpop.permute.xlu1 %10876  ;;  %2486 = vmatmul.mubr.f32.gmra.mrb[40].mxu1 %v2074_v57  ;;  %v11185_v40 = vpack.i.bf16 %v3192_v32, %v3191_v62  ;;  %v11195_v8 = vpack.i.bf16 %v3196_v25, %v3195_v6  ;;  %v10838_v35 = vunpack.i.l.bf16 %v14241_v9  ;;  %v3193_v32 = vld [vmem:[#allocation2 + $0xa8] sm:$0xff]  ;;  %v10779_v27 = vunpack.i.h.bf16 %v14113_v17  ;;  %v18565_v25 = vld [vmem:[#allocation64_spill] sm:$0xff] }
 0x2e0   : > { %18560 = vst [vmem:[#allocation119_spill] sm:$0xff] %v14303_v34  ;;  %11166 = vrot.lane.b32.xlu0 %v14172_v36, %s12284_s0  ;;  %2490 = vmatprep.mubr.f32.mxu1 %v2171_v43  ;;  %v3199_v43 = vld [vmem:[#allocation2 + $0x108] sm:$0xff]  ;;  %v10839_v17 = vunpack.i.h.bf16 %v14241_v9 }
 0x2e1   : > { %11151 = vrot.lane.b32.xlu1 %v13975_v58, %s12284_s0  ;;  %v11170_v58 = vpack.i.bf16 %v3186_v4, %v3185_v11  ;;  %v18564_v4 = vld [vmem:[#allocation71_spill] sm:$0xff]  ;;  %v11205_v6 = vpack.i.bf16 %v3200_v53, %v3199_v43  ;;  %v3204_v53 = vld [vmem:[#allocation2 + $0x150] sm:$0xff] }
 0x2e2   : > { %v14325_v60 = vpop.permute.xlu0 %10861  ;;  %v2108_v62 = vsel %vm385_vm0, %v18564_v4, %v10843_v38  ;;  %v3197_v9 = vld [vmem:[#allocation2 + $0xe8] sm:$0xff] }
 0x2e3   : > { %18563 = vst [vmem:[#allocation120_spill] sm:$0xff] %v14325_v60  ;;  %v14329_v36 = vpop.permute.xlu1 %10881  ;;  %2491 = vmatmul.mubr.f32.gmra.mrb[42].mxu1 %v2075_v55  ;;  %v11180_v55 = vpack.i.bf16 %v3190_v22, %v3189_v39  ;;  %v10784_v39 = vunpack.i.h.bf16 %v14135_v63 }
 0x2e4   : > { %11176 = vrot.lane.b32.xlu0 %v11175_v56, %s12285_s25 }
 0x2e5   : > { %11161 = vrot.lane.b32.xlu1 %v14109_v18, %s12284_s0  ;;  %v10783_v18 = vunpack.i.l.bf16 %v14135_v63  ;;  %v3203_v63 = vld [vmem:[#allocation2 + $0x148] sm:$0xff] }
 0x2e6   : > { %v14334_v12 = vpop.permute.xlu0 %10886 }
 0x2e7   : > { %v10897_v50 = vpop.permute.xlu1 %10896 }
 0x2e8   : > { %11186 = vrot.lane.b32.xlu0 %v11185_v40, %s12285_s25  ;;  %v10898_v61 = vunpack.i.l.bf16 %v10897_v50  ;;  %v10899_v42 = vunpack.i.h.bf16 %v10897_v50  ;;  %v2010_v50 = vsel %vm385_vm0, %v18565_v25, %v10778_v20 }
 0x2e9   : > { %11171 = vrot.lane.b32.xlu1 %v11170_v58, %s12284_s0  ;;  %v3194_v58 = vld [vmem:[#allocation2 + $0xb0] sm:$0xff]  ;;  %v2043_v38 = vsel %vm2020_vm1, %v2010_v50, %v10783_v18 }
 0x2ea   : > { %v14342_v57 = vpop.permute.xlu0 %10891  ;;  %v2140_v40 = vsel %vm2020_vm1, %v2108_v62, %v10898_v61  ;;  %v2076_v61 = vsel %vm2053_vm2, %v2043_v38, %v10838_v35  ;;  %v11190_v43 = vpack.i.bf16 %v3194_v58, %v3193_v32  ;;  %v18569_v35 = vld [vmem:[#allocation66_spill] sm:$0xff]  ;;  %v11215_v58 = vpack.i.bf16 %v3204_v53, %v3203_v63  ;;  %v3201_v38 = vld [vmem:[#allocation2 + $0x128] sm:$0xff]  ;;  %v3206_v53 = vld [vmem:[#allocation2 + $0x170] sm:$0xff] }
 0x2eb   : > { %v10902_v28 = vpop.permute.xlu1 %10901  ;;  %v3205_v63 = vld [vmem:[#allocation2 + $0x168] sm:$0xff] }
 0x2ec   : > { %v10904_v56 = vunpack.i.h.bf16 %v10902_v28  ;;  %v10903_v11 = vunpack.i.l.bf16 %v10902_v28  ;;  %11196 = vrot.lane.b32.xlu0 %v11195_v8, %s12285_s25  ;;  %v18567_v28 = vld [vmem:[#allocation74_spill] sm:$0xff] }
 0x2ed   : > { %11181 = vrot.lane.b32.xlu1 %v11180_v55, %s12285_s25  ;;  %v2109_v4 = vsel %vm385_vm0, %v18567_v28, %v10844_v13  ;;  %v14370_v13 = vld [vmem:[%s18152_s4] ss:$0 sm:$0xff]  ;;  %v3202_v28 = vld [vmem:[#allocation2 + $0x130] sm:$0xff] }
 0x2ee   : > { %v14354_v22 = vpop.permute.xlu0 %10916  ;;  %v2172_v8 = vsel %vm2053_vm2, %v2140_v40, %v10903_v11  ;;  %v2141_v20 = vsel %vm2020_vm1, %v2109_v4, %v10899_v42  ;;  %v3198_v11 = vld [vmem:[#allocation2 + $0xf0] sm:$0xff]  ;;  %v2011_v42 = vsel %vm385_vm0, %v18569_v35, %v10779_v27  ;;  %v11220_v35 = vpack.i.bf16 %v3206_v53, %v3205_v63  ;;  %v3217_v53 = vld [vmem:[#allocation2 + $0x228] sm:$0xff] }
 0x2ef   : > { %18566 = vst [vmem:[#allocation71_spill] sm:$0xff] %v14354_v22  ;;  %v14361_v55 = vpop.permute.xlu1 %10906  ;;  %2495 = vmatprep.mubr.f32.mxu1 %v2172_v8  ;;  %v2173_v18 = vsel %vm2053_vm2, %v2141_v20, %v10904_v56  ;;  %v2044_v40 = vsel %vm2020_vm1, %v2011_v42, %v10784_v39  ;;  %v11200_v8 = vpack.i.bf16 %v3198_v11, %v3197_v9  ;;  %v3215_v42 = vld [vmem:[#allocation2 + $0x208] sm:$0xff]  ;;  %v10833_v63 = vunpack.i.l.bf16 %v14247_v24  ;;  %v3096_v22 = vld [vmem:[#allocation2 + $0x70] sm:$0xff] }
 0x2f0   : > { %18568 = vst [vmem:[#allocation64_spill] sm:$0xff] %v14361_v55  ;;  %11206 = vrot.lane.b32.xlu0 %v11205_v6, %s12285_s25  ;;  %2496 = vmatmul.mubr.f32.gmra.mrb[44].mxu1 %v2076_v61  ;;  %v2077_v50 = vsel %vm2053_vm2, %v2044_v40, %v10839_v17  ;;  %v11210_v17 = vpack.i.bf16 %v3202_v28, %v3201_v38  ;;  %v3210_v40 = vld [vmem:[#allocation2 + $0x1b0] sm:$0xff]  ;;  %v18652_v55 = vld [vmem:[#allocation115_spill] sm:$0xff] }
 0x2f1   : > { %11191 = vrot.lane.b32.xlu1 %v11190_v43, %s12285_s25  ;;  %2500 = vmatprep.mubr.f32.mxu1 %v2173_v18  ;;  %v2387_v32 = vpop.f32.mrb[0].mxu1  ;;  %v11230_v28 = vpack.i.bf16 %v3210_v40, %v13959_v21  ;;  %v10894_v21 = vunpack.i.h.bf16 %v14342_v57 }
 0x2f2   : > { %v14375_v62 = vpop.permute.xlu0 %10921  ;;  %v2388_v56 = vadd.f32 %v14370_v13, %v2387_v32  ;;  %v2389_v25 = vpop.f32.mrb[1].mxu1  ;;  %v3216_v32 = vld [vmem:[#allocation2 + $0x210] sm:$0xff] }
 0x2f3   : > { %18570 = vst [vmem:[#allocation74_spill] sm:$0xff] %v14375_v62  ;;  %v14379_v6 = vpop.permute.xlu1 %10911  ;;  %v11245_v25 = vpack.i.bf16 %v3216_v32, %v3215_v42  ;;  %v10888_v42 = vunpack.i.l.bf16 %v14334_v12  ;;  %v18675_v62 = vld [vmem:[#allocation102_spill] sm:$0xff] }
 0x2f4   : > { %18571 = vst [vmem:[#allocation66_spill] sm:$0xff] %v14379_v6  ;;  %11216 = vrot.lane.b32.xlu0 %v11215_v58, %s12285_s25  ;;  %2501 = vmatmul.mubr.f32.gmra.mrb[46].mxu1 %v2077_v50  ;;  %v14384_v27 = vadd.f32 %v13757_v51, %v2388_v56  ;;  %v10893_v50 = vunpack.i.l.bf16 %v14342_v57 }
 0x2f5   : > { %11201 = vrot.lane.b32.xlu1 %v11200_v8, %s12285_s25  ;;  %v2392_v39 = vpop.f32.mrb[2].mxu1 }
 0x2f6   : > { %18572 = vst [vmem:[#allocation121_spill] sm:$0xff] %v14384_v27  ;;  %v14387_v4 = vpop.permute.xlu0 %10926  ;;  %v2393_v61 = vadd.f32 %v14370_v13, %v2392_v39  ;;  %v2394_v20 = vpop.f32.mrb[3].mxu1  ;;  %v10828_v39 = vunpack.i.l.bf16 %v14233_v49  ;;  %v18646_v27 = vld [vmem:[#allocation36_spill] sm:$0xff] }
 0x2f7   : > { %v14390_v43 = vpop.permute.xlu1 %10936  ;;  %v10323_v19 = vunpack.i.l.bf16 %v18646_v27 }
 0x2f8   : > { %11226 = vrot.lane.b32.xlu0 %v13894_v7, %s12285_s25  ;;  %v14395_v18 = vadd.f32 %v13753_v16, %v2393_v61 }
 0x2f9   : > { %11211 = vrot.lane.b32.xlu1 %v11210_v17, %s12285_s25  ;;  %v2397_v11 = vpop.f32.mrb[4].mxu1  ;;  %v4244_v17 = vld [vmem:[%s18153_s5 + $0x108] sm:$0xff] }
 0x2fa   : > { %18573 = vst [vmem:[#allocation122_spill] sm:$0xff] %v14395_v18  ;;  %v14398_v51 = vpop.permute.xlu0 %10931  ;;  %v2398_v58 = vadd.f32 %v14370_v13, %v2397_v11  ;;  %v2399_v7 = vpop.f32.mrb[5].mxu1  ;;  %v3218_v11 = vld [vmem:[#allocation2 + $0x230] sm:$0xff] }
 0x2fb   : > { %v14400_v9 = vpop.permute.xlu1 %10941 }
 0x2fc   : > { %11236 = vrot.lane.b32.xlu0 %v14046_v23, %s12285_s25  ;;  %v14407_v16 = vadd.f32 %v13780_v41, %v2398_v58  ;;  %v4243_v41 = vld [vmem:[%s18153_s5 + $0x100] sm:$0xff] }
 0x2fd   : > { %11221 = vrot.lane.b32.xlu1 %v11220_v35, %s12285_s25  ;;  %v2402_v38 = vpop.f32.mrb[6].mxu1  ;;  %v14425_v35 = vpack.c.bf16 %v4244_v17, %v4243_v41  ;;  %v18579_v41 = vld [vmem:[#allocation7_spill] sm:$0xff]  ;;  %v18580_v17 = vld [vmem:[#allocation70_spill] sm:$0xff] }
 0x2fe   : > { %18574 = vst [vmem:[#allocation123_spill] sm:$0xff] %v14407_v16  ;;  %v10947_v56 = vpop.permute.xlu0 %10946  ;;  %v2403_v23 = vadd.f32 %v14370_v13, %v2402_v38  ;;  %v2404_v20 = vpop.f32.mrb[7].mxu1  ;;  %v2964_v16 = vld [vmem:[#allocation2 + $0xf] sm:$0xff] }
 0x2ff   : > { %v14410_v8 = vpop.permute.xlu1 %10966  ;;  %v10948_v61 = vunpack.i.l.bf16 %v10947_v56  ;;  %v10949_v32 = vunpack.i.h.bf16 %v10947_v56  ;;  %v18578_v20 = vld [vmem:[#allocation80_spill] sm:$0xff]  ;;  %10098 = vmatprep.subr.bf16.mxu1 %v14425_v35 }
 0x300   : > { %18575 = vst [vmem:[#allocation124_spill] sm:$0xff] %v14410_v8  ;;  %11246 = vrot.lane.b32.xlu0 %v11245_v25, %s12285_s25  ;;  %v14429_v58 = vadd.f32 %v13774_v0, %v2403_v23  ;;  %v2110_v57 = vsel %vm385_vm0, %v18578_v20, %v10893_v50  ;;  %v2012_v0 = vsel %vm385_vm0, %v18580_v17, %v10828_v39  ;;  %v10878_v17 = vunpack.i.l.bf16 %v14315_v59 }
 0x301   : > { %11231 = vrot.lane.b32.xlu1 %v11230_v28, %s12285_s25  ;;  %v10829_v28 = vunpack.i.h.bf16 %v14233_v49  ;;  %v2142_v56 = vsel %vm2020_vm1, %v2110_v57, %v10948_v61  ;;  %v11250_v23 = vpack.i.bf16 %v3218_v11, %v3217_v53  ;;  %v2045_v20 = vsel %vm2020_vm1, %v2012_v0, %v10833_v63  ;;  %v18583_v53 = vld [vmem:[#allocation8_spill] sm:$0xff]  ;;  %v18584_v63 = vld [vmem:[#allocation73_spill] sm:$0xff] }
 0x302   : > { %18576 = vst [vmem:[#allocation125_spill] sm:$0xff] %v14429_v58  ;;  %v10952_v7 = vpop.permute.xlu0 %10951  ;;  %v18581_v58 = vld [vmem:[#allocation83_spill] sm:$0xff]  ;;  %v2078_v39 = vsel %vm2053_vm2, %v2045_v20, %v10888_v42  ;;  %v18589_v0 = vld [vmem:[#allocation9_spill] sm:$0xff] }
 0x303   : > { %v10954_v40 = vunpack.i.h.bf16 %v10952_v7  ;;  %v10953_v25 = vunpack.i.l.bf16 %v10952_v7  ;;  %v14431_v38 = vpop.permute.xlu1 %10971  ;;  %v10834_v7 = vunpack.i.h.bf16 %v14247_v24  ;;  %v2111_v49 = vsel %vm385_vm0, %v18581_v58, %v10894_v21  ;;  %v18586_v58 = vld [vmem:[#allocation10_spill] sm:$0xff] }
 0x304   : > { %18577 = vst [vmem:[#allocation126_spill] sm:$0xff] %v14431_v38  ;;  %4832 = vrot.lane.b32.xlu0 %v18579_v41, %s12283_s13  ;;  %v10889_v41 = vunpack.i.h.bf16 %v14334_v12  ;;  %v2143_v61 = vsel %vm2020_vm1, %v2111_v49, %v10949_v32  ;;  %v2013_v21 = vsel %vm385_vm0, %v18584_v63, %v10829_v28  ;;  %v10943_v28 = vunpack.i.l.bf16 %v14400_v9 }
 0x305   : > { %11241 = vrot.lane.b32.xlu1 %v14116_v14, %s12285_s25  ;;  %v2174_v50 = vsel %vm2053_vm2, %v2142_v56, %v10953_v25  ;;  %v2175_v14 = vsel %vm2053_vm2, %v2143_v61, %v10954_v40  ;;  %v2046_v12 = vsel %vm2020_vm1, %v2013_v21, %v10834_v7  ;;  %v18587_v40 = vld [vmem:[#allocation6_spill] sm:$0xff]  ;;  %v18588_v56 = vld [vmem:[#allocation12_spill] sm:$0xff]  ;;  %v10944_v7 = vunpack.i.h.bf16 %v14400_v9 }
 0x306   : > { %v14450_v18 = vpop.permute.xlu0 %10956  ;;  %2505 = vmatprep.mubr.f32.mxu1 %v2174_v50  ;;  %v2079_v42 = vsel %vm2053_vm2, %v2046_v12, %v10889_v41  ;;  %v10938_v49 = vunpack.i.l.bf16 %v14390_v43  ;;  %v10879_v9 = vunpack.i.h.bf16 %v14315_v59 }
 0x307   : > { %18582 = vst [vmem:[#allocation80_spill] sm:$0xff] %v14450_v18  ;;  %v14454_v24 = vpop.permute.xlu1 %10976  ;;  %2506 = vmatmul.mubr.f32.gmra.mrb[48].mxu1 %v2078_v39 }
 0x308   : > { %4836 = vrot.lane.b32.xlu0 %v18583_v53, %s12283_s13  ;;  %2510 = vmatprep.mubr.f32.mxu1 %v2175_v14 }
 0x309   : > { %11251 = vrot.lane.b32.xlu1 %v11250_v23, %s12285_s25  ;;  %v10883_v23 = vunpack.i.l.bf16 %v14329_v36 }
 0x30a   : > { %v14463_v11 = vpop.permute.xlu0 %10961 }
 0x30b   : > { %18585 = vst [vmem:[#allocation70_spill] sm:$0xff] %v14463_v11  ;;  %v14466_v32 = vpop.permute.xlu1 %10981  ;;  %2511 = vmatmul.mubr.f32.gmra.mrb[50].mxu1 %v2079_v42  ;;  %v18590_v42 = vld [vmem:[#allocation14_spill] sm:$0xff]  ;;  %v3091_v11 = vld [vmem:[#allocation2 + $0x28] sm:$0xff] }
 0x30c   : > { %4840 = vrot.lane.b32.xlu0 %v18586_v58, %s12283_s13  ;;  %v18593_v58 = vld [vmem:[#allocation11_spill] sm:$0xff] }
 0x30d   : > { %4834 = vrot.lane.b32.xlu1 %v18587_v40, %s12283_s13  ;;  %v18591_v40 = vld [vmem:[#allocation88_spill] sm:$0xff] }
 0x30e   : > { %v14472_v25 = vpop.permute.xlu0 %10986 }
 0x30f   : > { %v10997_v57 = vpop.permute.xlu1 %10996 }
 0x310   : > { %4844 = vrot.lane.b32.xlu0 %v18588_v56, %s12283_s13  ;;  %v10998_v41 = vunpack.i.l.bf16 %v10997_v57  ;;  %v10999_v39 = vunpack.i.h.bf16 %v10997_v57 }
 0x311   : > { %4838 = vrot.lane.b32.xlu1 %v18589_v0, %s12283_s13  ;;  %v2407_v20 = vpop.f32.mrb[8].mxu1  ;;  %v2112_v0 = vsel %vm385_vm0, %v18591_v40, %v10943_v28  ;;  %v18596_v28 = vld [vmem:[#allocation91_spill] sm:$0xff] }
 0x312   : > { %v14482_v50 = vpop.permute.xlu0 %10991  ;;  %v2408_v61 = vadd.f32 %v14370_v13, %v2407_v20  ;;  %v2409_v63 = vpop.f32.mrb[9].mxu1  ;;  %v2144_v57 = vsel %vm2020_vm1, %v2112_v0, %v10998_v41  ;;  %v18594_v20 = vld [vmem:[#allocation79_spill] sm:$0xff] }
 0x313   : > { %v11002_v14 = vpop.permute.xlu1 %11001  ;;  %v2014_v63 = vsel %vm385_vm0, %v18594_v20, %v10878_v17  ;;  %v18598_v20 = vld [vmem:[#allocation16_spill] sm:$0xff] }
 0x314   : > { %v11004_v21 = vunpack.i.h.bf16 %v11002_v14  ;;  %v11003_v12 = vunpack.i.l.bf16 %v11002_v14  ;;  %4848 = vrot.lane.b32.xlu0 %v18590_v42, %s12283_s13  ;;  %v14492_v56 = vadd.f32 %v13819_v45, %v2408_v61  ;;  %v10884_v14 = vunpack.i.h.bf16 %v14329_v36 }
 0x315   : > { %4842 = vrot.lane.b32.xlu1 %v18593_v58, %s12283_s13  ;;  %v2412_v42 = vpop.f32.mrb[10].mxu1  ;;  %v2047_v59 = vsel %vm2020_vm1, %v2014_v63, %v10883_v23  ;;  %v2113_v45 = vsel %vm385_vm0, %v18596_v28, %v10944_v7  ;;  %v10939_v61 = vunpack.i.h.bf16 %v14390_v43  ;;  %v18600_v43 = vld [vmem:[#allocation13_spill] sm:$0xff]  ;;  %v18604_v28 = vld [vmem:[#allocation15_spill] sm:$0xff] }
 0x316   : > { %18592 = vst [vmem:[#allocation83_spill] sm:$0xff] %v14492_v56  ;;  %v14500_v53 = vpop.permute.xlu0 %11016  ;;  %v2176_v40 = vsel %vm2053_vm2, %v2144_v57, %v11003_v12  ;;  %v2413_v58 = vadd.f32 %v14370_v13, %v2412_v42  ;;  %v2414_v0 = vpop.f32.mrb[11].mxu1  ;;  %v2080_v36 = vsel %vm2053_vm2, %v2047_v59, %v10938_v49  ;;  %v2145_v17 = vsel %vm2020_vm1, %v2113_v45, %v10999_v39  ;;  %v18601_v12 = vld [vmem:[#allocation82_spill] sm:$0xff] }
 0x317   : > { %18595 = vst [vmem:[#allocation73_spill] sm:$0xff] %v14500_v53  ;;  %v14508_v41 = vpop.permute.xlu1 %11006  ;;  %2515 = vmatprep.mubr.f32.mxu1 %v2176_v40  ;;  %v2177_v23 = vsel %vm2053_vm2, %v2145_v17, %v11004_v21  ;;  %v2015_v42 = vsel %vm385_vm0, %v18601_v12, %v10879_v9  ;;  %v10993_v39 = vunpack.i.l.bf16 %v14482_v50  ;;  %v10928_v21 = vunpack.i.l.bf16 %v14387_v4 }
 0x318   : > { %18597 = vst [vmem:[#allocation88_spill] sm:$0xff] %v14508_v41  ;;  %4852 = vrot.lane.b32.xlu0 %v18598_v20, %s12283_s13  ;;  %2516 = vmatmul.mubr.f32.gmra.mrb[52].mxu1 %v2080_v36  ;;  %v14516_v7 = vadd.f32 %v13816_v15, %v2413_v58  ;;  %v2048_v49 = vsel %vm2020_vm1, %v2015_v42, %v10884_v14  ;;  %v18603_v58 = vld [vmem:[#allocation18_spill] sm:$0xff]  ;;  %v10933_v59 = vunpack.i.l.bf16 %v14398_v51  ;;  %v10994_v9 = vunpack.i.h.bf16 %v14482_v50  ;;  %v18605_v42 = vld [vmem:[#allocation97_spill] sm:$0xff]  ;;  %v18606_v50 = vld [vmem:[#allocation20_spill] sm:$0xff] }
 0x319   : > { %4846 = vrot.lane.b32.xlu1 %v18600_v43, %s12283_s13  ;;  %2520 = vmatprep.mubr.f32.mxu1 %v2177_v23  ;;  %v2081_v40 = vsel %vm2053_vm2, %v2048_v49, %v10939_v61  ;;  %v10929_v14 = vunpack.i.h.bf16 %v14387_v4  ;;  %v10988_v45 = vunpack.i.l.bf16 %v14472_v25  ;;  %v10934_v36 = vunpack.i.h.bf16 %v14398_v51  ;;  %v18609_v43 = vld [vmem:[#allocation100_spill] sm:$0xff] }
 0x31a   : > { %18599 = vst [vmem:[#allocation79_spill] sm:$0xff] %v14516_v7  ;;  %v11032_v57 = vpop.permute.xlu0 %11031  ;;  %v2114_v49 = vsel %vm385_vm0, %v18605_v42, %v10993_v39  ;;  %v2115_v39 = vsel %vm385_vm0, %v18609_v43, %v10994_v9  ;;  %v10984_v20 = vunpack.i.h.bf16 %v14466_v32 }
 0x31b   : > { %v14524_v63 = vpop.permute.xlu1 %11011  ;;  %v11033_v15 = vunpack.i.l.bf16 %v11032_v57  ;;  %v11034_v0 = vunpack.i.h.bf16 %v11032_v57  ;;  %v10989_v57 = vunpack.i.h.bf16 %v14472_v25 }
 0x31c   : > { %18602 = vst [vmem:[#allocation91_spill] sm:$0xff] %v14524_v63  ;;  %4856 = vrot.lane.b32.xlu0 %v18603_v58, %s12283_s13  ;;  %2521 = vmatmul.mubr.f32.gmra.mrb[54].mxu1 %v2081_v40  ;;  %v18608_v58 = vld [vmem:[#allocation17_spill] sm:$0xff] }
 0x31d   : > { %4850 = vrot.lane.b32.xlu1 %v18604_v28, %s12283_s13  ;;  %v2146_v40 = vsel %vm2020_vm1, %v2114_v49, %v11033_v15  ;;  %v18607_v28 = vld [vmem:[#allocation87_spill] sm:$0xff]  ;;  %v2147_v49 = vsel %vm2020_vm1, %v2115_v39, %v11034_v0  ;;  %v10983_v39 = vunpack.i.l.bf16 %v14466_v32 }
 0x31e   : > { %v11037_v61 = vpop.permute.xlu0 %11036  ;;  %v2016_v4 = vsel %vm385_vm0, %v18607_v28, %v10928_v21  ;;  %v18610_v21 = vld [vmem:[#allocation90_spill] sm:$0xff] }
 0x31f   : > { %v11039_v17 = vunpack.i.h.bf16 %v11037_v61  ;;  %v11038_v23 = vunpack.i.l.bf16 %v11037_v61  ;;  %v14537_v12 = vpop.permute.xlu1 %11021  ;;  %v2049_v61 = vsel %vm2020_vm1, %v2016_v4, %v10933_v59  ;;  %v2017_v25 = vsel %vm385_vm0, %v18610_v21, %v10929_v14  ;;  %v18615_v21 = vld [vmem:[#allocation105_spill] sm:$0xff] }
 0x320   : > { %4860 = vrot.lane.b32.xlu0 %v18606_v50, %s12283_s13  ;;  %v2082_v15 = vsel %vm2053_vm2, %v2049_v61, %v10988_v45  ;;  %v2050_v59 = vsel %vm2020_vm1, %v2017_v25, %v10934_v36  ;;  %v18611_v45 = vld [vmem:[#allocation22_spill] sm:$0xff] }
 0x321   : > { %4854 = vrot.lane.b32.xlu1 %v18608_v58, %s12283_s13  ;;  %v2178_v51 = vsel %vm2053_vm2, %v2146_v40, %v11038_v23  ;;  %v2417_v50 = vpop.f32.mrb[12].mxu1  ;;  %v2179_v23 = vsel %vm2053_vm2, %v2147_v49, %v11039_v17  ;;  %v10978_v40 = vunpack.i.l.bf16 %v14454_v24  ;;  %v18613_v17 = vld [vmem:[#allocation19_spill] sm:$0xff]  ;;  %v2083_v36 = vsel %vm2053_vm2, %v2050_v59, %v10989_v57 }
 0x322   : > { %v14553_v42 = vpop.permute.xlu0 %11041  ;;  %2525 = vmatprep.mubr.f32.mxu1 %v2178_v51  ;;  %v2418_v4 = vadd.f32 %v14370_v13, %v2417_v50  ;;  %v2419_v0 = vpop.f32.mrb[13].mxu1  ;;  %v18612_v51 = vld [vmem:[#allocation34_spill] sm:$0xff]  ;;  %v10979_v59 = vunpack.i.h.bf16 %v14454_v24 }
 0x323   : > { %v11027_v28 = vpop.permute.xlu1 %11026  ;;  %2526 = vmatmul.mubr.f32.gmra.mrb[56].mxu1 %v2082_v15  ;;  %v10309_v14 = vunpack.i.h.bf16 %v18612_v51  ;;  %v10308_v61 = vunpack.i.l.bf16 %v18612_v51  ;;  %v11023_v15 = vunpack.i.l.bf16 %v14537_v12  ;;  %v18617_v0 = vld [vmem:[#allocation37_spill] sm:$0xff] }
 0x324   : > { %v11029_v43 = vunpack.i.h.bf16 %v11027_v28  ;;  %v11028_v9 = vunpack.i.l.bf16 %v11027_v28  ;;  %4864 = vrot.lane.b32.xlu0 %v18611_v45, %s12283_s13  ;;  %2530 = vmatprep.mubr.f32.mxu1 %v2179_v23  ;;  %v14573_v50 = vadd.f32 %v13838_v3, %v2418_v4  ;;  %v18616_v28 = vld [vmem:[#allocation108_spill] sm:$0xff]  ;;  %v10313_v51 = vunpack.i.l.bf16 %v18617_v0 }
 0x325   : > { %4858 = vrot.lane.b32.xlu1 %v18613_v17, %s12283_s13  ;;  %v2422_v17 = vpop.f32.mrb[14].mxu1  ;;  %v18619_v4 = vld [vmem:[#allocation24_spill] sm:$0xff] }
 0x326   : > { %18614 = vst [vmem:[#allocation82_spill] sm:$0xff] %v14573_v50  ;;  %v14575_v49 = vpop.permute.xlu0 %11046  ;;  %v2116_v25 = vsel %vm385_vm0, %v18615_v21, %v11028_v9  ;;  %v2117_v23 = vsel %vm385_vm0, %v18616_v28, %v11029_v43  ;;  %v2423_v3 = vadd.f32 %v14370_v13, %v2422_v17  ;;  %v2424_v58 = vpop.f32.mrb[15].mxu1  ;;  %v18620_v9 = vld [vmem:[#allocation96_spill] sm:$0xff]  ;;  %v10314_v28 = vunpack.i.h.bf16 %v18617_v0 }
 0x327   : > { %v14582_v45 = vpop.permute.xlu1 %11051  ;;  %2531 = vmatmul.mubr.f32.gmra.mrb[58].mxu1 %v2083_v36  ;;  %v2148_v57 = vsel %vm2020_vm1, %v2116_v25, %v10308_v61  ;;  %v2018_v21 = vsel %vm385_vm0, %v18620_v9, %v10978_v40  ;;  %v2149_v43 = vsel %vm2020_vm1, %v2117_v23, %v10309_v14  ;;  %v18621_v36 = vld [vmem:[#allocation21_spill] sm:$0xff]  ;;  %v11024_v17 = vunpack.i.h.bf16 %v14537_v12  ;;  %v18623_v23 = vld [vmem:[#allocation26_spill] sm:$0xff] }
 0x328   : > { %18618 = vst [vmem:[#allocation97_spill] sm:$0xff] %v14582_v45  ;;  %4868 = vrot.lane.b32.xlu0 %v18619_v4, %s12283_s13  ;;  %v2180_v24 = vsel %vm2053_vm2, %v2148_v57, %v10313_v51  ;;  %v2051_v61 = vsel %vm2020_vm1, %v2018_v21, %v10983_v39  ;;  %v14600_v58 = vadd.f32 %v13834_v33, %v2423_v3  ;;  %v18624_v39 = vld [vmem:[#allocation99_spill] sm:$0xff]  ;;  %v18627_v3 = vld [vmem:[#allocation28_spill] sm:$0xff]  ;;  %v18628_v9 = vld [vmem:[#allocation25_spill] sm:$0xff]  ;;  %v10324_v45 = vunpack.i.h.bf16 %v18646_v27 }
 0x329   : > { %4862 = vrot.lane.b32.xlu1 %v18621_v36, %s12283_s13  ;;  %2535 = vmatprep.mubr.f32.mxu1 %v2180_v24  ;;  %v2084_v14 = vsel %vm2053_vm2, %v2051_v61, %v11023_v15  ;;  %v2181_v32 = vsel %vm2053_vm2, %v2149_v43, %v10314_v28  ;;  %v2019_v12 = vsel %vm385_vm0, %v18624_v39, %v10979_v59  ;;  %v18625_v33 = vld [vmem:[#allocation23_spill] sm:$0xff]  ;;  %v18630_v43 = vld [vmem:[#allocation30_spill] sm:$0xff]  ;;  %v18632_v61 = vld [vmem:[#allocation32_spill] sm:$0xff] }
 0x32a   : > { %18622 = vst [vmem:[#allocation87_spill] sm:$0xff] %v14600_v58  ;;  %v14602_v40 = vpop.permute.xlu0 %11066  ;;  %v2052_v0 = vsel %vm2020_vm1, %v2019_v12, %v10984_v20  ;;  %v18631_v20 = vld [vmem:[#allocation27_spill] sm:$0xff]  ;;  %v18643_v58 = vld [vmem:[#allocation33_spill] sm:$0xff] }
 0x32b   : > { %v14605_v25 = vpop.permute.xlu1 %11056  ;;  %2536 = vmatmul.mubr.f32.gmra.mrb[60].mxu1 %v2084_v14  ;;  %v2085_v15 = vsel %vm2053_vm2, %v2052_v0, %v11024_v17  ;;  %v18633_v17 = vld [vmem:[#allocation29_spill] sm:$0xff]  ;;  %v10318_v7 = vunpack.i.l.bf16 %v18643_v58 }
 0x32c   : > { %4872 = vrot.lane.b32.xlu0 %v18623_v23, %s12283_s13  ;;  %2540 = vmatprep.mubr.f32.mxu1 %v2181_v32 }
 0x32d   : > { %4866 = vrot.lane.b32.xlu1 %v18625_v33, %s12283_s13 }
 0x32e   : > { %v14615_v51 = vpop.permute.xlu0 %11071 }
 0x32f   : > { %18626 = vst [vmem:[#allocation100_spill] sm:$0xff] %v14615_v51  ;;  %v14618_v57 = vpop.permute.xlu1 %11061  ;;  %2541 = vmatmul.mubr.f32.gmra.mrb[62].mxu1 %v2085_v15  ;;  %v18634_v15 = vld [vmem:[#allocation38_spill] sm:$0xff] }
 0x330   : > { %4876 = vrot.lane.b32.xlu0 %v18627_v3, %s12283_s13  ;;  %v18651_v51 = vld [vmem:[#allocation114_spill] sm:$0xff] }
 0x331   : > { %4870 = vrot.lane.b32.xlu1 %v18628_v9, %s12283_s13  ;;  %v4993_v9 = vld [vmem:[#allocation2 + $0x10] sm:$0xff]  ;;  %v10474_v8 = vunpack.i.h.bf16 %v18651_v51  ;;  %v10473_v6 = vunpack.i.l.bf16 %v18651_v51 }
 0x332   : > { %v14624_v21 = vpop.permute.xlu0 %11081 }
 0x333   : > { %v14626_v59 = vpop.permute.xlu1 %11076 }
 0x334   : > { %18629 = vst [vmem:[#allocation90_spill] sm:$0xff] %v14626_v59  ;;  %4880 = vrot.lane.b32.xlu0 %v18630_v43, %s12283_s13  ;;  %v18636_v43 = vld [vmem:[#allocation31_spill] sm:$0xff]  ;;  %v10419_v59 = vunpack.i.h.bf16 %v13546_v46 }
 0x335   : > { %4874 = vrot.lane.b32.xlu1 %v18631_v20, %s12283_s13 }
 0x336   : > { %v14632_v28 = vpop.permute.xlu0 %11096 }
 0x337   : > { %v14634_v24 = vpop.permute.xlu1 %11086  ;;  %v11098_v27 = vunpack.i.l.bf16 %v14632_v28 }
 0x338   : > { %4884 = vrot.lane.b32.xlu0 %v18632_v61, %s12283_s13  ;;  %v4992_v61 = vld [vmem:[#allocation2 + $0x8] sm:$0xff] }
 0x339   : > { %4878 = vrot.lane.b32.xlu1 %v18633_v17, %s12283_s13  ;;  %v2427_v32 = vpop.f32.mrb[16].mxu1 }
 0x33a   : > { %v14640_v14 = vpop.permute.xlu0 %11106  ;;  %v2428_v39 = vadd.f32 %v14370_v13, %v2427_v32  ;;  %v2429_v0 = vpop.f32.mrb[17].mxu1 }
 0x33b   : > { %v14643_v12 = vpop.permute.xlu1 %11091  ;;  %v18637_v0 = vld [vmem:[#allocation40_spill] sm:$0xff] }
 0x33c   : > { %4888 = vrot.lane.b32.xlu0 %v18634_v15, %s12283_s13  ;;  %v14648_v20 = vadd.f32 %v13870_v44, %v2428_v39  ;;  %v11255_v15 = vpack.i.bf16 %v4993_v9, %v4992_v61  ;;  %v18639_v39 = vld [vmem:[#allocation35_spill] sm:$0xff] }
 0x33d   : > { %4882 = vrot.lane.b32.xlu1 %v18636_v43, %s12283_s13  ;;  %v2432_v3 = vpop.f32.mrb[18].mxu1  ;;  %v6241_v9 = vld [vmem:[%s18155_s7 + $0x108] sm:$0xff] }
 0x33e   : > { %18635 = vst [vmem:[#allocation34_spill] sm:$0xff] %v14648_v20  ;;  %v14652_v17 = vpop.permute.xlu0 %11116  ;;  %v2433_v33 = vadd.f32 %v14370_v13, %v2432_v3  ;;  %v2434_v23 = vpop.f32.mrb[19].mxu1  ;;  %v18640_v3 = vld [vmem:[#allocation39_spill] sm:$0xff] }
 0x33f   : > { %v14655_v32 = vpop.permute.xlu1 %11101  ;;  %v2963_v20 = vld [vmem:[#allocation2 + $0x7] sm:$0xff] }
 0x340   : > { %4892 = vrot.lane.b32.xlu0 %v18637_v0, %s12283_s13  ;;  %v14660_v44 = vadd.f32 %v13863_v31, %v2433_v33  ;;  %v6240_v31 = vld [vmem:[%s18155_s7 + $0x100] sm:$0xff]  ;;  %v18641_v33 = vld [vmem:[#allocation41_spill] sm:$0xff]  ;;  %v4019_v34 = vsel %vm385_vm0, %v2963_v20, %v10318_v7  ;;  %v10424_v7 = vunpack.i.h.bf16 %v13562_v54 }
 0x341   : > { %4886 = vrot.lane.b32.xlu1 %v18639_v39, %s12283_s13  ;;  %v4051_v20 = vsel %vm2020_vm1, %v4019_v34, %v10323_v19  ;;  %v6243_v19 = vld [vmem:[%s18155_s7 + $0x118] sm:$0xff]  ;;  %v10414_v34 = vunpack.i.h.bf16 %v13565_v37 }
 0x342   : > { %18638 = vst [vmem:[#allocation105_spill] sm:$0xff] %v14660_v44  ;;  %v14664_v43 = vpop.permute.xlu0 %11126 }
 0x343   : > { %v14666_v36 = vpop.permute.xlu1 %11111 }
 0x344   : > { %11256 = vrot.lane.b32.xlu0 %v11255_v15, %s12283_s13  ;;  %v14685_v15 = vpack.c.bf16 %v6241_v9, %v6240_v31 }
 0x345   : > { %4890 = vrot.lane.b32.xlu1 %v18640_v3, %s12283_s13 }
 0x346   : > { %v14671_v23 = vpop.permute.xlu0 %11136  ;;  %10154 = vmatprep.subr.bf16.mxu0 %v14685_v15 }
 0x347   : > { %v14673_v4 = vpop.permute.xlu1 %11121 }
 0x349   : > { %4894 = vrot.lane.b32.xlu1 %v18641_v33, %s12283_s13  ;;  %v2437_v39 = vpop.f32.mrb[20].mxu1  ;;  %v10319_v33 = vunpack.i.h.bf16 %v18643_v58  ;;  %v10418_v58 = vunpack.i.l.bf16 %v13546_v46  ;;  %v6242_v46 = vld [vmem:[%s18155_s7 + $0x110] sm:$0xff] }
 0x34a   : > { %v14683_v61 = vpop.permute.xlu0 %11146  ;;  %v2438_v0 = vadd.f32 %v14370_v13, %v2437_v39  ;;  %v2439_v44 = vpop.f32.mrb[21].mxu1 }
 0x34b   : > { %18642 = vst [vmem:[#allocation108_spill] sm:$0xff] %v14683_v61  ;;  %v14687_v3 = vpop.permute.xlu1 %11131  ;;  %v4020_v41 = vsel %vm385_vm0, %v2964_v16, %v10319_v33  ;;  %v10413_v16 = vunpack.i.l.bf16 %v13565_v37  ;;  %v11099_v33 = vunpack.i.h.bf16 %v14632_v28  ;;  %v11069_v61 = vunpack.i.h.bf16 %v14602_v40 }
 0x34c   : > { %v14694_v50 = vadd.f32 %v13902_v1, %v2438_v0  ;;  %v10409_v1 = vunpack.i.h.bf16 %v13553_v30  ;;  %v10408_v0 = vunpack.i.l.bf16 %v13553_v30  ;;  %v4083_v30 = vsel %vm2053_vm2, %v4051_v20, %v10418_v58  ;;  %v3092_v20 = vld [vmem:[#allocation2 + $0x30] sm:$0xff] }
 0x34d   : > { %v2442_v9 = vpop.f32.mrb[22].mxu1 }
 0x34e   : > { %18644 = vst [vmem:[#allocation37_spill] sm:$0xff] %v14694_v50  ;;  %v14696_v56 = vpop.permute.xlu0 %11156  ;;  %v2443_v44 = vadd.f32 %v14370_v13, %v2442_v9  ;;  %v2444_v39 = vpop.f32.mrb[23].mxu1  ;;  %v10423_v9 = vunpack.i.l.bf16 %v13562_v54 }
 0x34f   : > { %18645 = vst [vmem:[#allocation96_spill] sm:$0xff] %v14696_v56  ;;  %v14698_v31 = vpop.permute.xlu1 %11141  ;;  %v4116_v56 = vsel %vm385_vm0, %v3092_v20, %v10424_v7 }
 0x350   : > { %v14708_v50 = vadd.f32 %v13898_v5, %v2443_v44  ;;  %v4052_v5 = vsel %vm2020_vm1, %v4020_v41, %v10324_v45  ;;  %v2965_v44 = vld [vmem:[#allocation2 + $0x27] sm:$0xff]  ;;  %v4115_v28 = vsel %vm385_vm0, %v3091_v11, %v10423_v9  ;;  %v10458_v11 = vunpack.i.l.bf16 %v18652_v55 }
 0x351   : > { %v4021_v54 = vsel %vm385_vm0, %v2965_v44, %v10408_v0  ;;  %v18650_v0 = vld [vmem:[#allocation113_spill] sm:$0xff] }
 0x352   : > { %18647 = vst [vmem:[#allocation99_spill] sm:$0xff] %v14708_v50  ;;  %v14710_v63 = vpop.permute.xlu0 %11166  ;;  %v2966_v50 = vld [vmem:[#allocation2 + $0x2f] sm:$0xff]  ;;  %v10469_v44 = vunpack.i.h.bf16 %v18650_v0 }
 0x353   : > { %v14714_v39 = vpop.permute.xlu1 %11151  ;;  %v4022_v18 = vsel %vm385_vm0, %v2966_v50, %v10409_v1  ;;  %v10468_v50 = vunpack.i.l.bf16 %v18650_v0  ;;  %v4147_v1 = vsel %vm2020_vm1, %v4115_v28, %v11098_v27  ;;  %v4148_v0 = vsel %vm2020_vm1, %v4116_v56, %v11099_v33  ;;  %v18653_v28 = vld [vmem:[#allocation116_spill] sm:$0xff] }
 0x354   : > { %18648 = vst [vmem:[#allocation33_spill] sm:$0xff] %v14714_v39  ;;  %v4053_v27 = vsel %vm2020_vm1, %v4021_v54, %v10413_v16  ;;  %v10464_v7 = vunpack.i.h.bf16 %v18653_v28  ;;  %v10463_v20 = vunpack.i.l.bf16 %v18653_v28  ;;  %v3094_v16 = vld [vmem:[#allocation2 + $0x50] sm:$0xff]  ;;  %v11103_v54 = vunpack.i.l.bf16 %v14655_v32 }
 0x355   : > { %v4085_v56 = vsel %vm2053_vm2, %v4053_v27, %v10468_v50  ;;  %v18656_v27 = vld [vmem:[#allocation42_spill] sm:$0xff] }
 0x356   : > { %v11177_v53 = vpop.permute.xlu0 %11176  ;;  %v10523_v28 = vunpack.i.l.bf16 %v18656_v27 }
 0x357   : > { %v11179_v41 = vunpack.i.h.bf16 %v11177_v53  ;;  %v11178_v45 = vunpack.i.l.bf16 %v11177_v53  ;;  %v14733_v58 = vpop.permute.xlu1 %11161  ;;  %v10157_v53 = vpack.c.bf16 %v6243_v19, %v6242_v46  ;;  %v4054_v46 = vsel %vm2020_vm1, %v4022_v18, %v10414_v34  ;;  %v18654_v19 = vld [vmem:[#allocation68_spill] sm:$0xff] }
 0x358   : > { %18649 = vst [vmem:[#allocation36_spill] sm:$0xff] %v14733_v58  ;;  %v10459_v58 = vunpack.i.h.bf16 %v18652_v55  ;;  %v10518_v55 = vunpack.i.l.bf16 %v18654_v19  ;;  %v14759_v33 = vsel %vm2053_vm2, %v4054_v46, %v10469_v44  ;;  %v4118_v34 = vsel %vm385_vm0, %v3094_v16, %v10474_v8 }
 0x359   : > { %v4179_v37 = vsel %vm2053_vm2, %v4147_v1, %v11178_v45  ;;  %v4180_v51 = vsel %vm2053_vm2, %v4148_v0, %v11179_v41  ;;  %v4084_v45 = vsel %vm2053_vm2, %v4052_v5, %v10419_v59  ;;  %v3093_v1 = vld [vmem:[#allocation2 + $0x48] sm:$0xff]  ;;  %v18655_v59 = vld [vmem:[#allocation69_spill] sm:$0xff] }
 0x35a   : > { %v14745_v9 = vpop.permute.xlu0 %11186  ;;  %4414 = vmatprep.mubr.f32.mxu0 %v4179_v37  ;;  %v4117_v18 = vsel %vm385_vm0, %v3093_v1, %v10473_v6  ;;  %v2967_v41 = vld [vmem:[#allocation2 + $0x47] sm:$0xff]  ;;  %v2968_v37 = vld [vmem:[#allocation2 + $0x4f] sm:$0xff]  ;;  %v10509_v5 = vunpack.i.h.bf16 %v18655_v59  ;;  %v10508_v50 = vunpack.i.l.bf16 %v18655_v59 }
 0x35b   : > { %v14751_v39 = vpop.permute.xlu1 %11171  ;;  %4415 = vmatmul.mubr.f32.vlgmr.msra.gmra.mrb[64].mxu0 %v4083_v30  ;;  %v10519_v30 = vunpack.i.h.bf16 %v18654_v19  ;;  %v4023_v44 = vsel %vm385_vm0, %v2967_v41, %v10458_v11  ;;  %v10524_v19 = vunpack.i.h.bf16 %v18656_v27  ;;  %v18657_v11 = vld [vmem:[#allocation46_spill] sm:$0xff]  ;;  %v3095_v27 = vld [vmem:[#allocation2 + $0x68] sm:$0xff] }
 0x35c   : > { %4419 = vmatprep.mubr.f32.mxu0 %v4180_v51  ;;  %10156 = vmatpush3.bf16.msra.mxu0 %v14685_v15  ;;  %v4024_v15 = vsel %vm385_vm0, %v2968_v37, %v10459_v58  ;;  %v11104_v51 = vunpack.i.h.bf16 %v14655_v32  ;;  %v4055_v8 = vsel %vm2020_vm1, %v4023_v44, %v10463_v20  ;;  %v10514_v58 = vunpack.i.h.bf16 %v18657_v11  ;;  %v2969_v20 = vld [vmem:[#allocation2 + $0x67] sm:$0xff]  ;;  %v2970_v37 = vld [vmem:[#allocation2 + $0x6f] sm:$0xff] }
 0x35d   : > { %10158 = vmatprep.subr.bf16.mxu0 %v10157_v53  ;;  %v4056_v46 = vsel %vm2020_vm1, %v4024_v15, %v10464_v7  ;;  %v14778_v59 = vsel %vm2053_vm2, %v4055_v8, %v10518_v55  ;;  %v10513_v41 = vunpack.i.l.bf16 %v18657_v11  ;;  %v4149_v32 = vsel %vm2020_vm1, %v4117_v18, %v11103_v54  ;;  %v18658_v7 = vld [vmem:[#allocation43_spill] sm:$0xff] }
 0x35e   : > { %v14768_v0 = vpop.permute.xlu0 %11196  ;;  %v10568_v44 = vunpack.i.l.bf16 %v18658_v7  ;;  %v4026_v8 = vsel %vm385_vm0, %v2970_v37, %v10509_v5  ;;  %v11108_v54 = vunpack.i.l.bf16 %v14640_v14  ;;  %v4150_v11 = vsel %vm2020_vm1, %v4118_v34, %v11104_v51 }
 0x35f   : > { %v11182_v6 = vpop.permute.xlu1 %11181  ;;  %4420 = vmatmul.mubr.f32.gmra.mrb[66].mxu0 %v4084_v45  ;;  %v14784_v45 = vsel %vm2053_vm2, %v4056_v46, %v10519_v30  ;;  %v4119_v38 = vsel %vm385_vm0, %v3095_v27, %v10523_v28  ;;  %v4058_v28 = vsel %vm2020_vm1, %v4026_v8, %v10514_v58 }
 0x360   : > { %v11184_v1 = vunpack.i.h.bf16 %v11182_v6  ;;  %v11183_v16 = vunpack.i.l.bf16 %v11182_v6  ;;  %10160 = vmatpush3.bf16.msra.mxu0 %v10157_v53  ;;  %v4025_v6 = vsel %vm385_vm0, %v2969_v20, %v10508_v50  ;;  %v4120_v50 = vsel %vm385_vm0, %v3096_v22, %v10524_v19  ;;  %v18659_v20 = vld [vmem:[#allocation75_spill] sm:$0xff]  ;;  %v18663_v19 = vld [vmem:[#allocation77_spill] sm:$0xff] }
 0x361   : > { %10161 = vmatprep.subr.bf16.mxu0 %v18525_v48  ;;  %v10573_v37 = vunpack.i.l.bf16 %v18659_v20  ;;  %v4057_v34 = vsel %vm2020_vm1, %v4025_v6, %v10513_v41  ;;  %v10574_v51 = vunpack.i.h.bf16 %v18659_v20  ;;  %v4151_v8 = vsel %vm2020_vm1, %v4119_v38, %v11108_v54  ;;  %v3097_v20 = vld [vmem:[#allocation2 + $0x88] sm:$0xff]  ;;  %v3098_v54 = vld [vmem:[#allocation2 + $0x90] sm:$0xff] }
 0x362   : > { %v14788_v15 = vpop.permute.xlu0 %11206  ;;  %v2447_v55 = vpop.f32.mrb[24].mxu1  ;;  %v4181_v53 = vsel %vm2053_vm2, %v4149_v32, %v11183_v16  ;;  %v10569_v16 = vunpack.i.h.bf16 %v18658_v7  ;;  %v11188_v32 = vunpack.i.l.bf16 %v14745_v9  ;;  %v4182_v5 = vsel %vm2053_vm2, %v4150_v11, %v11184_v1  ;;  %v18662_v7 = vld [vmem:[#allocation76_spill] sm:$0xff] }
 0x363   : > { %v2448_v30 = vadd.f32 %v14370_v13, %v2447_v55  ;;  %v14795_v18 = vpop.permute.xlu1 %11191  ;;  %v2449_v46 = vpop.f32.mrb[25].mxu1  ;;  %4424 = vmatprep.mubr.f32.mxu0 %v4181_v53  ;;  %v18660_v55 = vld [vmem:[#allocation89_spill] sm:$0xff]  ;;  %v10559_v53 = vunpack.i.h.bf16 %v18662_v7  ;;  %v14815_v22 = vsel %vm2053_vm2, %v4057_v34, %v10568_v44  ;;  %v10564_v11 = vunpack.i.h.bf16 %v18663_v19 }
 0x364   : > { %4425 = vmatmul.mubr.f32.gmra.mrb[68].mxu0 %v4085_v56  ;;  %v10558_v56 = vunpack.i.l.bf16 %v18662_v7  ;;  %v11109_v46 = vunpack.i.h.bf16 %v14640_v14  ;;  %v4183_v44 = vsel %vm2053_vm2, %v4151_v8, %v11188_v32  ;;  %v18664_v14 = vld [vmem:[#allocation78_spill] sm:$0xff]  ;;  %v4121_v38 = vsel %vm385_vm0, %v3097_v20, %v10573_v37 }
 0x365   : > { %v14805_v60 = vadd.f32 %v18660_v55, %v2448_v30  ;;  %4429 = vmatprep.mubr.f32.mxu0 %v4182_v5  ;;  %v10563_v30 = vunpack.i.l.bf16 %v18663_v19  ;;  %v11189_v5 = vunpack.i.h.bf16 %v14745_v9  ;;  %v14828_v55 = vsel %vm2053_vm2, %v4058_v28, %v10569_v16  ;;  %v2971_v9 = vld [vmem:[#allocation2 + $0x87] sm:$0xff]  ;;  %v18667_v19 = vld [vmem:[#allocation45_spill] sm:$0xff] }
 0x366   : > { %v14812_v27 = vpop.permute.xlu0 %11216  ;;  %v2452_v1 = vpop.f32.mrb[26].mxu1  ;;  %v10619_v34 = vunpack.i.h.bf16 %v18664_v14  ;;  %v10618_v7 = vunpack.i.l.bf16 %v18664_v14  ;;  %v10623_v32 = vunpack.i.l.bf16 %v18667_v19  ;;  %v4122_v16 = vsel %vm385_vm0, %v3098_v54, %v10574_v51 }
 0x367   : > { %18661 = vst [vmem:[#allocation113_spill] sm:$0xff] %v14805_v60  ;;  %v2453_v41 = vadd.f32 %v14370_v13, %v2452_v1  ;;  %v14820_v6 = vpop.permute.xlu1 %11201  ;;  %v2454_v58 = vpop.f32.mrb[27].mxu1  ;;  %v18665_v1 = vld [vmem:[#allocation49_spill] sm:$0xff]  ;;  %v4027_v28 = vsel %vm385_vm0, %v2971_v9, %v10558_v56  ;;  %v2972_v60 = vld [vmem:[#allocation2 + $0x8f] sm:$0xff]  ;;  %v11113_v14 = vunpack.i.l.bf16 %v14666_v36 }
 0x368   : > { %4430 = vmatmul.mubr.f32.gmra.mrb[70].mxu0 %v14759_v33  ;;  %v10624_v33 = vunpack.i.h.bf16 %v18667_v19  ;;  %v4059_v37 = vsel %vm2020_vm1, %v4027_v28, %v10563_v30  ;;  %v4028_v20 = vsel %vm385_vm0, %v2972_v60, %v10559_v53  ;;  %v11193_v19 = vunpack.i.l.bf16 %v14795_v18  ;;  %v3099_v56 = vld [vmem:[#allocation2 + $0xa8] sm:$0xff]  ;;  %v18670_v9 = vld [vmem:[#allocation84_spill] sm:$0xff]  ;;  %v4246_v30 = vld [vmem:[%s18153_s5 + $0x118] sm:$0xff] }
 0x369   : > { %v14833_v58 = vadd.f32 %v18665_v1, %v2453_v41  ;;  %4434 = vmatprep.mubr.f32.mxu0 %v4183_v44  ;;  %v4152_v44 = vsel %vm2020_vm1, %v4120_v50, %v11109_v46  ;;  %v18669_v1 = vld [vmem:[#allocation50_spill] sm:$0xff]  ;;  %v4060_v54 = vsel %vm2020_vm1, %v4028_v20, %v10564_v11  ;;  %v14856_v50 = vsel %vm2053_vm2, %v4059_v37, %v10618_v7  ;;  %v3100_v60 = vld [vmem:[#allocation2 + $0xb0] sm:$0xff]  ;;  %v18671_v46 = vld [vmem:[#allocation85_spill] sm:$0xff] }
 0x36a   : > { %v14838_v8 = vpop.permute.xlu0 %11226  ;;  %v4184_v51 = vsel %vm2053_vm2, %v4152_v44, %v11189_v5  ;;  %v14859_v53 = vsel %vm2053_vm2, %v4060_v54, %v10619_v34  ;;  %v11083_v5 = vunpack.i.l.bf16 %v14624_v21  ;;  %v4123_v7 = vsel %vm385_vm0, %v3099_v56, %v10623_v32  ;;  %v18673_v34 = vld [vmem:[#allocation52_spill] sm:$0xff] }
 0x36b   : > { %18666 = vst [vmem:[#allocation114_spill] sm:$0xff] %v14833_v58  ;;  %18668 = vst [vmem:[#allocation115_spill] sm:$0xff] %v14838_v8  ;;  %v14843_v41 = vpop.permute.xlu1 %11211  ;;  %v11043_v8 = vunpack.i.l.bf16 %v14553_v42  ;;  %v14873_v44 = vsel %vm385_vm0, %v3100_v60, %v10624_v33  ;;  %v4153_v47 = vsel %vm2020_vm1, %v4121_v38, %v11113_v14  ;;  %v11168_v11 = vunpack.i.l.bf16 %v14710_v63  ;;  %v12215_v60 = vld [vmem:[#allocation2 + $0x1c7] sm:$0xff] }
 0x36c   : > { %4435 = vmatmul.mubr.f32.gmra.mrb[72].mxu0 %v14778_v59  ;;  %v4245_v59 = vld [vmem:[%s18153_s5 + $0x110] sm:$0xff]  ;;  %v11194_v58 = vunpack.i.h.bf16 %v14795_v18  ;;  %v4185_v32 = vsel %vm2053_vm2, %v4153_v47, %v11193_v19  ;;  %v11044_v56 = vunpack.i.h.bf16 %v14553_v42  ;;  %v11084_v20 = vunpack.i.h.bf16 %v14624_v21  ;;  %v3119_v38 = vld [vmem:[#allocation2 + $0x1e8] sm:$0xff] }
 0x36d   : > { %4439 = vmatprep.mubr.f32.mxu0 %v4184_v51  ;;  %v11114_v51 = vunpack.i.h.bf16 %v14666_v36  ;;  %v14885_v33 = vpack.c.bf16 %v4246_v30, %v4245_v59  ;;  %v4047_v37 = vsel %vm385_vm0, %v12215_v60, %v11043_v8  ;;  %v11048_v36 = vunpack.i.l.bf16 %v14575_v49 }
 0x36e   : > { %v14869_v28 = vpop.permute.xlu0 %11236  ;;  %v11049_v14 = vunpack.i.h.bf16 %v14575_v49  ;;  %v11068_v18 = vunpack.i.l.bf16 %v14602_v40  ;;  %v4143_v19 = vsel %vm385_vm0, %v3119_v38, %v11083_v5  ;;  %v11118_v42 = vunpack.i.l.bf16 %v14652_v17  ;;  %v3120_v38 = vld [vmem:[#allocation2 + $0x1f0] sm:$0xff] }
 0x36f   : > { %18672 = vst [vmem:[#allocation116_spill] sm:$0xff] %v14869_v28  ;;  %v14878_v54 = vpop.permute.xlu1 %11221  ;;  %v4154_v21 = vsel %vm2020_vm1, %v4122_v16, %v11114_v51  ;;  %v4175_v5 = vsel %vm2020_vm1, %v4143_v19, %v11168_v11  ;;  %v4144_v16 = vsel %vm385_vm0, %v3120_v38, %v11084_v20  ;;  %v2992_v51 = vld [vmem:[#allocation2 + $0x1cf] sm:$0xff]  ;;  %v11093_v40 = vunpack.i.l.bf16 %v14643_v12 }
 0x370   : > { %4440 = vmatmul.mubr.f32.gmra.mrb[74].mxu0 %v14784_v45  ;;  %v11169_v45 = vunpack.i.h.bf16 %v14710_v63  ;;  %v4186_v63 = vsel %vm2053_vm2, %v4154_v21, %v11194_v58  ;;  %v4048_v11 = vsel %vm385_vm0, %v2992_v51, %v11044_v56  ;;  %v11119_v19 = vunpack.i.h.bf16 %v14652_v17  ;;  %v14925_v56 = vld [vmem:[%s18152_s4] ss:$0 sm:$0xff]  ;;  %v3121_v38 = vld [vmem:[#allocation2 + $0x208] sm:$0xff] }
 0x371   : > { %4444 = vmatprep.mubr.f32.mxu0 %v4185_v32  ;;  %v11198_v32 = vunpack.i.l.bf16 %v14768_v0 }
 0x372   : > { %v11247_v47 = vpop.permute.xlu0 %11246  ;;  %v4176_v58 = vsel %vm2020_vm1, %v4144_v16, %v11169_v45  ;;  %v11174_v16 = vunpack.i.h.bf16 %v14751_v39  ;;  %v4156_v51 = vsel %vm2020_vm1, %v14873_v44, %v11119_v19  ;;  %v3122_v19 = vld [vmem:[#allocation2 + $0x210] sm:$0xff] }
 0x373   : > { %v11249_v59 = vunpack.i.h.bf16 %v11247_v47  ;;  %v11248_v30 = vunpack.i.l.bf16 %v11247_v47  ;;  %v14896_v8 = vpop.permute.xlu1 %11231  ;;  %v2457_v60 = vpop.f32.mrb[28].mxu1 }
 0x374   : > { %18674 = vst [vmem:[#allocation68_spill] sm:$0xff] %v14896_v8  ;;  %v2458_v49 = vadd.f32 %v14370_v13, %v2457_v60  ;;  %v2459_v28 = vpop.f32.mrb[29].mxu1  ;;  %4445 = vmatmul.mubr.f32.gmra.mrb[76].mxu0 %v14815_v22  ;;  %v4079_v8 = vsel %vm2020_vm1, %v4047_v37, %v11048_v36  ;;  %v4155_v36 = vsel %vm2020_vm1, %v4123_v7, %v11118_v42  ;;  %v11058_v7 = vunpack.i.l.bf16 %v14605_v25 }
 0x375   : > { %4449 = vmatprep.mubr.f32.mxu0 %v4186_v63  ;;  %v4207_v47 = vsel %vm2053_vm2, %v4175_v5, %v11248_v30  ;;  %v4111_v22 = vsel %vm2053_vm2, %v4079_v8, %v11068_v18  ;;  %v11199_v18 = vunpack.i.h.bf16 %v14768_v0  ;;  %v4187_v30 = vsel %vm2053_vm2, %v4155_v36, %v11198_v32 }
 0x376   : > { %v14909_v13 = vadd.f32 %v18675_v62, %v2458_v49  ;;  %v4833_v28 = vpop.permute.xlu0 %4832  ;;  %4554 = vmatprep.mubr.f32.mxu1 %v4207_v47  ;;  %v4208_v62 = vsel %vm2053_vm2, %v4176_v58, %v11249_v59  ;;  %v4080_v8 = vsel %vm2020_vm1, %v4048_v11, %v11049_v14  ;;  %v3101_v59 = vld [vmem:[#allocation2 + $0xc8] sm:$0xff]  ;;  %v11173_v0 = vunpack.i.l.bf16 %v14751_v39  ;;  %v18678_v49 = vld [vmem:[#allocation53_spill] sm:$0xff] }
 0x377   : > { %4928 = vst.msk [vmem:[#allocation2 + $0x28] sm:$0xff] %vm385_vm0, %v4833_v28  ;;  %v14917_v37 = vpop.permute.xlu1 %11241  ;;  %v2462_v20 = vpop.f32.mrb[30].mxu1  ;;  %4555 = vmatmul.mubr.f32.vlgmr.msra.gmra.mrb[64].mxu1 %v4111_v22  ;;  %v4112_v42 = vsel %vm2053_vm2, %v4080_v8, %v11069_v61  ;;  %v18677_v60 = vunpack.i.l.bf16 %v18673_v34  ;;  %v11088_v32 = vunpack.i.l.bf16 %v14634_v24  ;;  %v11094_v14 = vunpack.i.h.bf16 %v14643_v12  ;;  %v14945_v61 = vld [vmem:[#allocation2 + $0x49] sm:$0xff] }
 0x378   : > { %18676 = vst [vmem:[#allocation69_spill] sm:$0xff] %v14909_v13  ;;  %v2463_v45 = vadd.f32 %v14925_v56, %v2462_v20  ;;  %v2464_v17 = vpop.f32.mrb[31].mxu1  ;;  %4450 = vmatmul.mubr.f32.gmra.mrb[78].mxu0 %v14828_v55  ;;  %4559 = vmatprep.mubr.f32.mxu1 %v4208_v62  ;;  %v11063_v55 = vunpack.i.l.bf16 %v14618_v57  ;;  %v11123_v47 = vunpack.i.l.bf16 %v14673_v4  ;;  %v4145_v12 = vsel %vm385_vm0, %v3121_v38, %v11093_v40  ;;  %v2993_v20 = vld [vmem:[#allocation2 + $0x1e7] sm:$0xff] }
 0x379   : > { %4454 = vmatprep.mubr.f32.mxu0 %v4187_v30  ;;  %v4125_v21 = vsel %vm385_vm0, %v3101_v59, %v18677_v60  ;;  %10100 = vmatpush3.bf16.msra.mxu1 %v14425_v35  ;;  %v11203_v28 = vunpack.i.l.bf16 %v14820_v6  ;;  %v4188_v11 = vsel %vm2053_vm2, %v4156_v51, %v11199_v18  ;;  %v11059_v39 = vunpack.i.h.bf16 %v14605_v25  ;;  %v14965_v25 = vld [vmem:[#allocation2 + $0x69] sm:$0xff] }
 0x37a   : > { %v14942_v63 = vadd.f32 %v18678_v49, %v2463_v45  ;;  %v4837_v5 = vpop.permute.xlu0 %4836  ;;  %10102 = vmatprep.subr.bf16.mxu1 %v14885_v33  ;;  %v11064_v62 = vunpack.i.h.bf16 %v14618_v57  ;;  %v4177_v44 = vsel %vm2020_vm1, %v4145_v12, %v11173_v0  ;;  %v4049_v40 = vsel %vm385_vm0, %v2993_v20, %v11058_v7  ;;  %v2973_v59 = vld [vmem:[#allocation2 + $0xa7] sm:$0xff]  ;;  %v3102_v49 = vld [vmem:[#allocation2 + $0xd0] sm:$0xff] }
 0x37b   : > { %v11252_v35 = vpop.permute.xlu1 %11251  ;;  %4560 = vmatmul.mubr.f32.gmra.mrb[66].mxu1 %v4112_v42  ;;  %4930 = vst.msk [vmem:[#allocation2 + $0x48] sm:$0xff] %vm385_vm0, %v4837_v5  ;;  %v11089_v36 = vunpack.i.h.bf16 %v14634_v24  ;;  %v4081_v18 = vsel %vm2020_vm1, %v4049_v40, %v11063_v55  ;;  %v4146_v17 = vsel %vm385_vm0, %v3122_v19, %v11094_v14  ;;  %v11124_v57 = vunpack.i.h.bf16 %v14673_v4  ;;  %v18682_v38 = vld [vmem:[#allocation51_spill] sm:$0xff] }
 0x37c   : > { %18679 = vst [vmem:[#allocation42_spill] sm:$0xff] %v14942_v63  ;;  %v11254_v22 = vunpack.i.h.bf16 %v11252_v35  ;;  %v11253_v58 = vunpack.i.l.bf16 %v11252_v35  ;;  %4455 = vmatmul.mubr.f32.gmra.mrb[80].mxu0 %v14856_v50  ;;  %v4113_v8 = vsel %vm2053_vm2, %v4081_v18, %v11088_v32  ;;  %v4178_v24 = vsel %vm2020_vm1, %v4146_v17, %v11174_v16  ;;  %v14993_v12 = vld [vmem:[#allocation2 + $0x89] sm:$0xff]  ;;  %v18686_v18 = vld [vmem:[#allocation54_spill] sm:$0xff] }
 0x37d   : > { %4459 = vmatprep.mubr.f32.mxu0 %v4188_v11  ;;  %10104 = vmatpush3.bf16.msra.mxu1 %v14885_v33  ;;  %v4157_v33 = vsel %vm2020_vm1, %v4125_v21, %v11123_v47  ;;  %v11204_v7 = vunpack.i.h.bf16 %v14820_v6  ;;  %v18680_v42 = vunpack.i.l.bf16 %v18669_v1  ;;  %v2994_v21 = vld [vmem:[#allocation2 + $0x1ef] sm:$0xff]  ;;  %v10609_v55 = vunpack.i.h.bf16 %v18669_v1  ;;  %v5182_v63 = vld [vmem:[#allocation2 + $0x227] sm:$0xff] }
 0x37e   : > { %v4841_v45 = vpop.permute.xlu0 %4840  ;;  %v4209_v50 = vsel %vm2053_vm2, %v4177_v44, %v11253_v58  ;;  %10105 = vmatprep.subr.bf16.mxu1 %v18525_v48  ;;  %v4189_v4 = vsel %vm2053_vm2, %v4157_v33, %v11203_v28  ;;  %v4210_v0 = vsel %vm2053_vm2, %v4178_v24, %v11254_v22  ;;  %v10614_v32 = vunpack.i.h.bf16 %v18670_v9  ;;  %v14995_v28 = vpop.f32.mrb[62].mxu0  ;;  %v2974_v19 = vld [vmem:[#allocation2 + $0xaf] sm:$0xff] }
 0x37f   : > { %v4835_v30 = vpop.permute.xlu1 %4834  ;;  %4564 = vmatprep.mubr.f32.mxu1 %v4209_v50  ;;  %4932 = vst.msk [vmem:[#allocation2 + $0x68] sm:$0xff] %vm385_vm0, %v4841_v45  ;;  %v4029_v60 = vsel %vm385_vm0, %v2973_v59, %v18680_v42  ;;  %v18681_v6 = vunpack.i.l.bf16 %v18670_v9  ;;  %v4050_v14 = vsel %vm385_vm0, %v2994_v21, %v11059_v39  ;;  %v10669_v5 = vunpack.i.h.bf16 %v18671_v46  ;;  %v3103_v50 = vld [vmem:[#allocation2 + $0xe8] sm:$0xff]  ;;  %v18687_v59 = vld [vmem:[#allocation92_spill] sm:$0xff] }
 0x380   : > { %4929 = vst.msk [vmem:[#allocation2 + $0x30] sm:$0xff] %vm385_vm0, %v4835_v30  ;;  %4460 = vmatmul.mubr.f32.gmra.mrb[82].mxu0 %v14859_v53  ;;  %4565 = vmatmul.mubr.f32.gmra.mrb[68].mxu1 %v4113_v8  ;;  %v10723_v47 = vunpack.i.l.bf16 %v18682_v38  ;;  %v4082_v35 = vsel %vm2020_vm1, %v4050_v14, %v11064_v62  ;;  %v18683_v1 = vunpack.i.h.bf16 %v18673_v34  ;;  %v11128_v9 = vunpack.i.l.bf16 %v14664_v43  ;;  %v3220_v62 = vld [vmem:[#allocation2 + $0x51] sm:$0xff]  ;;  %v15004_v34 = vpop.f32.mrb[63].mxu0  ;;  %v15017_v24 = vld [vmem:[#allocation2 + $0xa9] sm:$0xff] }
 0x381   : > { %4464 = vmatprep.mubr.f32.mxu0 %v4189_v4  ;;  %4569 = vmatprep.mubr.f32.mxu1 %v4210_v0  ;;  %v4061_v53 = vsel %vm2020_vm1, %v4029_v60, %v18681_v6  ;;  %v18684_v58 = vunpack.i.l.bf16 %v18671_v46  ;;  %v4114_v20 = vsel %vm2053_vm2, %v4082_v35, %v11089_v36  ;;  %v11208_v44 = vunpack.i.l.bf16 %v14788_v15  ;;  %v18685_v46 = vld [vmem:[#allocation47_spill] sm:$0xff] }
 0x382   : > { %v4845_v16 = vpop.permute.xlu0 %4844  ;;  %v4126_v51 = vsel %vm385_vm0, %v3102_v49, %v18683_v1  ;;  %v10658_v45 = vunpack.i.l.bf16 %v18685_v46  ;;  %v4030_v36 = vsel %vm385_vm0, %v2974_v19, %v10609_v55  ;;  %v10663_v17 = vunpack.i.l.bf16 %v18686_v18  ;;  %v4994_v60 = vld [vmem:[#allocation2 + $0x28] sm:$0xff]  ;;  %v3222_v55 = vld [vmem:[#allocation2 + $0x71] sm:$0xff] }
 0x383   : > { %v4839_v22 = vpop.permute.xlu1 %4838  ;;  %v4093_v11 = vsel %vm2053_vm2, %v4061_v53, %v18684_v58  ;;  %v4158_v39 = vsel %vm2020_vm1, %v4126_v51, %v11124_v57  ;;  %4934 = vst.msk [vmem:[#allocation2 + $0x88] sm:$0xff] %vm385_vm0, %v4845_v16  ;;  %v10724_v57 = vunpack.i.h.bf16 %v18682_v38  ;;  %v4062_v8 = vsel %vm2020_vm1, %v4030_v36, %v10614_v32  ;;  %v2975_v14 = vld [vmem:[#allocation2 + $0xc7] sm:$0xff]  ;;  %v3104_v38 = vld [vmem:[#allocation2 + $0xf0] sm:$0xff] }
 0x384   : > { %4465 = vmatmul.mubr.f32.gmra.mrb[84].mxu0 %v4093_v11  ;;  %4570 = vmatmul.mubr.f32.gmra.mrb[70].mxu1 %v4114_v20  ;;  %v4190_v40 = vsel %vm2053_vm2, %v4158_v39, %v11204_v7  ;;  %4931 = vst.msk [vmem:[#allocation2 + $0x50] sm:$0xff] %vm385_vm0, %v4839_v22  ;;  %v4127_v33 = vsel %vm385_vm0, %v3103_v50, %v10723_v47  ;;  %v10718_v7 = vunpack.i.l.bf16 %v18687_v59  ;;  %v11129_v4 = vunpack.i.h.bf16 %v14664_v43  ;;  %v18688_v47 = vld [vmem:[#allocation55_spill] sm:$0xff] }
 0x385   : > { %4469 = vmatprep.mubr.f32.mxu0 %v4190_v40  ;;  %9801 = vmatprep.mubr.msk.f32.mxu1 %vm385_vm0, %v14945_v61  ;;  %v4094_v61 = vsel %vm2053_vm2, %v4062_v8, %v10669_v5  ;;  %v4159_v42 = vsel %vm2020_vm1, %v4127_v33, %v11128_v9  ;;  %v10659_v32 = vunpack.i.h.bf16 %v18685_v46  ;;  %v11209_v6 = vunpack.i.h.bf16 %v14788_v15  ;;  %v2976_v22 = vld [vmem:[#allocation2 + $0xcf] sm:$0xff] }
 0x386   : > { %v4849_v30 = vpop.permute.xlu0 %4848  ;;  %v4191_v53 = vsel %vm2053_vm2, %v4159_v42, %v11208_v44  ;;  %v10664_v49 = vunpack.i.h.bf16 %v18686_v18  ;;  %v4031_v5 = vsel %vm385_vm0, %v2975_v14, %v10658_v45  ;;  %v10719_v15 = vunpack.i.h.bf16 %v18687_v59  ;;  %v15038_v58 = vld [vmem:[#allocation2 + $0xc9] sm:$0xff]  ;;  %v3224_v46 = vld [vmem:[#allocation2 + $0x91] sm:$0xff] }
 0x387   : > { %v4843_v0 = vpop.permute.xlu1 %4842  ;;  %v4995_v21 = vld [vmem:[#allocation2 + $0x30] sm:$0xff]  ;;  %4936 = vst.msk [vmem:[#allocation2 + $0xa8] sm:$0xff] %vm385_vm0, %v4849_v30  ;;  %v10773_v16 = vunpack.i.l.bf16 %v18688_v47  ;;  %v4063_v51 = vsel %vm2020_vm1, %v4031_v5, %v10663_v17  ;;  %v4128_v9 = vsel %vm385_vm0, %v3104_v38, %v10724_v57  ;;  %v4996_v40 = vld [vmem:[#allocation2 + $0x48] sm:$0xff]  ;;  %v11213_v45 = vunpack.i.l.bf16 %v14843_v41 }
 0x388   : > { %4470 = vmatmul.mubr.f32.gmra.mrb[86].mxu0 %v4094_v61  ;;  %9802 = vmatmul.mubr.msk.f32.vlgmr.msra.gmra.mrb[72].mxu1 %vm385_vm0, %v3220_v62  ;;  %v11260_v43 = vpack.i.bf16 %v4995_v21, %v4994_v60  ;;  %4933 = vst.msk [vmem:[#allocation2 + $0x70] sm:$0xff] %vm385_vm0, %v4843_v0  ;;  %v4095_v62 = vsel %vm2053_vm2, %v4063_v51, %v10718_v7  ;;  %v18689_v17 = vld [vmem:[#allocation56_spill] sm:$0xff]  ;;  %v3105_v59 = vld [vmem:[#allocation2 + $0x108] sm:$0xff]  ;;  %v18692_v7 = vld [vmem:[#allocation58_spill] sm:$0xff]  ;;  %v10774_v0 = vunpack.i.h.bf16 %v18688_v47 }
 0x389   : > { %4474 = vmatprep.mubr.f32.mxu0 %v4191_v53  ;;  %9804 = vmatprep.mubr.msk.f32.mxu1 %vm385_vm0, %v14965_v25  ;;  %v11133_v25 = vunpack.i.l.bf16 %v14687_v3  ;;  %v4160_v44 = vsel %vm2020_vm1, %v4128_v9, %v11129_v4  ;;  %v4032_v18 = vsel %vm385_vm0, %v2976_v22, %v10659_v32  ;;  %v10708_v57 = vunpack.i.l.bf16 %v18689_v17  ;;  %v18690_v30 = vld [vmem:[#allocation104_spill] sm:$0xff]  ;;  %v4998_v47 = vld [vmem:[#allocation2 + $0x68] sm:$0xff]  ;;  %v18694_v22 = vld [vmem:[#allocation98_spill] sm:$0xff] }
 0x38a   : > { %11261 = vrot.lane.b32.xlu1 %v11260_v43, %s12283_s13  ;;  %v4853_v35 = vpop.permute.xlu0 %4852  ;;  %v2467_v1 = vpop.f32.mrb[32].mxu1  ;;  %v4192_v36 = vsel %vm2053_vm2, %v4160_v44, %v11209_v6  ;;  %v4064_v33 = vsel %vm2020_vm1, %v4032_v18, %v10664_v49  ;;  %v10713_v4 = vunpack.i.l.bf16 %v18692_v7  ;;  %v4129_v21 = vsel %vm385_vm0, %v3105_v59, %v10773_v16  ;;  %v2978_v32 = vld [vmem:[#allocation2 + $0xef] sm:$0xff] }
 0x38b   : > { %v2468_v11 = vadd.f32 %v14925_v56, %v2467_v1  ;;  %v4847_v20 = vpop.permute.xlu1 %4846  ;;  %v2469_v39 = vpop.f32.mrb[33].mxu1  ;;  %v4997_v19 = vld [vmem:[#allocation2 + $0x50] sm:$0xff]  ;;  %4938 = vst.msk [vmem:[#allocation2 + $0xc8] sm:$0xff] %vm385_vm0, %v4853_v35  ;;  %v4096_v60 = vsel %vm2053_vm2, %v4064_v33, %v10719_v15  ;;  %v11134_v43 = vunpack.i.h.bf16 %v14687_v3  ;;  %v4161_v38 = vsel %vm2020_vm1, %v4129_v21, %v11133_v25 }
 0x38c   : > { %4475 = vmatmul.mubr.f32.gmra.mrb[88].mxu0 %v4095_v62  ;;  %9805 = vmatmul.mubr.msk.f32.gmra.mrb[74].mxu1 %vm385_vm0, %v3222_v55  ;;  %v11265_v50 = vpack.i.bf16 %v4997_v19, %v4996_v40  ;;  %4935 = vst.msk [vmem:[#allocation2 + $0x90] sm:$0xff] %vm385_vm0, %v4847_v20  ;;  %v2977_v55 = vld [vmem:[#allocation2 + $0xe7] sm:$0xff]  ;;  %v3226_v1 = vld [vmem:[#allocation2 + $0xb1] sm:$0xff]  ;;  %v10709_v15 = vunpack.i.h.bf16 %v18689_v17  ;;  %v11214_v16 = vunpack.i.h.bf16 %v14843_v41  ;;  %v4193_v3 = vsel %vm2053_vm2, %v4161_v38, %v11213_v45 }
 0x38d   : > { %v15052_v8 = vadd.f32 %v18690_v30, %v2468_v11  ;;  %4479 = vmatprep.mubr.f32.mxu0 %v4192_v36  ;;  %9807 = vmatprep.mubr.msk.f32.mxu1 %vm385_vm0, %v14993_v12  ;;  %v15062_v6 = vld [vmem:[#allocation2 + $0xe9] sm:$0xff]  ;;  %v10714_v9 = vunpack.i.h.bf16 %v18692_v7  ;;  %v4033_v11 = vsel %vm385_vm0, %v2977_v55, %v10708_v57  ;;  %v10823_v20 = vunpack.i.l.bf16 %v14219_v10  ;;  %v3228_v30 = vld [vmem:[#allocation2 + $0xd1] sm:$0xff] }
 0x38e   : > { %11266 = vrot.lane.b32.xlu0 %v11265_v50, %s12283_s13  ;;  %v4857_v61 = vpop.permute.xlu0 %4856  ;;  %v2472_v42 = vpop.f32.mrb[34].mxu1  ;;  %v18693_v12 = vld [vmem:[#allocation60_spill] sm:$0xff]  ;;  %v4065_v62 = vsel %vm2020_vm1, %v4033_v11, %v10713_v4  ;;  %v2979_v40 = vld [vmem:[#allocation2 + $0x107] sm:$0xff]  ;;  %v11218_v33 = vunpack.i.l.bf16 %v14812_v27  ;;  %v4034_v4 = vsel %vm385_vm0, %v2978_v32, %v10709_v15  ;;  %v18697_v55 = vld [vmem:[#allocation109_spill] sm:$0xff]  ;;  %v11139_v38 = vunpack.i.h.bf16 %v14671_v23 }
 0x38f   : > { %18691 = vst [vmem:[#allocation46_spill] sm:$0xff] %v15052_v8  ;;  %v10768_v53 = vunpack.i.l.bf16 %v18693_v12  ;;  %v2473_v14 = vadd.f32 %v14925_v56, %v2472_v42  ;;  %v4851_v49 = vpop.permute.xlu1 %4850  ;;  %v2474_v5 = vpop.f32.mrb[35].mxu1  ;;  %v4999_v35 = vld [vmem:[#allocation2 + $0x70] sm:$0xff]  ;;  %4940 = vst.msk [vmem:[#allocation2 + $0xe8] sm:$0xff] %vm385_vm0, %v4857_v61  ;;  %v10769_v45 = vunpack.i.h.bf16 %v18693_v12  ;;  %v5000_v17 = vld [vmem:[#allocation2 + $0x88] sm:$0xff]  ;;  %v4066_v42 = vsel %vm2020_vm1, %v4034_v4, %v10714_v9 }
 0x390   : > { %4480 = vmatmul.mubr.f32.gmra.mrb[90].mxu0 %v4096_v60  ;;  %9808 = vmatmul.mubr.msk.f32.gmra.mrb[76].mxu1 %vm385_vm0, %v3224_v46  ;;  %v11270_v51 = vpack.i.bf16 %v4999_v35, %v4998_v47  ;;  %4937 = vst.msk [vmem:[#allocation2 + $0xb0] sm:$0xff] %vm385_vm0, %v4851_v49  ;;  %v3106_v41 = vld [vmem:[#allocation2 + $0x110] sm:$0xff]  ;;  %v3107_v60 = vld [vmem:[#allocation2 + $0x128] sm:$0xff]  ;;  %v10763_v12 = vunpack.i.l.bf16 %v18697_v55 }
 0x391   : > { %v15076_v25 = vadd.f32 %v18694_v22, %v2473_v14  ;;  %4484 = vmatprep.mubr.f32.mxu0 %v4193_v3  ;;  %9810 = vmatprep.mubr.msk.f32.mxu1 %vm385_vm0, %v15017_v24  ;;  %v4130_v44 = vsel %vm385_vm0, %v3106_v41, %v10774_v0  ;;  %v15085_v19 = vld [vmem:[#allocation2 + $0x109] sm:$0xff]  ;;  %v11138_v24 = vunpack.i.l.bf16 %v14671_v23  ;;  %v4097_v50 = vsel %vm2053_vm2, %v4065_v62, %v10768_v53  ;;  %v18696_v0 = vld [vmem:[#allocation106_spill] sm:$0xff] }
 0x392   : > { %11271 = vrot.lane.b32.xlu1 %v11270_v51, %s12283_s13  ;;  %v4861_v39 = vpop.permute.xlu0 %4860  ;;  %v2980_v46 = vld [vmem:[#allocation2 + $0x10f] sm:$0xff]  ;;  %v4162_v18 = vsel %vm2020_vm1, %v4130_v44, %v11134_v43  ;;  %v10758_v61 = vunpack.i.l.bf16 %v18696_v0  ;;  %v10759_v21 = vunpack.i.h.bf16 %v18696_v0  ;;  %v10824_v53 = vunpack.i.h.bf16 %v14219_v10  ;;  %v15108_v49 = vld [vmem:[#allocation2 + $0x127] sm:$0xff] }
 0x393   : > { %18695 = vst [vmem:[#allocation43_spill] sm:$0xff] %v15076_v25  ;;  %v4855_v36 = vpop.permute.xlu1 %4854  ;;  %v5001_v57 = vld [vmem:[#allocation2 + $0x90] sm:$0xff]  ;;  %4942 = vst.msk [vmem:[#allocation2 + $0x108] sm:$0xff] %vm385_vm0, %v4861_v39  ;;  %v4194_v59 = vsel %vm2053_vm2, %v4162_v18, %v11214_v16  ;;  %v4131_v43 = vsel %vm385_vm0, %v3107_v60, %v10823_v20  ;;  %v4098_v35 = vsel %vm2053_vm2, %v4066_v42, %v10769_v45  ;;  %v11219_v3 = vunpack.i.h.bf16 %v14812_v27  ;;  %v3109_v44 = vld [vmem:[#allocation2 + $0x148] sm:$0xff] }
 0x394   : > { %4485 = vmatmul.mubr.f32.gmra.mrb[92].mxu0 %v4097_v50  ;;  %9811 = vmatmul.mubr.msk.f32.gmra.mrb[78].mxu1 %vm385_vm0, %v3226_v1  ;;  %v11275_v7 = vpack.i.bf16 %v5001_v57, %v5000_v17  ;;  %4939 = vst.msk [vmem:[#allocation2 + $0xd0] sm:$0xff] %vm385_vm0, %v4855_v36  ;;  %v15106_v14 = vld [vmem:[#allocation2 + $0x129] sm:$0xff]  ;;  %v4163_v10 = vsel %vm2020_vm1, %v4131_v43, %v11138_v24  ;;  %v3230_v16 = vld [vmem:[#allocation2 + $0xf1] sm:$0xff]  ;;  %v10764_v23 = vunpack.i.h.bf16 %v18697_v55  ;;  %v10873_v41 = vunpack.i.l.bf16 %v14288_v2 }
 0x395   : > { %4489 = vmatprep.mubr.f32.mxu0 %v4194_v59  ;;  %9813 = vmatprep.mubr.msk.f32.mxu1 %vm385_vm0, %v15038_v58  ;;  %v15110_v5 = vld [vmem:[#allocation2 + $0x12f] sm:$0xff]  ;;  %v10818_v58 = vunpack.i.l.bf16 %v14196_v26  ;;  %v4195_v51 = vsel %vm2053_vm2, %v4163_v10, %v11218_v33  ;;  %v4035_v22 = vsel %vm385_vm0, %v2979_v40, %v10758_v61  ;;  %v4036_v62 = vsel %vm385_vm0, %v2980_v46, %v10759_v21  ;;  %v15132_v24 = vld [vmem:[#allocation2 + $0x147] sm:$0xff]  ;;  %v18698_v21 = vld [vmem:[#allocation57_spill] sm:$0xff] }
 0x396   : > { %11276 = vrot.lane.b32.xlu0 %v11275_v7, %s12283_s13  ;;  %v4865_v32 = vpop.permute.xlu0 %4864  ;;  %v5002_v1 = vld [vmem:[#allocation2 + $0xa8] sm:$0xff]  ;;  %v3108_v11 = vld [vmem:[#allocation2 + $0x130] sm:$0xff]  ;;  %v4067_v20 = vsel %vm2020_vm1, %v4035_v22, %v10763_v12  ;;  %v11143_v40 = vunpack.i.l.bf16 %v14698_v31  ;;  %v11223_v46 = vunpack.i.l.bf16 %v14878_v54  ;;  %v10808_v0 = vunpack.i.l.bf16 %v14203_v29 }
 0x397   : > { %v4859_v47 = vpop.permute.xlu1 %4858  ;;  %v5003_v15 = vld [vmem:[#allocation2 + $0xb0] sm:$0xff]  ;;  %4944 = vst.msk [vmem:[#allocation2 + $0x128] sm:$0xff] %vm385_vm0, %v4865_v32  ;;  %v4132_v39 = vsel %vm385_vm0, %v3108_v11, %v10824_v53  ;;  %v4099_v18 = vsel %vm2053_vm2, %v4067_v20, %v10818_v58  ;;  %v5004_v57 = vld [vmem:[#allocation2 + $0xc8] sm:$0xff]  ;;  %v4068_v61 = vsel %vm2020_vm1, %v4036_v62, %v10764_v23  ;;  %v10813_v42 = vunpack.i.l.bf16 %v14222_v52  ;;  %v18700_v58 = vld [vmem:[#allocation118_spill] sm:$0xff] }
 0x398   : > { %4490 = vmatmul.mubr.f32.gmra.mrb[94].mxu0 %v4098_v35  ;;  %9814 = vmatmul.mubr.msk.f32.gmra.mrb[80].mxu1 %vm385_vm0, %v3228_v30  ;;  %v11280_v9 = vpack.i.bf16 %v5003_v15, %v5002_v1  ;;  %4941 = vst.msk [vmem:[#allocation2 + $0xf0] sm:$0xff] %vm385_vm0, %v4859_v47  ;;  %v15130_v45 = vld [vmem:[#allocation2 + $0x149] sm:$0xff]  ;;  %v4164_v17 = vsel %vm2020_vm1, %v4132_v39, %v11139_v38  ;;  %v3232_v33 = vld [vmem:[#allocation2 + $0x111] sm:$0xff]  ;;  %v10874_v60 = vunpack.i.h.bf16 %v14288_v2  ;;  %v10868_v38 = vunpack.i.l.bf16 %v18700_v58  ;;  %v18702_v39 = vld [vmem:[#allocation62_spill] sm:$0xff] }
 0x399   : > { %4494 = vmatprep.mubr.f32.mxu0 %v4195_v51  ;;  %9816 = vmatprep.mubr.msk.f32.mxu1 %vm385_vm0, %v15062_v6  ;;  %v10819_v6 = vunpack.i.h.bf16 %v14196_v26  ;;  %v4196_v26 = vsel %vm2053_vm2, %v4164_v17, %v11219_v3  ;;  %v4133_v53 = vsel %vm385_vm0, %v3109_v44, %v10873_v41  ;;  %v3111_v32 = vld [vmem:[#allocation2 + $0x168] sm:$0xff]  ;;  %v11224_v3 = vunpack.i.h.bf16 %v14878_v54  ;;  %v3110_v41 = vld [vmem:[#allocation2 + $0x150] sm:$0xff] }
 0x39a   : > { %11281 = vrot.lane.b32.xlu1 %v11280_v9, %s12283_s13  ;;  %v4869_v27 = vpop.permute.xlu0 %4868  ;;  %v2477_v50 = vpop.f32.mrb[36].mxu1  ;;  %v15155_v43 = vld [vmem:[#allocation2 + $0x169] sm:$0xff]  ;;  %v4165_v2 = vsel %vm2020_vm1, %v4133_v53, %v11143_v40  ;;  %v10809_v22 = vunpack.i.h.bf16 %v14203_v29  ;;  %v10814_v11 = vunpack.i.h.bf16 %v14222_v52  ;;  %v4037_v54 = vsel %vm385_vm0, %v15108_v49, %v10808_v0 }
 0x39b   : > { %v4863_v36 = vpop.permute.xlu1 %4862  ;;  %v5005_v30 = vld [vmem:[#allocation2 + $0xd0] sm:$0xff]  ;;  %4946 = vst.msk [vmem:[#allocation2 + $0x148] sm:$0xff] %vm385_vm0, %v4869_v27  ;;  %v2478_v59 = vadd.f32 %v14925_v56, %v2477_v50  ;;  %v2479_v7 = vpop.f32.mrb[37].mxu1  ;;  %v4100_v10 = vsel %vm2053_vm2, %v4068_v61, %v10819_v6  ;;  %v5006_v1 = vld [vmem:[#allocation2 + $0xe8] sm:$0xff]  ;;  %v18701_v27 = vld [vmem:[#allocation74_spill] sm:$0xff]  ;;  %v4069_v29 = vsel %vm2020_vm1, %v4037_v54, %v10813_v42  ;;  %v4134_v52 = vsel %vm385_vm0, %v3110_v41, %v10874_v60 }
 0x39c   : > { %4495 = vmatmul.mubr.f32.gmra.mrb[96].mxu0 %v4099_v18  ;;  %9817 = vmatmul.mubr.msk.f32.gmra.mrb[82].mxu1 %vm385_vm0, %v3230_v16  ;;  %v11285_v4 = vpack.i.bf16 %v5005_v30, %v5004_v57  ;;  %4943 = vst.msk [vmem:[#allocation2 + $0x110] sm:$0xff] %vm385_vm0, %v4863_v36  ;;  %v3234_v16 = vld [vmem:[#allocation2 + $0x131] sm:$0xff]  ;;  %v10923_v20 = vunpack.i.l.bf16 %v18701_v27  ;;  %v15180_v6 = vld [vmem:[#allocation2 + $0x189] sm:$0xff]  ;;  %v4101_v18 = vsel %vm2053_vm2, %v4069_v29, %v10868_v38 }
 0x39d   : > { %4499 = vmatprep.mubr.f32.mxu0 %v4196_v26  ;;  %9819 = vmatprep.mubr.msk.f32.mxu1 %vm385_vm0, %v15085_v19  ;;  %v15151_v55 = vadd.f32 %v18698_v21, %v2478_v59  ;;  %v11144_v19 = vunpack.i.h.bf16 %v14698_v31  ;;  %v4197_v31 = vsel %vm2053_vm2, %v4165_v2, %v11223_v46  ;;  %v15182_v40 = vld [vmem:[#allocation2 + $0x188] sm:$0xff]  ;;  %v18704_v49 = vld [vmem:[#allocation108_spill] sm:$0xff]  ;;  %v4038_v61 = vsel %vm385_vm0, %v15110_v5, %v10809_v22 }
 0x39e   : > { %11286 = vrot.lane.b32.xlu0 %v11285_v4, %s12283_s13  ;;  %v4873_v12 = vpop.permute.xlu0 %4872  ;;  %v2482_v35 = vpop.f32.mrb[38].mxu1  ;;  %v11148_v36 = vunpack.i.l.bf16 %v18704_v49  ;;  %v5008_v57 = vld [vmem:[#allocation2 + $0x108] sm:$0xff]  ;;  %v18707_v42 = vld [vmem:[#allocation120_spill] sm:$0xff]  ;;  %v10924_v21 = vunpack.i.h.bf16 %v18701_v27  ;;  %v4070_v53 = vsel %vm2020_vm1, %v4038_v61, %v10814_v11  ;;  %v11149_v5 = vunpack.i.h.bf16 %v18704_v49  ;;  %v18709_v11 = vld [vmem:[#allocation126_spill] sm:$0xff] }
 0x39f   : > { %18699 = vst [vmem:[#allocation75_spill] sm:$0xff] %v15151_v55  ;;  %v4867_v47 = vpop.permute.xlu1 %4866  ;;  %v5007_v15 = vld [vmem:[#allocation2 + $0xf0] sm:$0xff]  ;;  %4948 = vst.msk [vmem:[#allocation2 + $0x168] sm:$0xff] %vm385_vm0, %v4873_v12  ;;  %v2483_v51 = vadd.f32 %v14925_v56, %v2482_v35  ;;  %v2484_v9 = vpop.f32.mrb[39].mxu1  ;;  %v4166_v17 = vsel %vm2020_vm1, %v4134_v52, %v11144_v19  ;;  %v18705_v46 = vld [vmem:[#allocation115_spill] sm:$0xff]  ;;  %v10863_v60 = vunpack.i.l.bf16 %v18707_v42  ;;  %v10864_v22 = vunpack.i.h.bf16 %v18707_v42 }
 0x3a0   : > { %4500 = vmatmul.mubr.f32.gmra.mrb[98].mxu0 %v4100_v10  ;;  %9820 = vmatmul.mubr.msk.f32.gmra.mrb[84].mxu1 %vm385_vm0, %v3232_v33  ;;  %v11290_v23 = vpack.i.bf16 %v5007_v15, %v5006_v1  ;;  %4945 = vst.msk [vmem:[#allocation2 + $0x130] sm:$0xff] %vm385_vm0, %v4867_v47  ;;  %v3236_v33 = vld [vmem:[#allocation2 + $0x151] sm:$0xff]  ;;  %v11228_v59 = vunpack.i.l.bf16 %v18705_v46  ;;  %v4198_v7 = vsel %vm2053_vm2, %v4166_v17, %v11224_v3  ;;  %v18706_v4 = vld [vmem:[#allocation67_spill] sm:$0xff]  ;;  %v10973_v54 = vunpack.i.l.bf16 %v18709_v11 }
 0x3a1   : > { %4504 = vmatprep.mubr.f32.mxu0 %v4197_v31  ;;  %9822 = vmatprep.mubr.msk.f32.mxu1 %vm385_vm0, %v15106_v14  ;;  %v15175_v62 = vadd.f32 %v18702_v39, %v2483_v51  ;;  %v10869_v14 = vunpack.i.h.bf16 %v18700_v58  ;;  %v10858_v0 = vunpack.i.l.bf16 %v18706_v4  ;;  %v4135_v58 = vsel %vm385_vm0, %v3111_v32, %v10923_v20  ;;  %v3238_v38 = vld [vmem:[#allocation2 + $0x171] sm:$0xff]  ;;  %v15203_v19 = vld [vmem:[#allocation2 + $0x1a9] sm:$0xff] }
 0x3a2   : > { %11291 = vrot.lane.b32.xlu1 %v11290_v23, %s12283_s13  ;;  %v4877_v44 = vpop.permute.xlu0 %4876  ;;  %v15205_v47 = vld [vmem:[#allocation2 + $0x1a8] sm:$0xff]  ;;  %v4167_v1 = vsel %vm2020_vm1, %v4135_v58, %v11148_v36  ;;  %v3112_v3 = vld [vmem:[#allocation2 + $0x170] sm:$0xff]  ;;  %v11229_v32 = vunpack.i.h.bf16 %v18705_v46  ;;  %v10859_v31 = vunpack.i.h.bf16 %v18706_v4  ;;  %v18714_v4 = vld [vmem:[#allocation66_spill] sm:$0xff]  ;;  %v10974_v61 = vunpack.i.h.bf16 %v18709_v11 }
 0x3a3   : > { %18703 = vst [vmem:[#allocation89_spill] sm:$0xff] %v15175_v62  ;;  %v4871_v50 = vpop.permute.xlu1 %4870  ;;  %v5009_v30 = vld [vmem:[#allocation2 + $0x110] sm:$0xff]  ;;  %4950 = vst.msk [vmem:[#allocation2 + $0x188] sm:$0xff] %vm385_vm0, %v4877_v44  ;;  %v4102_v2 = vsel %vm2053_vm2, %v4070_v53, %v10869_v14  ;;  %v5010_v15 = vld [vmem:[#allocation2 + $0x128] sm:$0xff]  ;;  %v4199_v51 = vsel %vm2053_vm2, %v4167_v1, %v11228_v59  ;;  %v4039_v23 = vsel %vm385_vm0, %v15132_v24, %v10858_v0  ;;  %v10913_v0 = vunpack.i.l.bf16 %v18714_v4 }
 0x3a4   : > { %4505 = vmatmul.mubr.f32.gmra.mrb[100].mxu0 %v4101_v18  ;;  %9823 = vmatmul.mubr.msk.f32.gmra.mrb[86].mxu1 %vm385_vm0, %v3234_v16  ;;  %v11295_v26 = vpack.i.bf16 %v5009_v30, %v5008_v57  ;;  %4947 = vst.msk [vmem:[#allocation2 + $0x150] sm:$0xff] %vm385_vm0, %v4871_v50  ;;  %v4071_v27 = vsel %vm2020_vm1, %v4039_v23, %v10863_v60  ;;  %v3240_v39 = vld [vmem:[#allocation2 + $0x191] sm:$0xff]  ;;  %v15226_v44 = vld [vmem:[#allocation2 + $0x1c9] sm:$0xff] }
 0x3a5   : > { %4509 = vmatprep.mubr.f32.mxu0 %v4198_v7  ;;  %9825 = vmatprep.mubr.msk.f32.mxu1 %vm385_vm0, %v15130_v45  ;;  %v18708_v45 = vld [vmem:[#allocation71_spill] sm:$0xff]  ;;  %v4136_v20 = vsel %vm385_vm0, %v3112_v3, %v10924_v21  ;;  %v3114_v18 = vld [vmem:[#allocation2 + $0x190] sm:$0xff]  ;;  %v4137_v21 = vsel %vm385_vm0, %v15182_v40, %v10973_v54  ;;  %v10914_v3 = vunpack.i.h.bf16 %v18714_v4 }
 0x3a6   : > { %11296 = vrot.lane.b32.xlu0 %v11295_v26, %s12283_s13  ;;  %v4881_v12 = vpop.permute.xlu0 %4880  ;;  %v10918_v35 = vunpack.i.l.bf16 %v18708_v45  ;;  %v10919_v29 = vunpack.i.h.bf16 %v18708_v45  ;;  %v4168_v49 = vsel %vm2020_vm1, %v4136_v20, %v11149_v5  ;;  %v5012_v36 = vld [vmem:[#allocation2 + $0x148] sm:$0xff]  ;;  %v18711_v17 = vld [vmem:[#allocation68_spill] sm:$0xff] }
 0x3a7   : > { %v4875_v10 = vpop.permute.xlu1 %4874  ;;  %v5011_v16 = vld [vmem:[#allocation2 + $0x130] sm:$0xff]  ;;  %4952 = vst.msk [vmem:[#allocation2 + $0x1a8] sm:$0xff] %vm385_vm0, %v4881_v12  ;;  %v11233_v57 = vunpack.i.l.bf16 %v18711_v17  ;;  %v4200_v30 = vsel %vm2053_vm2, %v4168_v49, %v11229_v32  ;;  %v5014_v5 = vld [vmem:[#allocation2 + $0x168] sm:$0xff]  ;;  %v11234_v40 = vunpack.i.h.bf16 %v18711_v17 }
 0x3a8   : > { %4510 = vmatmul.mubr.f32.gmra.mrb[102].mxu0 %v4102_v2  ;;  %9826 = vmatmul.mubr.msk.f32.gmra.mrb[88].mxu1 %vm385_vm0, %v3236_v33  ;;  %v11300_v9 = vpack.i.bf16 %v5011_v16, %v5010_v15  ;;  %4949 = vst.msk [vmem:[#allocation2 + $0x170] sm:$0xff] %vm385_vm0, %v4875_v10  ;;  %v4103_v24 = vsel %vm2053_vm2, %v4071_v27, %v10918_v35  ;;  %v18712_v46 = vld [vmem:[#allocation64_spill] sm:$0xff] }
 0x3a9   : > { %4514 = vmatprep.mubr.f32.mxu0 %v4199_v51  ;;  %9828 = vmatprep.mubr.msk.f32.mxu1 %vm385_vm0, %v15155_v43  ;;  %v18710_v43 = vld [vmem:[#allocation33_spill] sm:$0xff]  ;;  %v10908_v59 = vunpack.i.l.bf16 %v18712_v46  ;;  %v18713_v7 = vld [vmem:[#allocation72_spill] sm:$0xff]  ;;  %v10909_v1 = vunpack.i.h.bf16 %v18712_v46 }
 0x3aa   : > { %11301 = vrot.lane.b32.xlu1 %v11300_v9, %s12283_s13  ;;  %v4885_v41 = vpop.permute.xlu0 %4884  ;;  %v11153_v52 = vunpack.i.l.bf16 %v18710_v43  ;;  %v4040_v26 = vsel %vm385_vm0, %v18713_v7, %v10859_v31  ;;  %v15248_v12 = vld [vmem:[#allocation2 + $0x1e9] sm:$0xff]  ;;  %v3242_v2 = vld [vmem:[#allocation2 + $0x1b1] sm:$0xff] }
 0x3ab   : > { %v4879_v14 = vpop.permute.xlu1 %4878  ;;  %v5013_v50 = vld [vmem:[#allocation2 + $0x150] sm:$0xff]  ;;  %4954 = vst.msk [vmem:[#allocation2 + $0x1c8] sm:$0xff] %vm385_vm0, %v4885_v41  ;;  %v4072_v60 = vsel %vm2020_vm1, %v4040_v26, %v10864_v22  ;;  %v4138_v41 = vsel %vm385_vm0, %v3114_v18, %v10974_v61  ;;  %v18722_v7 = vld [vmem:[#allocation107_spill] sm:$0xff] }
 0x3ac   : > { %4515 = vmatmul.mubr.f32.gmra.mrb[104].mxu0 %v4103_v24  ;;  %9829 = vmatmul.mubr.msk.f32.gmra.mrb[90].mxu1 %vm385_vm0, %v3238_v38  ;;  %v11305_v33 = vpack.i.bf16 %v5013_v50, %v5012_v36  ;;  %4951 = vst.msk [vmem:[#allocation2 + $0x190] sm:$0xff] %vm385_vm0, %v4879_v14  ;;  %v18715_v53 = vld [vmem:[#allocation124_spill] sm:$0xff]  ;;  %v4104_v45 = vsel %vm2053_vm2, %v4072_v60, %v10919_v29  ;;  %v5016_v24 = vld [vmem:[#allocation2 + $0x188] sm:$0xff] }
 0x3ad   : > { %4519 = vmatprep.mubr.f32.mxu0 %v4200_v30  ;;  %9831 = vmatprep.mubr.msk.f32.mxu1 %vm385_vm0, %v15180_v6  ;;  %v10968_v58 = vunpack.i.l.bf16 %v18715_v53  ;;  %v11154_v6 = vunpack.i.h.bf16 %v18710_v43  ;;  %v4169_v35 = vsel %vm2020_vm1, %v4137_v21, %v11153_v52  ;;  %v18716_v32 = vld [vmem:[#allocation48_spill] sm:$0xff]  ;;  %v10969_v9 = vunpack.i.h.bf16 %v18715_v53 }
 0x3ae   : > { %11306 = vrot.lane.b32.xlu0 %v11305_v33, %s12283_s13  ;;  %v4889_v42 = vpop.permute.xlu0 %4888  ;;  %v4201_v15 = vsel %vm2053_vm2, %v4169_v35, %v11233_v57  ;;  %v4041_v51 = vsel %vm385_vm0, %v18716_v32, %v10908_v59  ;;  %v18717_v31 = vld [vmem:[#allocation100_spill] sm:$0xff] }
 0x3af   : > { %v4883_v38 = vpop.permute.xlu1 %4882  ;;  %v5015_v10 = vld [vmem:[#allocation2 + $0x170] sm:$0xff]  ;;  %4956 = vst.msk [vmem:[#allocation2 + $0x1e8] sm:$0xff] %vm385_vm0, %v4889_v42  ;;  %v11073_v23 = vunpack.i.l.bf16 %v18717_v31  ;;  %v4073_v54 = vsel %vm2020_vm1, %v4041_v51, %v10913_v0  ;;  %v4170_v14 = vsel %vm2020_vm1, %v4138_v41, %v11154_v6  ;;  %v18724_v0 = vld [vmem:[#allocation70_spill] sm:$0xff]  ;;  %v11074_v42 = vunpack.i.h.bf16 %v18717_v31  ;;  %v18728_v51 = vld [vmem:[#allocation81_spill] sm:$0xff] }
 0x3b0   : > { %4520 = vmatmul.mubr.f32.gmra.mrb[106].mxu0 %v4104_v45  ;;  %9832 = vmatmul.mubr.msk.f32.gmra.mrb[92].mxu1 %vm385_vm0, %v3240_v39  ;;  %v11310_v16 = vpack.i.bf16 %v5015_v10, %v5014_v5  ;;  %4953 = vst.msk [vmem:[#allocation2 + $0x1b0] sm:$0xff] %vm385_vm0, %v4883_v38  ;;  %v15270_v27 = vld [vmem:[#allocation2 + $0x209] sm:$0xff]  ;;  %v4105_v52 = vsel %vm2053_vm2, %v4073_v54, %v10968_v58  ;;  %v3244_v36 = vld [vmem:[#allocation2 + $0x1d1] sm:$0xff]  ;;  %v10963_v61 = vunpack.i.l.bf16 %v18724_v0  ;;  %v18729_v31 = vld [vmem:[#allocation90_spill] sm:$0xff] }
 0x3b1   : > { %4524 = vmatprep.mubr.f32.mxu0 %v4201_v15  ;;  %9834 = vmatprep.mubr.msk.f32.mxu1 %vm385_vm0, %v15203_v19  ;;  %v18718_v20 = vld [vmem:[#allocation96_spill] sm:$0xff]  ;;  %v4202_v18 = vsel %vm2053_vm2, %v4170_v14, %v11234_v40  ;;  %v4139_v53 = vsel %vm385_vm0, %v15205_v47, %v11073_v23  ;;  %v18725_v58 = vld [vmem:[#allocation73_spill] sm:$0xff]  ;;  %v5018_v10 = vld [vmem:[#allocation2 + $0x1a8] sm:$0xff]  ;;  %v11078_v23 = vunpack.i.l.bf16 %v18729_v31 }
 0x3b2   : > { %11311 = vrot.lane.b32.xlu1 %v11310_v16, %s12283_s13  ;;  %v4893_v22 = vpop.permute.xlu0 %4892  ;;  %v2487_v11 = vpop.f32.mrb[40].mxu1  ;;  %v11158_v39 = vunpack.i.l.bf16 %v18718_v20  ;;  %v18719_v50 = vld [vmem:[#allocation116_spill] sm:$0xff]  ;;  %v11018_v6 = vunpack.i.l.bf16 %v18725_v58  ;;  %v11159_v38 = vunpack.i.h.bf16 %v18718_v20  ;;  %v5020_v14 = vld [vmem:[#allocation2 + $0x1c8] sm:$0xff] }
 0x3b3   : > { %v2488_v19 = vadd.f32 %v14925_v56, %v2487_v11  ;;  %v4887_v29 = vpop.permute.xlu1 %4886  ;;  %v2489_v43 = vpop.f32.mrb[41].mxu1  ;;  %v5017_v49 = vld [vmem:[#allocation2 + $0x190] sm:$0xff]  ;;  %4958 = vst.msk [vmem:[#allocation2 + $0x208] sm:$0xff] %vm385_vm0, %v4893_v22  ;;  %v11238_v17 = vunpack.i.l.bf16 %v18719_v50  ;;  %v11239_v15 = vunpack.i.h.bf16 %v18719_v50  ;;  %v18730_v11 = vld [vmem:[#allocation95_spill] sm:$0xff] }
 0x3b4   : > { %4525 = vmatmul.mubr.f32.gmra.mrb[108].mxu0 %v4105_v52  ;;  %9835 = vmatmul.mubr.msk.f32.gmra.mrb[94].mxu1 %vm385_vm0, %v3242_v2  ;;  %v11315_v57 = vpack.i.bf16 %v5017_v49, %v5016_v24  ;;  %v18720_v30 = vld [vmem:[#allocation44_spill] sm:$0xff]  ;;  %4955 = vst.msk [vmem:[#allocation2 + $0x1d0] sm:$0xff] %vm385_vm0, %v4887_v29  ;;  %v4171_v5 = vsel %vm2020_vm1, %v4139_v53, %v11158_v39  ;;  %v11019_v39 = vunpack.i.h.bf16 %v18725_v58  ;;  %v18736_v53 = vld [vmem:[#allocation97_spill] sm:$0xff] }
 0x3b5   : > { %v4042_v33 = vsel %vm385_vm0, %v18720_v30, %v10909_v1  ;;  %v18721_v46 = vld [vmem:[#allocation80_spill] sm:$0xff]  ;;  %v15285_v26 = vadd.f32 %v18722_v7, %v2488_v19  ;;  %4529 = vmatprep.mubr.f32.mxu0 %v4202_v18  ;;  %9837 = vmatprep.mubr.msk.f32.mxu1 %vm385_vm0, %v15226_v44  ;;  %v4203_v47 = vsel %vm2053_vm2, %v4171_v5, %v11238_v17  ;;  %v18732_v18 = vld [vmem:[#allocation86_spill] sm:$0xff]  ;;  %v18734_v7 = vld [vmem:[#allocation91_spill] sm:$0xff]  ;;  %v11053_v58 = vunpack.i.l.bf16 %v18736_v53 }
 0x3b6   : > { %v10958_v59 = vunpack.i.l.bf16 %v18721_v46  ;;  %v4074_v4 = vsel %vm2020_vm1, %v4042_v33, %v10914_v3  ;;  %11316 = vrot.lane.b32.xlu0 %v11315_v57, %s12283_s13  ;;  %v2492_v60 = vpop.f32.mrb[42].mxu1  ;;  %v3246_v1 = vld [vmem:[#allocation2 + $0x1f1] sm:$0xff]  ;;  %v10959_v40 = vunpack.i.h.bf16 %v18721_v46  ;;  %v18726_v3 = vld [vmem:[#allocation110_spill] sm:$0xff]  ;;  %v4140_v54 = vsel %vm385_vm0, %v18730_v11, %v11074_v42  ;;  %v5024_v20 = vld [vmem:[#allocation2 + $0x9] sm:$0xff] }
 0x3b7   : > { %18723 = vst [vmem:[#allocation76_spill] sm:$0xff] %v15285_v26  ;;  %v4106_v21 = vsel %vm2053_vm2, %v4074_v4, %v10969_v9  ;;  %v2493_v44 = vadd.f32 %v14925_v56, %v2492_v60  ;;  %v4891_v45 = vpop.permute.xlu1 %4890  ;;  %v2494_v35 = vpop.f32.mrb[43].mxu1  ;;  %v5019_v2 = vld [vmem:[#allocation2 + $0x1b0] sm:$0xff]  ;;  %v10964_v56 = vunpack.i.h.bf16 %v18724_v0  ;;  %v4172_v52 = vsel %vm2020_vm1, %v4140_v54, %v11159_v38 }
 0x3b8   : > { %4530 = vmatmul.mubr.f32.gmra.mrb[110].mxu0 %v4106_v21  ;;  %9838 = vmatmul.mubr.msk.f32.gmra.mrb[96].mxu1 %vm385_vm0, %v3244_v36  ;;  %v11320_v16 = vpack.i.bf16 %v5019_v2, %v5018_v10  ;;  %4957 = vst.msk [vmem:[#allocation2 + $0x1f0] sm:$0xff] %vm385_vm0, %v4891_v45  ;;  %v4043_v9 = vsel %vm385_vm0, %v18728_v51, %v10958_v59  ;;  %v3248_v41 = vld [vmem:[#allocation2 + $0x211] sm:$0xff]  ;;  %v11243_v36 = vunpack.i.l.bf16 %v14917_v37  ;;  %v11079_v46 = vunpack.i.h.bf16 %v18729_v31  ;;  %v3249_v21 = vld [vmem:[#allocation2 + $0x229] sm:$0xff] }
 0x3b9   : > { %v15307_v32 = vadd.f32 %v18726_v3, %v2493_v44  ;;  %4534 = vmatprep.mubr.f32.mxu0 %v4203_v47  ;;  %9840 = vmatprep.mubr.msk.f32.mxu1 %vm385_vm0, %v15248_v12  ;;  %v4075_v22 = vsel %vm2020_vm1, %v4043_v9, %v10963_v61  ;;  %v18731_v19 = vld [vmem:[#allocation36_spill] sm:$0xff]  ;;  %v4204_v50 = vsel %vm2053_vm2, %v4172_v52, %v11239_v15  ;;  %v11013_v4 = vunpack.i.l.bf16 %v18734_v7  ;;  %v18735_v61 = vld [vmem:[#allocation101_spill] sm:$0xff]  ;;  %v5022_v44 = vld [vmem:[#allocation2 + $0x1e8] sm:$0xff] }
 0x3ba   : > { %11321 = vrot.lane.b32.xlu1 %v11320_v16, %s12283_s13  ;;  %v11163_v29 = vunpack.i.l.bf16 %v18731_v19  ;;  %v4107_v12 = vsel %vm2053_vm2, %v4075_v22, %v11018_v6  ;;  %v5025_v49 = vld [vmem:[#allocation2 + $0x11] sm:$0xff]  ;;  %v4044_v57 = vsel %vm385_vm0, %v18732_v18, %v10959_v40  ;;  %v11164_v0 = vunpack.i.h.bf16 %v18731_v19  ;;  %v5026_v2 = vld [vmem:[#allocation2 + $0x29] sm:$0xff]  ;;  %v15367_v19 = vld [vmem:[%s18152_s4] ss:$0 sm:$0xff] }
 0x3bb   : > { %18727 = vst [vmem:[#allocation77_spill] sm:$0xff] %v15307_v32  ;;  %v4895_v43 = vpop.permute.xlu1 %4894  ;;  %v5021_v24 = vld [vmem:[#allocation2 + $0x1d0] sm:$0xff]  ;;  %v4076_v59 = vsel %vm2020_vm1, %v4044_v57, %v10964_v56  ;;  %v4141_v42 = vsel %vm385_vm0, %v18735_v61, %v11078_v23  ;;  %v11335_v60 = vpack.i.bf16 %v5025_v49, %v5024_v20  ;;  %v11244_v6 = vunpack.i.h.bf16 %v14917_v37  ;;  %v18737_v37 = vld [vmem:[#allocation93_spill] sm:$0xff]  ;;  %v18738_v15 = vld [vmem:[#allocation103_spill] sm:$0xff] }
 0x3bc   : > { %4535 = vmatmul.mubr.f32.gmra.mrb[112].mxu0 %v4107_v12  ;;  %9841 = vmatmul.mubr.msk.f32.gmra.mrb[98].mxu1 %vm385_vm0, %v3246_v1  ;;  %v11325_v17 = vpack.i.bf16 %v5021_v24, %v5020_v14  ;;  %4959 = vst.msk [vmem:[#allocation2 + $0x210] sm:$0xff] %vm385_vm0, %v4895_v43  ;;  %v18733_v30 = vld [vmem:[#allocation88_spill] sm:$0xff]  ;;  %v4108_v38 = vsel %vm2053_vm2, %v4076_v59, %v11019_v39  ;;  %v11014_v51 = vunpack.i.h.bf16 %v18734_v7  ;;  %v6208_v23 = vld [vmem:[%s18155_s7] sm:$0xff]  ;;  %v6209_v22 = vld [vmem:[%s18155_s7 + $0x8] sm:$0xff]  ;;  %v11054_v11 = vunpack.i.h.bf16 %v18736_v53 }
 0x3bd   : > { %v11008_v33 = vunpack.i.l.bf16 %v18733_v30  ;;  %4539 = vmatprep.mubr.f32.mxu0 %v4204_v50  ;;  %9843 = vmatprep.mubr.msk.f32.mxu1 %vm385_vm0, %v15270_v27  ;;  %v4173_v27 = vsel %vm2020_vm1, %v4141_v42, %v11163_v29  ;;  %v3250_v10 = vld [vmem:[#allocation2 + $0x231] sm:$0xff]  ;;  %v11009_v1 = vunpack.i.h.bf16 %v18733_v30  ;;  %v4142_v47 = vsel %vm385_vm0, %v18738_v15, %v11079_v46  ;;  %v5028_v16 = vld [vmem:[#allocation2 + $0x49] sm:$0xff]  ;;  %v18739_v24 = vld [vmem:[#allocation94_spill] sm:$0xff] }
 0x3be   : > { %11326 = vrot.lane.b32.xlu0 %v11325_v17, %s12283_s13  ;;  %v4205_v35 = vsel %vm2053_vm2, %v4173_v27, %v11243_v36  ;;  %v5029_v56 = vld [vmem:[#allocation2 + $0x51] sm:$0xff]  ;;  %v4174_v31 = vsel %vm2020_vm1, %v4142_v47, %v11164_v0  ;;  %v10106_v39 = vpack.c.bf16 %v6209_v22, %v6208_v23  ;;  %v5030_v14 = vld [vmem:[#allocation2 + $0x69] sm:$0xff]  ;;  %v6216_v22 = vld [vmem:[%s18155_s7 + $0x40] sm:$0xff] }
 0x3bf   : > { %v5023_v45 = vld [vmem:[#allocation2 + $0x1f0] sm:$0xff]  ;;  %v4045_v40 = vsel %vm385_vm0, %v18737_v37, %v11008_v33  ;;  %v4206_v20 = vsel %vm2053_vm2, %v4174_v31, %v11244_v6  ;;  %v15371_v12 = vpack.i.bf16 %v5029_v56, %v5028_v16  ;;  %v4046_v49 = vsel %vm385_vm0, %v18739_v24, %v11009_v1  ;;  %v6211_v46 = vld [vmem:[%s18155_s7 + $0x18] sm:$0xff]  ;;  %v5212_v26 = vld [vmem:[#allocation2 + $0x208] sm:$0xff] }
 0x3c0   : > { %4540 = vmatmul.mubr.f32.gmra.mrb[114].mxu0 %v4108_v38  ;;  %9844 = vmatmul.mubr.msk.f32.gmra.mrb[100].mxu1 %vm385_vm0, %v3248_v41  ;;  %v11330_v5 = vpack.i.bf16 %v5023_v45, %v5022_v44  ;;  %v5027_v3 = vld [vmem:[#allocation2 + $0x31] sm:$0xff]  ;;  %v4077_v9 = vsel %vm2020_vm1, %v4045_v40, %v11013_v4  ;;  %v5032_v36 = vld [vmem:[#allocation2 + $0x89] sm:$0xff]  ;;  %v4078_v30 = vsel %vm2020_vm1, %v4046_v49, %v11014_v51  ;;  %v6212_v44 = vld [vmem:[%s18155_s7 + $0x20] sm:$0xff] }
 0x3c1   : > { %4544 = vmatprep.mubr.f32.mxu0 %v4205_v35  ;;  %9846 = vmatprep.mubr.msk.f32.mxu1 %vm385_vm0, %v3249_v21  ;;  %v4109_v41 = vsel %vm2053_vm2, %v4077_v9, %v11053_v58  ;;  %v15373_v52 = vpack.i.bf16 %v5027_v3, %v5026_v2  ;;  %v5033_v50 = vld [vmem:[#allocation2 + $0x91] sm:$0xff]  ;;  %v4110_v7 = vsel %vm2053_vm2, %v4078_v30, %v11054_v11  ;;  %v5034_v21 = vld [vmem:[#allocation2 + $0xa9] sm:$0xff] }
 0x3c2   : > { %11336 = vrot.lane.b32.xlu0 %v11335_v60, %s12284_s0  ;;  %11331 = vrot.lane.b32.xlu1 %v11330_v5, %s12283_s13  ;;  %v5031_v17 = vld [vmem:[#allocation2 + $0x71] sm:$0xff]  ;;  %v15394_v42 = vpack.i.bf16 %v5033_v50, %v5032_v36  ;;  %v5036_v53 = vld [vmem:[#allocation2 + $0xc9] sm:$0xff] }
 0x3c3   : > { %v2497_v54 = vpop.f32.mrb[44].mxu1  ;;  %10107 = vmatpush1.bf16.msra.mxu1 %v10106_v39  ;;  %v18740_v18 = vld [vmem:[#allocation112_spill] sm:$0xff]  ;;  %v15396_v60 = vpack.i.bf16 %v5031_v17, %v5030_v14  ;;  %v18742_v38 = vld [vmem:[#allocation111_spill] sm:$0xff]  ;;  %v6215_v47 = vld [vmem:[%s18155_s7 + $0x38] sm:$0xff] }
 0x3c4   : > { %v2498_v29 = vadd.f32 %v15367_v19, %v2497_v54  ;;  %v2499_v43 = vpop.f32.mrb[45].mxu1  ;;  %4545 = vmatmul.mubr.f32.gmra.mrb[116].mxu0 %v4109_v41  ;;  %9847 = vmatmul.mubr.msk.f32.gmra.mrb[102].mxu1 %vm385_vm0, %v3250_v10  ;;  %v6210_v33 = vld [vmem:[%s18155_s7 + $0x10] sm:$0xff]  ;;  %v6213_v45 = vld [vmem:[%s18155_s7 + $0x28] sm:$0xff]  ;;  %v6219_v49 = vld [vmem:[%s18155_s7 + $0x58] sm:$0xff] }
 0x3c5   : > { %4549 = vmatprep.mubr.f32.mxu0 %v4206_v20  ;;  %10108 = vmatprep.subr.bf16.mxu1 %v18525_v48  ;;  %v10109_v4 = vpack.c.bf16 %v6211_v46, %v6210_v33  ;;  %v15399_v58 = vld [vmem:[#allocation2 + $0xd1] sm:$0xff]  ;;  %v15421_v10 = vld [vmem:[#allocation2 + $0xe9] sm:$0xff]  ;;  %v10112_v2 = vpack.c.bf16 %v6213_v45, %v6212_v44 }
 0x3c6   : > { %v15378_v57 = vadd.f32 %v18740_v18, %v2498_v29  ;;  %11346 = vrot.lane.b32.xlu0 %v15371_v12, %s12284_s0  ;;  %11341 = vrot.lane.b32.xlu1 %v15373_v52, %s12284_s0  ;;  %v5035_v6 = vld [vmem:[#allocation2 + $0xb1] sm:$0xff]  ;;  %v15417_v35 = vpack.i.bf16 %v15399_v58, %v5036_v53  ;;  %v15424_v1 = vld [vmem:[#allocation2 + $0x109] sm:$0xff] }
 0x3c7   : > { %v2502_v59 = vpop.f32.mrb[46].mxu1  ;;  %10110 = vmatpush1.bf16.msra.mxu1 %v10109_v4  ;;  %v15419_v5 = vpack.i.bf16 %v5035_v6, %v5034_v21  ;;  %v15426_v37 = vld [vmem:[#allocation2 + $0x111] sm:$0xff]  ;;  %v15449_v3 = vld [vmem:[#allocation2 + $0x129] sm:$0xff] }
 0x3c8   : > { %18741 = vst [vmem:[#allocation78_spill] sm:$0xff] %v15378_v57  ;;  %v2503_v0 = vadd.f32 %v15367_v19, %v2502_v59  ;;  %v2504_v61 = vpop.f32.mrb[47].mxu1  ;;  %4550 = vmatmul.mubr.f32.gmra.mrb[118].mxu0 %v4110_v7  ;;  %10111 = vmatprep.subr.bf16.mxu1 %v18525_v48  ;;  %v15428_v40 = vld [vmem:[#allocation2 + $0xf1] sm:$0xff]  ;;  %v15453_v9 = vld [vmem:[#allocation2 + $0x149] sm:$0xff]  ;;  %v6220_v7 = vld [vmem:[%s18155_s7 + $0x60] sm:$0xff] }
 0x3c9   : > { %9857 = vmatprep.mubr.msk.f32.mxu0 %vm385_vm0, %v5028_v16  ;;  %v6214_v15 = vld [vmem:[%s18155_s7 + $0x30] sm:$0xff]  ;;  %v15443_v16 = vpack.i.bf16 %v15426_v37, %v15424_v1  ;;  %v6217_v11 = vld [vmem:[%s18155_s7 + $0x48] sm:$0xff] }
 0x3ca   : > { %v15402_v27 = vadd.f32 %v18742_v38, %v2503_v0  ;;  %11356 = vrot.lane.b32.xlu0 %v15394_v42, %s12284_s0  ;;  %11351 = vrot.lane.b32.xlu1 %v15396_v60, %s12284_s0  ;;  %v10115_v51 = vpack.c.bf16 %v6215_v47, %v6214_v15  ;;  %v15455_v31 = vld [vmem:[#allocation2 + $0x151] sm:$0xff]  ;;  %v10118_v54 = vpack.c.bf16 %v6217_v11, %v6216_v22  ;;  %v15478_v39 = vld [vmem:[#allocation2 + $0x169] sm:$0xff] }
 0x3cb   : > { %10113 = vmatpush1.bf16.msra.mxu1 %v10112_v2  ;;  %v15457_v23 = vld [vmem:[#allocation2 + $0x131] sm:$0xff]  ;;  %v15472_v41 = vpack.i.bf16 %v15455_v31, %v15453_v9  ;;  %v15482_v29 = vld [vmem:[#allocation2 + $0x189] sm:$0xff] }
 0x3cc   : > { %18743 = vst [vmem:[#allocation49_spill] sm:$0xff] %v15402_v27  ;;  %9858 = vmatmul.mubr.msk.f32.vlgmr.msra.gmra.mrb[120].mxu0 %vm385_vm0, %v5029_v56  ;;  %v15447_v56 = vpack.i.bf16 %v15428_v40, %v15421_v10  ;;  %10114 = vmatprep.subr.bf16.mxu1 %v18525_v48  ;;  %v15476_v20 = vpack.i.bf16 %v15457_v23, %v15449_v3  ;;  %v15484_v43 = vld [vmem:[#allocation2 + $0x191] sm:$0xff]  ;;  %v15507_v18 = vld [vmem:[#allocation2 + $0x1a9] sm:$0xff] }
 0x3cd   : > { %9860 = vmatprep.mubr.msk.f32.mxu0 %vm385_vm0, %v5030_v14  ;;  %v15486_v14 = vld [vmem:[#allocation2 + $0x171] sm:$0xff]  ;;  %v15511_v30 = vld [vmem:[#allocation2 + $0x1c9] sm:$0xff] }
 0x3ce   : > { %11366 = vrot.lane.b32.xlu0 %v15417_v35, %s12284_s0  ;;  %11361 = vrot.lane.b32.xlu1 %v15419_v5, %s12284_s0  ;;  %v6218_v24 = vld [vmem:[%s18155_s7 + $0x50] sm:$0xff]  ;;  %v6221_v4 = vld [vmem:[%s18155_s7 + $0x68] sm:$0xff] }
 0x3cf   : > { %10116 = vmatpush1.bf16.msra.mxu1 %v10115_v51  ;;  %v15513_v33 = vld [vmem:[#allocation2 + $0x1d1] sm:$0xff]  ;;  %v18744_v38 = vld [vmem:[#allocation63_spill] sm:$0xff] }
 0x3d0   : > { %9861 = vmatmul.mubr.msk.f32.gmra.mrb[122].mxu0 %vm385_vm0, %v5031_v17  ;;  %10117 = vmatprep.subr.bf16.mxu1 %v18525_v48  ;;  %v15505_v17 = vpack.i.bf16 %v15486_v14, %v15478_v39  ;;  %v15515_v46 = vld [vmem:[#allocation2 + $0x1b1] sm:$0xff]  ;;  %v15544_v2 = vld [vmem:[#allocation2 + $0x1e9] sm:$0xff] }
 0x3d1   : > { %9863 = vmatprep.mubr.msk.f32.mxu0 %vm385_vm0, %v5032_v36  ;;  %v10121_v36 = vpack.c.bf16 %v6219_v49, %v6218_v24  ;;  %v5057_v45 = vld [vmem:[#allocation2 + $0x2f] sm:$0xff]  ;;  %v5056_v22 = vld [vmem:[#allocation2 + $0x27] sm:$0xff]  ;;  %v6223_v24 = vld [vmem:[%s18155_s7 + $0x78] sm:$0xff] }
 0x3d2   : > { %11376 = vrot.lane.b32.xlu0 %v15443_v16, %s12284_s0  ;;  %11371 = vrot.lane.b32.xlu1 %v15447_v56, %s12284_s0  ;;  %v18746_v49 = vld [vmem:[#allocation59_spill] sm:$0xff]  ;;  %v5211_v62 = vld [vmem:[#allocation2 + $0x1f0] sm:$0xff] }
 0x3d3   : > { %10119 = vmatpush1.bf16.msra.mxu1 %v10118_v54  ;;  %v6222_v54 = vld [vmem:[%s18155_s7 + $0x70] sm:$0xff] }
 0x3d4   : > { %9864 = vmatmul.mubr.msk.f32.gmra.mrb[124].mxu0 %vm385_vm0, %v5033_v50  ;;  %v15501_v50 = vpack.i.bf16 %v15484_v43, %v15482_v29  ;;  %10120 = vmatprep.subr.bf16.mxu1 %v18525_v48  ;;  %v5183_v55 = vld [vmem:[#allocation2 + $0x22f] sm:$0xff] }
 0x3d5   : > { %9866 = vmatprep.mubr.msk.f32.mxu0 %vm385_vm0, %v5034_v21  ;;  %v10124_v21 = vpack.c.bf16 %v6221_v4, %v6220_v7  ;;  %v10127_v7 = vpack.c.bf16 %v6223_v24, %v6222_v54  ;;  %v5060_v4 = vld [vmem:[#allocation2 + $0x67] sm:$0xff]  ;;  %v6227_v54 = vld [vmem:[%s18155_s7 + $0x98] sm:$0xff]  ;;  %v5069_v24 = vld [vmem:[#allocation2 + $0xef] sm:$0xff] }
 0x3d6   : > { %11386 = vrot.lane.b32.xlu0 %v15472_v41, %s12284_s0  ;;  %11381 = vrot.lane.b32.xlu1 %v15476_v20, %s12284_s0 }
 0x3d7   : > { %10122 = vmatpush1.bf16.msra.mxu1 %v10121_v36 }
 0x3d8   : > { %9867 = vmatmul.mubr.msk.f32.gmra.mrb[126].mxu0 %vm385_vm0, %v5035_v6  ;;  %v15536_v6 = vpack.i.bf16 %v15515_v46, %v15507_v18  ;;  %10123 = vmatprep.subr.bf16.mxu1 %v18525_v48 }
 0x3d9   : > { %9869 = vmatprep.mubr.msk.f32.mxu0 %vm385_vm0, %v5036_v53  ;;  %v15532_v53 = vpack.i.bf16 %v15513_v33, %v15511_v30 }
 0x3da   : > { %11396 = vrot.lane.b32.xlu0 %v15501_v50, %s12284_s0  ;;  %11391 = vrot.lane.b32.xlu1 %v15505_v17, %s12284_s0  ;;  %v2507_v59 = vpop.f32.mrb[48].mxu1 }
 0x3db   : > { %v2508_v0 = vadd.f32 %v15367_v19, %v2507_v59  ;;  %v2509_v61 = vpop.f32.mrb[49].mxu1  ;;  %10125 = vmatpush1.bf16.msra.mxu1 %v10124_v21  ;;  %v5059_v59 = vld [vmem:[#allocation2 + $0x4f] sm:$0xff] }
 0x3dc   : > { %9870 = vmatmul.mubr.msk.f32.gmra.mrb[128].mxu0 %vm385_vm0, %v15399_v58  ;;  %v15546_v58 = vld [vmem:[#allocation2 + $0x1f1] sm:$0xff]  ;;  %10126 = vmatprep.subr.bf16.mxu1 %v18525_v48 }
 0x3dd   : > { %v15540_v44 = vadd.f32 %v18744_v38, %v2508_v0  ;;  %9872 = vmatprep.mubr.msk.f32.mxu0 %vm385_vm0, %v15421_v10  ;;  %v11415_v10 = vpack.i.bf16 %v5057_v45, %v5056_v22  ;;  %v15557_v11 = vpack.i.bf16 %v15546_v58, %v15544_v2  ;;  %v5058_v0 = vld [vmem:[#allocation2 + $0x47] sm:$0xff]  ;;  %v5065_v38 = vld [vmem:[#allocation2 + $0xaf] sm:$0xff] }
 0x3de   : > { %11406 = vrot.lane.b32.xlu0 %v15532_v53, %s12284_s0  ;;  %11401 = vrot.lane.b32.xlu1 %v15536_v6, %s12284_s0  ;;  %v2512_v15 = vpop.f32.mrb[50].mxu1  ;;  %v15578_v21 = vpack.i.bf16 %v5059_v59, %v5058_v0  ;;  %v5063_v45 = vld [vmem:[#allocation2 + $0x8f] sm:$0xff]  ;;  %v5068_v59 = vld [vmem:[#allocation2 + $0xe7] sm:$0xff] }
 0x3df   : > { %18745 = vst [vmem:[#allocation45_spill] sm:$0xff] %v15540_v44  ;;  %v2513_v47 = vadd.f32 %v15367_v19, %v2512_v15  ;;  %v2514_v51 = vpop.f32.mrb[51].mxu1  ;;  %10128 = vmatpush1.bf16.msra.mxu1 %v10127_v7  ;;  %v6225_v15 = vld [vmem:[%s18155_s7 + $0x88] sm:$0xff] }
 0x3e0   : > { %9873 = vmatmul.mubr.msk.f32.gmra.mrb[130].mxu0 %vm385_vm0, %v15428_v40  ;;  %v5061_v40 = vld [vmem:[#allocation2 + $0x6f] sm:$0xff]  ;;  %10129 = vmatprep.subr.bf16.mxu1 %v18525_v48  ;;  %v5062_v51 = vld [vmem:[#allocation2 + $0x87] sm:$0xff] }
 0x3e1   : > { %v15567_v36 = vadd.f32 %v18746_v49, %v2513_v47  ;;  %9875 = vmatprep.mubr.msk.f32.mxu0 %vm385_vm0, %v15424_v1  ;;  %v15576_v61 = vpack.i.bf16 %v5061_v40, %v5060_v4  ;;  %v6224_v1 = vld [vmem:[%s18155_s7 + $0x80] sm:$0xff]  ;;  %v5067_v49 = vld [vmem:[#allocation2 + $0xcf] sm:$0xff] }
 0x3e2   : > { %11416 = vrot.lane.b32.xlu0 %v11415_v10, %s12285_s25  ;;  %11411 = vrot.lane.b32.xlu1 %v15557_v11, %s12284_s0  ;;  %v5064_v47 = vld [vmem:[#allocation2 + $0xa7] sm:$0xff]  ;;  %v6226_v10 = vld [vmem:[%s18155_s7 + $0x90] sm:$0xff] }
 0x3e3   : > { %18747 = vst [vmem:[#allocation50_spill] sm:$0xff] %v15567_v36  ;;  %v15595_v22 = vpack.i.bf16 %v5065_v38, %v5064_v47  ;;  %v5066_v7 = vld [vmem:[#allocation2 + $0xc7] sm:$0xff]  ;;  %v18748_v47 = vld [vmem:[#allocation117_spill] sm:$0xff]  ;;  %v5209_v36 = vld [vmem:[#allocation2 + $0x1d0] sm:$0xff] }
 0x3e4   : > { %9876 = vmatmul.mubr.msk.f32.gmra.mrb[132].mxu0 %vm385_vm0, %v15426_v37  ;;  %v10130_v37 = vpack.c.bf16 %v6225_v15, %v6224_v1  ;;  %v15617_v1 = vpack.i.bf16 %v5067_v49, %v5066_v7  ;;  %v6228_v38 = vld [vmem:[%s18155_s7 + $0xa0] sm:$0xff]  ;;  %v5073_v15 = vld [vmem:[#allocation2 + $0x12f] sm:$0xff]  ;;  %v6231_v7 = vld [vmem:[%s18155_s7 + $0xb8] sm:$0xff] }
 0x3e5   : > { %9878 = vmatprep.mubr.msk.f32.mxu0 %vm385_vm0, %v15449_v3  ;;  %v15597_v3 = vpack.i.bf16 %v5063_v45, %v5062_v51  ;;  %v6229_v45 = vld [vmem:[%s18155_s7 + $0xa8] sm:$0xff] }
 0x3e6   : > { %11426 = vrot.lane.b32.xlu0 %v15576_v61, %s12285_s25  ;;  %11421 = vrot.lane.b32.xlu1 %v15578_v21, %s12285_s25 }
 0x3e7   : > { %10131 = vmatpush1.bf16.msra.mxu1 %v10130_v37  ;;  %v5071_v37 = vld [vmem:[#allocation2 + $0x10f] sm:$0xff] }
 0x3e8   : > { %9879 = vmatmul.mubr.msk.f32.gmra.mrb[134].mxu0 %vm385_vm0, %v15457_v23  ;;  %10132 = vmatprep.subr.bf16.mxu1 %v18525_v48  ;;  %v10133_v23 = vpack.c.bf16 %v6227_v54, %v6226_v10  ;;  %v5072_v54 = vld [vmem:[#allocation2 + $0x127] sm:$0xff] }
 0x3e9   : > { %9881 = vmatprep.mubr.msk.f32.mxu0 %vm385_vm0, %v15453_v9  ;;  %v15615_v9 = vpack.i.bf16 %v5069_v24, %v5068_v59  ;;  %v5070_v24 = vld [vmem:[#allocation2 + $0x107] sm:$0xff]  ;;  %v6230_v59 = vld [vmem:[%s18155_s7 + $0xb0] sm:$0xff] }
 0x3ea   : > { %11436 = vrot.lane.b32.xlu0 %v15595_v22, %s12285_s25  ;;  %11431 = vrot.lane.b32.xlu1 %v15597_v3, %s12285_s25 }
 0x3eb   : > { %v2517_v40 = vpop.f32.mrb[52].mxu1  ;;  %10134 = vmatpush1.bf16.msra.mxu1 %v10133_v23  ;;  %v15638_v23 = vpack.i.bf16 %v5073_v15, %v5072_v54  ;;  %v5076_v15 = vld [vmem:[#allocation2 + $0x167] sm:$0xff]  ;;  %v5081_v54 = vld [vmem:[#allocation2 + $0x1af] sm:$0xff] }
 0x3ec   : > { %v2518_v4 = vadd.f32 %v15367_v19, %v2517_v40  ;;  %v2519_v0 = vpop.f32.mrb[53].mxu1  ;;  %9882 = vmatmul.mubr.msk.f32.gmra.mrb[136].mxu0 %vm385_vm0, %v15455_v31  ;;  %10135 = vmatprep.subr.bf16.mxu1 %v18525_v48  ;;  %v10136_v31 = vpack.c.bf16 %v6229_v45, %v6228_v38  ;;  %v15640_v40 = vpack.i.bf16 %v5071_v37, %v5070_v24  ;;  %v18750_v38 = vld [vmem:[#allocation61_spill] sm:$0xff]  ;;  %v5074_v37 = vld [vmem:[#allocation2 + $0x147] sm:$0xff]  ;;  %v5079_v24 = vld [vmem:[#allocation2 + $0x18f] sm:$0xff] }
 0x3ed   : > { %9884 = vmatprep.mubr.msk.f32.mxu0 %vm385_vm0, %v15478_v39  ;;  %v5075_v0 = vld [vmem:[#allocation2 + $0x14f] sm:$0xff] }
 0x3ee   : > { %v15629_v51 = vadd.f32 %v18748_v47, %v2518_v4  ;;  %11446 = vrot.lane.b32.xlu0 %v15615_v9, %s12285_s25  ;;  %11441 = vrot.lane.b32.xlu1 %v15617_v1, %s12285_s25  ;;  %v5077_v4 = vld [vmem:[#allocation2 + $0x16f] sm:$0xff]  ;;  %v6232_v47 = vld [vmem:[%s18155_s7 + $0xc0] sm:$0xff] }
 0x3ef   : > { %v2522_v10 = vpop.f32.mrb[54].mxu1  ;;  %10137 = vmatpush1.bf16.msra.mxu1 %v10136_v31  ;;  %v15662_v31 = vpack.i.bf16 %v5075_v0, %v5074_v37 }
 0x3f0   : > { %18749 = vst [vmem:[#allocation84_spill] sm:$0xff] %v15629_v51  ;;  %v2523_v49 = vadd.f32 %v15367_v19, %v2522_v10  ;;  %v2524_v39 = vpop.f32.mrb[55].mxu1  ;;  %9885 = vmatmul.mubr.msk.f32.gmra.mrb[138].mxu0 %vm385_vm0, %v15486_v14  ;;  %10138 = vmatprep.subr.bf16.mxu1 %v18525_v48  ;;  %v10139_v14 = vpack.c.bf16 %v6231_v7, %v6230_v59  ;;  %v6233_v10 = vld [vmem:[%s18155_s7 + $0xc8] sm:$0xff] }
 0x3f1   : > { %9887 = vmatprep.mubr.msk.f32.mxu0 %vm385_vm0, %v15482_v29  ;;  %v15660_v29 = vpack.i.bf16 %v5077_v4, %v5076_v15  ;;  %v5080_v7 = vld [vmem:[#allocation2 + $0x1a7] sm:$0xff] }
 0x3f2   : > { %v15652_v45 = vadd.f32 %v18750_v38, %v2523_v49  ;;  %11456 = vrot.lane.b32.xlu0 %v15638_v23, %s12285_s25  ;;  %11451 = vrot.lane.b32.xlu1 %v15640_v40, %s12285_s25  ;;  %v5078_v4 = vld [vmem:[#allocation2 + $0x187] sm:$0xff]  ;;  %v6235_v38 = vld [vmem:[%s18155_s7 + $0xd8] sm:$0xff] }
 0x3f3   : > { %10140 = vmatpush1.bf16.msra.mxu1 %v10139_v14  ;;  %v15682_v0 = vpack.i.bf16 %v5079_v24, %v5078_v4  ;;  %v6234_v14 = vld [vmem:[%s18155_s7 + $0xd0] sm:$0xff]  ;;  %v18752_v15 = vld [vmem:[#allocation119_spill] sm:$0xff] }
 0x3f4   : > { %18751 = vst [vmem:[#allocation85_spill] sm:$0xff] %v15652_v45  ;;  %9888 = vmatmul.mubr.msk.f32.gmra.mrb[140].mxu0 %vm385_vm0, %v15484_v43  ;;  %10141 = vmatprep.subr.bf16.mxu1 %v18525_v48  ;;  %v10142_v43 = vpack.c.bf16 %v6233_v10, %v6232_v47  ;;  %v5083_v47 = vld [vmem:[#allocation2 + $0x1cf] sm:$0xff]  ;;  %v10145_v10 = vpack.c.bf16 %v6235_v38, %v6234_v14  ;;  %v18754_v14 = vld [vmem:[#allocation65_spill] sm:$0xff] }
 0x3f5   : > { %9890 = vmatprep.mubr.msk.f32.mxu0 %vm385_vm0, %v15507_v18  ;;  %v15680_v18 = vpack.i.bf16 %v5081_v54, %v5080_v7  ;;  %v6236_v7 = vld [vmem:[%s18155_s7 + $0xe0] sm:$0xff]  ;;  %v6237_v4 = vld [vmem:[%s18155_s7 + $0xe8] sm:$0xff] }
 0x3f6   : > { %11466 = vrot.lane.b32.xlu0 %v15660_v29, %s12285_s25  ;;  %11461 = vrot.lane.b32.xlu1 %v15662_v31, %s12285_s25  ;;  %v2527_v49 = vpop.f32.mrb[56].mxu1 }
 0x3f7   : > { %v2528_v39 = vadd.f32 %v15367_v19, %v2527_v49  ;;  %v2529_v59 = vpop.f32.mrb[57].mxu1  ;;  %10143 = vmatpush1.bf16.msra.mxu1 %v10142_v43  ;;  %v5084_v49 = vld [vmem:[#allocation2 + $0x1e7] sm:$0xff] }
 0x3f8   : > { %9891 = vmatmul.mubr.msk.f32.gmra.mrb[142].mxu0 %vm385_vm0, %v15515_v46  ;;  %v5085_v46 = vld [vmem:[#allocation2 + $0x1ef] sm:$0xff]  ;;  %10144 = vmatprep.subr.bf16.mxu1 %v18525_v48 }
 0x3f9   : > { %v15691_v37 = vadd.f32 %v18752_v15, %v2528_v39  ;;  %9893 = vmatprep.mubr.msk.f32.mxu0 %vm385_vm0, %v15511_v30  ;;  %v5082_v39 = vld [vmem:[#allocation2 + $0x1c7] sm:$0xff]  ;;  %v15703_v30 = vpack.i.bf16 %v5085_v46, %v5084_v49  ;;  %v10148_v15 = vpack.c.bf16 %v6237_v4, %v6236_v7  ;;  %v6239_v49 = vld [vmem:[%s18155_s7 + $0xf8] sm:$0xff] }
 0x3fa   : > { %11476 = vrot.lane.b32.xlu0 %v15680_v18, %s12285_s25  ;;  %11471 = vrot.lane.b32.xlu1 %v15682_v0, %s12285_s25  ;;  %v2532_v54 = vpop.f32.mrb[58].mxu1  ;;  %v15705_v59 = vpack.i.bf16 %v5083_v47, %v5082_v39 }
 0x3fb   : > { %18753 = vst [vmem:[#allocation52_spill] sm:$0xff] %v15691_v37  ;;  %v2533_v24 = vadd.f32 %v15367_v19, %v2532_v54  ;;  %v2534_v43 = vpop.f32.mrb[59].mxu1  ;;  %10146 = vmatpush1.bf16.msra.mxu1 %v10145_v10  ;;  %v5086_v54 = vld [vmem:[#allocation2 + $0x207] sm:$0xff] }
 0x3fc   : > { %9894 = vmatmul.mubr.msk.f32.gmra.mrb[144].mxu0 %vm385_vm0, %v15513_v33  ;;  %v5087_v33 = vld [vmem:[#allocation2 + $0x20f] sm:$0xff]  ;;  %10147 = vmatprep.subr.bf16.mxu1 %v18525_v48 }
 0x3fd   : > { %v15714_v38 = vadd.f32 %v18754_v14, %v2533_v24  ;;  %9896 = vmatprep.mubr.msk.f32.mxu0 %vm385_vm0, %v15544_v2  ;;  %v15726_v24 = vld [vmem:[#allocation2 + $0x209] sm:$0xff]  ;;  %v15728_v2 = vpack.i.bf16 %v5087_v33, %v5086_v54  ;;  %v15747_v33 = vld [vmem:[#allocation2 + $0x211] sm:$0xff] }
 0x3fe   : > { %11486 = vrot.lane.b32.xlu0 %v15703_v30, %s12285_s25  ;;  %11481 = vrot.lane.b32.xlu1 %v15705_v59, %s12285_s25  ;;  %v2537_v46 = vpop.f32.mrb[60].mxu1  ;;  %v6238_v43 = vld [vmem:[%s18155_s7 + $0xf0] sm:$0xff]  ;;  %v5208_v37 = vld [vmem:[#allocation2 + $0x1c8] sm:$0xff] }
 0x3ff   : > { %18755 = vst [vmem:[#allocation102_spill] sm:$0xff] %v15714_v38  ;;  %v2538_v47 = vadd.f32 %v15367_v19, %v2537_v46  ;;  %v2539_v10 = vpop.f32.mrb[61].mxu1  ;;  %10149 = vmatpush1.bf16.msra.mxu1 %v10148_v15  ;;  %v5185_v15 = vld [vmem:[#allocation2 + $0x50] sm:$0xff]  ;;  %v11685_v32 = vpack.i.bf16 %v5209_v36, %v5208_v37  ;;  %v5210_v36 = vld [vmem:[#allocation2 + $0x1e8] sm:$0xff] }
 0x400   : > { %9897 = vmatmul.mubr.msk.f32.gmra.mrb[146].mxu0 %vm385_vm0, %v15546_v58  ;;  %10150 = vmatprep.subr.bf16.mxu1 %v18525_v48  ;;  %v10151_v58 = vpack.c.bf16 %v6239_v49, %v6238_v43  ;;  %v5189_v54 = vld [vmem:[#allocation2 + $0x90] sm:$0xff]  ;;  %v15764_v43 = vpop.permute.xlu0 %11256  ;;  %v15773_v49 = vpop.permute.xlu1 %11261 }
 0x401   : > { %v15737_v39 = vadd.f32 %v15004_v34, %v2538_v47  ;;  %9899 = vmatprep.mubr.msk.f32.mxu0 %vm385_vm0, %v15726_v24  ;;  %v5186_v47 = vld [vmem:[#allocation2 + $0x68] sm:$0xff] }
 0x402   : > { %11496 = vrot.lane.b32.xlu0 %v15373_v52, %s12283_s13  ;;  %11491 = vrot.lane.b32.xlu1 %v15728_v2, %s12285_s25  ;;  %v2542_v7 = vpop.f32.mrb[62].mxu1  ;;  %v5184_v52 = vld [vmem:[#allocation2 + $0x48] sm:$0xff] }
 0x403   : > { %18756 = vst [vmem:[#allocation53_spill] sm:$0xff] %v15737_v39  ;;  %v2543_v4 = vadd.f32 %v15367_v19, %v2542_v7  ;;  %v2544_v14 = vpop.f32.mrb[63].mxu1  ;;  %10152 = vmatpush1.bf16.msra.mxu1 %v10151_v58  ;;  %v11515_v46 = vpack.i.bf16 %v5185_v15, %v5184_v52  ;;  %v5187_v19 = vld [vmem:[#allocation2 + $0x70] sm:$0xff] }
 0x404   : > { %9900 = vmatmul.mubr.msk.f32.gmra.mrb[148].mxu0 %vm385_vm0, %v15747_v33  ;;  %v11525_v10 = vpack.i.bf16 %v5187_v19, %v5186_v47  ;;  %v5193_v7 = vld [vmem:[#allocation2 + $0xd0] sm:$0xff] }
 0x405   : > { %v15752_v34 = vadd.f32 %v14995_v28, %v2543_v4  ;;  %v5188_v28 = vld [vmem:[#allocation2 + $0x88] sm:$0xff]  ;;  %v15780_v4 = vpop.permute.xlu1 %11271  ;;  %v5195_v52 = vld [vmem:[#allocation2 + $0xf0] sm:$0xff] }
 0x406   : > { %11506 = vrot.lane.b32.xlu0 %v15396_v60, %s12283_s13  ;;  %11501 = vrot.lane.b32.xlu1 %v15371_v12, %s12283_s13  ;;  %v11535_v60 = vpack.i.bf16 %v5189_v54, %v5188_v28  ;;  %v5191_v12 = vld [vmem:[#allocation2 + $0xb0] sm:$0xff] }
 0x407   : > { %18757 = vst [vmem:[#allocation51_spill] sm:$0xff] %v15752_v34 }
 0x40a   : > { %11516 = vrot.lane.b32.xlu0 %v11515_v46, %s12285_s25  ;;  %11511 = vrot.lane.b32.xlu1 %v15578_v21, %s12284_s0  ;;  %v5190_v21 = vld [vmem:[#allocation2 + $0xa8] sm:$0xff] }
 0x40b   : > { %v11550_v58 = vpack.i.bf16 %v5191_v12, %v5190_v21  ;;  %v5199_v12 = vld [vmem:[#allocation2 + $0x130] sm:$0xff] }
 0x40e   : > { %11526 = vrot.lane.b32.xlu0 %v11525_v10, %s12285_s25  ;;  %11521 = vrot.lane.b32.xlu1 %v15576_v61, %s12284_s0  ;;  %v15775_v61 = vpop.permute.xlu0 %11266  ;;  %v5197_v10 = vld [vmem:[#allocation2 + $0x110] sm:$0xff] }
 0x412   : > { %11536 = vrot.lane.b32.xlu0 %v11535_v60, %s12285_s25  ;;  %11531 = vrot.lane.b32.xlu1 %v15597_v3, %s12284_s0  ;;  %v5192_v3 = vld [vmem:[#allocation2 + $0xc8] sm:$0xff]  ;;  %v15782_v14 = vpop.permute.xlu0 %11276 }
 0x416   : > { %11546 = vrot.lane.b32.xlu0 %v15595_v22, %s12284_s0  ;;  %11541 = vrot.lane.b32.xlu1 %v15394_v42, %s12283_s13  ;;  %v11565_v22 = vpack.i.bf16 %v5193_v7, %v5192_v3  ;;  %v15787_v42 = vpop.permute.xlu1 %11281  ;;  %v15789_v15 = vpop.permute.xlu0 %11286 }
 0x41a   : > { %11556 = vrot.lane.b32.xlu0 %v15419_v5, %s12283_s13  ;;  %11551 = vrot.lane.b32.xlu1 %v11550_v58, %s12285_s25  ;;  %v5194_v5 = vld [vmem:[#allocation2 + $0xe8] sm:$0xff]  ;;  %v15795_v46 = vpop.permute.xlu1 %11291  ;;  %v15797_v19 = vpop.permute.xlu0 %11296 }
 0x41b   : > { %v11580_v47 = vpack.i.bf16 %v5195_v52, %v5194_v5  ;;  %v5198_v58 = vld [vmem:[#allocation2 + $0x128] sm:$0xff] }
 0x41c   : > { %v5200_v5 = vld [vmem:[#allocation2 + $0x148] sm:$0xff] }
 0x41e   : > { %11566 = vrot.lane.b32.xlu0 %v11565_v22, %s12285_s25  ;;  %11561 = vrot.lane.b32.xlu1 %v15617_v1, %s12284_s0  ;;  %v5196_v1 = vld [vmem:[#allocation2 + $0x108] sm:$0xff]  ;;  %v15802_v54 = vpop.permute.xlu1 %11301  ;;  %v5201_v22 = vld [vmem:[#allocation2 + $0x150] sm:$0xff] }
 0x420   : > { %v15804_v28 = vpop.permute.xlu0 %11306 }
 0x421   : > { %18758 = vst [vmem:[#allocation47_spill] sm:$0xff] %v15804_v28 }
 0x422   : > { %11576 = vrot.lane.b32.xlu0 %v15615_v9, %s12284_s0  ;;  %11571 = vrot.lane.b32.xlu1 %v15417_v35, %s12283_s13  ;;  %v11595_v9 = vpack.i.bf16 %v5197_v10, %v5196_v1  ;;  %v11625_v10 = vpack.i.bf16 %v5201_v22, %v5200_v5 }
 0x424   : > { %v15809_v35 = vpop.permute.xlu1 %11311 }
 0x425   : > { %18759 = vst [vmem:[#allocation54_spill] sm:$0xff] %v15809_v35 }
 0x426   : > { %11586 = vrot.lane.b32.xlu0 %v15447_v56, %s12283_s13  ;;  %11581 = vrot.lane.b32.xlu1 %v11580_v47, %s12285_s25 }
 0x428   : > { %v15811_v60 = vpop.permute.xlu0 %11316 }
 0x429   : > { %18760 = vst [vmem:[#allocation92_spill] sm:$0xff] %v15811_v60  ;;  %v5247_v60 = vld [vmem:[#allocation2 + $0x231] sm:$0xff] }
 0x42a   : > { %11596 = vrot.lane.b32.xlu0 %v11595_v9, %s12285_s25  ;;  %11591 = vrot.lane.b32.xlu1 %v15640_v40, %s12284_s0  ;;  %v11610_v40 = vpack.i.bf16 %v5199_v12, %v5198_v58 }
 0x42c   : > { %v15819_v7 = vpop.permute.xlu1 %11321 }
 0x42d   : > { %18761 = vst [vmem:[#allocation55_spill] sm:$0xff] %v15819_v7 }
 0x42e   : > { %11606 = vrot.lane.b32.xlu0 %v15638_v23, %s12284_s0  ;;  %11601 = vrot.lane.b32.xlu1 %v15443_v16, %s12283_s13  ;;  %v15817_v56 = vpop.f32.mrb[64].mxu0 }
 0x42f   : > { %v4418_v21 = vpop.f32.mrb[65].mxu0 }
 0x430   : > { %v15821_v3 = vpop.permute.xlu0 %11326  ;;  %v5203_v21 = vld [vmem:[#allocation2 + $0x170] sm:$0xff] }
 0x431   : > { %18762 = vst [vmem:[#allocation56_spill] sm:$0xff] %v15821_v3 }
 0x432   : > { %11616 = vrot.lane.b32.xlu0 %v15476_v20, %s12283_s13  ;;  %11611 = vrot.lane.b32.xlu1 %v11610_v40, %s12285_s25  ;;  %v15826_v52 = vpop.f32.mrb[66].mxu0  ;;  %v5202_v40 = vld [vmem:[#allocation2 + $0x168] sm:$0xff] }
 0x433   : > { %v4423_v23 = vpop.f32.mrb[67].mxu0 }
 0x434   : > { %v15828_v16 = vpop.permute.xlu1 %11331  ;;  %v15830_v47 = vpop.permute.xlu0 %11336  ;;  %v11640_v23 = vpack.i.bf16 %v5203_v21, %v5202_v40 }
 0x435   : > { %18763 = vst [vmem:[#allocation104_spill] sm:$0xff] %v15828_v16  ;;  %v5214_v16 = vld [vmem:[#allocation2 + $0x228] sm:$0xff] }
 0x436   : > { %11626 = vrot.lane.b32.xlu0 %v11625_v10, %s12285_s25  ;;  %11621 = vrot.lane.b32.xlu1 %v15662_v31, %s12284_s0  ;;  %v5205_v10 = vld [vmem:[#allocation2 + $0x190] sm:$0xff] }
 0x437   : > { %v15835_v1 = vpop.f32.mrb[68].mxu0 }
 0x438   : > { %v15837_v9 = vpop.permute.xlu1 %11341  ;;  %v15839_v20 = vpop.permute.xlu0 %11346 }
 0x439   : > { %v4428_v12 = vpop.f32.mrb[69].mxu0 }
 0x43a   : > { %11636 = vrot.lane.b32.xlu0 %v15660_v29, %s12284_s0  ;;  %11631 = vrot.lane.b32.xlu1 %v15472_v41, %s12283_s13  ;;  %v5204_v29 = vld [vmem:[#allocation2 + $0x188] sm:$0xff] }
 0x43b   : > { %v15845_v58 = vpop.f32.mrb[70].mxu0  ;;  %v11655_v38 = vpack.i.bf16 %v5205_v10, %v5204_v29 }
 0x43c   : > { %v15847_v22 = vpop.permute.xlu1 %11351  ;;  %v15849_v31 = vpop.permute.xlu0 %11356 }
 0x43d   : > { %v4433_v5 = vpop.f32.mrb[71].mxu0 }
 0x43e   : > { %11646 = vrot.lane.b32.xlu0 %v15505_v17, %s12283_s13  ;;  %11641 = vrot.lane.b32.xlu1 %v11640_v23, %s12285_s25  ;;  %v5207_v5 = vld [vmem:[#allocation2 + $0x1b0] sm:$0xff] }
 0x43f   : > { %v15854_v12 = vpop.f32.mrb[72].mxu0 }
 0x440   : > { %v15856_v34 = vpop.permute.xlu1 %11361  ;;  %v15858_v41 = vpop.permute.xlu0 %11366 }
 0x441   : > { %v4438_v45 = vpop.f32.mrb[73].mxu0 }
 0x442   : > { %11656 = vrot.lane.b32.xlu0 %v11655_v38, %s12285_s25  ;;  %11651 = vrot.lane.b32.xlu1 %v15682_v0, %s12284_s0  ;;  %v5206_v38 = vld [vmem:[#allocation2 + $0x1a8] sm:$0xff] }
 0x443   : > { %v15863_v21 = vpop.f32.mrb[74].mxu0  ;;  %v11670_v29 = vpack.i.bf16 %v5207_v5, %v5206_v38 }
 0x444   : > { %v15865_v40 = vpop.permute.xlu1 %11371  ;;  %v15867_v17 = vpop.permute.xlu0 %11376 }
 0x445   : > { %v4443_v23 = vpop.f32.mrb[75].mxu0 }
 0x446   : > { %11666 = vrot.lane.b32.xlu0 %v15680_v18, %s12284_s0  ;;  %11661 = vrot.lane.b32.xlu1 %v15501_v50, %s12283_s13 }
 0x447   : > { %v15873_v45 = vpop.f32.mrb[76].mxu0 }
 0x448   : > { %v15875_v10 = vpop.permute.xlu1 %11381  ;;  %v15877_v0 = vpop.permute.xlu0 %11386 }
 0x449   : > { %18764 = vst [vmem:[#allocation58_spill] sm:$0xff] %v15877_v0  ;;  %v4448_v39 = vpop.f32.mrb[77].mxu0 }
 0x44a   : > { %11676 = vrot.lane.b32.xlu0 %v15536_v6, %s12283_s13  ;;  %11671 = vrot.lane.b32.xlu1 %v11670_v29, %s12285_s25  ;;  %v15882_v23 = vpop.f32.mrb[64].mxu1 }
 0x44b   : > { %v15884_v18 = vpop.f32.mrb[78].mxu0  ;;  %v4558_v50 = vpop.f32.mrb[65].mxu1 }
 0x44c   : > { %v15886_v27 = vpop.permute.xlu1 %11391  ;;  %v15888_v51 = vpop.permute.xlu0 %11396 }
 0x44d   : > { %18765 = vst [vmem:[#allocation60_spill] sm:$0xff] %v15886_v27  ;;  %18766 = vst [vmem:[#allocation98_spill] sm:$0xff] %v15888_v51  ;;  %v4453_v44 = vpop.f32.mrb[79].mxu0 }
 0x44e   : > { %11686 = vrot.lane.b32.xlu0 %v11685_v32, %s12285_s25  ;;  %11681 = vrot.lane.b32.xlu1 %v15705_v59, %s12284_s0  ;;  %v15893_v6 = vpop.f32.mrb[66].mxu1 }
 0x44f   : > { %v15895_v39 = vpop.f32.mrb[80].mxu0  ;;  %v4563_v5 = vpop.f32.mrb[67].mxu1 }
 0x450   : > { %v15897_v38 = vpop.permute.xlu1 %11401  ;;  %v15899_v29 = vpop.permute.xlu0 %11406  ;;  %v11700_v5 = vpack.i.bf16 %v5211_v62, %v5210_v36 }
 0x451   : > { %18767 = vst [vmem:[#allocation106_spill] sm:$0xff] %v15897_v38  ;;  %18768 = vst [vmem:[#allocation109_spill] sm:$0xff] %v15899_v29  ;;  %v4458_v50 = vpop.f32.mrb[81].mxu0 }
 0x452   : > { %11696 = vrot.lane.b32.xlu0 %v15703_v30, %s12284_s0  ;;  %11691 = vrot.lane.b32.xlu1 %v15532_v53, %s12283_s13  ;;  %v5213_v50 = vld [vmem:[#allocation2 + $0x210] sm:$0xff] }
 0x453   : > { %v15905_v32 = vpop.f32.mrb[82].mxu0  ;;  %v15907_v44 = vpop.f32.mrb[68].mxu1  ;;  %v11715_v62 = vpack.i.bf16 %v5213_v50, %v5212_v26  ;;  %v5215_v26 = vld [vmem:[#allocation2 + $0x230] sm:$0xff] }
 0x454   : > { %v15909_v37 = vpop.permute.xlu1 %11411  ;;  %v15911_v59 = vpop.permute.xlu0 %11416 }
 0x455   : > { %18769 = vst [vmem:[#allocation57_spill] sm:$0xff] %v15909_v37  ;;  %v4463_v57 = vpop.f32.mrb[83].mxu0  ;;  %v4568_v25 = vpop.f32.mrb[69].mxu1 }
 0x456   : > { %11706 = vrot.lane.b32.xlu0 %v15557_v11, %s12283_s13  ;;  %11701 = vrot.lane.b32.xlu1 %v11700_v5, %s12285_s25  ;;  %v15927_v25 = vld [vmem:[%s18154_s6] ss:$0 sm:$0xff]  ;;  %v11725_v5 = vpack.i.bf16 %v5183_v55, %v5182_v63 }
 0x457   : > { %v15916_v30 = vpop.f32.mrb[84].mxu0  ;;  %v15918_v53 = vpop.f32.mrb[70].mxu1  ;;  %v4422_v36 = vadd.f32 %v15927_v25, %v15826_v52  ;;  %v4417_v50 = vadd.f32 %v15927_v25, %v15817_v56  ;;  %v11720_v52 = vpack.i.bf16 %v15747_v33, %v15726_v24  ;;  %v4432_v63 = vadd.f32 %v15927_v25, %v15845_v58 }
 0x458   : > { %v15920_v8 = vpop.permute.xlu1 %11421  ;;  %v15922_v13 = vpop.permute.xlu0 %11426 }
 0x459   : > { %v4468_v57 = vpop.f32.mrb[85].mxu0  ;;  %v4573_v11 = vpop.f32.mrb[71].mxu1 }
 0x45a   : > { %11716 = vrot.lane.b32.xlu0 %v11715_v62, %s12285_s25  ;;  %11711 = vrot.lane.b32.xlu1 %v15728_v2, %s12284_s0  ;;  %v11730_v2 = vpack.i.bf16 %v5215_v26, %v5214_v16 }
 0x45b   : > { %v4471_v48 = vpop.f32.mrb[86].mxu0  ;;  %v9803_v37 = vpop.f32.mrb[72].mxu1 }
 0x45c   : > { %v15936_v29 = vadd.f32 %v9803_v37, %v4422_v36  ;;  %v15938_v57 = vpop.permute.xlu1 %11431  ;;  %v15940_v11 = vpop.permute.xlu0 %11436  ;;  %v4427_v36 = vadd.f32 %v15927_v25, %v15835_v1  ;;  %v4437_v1 = vadd.f32 %v15927_v25, %v15854_v12 }
 0x45d   : > { %v4473_v62 = vpop.f32.mrb[87].mxu0  ;;  %v4641_v3 = vpop.f32.mrb[73].mxu1 }
 0x45e   : > { %18770 = vst [vmem:[#allocation118_spill] sm:$0xff] %v15936_v29  ;;  %v15946_v55 = vadd.f32 %v4641_v3, %v4417_v50  ;;  %11721 = vrot.lane.b32.xlu1 %v11720_v52, %s12283_s13  ;;  %11726 = vrot.lane.b32.xlu0 %v11725_v5, %s12284_s0  ;;  %v4442_v3 = vadd.f32 %v15927_v25, %v15863_v21 }
 0x45f   : > { %v4476_v56 = vpop.f32.mrb[88].mxu0  ;;  %v9806_v37 = vpop.f32.mrb[74].mxu1  ;;  %v4452_v21 = vadd.f32 %v15927_v25, %v15884_v18 }
 0x460   : > { %18771 = vst [vmem:[#allocation74_spill] sm:$0xff] %v15946_v55  ;;  %v15952_v29 = vadd.f32 %v9806_v37, %v4432_v63  ;;  %v15954_v24 = vpop.permute.xlu1 %11441  ;;  %v15956_v33 = vpop.permute.xlu0 %11446 }
 0x461   : > { %v4478_v62 = vpop.f32.mrb[89].mxu0  ;;  %v4651_v58 = vpop.f32.mrb[75].mxu1 }
 0x462   : > { %18772 = vst [vmem:[#allocation62_spill] sm:$0xff] %v15952_v29  ;;  %v15960_v50 = vadd.f32 %v4651_v58, %v4427_v36  ;;  %11731 = vrot.lane.b32.xlu1 %v11730_v2, %s12285_s25  ;;  %v4447_v29 = vadd.f32 %v15927_v25, %v15873_v45 }
 0x463   : > { %v4481_v16 = vpop.f32.mrb[90].mxu0  ;;  %v9809_v5 = vpop.f32.mrb[76].mxu1 }
 0x464   : > { %18773 = vst [vmem:[#allocation108_spill] sm:$0xff] %v15960_v50  ;;  %v15965_v26 = vadd.f32 %v9809_v5, %v4442_v3  ;;  %v15967_v52 = vpop.permute.xlu1 %11451  ;;  %v15969_v63 = vpop.permute.xlu0 %11456 }
 0x465   : > { %v4483_v37 = vpop.f32.mrb[91].mxu0  ;;  %v4661_v62 = vpop.f32.mrb[77].mxu1 }
 0x466   : > { %18774 = vst [vmem:[#allocation115_spill] sm:$0xff] %v15965_v26  ;;  %v15973_v36 = vadd.f32 %v4661_v62, %v4437_v1  ;;  %v4462_v37 = vadd.f32 %v15927_v25, %v15905_v32  ;;  %v4457_v62 = vadd.f32 %v15927_v25, %v15895_v39 }
 0x467   : > { %v4486_v58 = vpop.f32.mrb[92].mxu0  ;;  %v9812_v2 = vpop.f32.mrb[78].mxu1 }
 0x468   : > { %18775 = vst [vmem:[#allocation67_spill] sm:$0xff] %v15973_v36  ;;  %v15977_v50 = vadd.f32 %v9812_v2, %v4452_v21  ;;  %v15979_v12 = vpop.permute.xlu1 %11461  ;;  %v15981_v3 = vpop.permute.xlu0 %11466 }
 0x469   : > { %18777 = vst [vmem:[#allocation71_spill] sm:$0xff] %v15979_v12  ;;  %18778 = vst [vmem:[#allocation126_spill] sm:$0xff] %v15981_v3  ;;  %v4488_v5 = vpop.f32.mrb[93].mxu0  ;;  %v4671_v26 = vpop.f32.mrb[79].mxu1 }
 0x46a   : > { %18776 = vst [vmem:[#allocation120_spill] sm:$0xff] %v15977_v50  ;;  %v15985_v55 = vadd.f32 %v4671_v26, %v4447_v29  ;;  %v4472_v5 = vadd.f32 %v15927_v25, %v4471_v48  ;;  %v4467_v26 = vadd.f32 %v15927_v25, %v15916_v30 }
 0x46b   : > { %v4491_v18 = vpop.f32.mrb[94].mxu0  ;;  %v9815_v1 = vpop.f32.mrb[80].mxu1 }
 0x46c   : > { %18779 = vst [vmem:[#allocation33_spill] sm:$0xff] %v15985_v55  ;;  %v15989_v36 = vadd.f32 %v9815_v1, %v4462_v37  ;;  %v15991_v45 = vpop.permute.xlu1 %11471  ;;  %v15993_v21 = vpop.permute.xlu0 %11476 }
 0x46d   : > { %18781 = vst [vmem:[#allocation64_spill] sm:$0xff] %v15991_v45  ;;  %18782 = vst [vmem:[#allocation72_spill] sm:$0xff] %v15993_v21  ;;  %v4493_v2 = vpop.f32.mrb[95].mxu0  ;;  %v4681_v50 = vpop.f32.mrb[81].mxu1 }
 0x46e   : > { %18780 = vst [vmem:[#allocation68_spill] sm:$0xff] %v15989_v36  ;;  %v15996_v38 = vadd.f32 %v4681_v50, %v4457_v62  ;;  %v4482_v2 = vadd.f32 %v15927_v25, %v4481_v16  ;;  %v4477_v62 = vadd.f32 %v15927_v25, %v4476_v56 }
 0x46f   : > { %v4496_v32 = vpop.f32.mrb[96].mxu0  ;;  %v9818_v29 = vpop.f32.mrb[82].mxu1 }
 0x470   : > { %18783 = vst [vmem:[#allocation66_spill] sm:$0xff] %v15996_v38  ;;  %v16000_v55 = vadd.f32 %v9818_v29, %v4472_v5  ;;  %v16002_v39 = vpop.permute.xlu1 %11481  ;;  %v16004_v37 = vpop.permute.xlu0 %11486 }
 0x471   : > { %18785 = vst [vmem:[#allocation48_spill] sm:$0xff] %v16002_v39  ;;  %18786 = vst [vmem:[#allocation100_spill] sm:$0xff] %v16004_v37  ;;  %v4498_v1 = vpop.f32.mrb[97].mxu0  ;;  %v4691_v36 = vpop.f32.mrb[83].mxu1 }
 0x472   : > { %18784 = vst [vmem:[#allocation124_spill] sm:$0xff] %v16000_v55  ;;  %v16007_v7 = vadd.f32 %v4691_v36, %v4467_v26  ;;  %v4492_v55 = vadd.f32 %v15927_v25, %v4491_v18  ;;  %v11258_v1 = vunpack.i.l.bf16 %v15764_v43  ;;  %v4960_v26 = vld [vmem:[#allocation2 + $0x7] sm:$0xff] }
 0x473   : > { %v4501_v48 = vpop.f32.mrb[98].mxu0  ;;  %v9821_v50 = vpop.f32.mrb[84].mxu1 }
 0x474   : > { %18787 = vst [vmem:[#allocation96_spill] sm:$0xff] %v16007_v7  ;;  %v16010_v38 = vadd.f32 %v9821_v50, %v4482_v2  ;;  %v16012_v21 = vpop.permute.xlu1 %11491  ;;  %v11497_v30 = vpop.permute.xlu0 %11496  ;;  %v4487_v7 = vadd.f32 %v15927_v25, %v4486_v58  ;;  %v4502_v18 = vadd.f32 %v15927_v25, %v4501_v48  ;;  %v6016_v51 = vsel %vm385_vm0, %v4960_v26, %v11258_v1  ;;  %v4961_v1 = vld [vmem:[#allocation2 + $0xf] sm:$0xff] }
 0x475   : > { %18789 = vst [vmem:[#allocation44_spill] sm:$0xff] %v16012_v21  ;;  %v4503_v5 = vpop.f32.mrb[99].mxu0  ;;  %v4701_v29 = vpop.f32.mrb[85].mxu1  ;;  %v11498_v39 = vunpack.i.l.bf16 %v11497_v30  ;;  %v11338_v58 = vunpack.i.l.bf16 %v15830_v47 }
 0x476   : > { %18788 = vst [vmem:[#allocation116_spill] sm:$0xff] %v16010_v38  ;;  %v16015_v37 = vadd.f32 %v4701_v29, %v4477_v62  ;;  %v11499_v5 = vunpack.i.h.bf16 %v11497_v30  ;;  %v5246_v29 = vld [vmem:[#allocation2 + $0x229] sm:$0xff]  ;;  %v4497_v30 = vadd.f32 %v15927_v25, %v4496_v32 }
 0x477   : > { %v4506_v16 = vpop.f32.mrb[100].mxu0  ;;  %v9824_v36 = vpop.f32.mrb[86].mxu1  ;;  %9902 = vmatprep.mubr.msk.f32.mxu0 %vm385_vm0, %v5246_v29 }
 0x478   : > { %18790 = vst [vmem:[#allocation80_spill] sm:$0xff] %v16015_v37  ;;  %v16019_v56 = vadd.f32 %v9824_v36, %v4492_v55  ;;  %v16021_v2 = vpop.permute.xlu1 %11501  ;;  %v16023_v50 = vpop.permute.xlu0 %11506  ;;  %v11259_v37 = vunpack.i.h.bf16 %v15764_v43  ;;  %9903 = vmatmul.mubr.msk.f32.gmra.mrb[150].mxu0 %vm385_vm0, %v5247_v60  ;;  %v4507_v28 = vadd.f32 %v15927_v25, %v4506_v16  ;;  %v5090_v16 = vld [vmem:[#allocation2 + $0x48] sm:$0xff] }
 0x479   : > { %v4508_v38 = vpop.f32.mrb[101].mxu0  ;;  %v4711_v21 = vpop.f32.mrb[87].mxu1  ;;  %v11503_v0 = vunpack.i.l.bf16 %v16021_v2 }
 0x47a   : > { %18791 = vst [vmem:[#allocation107_spill] sm:$0xff] %v16019_v56  ;;  %v16026_v62 = vadd.f32 %v4711_v21, %v4487_v7  ;;  %v5088_v56 = vld [vmem:[#allocation2 + $0x28] sm:$0xff]  ;;  %v11418_v38 = vunpack.i.l.bf16 %v15911_v59 }
 0x47b   : > { %v4511_v55 = vpop.f32.mrb[102].mxu0  ;;  %v9827_v36 = vpop.f32.mrb[88].mxu1  ;;  %v6112_v43 = vsel %vm385_vm0, %v5088_v56, %v11498_v39  ;;  %v11339_v39 = vunpack.i.h.bf16 %v15830_v47  ;;  %v11419_v47 = vunpack.i.h.bf16 %v15911_v59  ;;  %v11264_v59 = vunpack.i.h.bf16 %v15773_v49 }
 0x47c   : > { %18792 = vst [vmem:[#allocation70_spill] sm:$0xff] %v16026_v62  ;;  %v16034_v48 = vadd.f32 %v9827_v36, %v4502_v18  ;;  %v11512_v7 = vpop.permute.xlu1 %11511  ;;  %v11517_v21 = vpop.permute.xlu0 %11516  ;;  %v5089_v62 = vld [vmem:[#allocation2 + $0x30] sm:$0xff]  ;;  %v4512_v32 = vadd.f32 %v15927_v25, %v4511_v55 }
 0x47d   : > { %v11514_v26 = vunpack.i.h.bf16 %v11512_v7  ;;  %v11513_v45 = vunpack.i.l.bf16 %v11512_v7  ;;  %v11518_v27 = vunpack.i.l.bf16 %v11517_v21  ;;  %v4513_v35 = vpop.f32.mrb[103].mxu0  ;;  %v4721_v29 = vpop.f32.mrb[89].mxu1  ;;  %v6113_v3 = vsel %vm385_vm0, %v5089_v62, %v11499_v5 }
 0x47e   : > { %18793 = vst [vmem:[#allocation73_spill] sm:$0xff] %v16034_v48  ;;  %v11519_v18 = vunpack.i.h.bf16 %v11517_v21  ;;  %v16041_v36 = vadd.f32 %v4721_v29, %v4497_v30  ;;  %v6017_v35 = vsel %vm385_vm0, %v4961_v1, %v11259_v37  ;;  %v6048_v30 = vsel %vm2020_vm1, %v6016_v51, %v11338_v58 }
 0x47f   : > { %v4516_v56 = vpop.f32.mrb[104].mxu0  ;;  %v9830_v48 = vpop.f32.mrb[90].mxu1  ;;  %v6144_v60 = vsel %vm2020_vm1, %v6112_v43, %v11513_v45  ;;  %v6145_v7 = vsel %vm2020_vm1, %v6113_v3, %v11514_v26  ;;  %v11504_v21 = vunpack.i.h.bf16 %v16021_v2  ;;  %v6080_v37 = vsel %vm2053_vm2, %v6048_v30, %v11418_v38 }
 0x480   : > { %v16048_v5 = vadd.f32 %v9830_v48, %v4512_v32  ;;  %v11522_v62 = vpop.permute.xlu1 %11521  ;;  %v16050_v12 = vpop.permute.xlu0 %11526  ;;  %v6176_v55 = vsel %vm2053_vm2, %v6144_v60, %v11518_v27  ;;  %v6177_v27 = vsel %vm2053_vm2, %v6145_v7, %v11519_v18  ;;  %v6114_v51 = vsel %vm385_vm0, %v5090_v16, %v11503_v0  ;;  %v5091_v7 = vld [vmem:[#allocation2 + $0x50] sm:$0xff] }
 0x481   : > { %v11523_v45 = vunpack.i.l.bf16 %v11522_v62  ;;  %v4518_v43 = vpop.f32.mrb[105].mxu0  ;;  %v4731_v3 = vpop.f32.mrb[91].mxu1  ;;  %6411 = vmatprep.mubr.f32.mxu1 %v6176_v55  ;;  %v11528_v48 = vunpack.i.l.bf16 %v16050_v12  ;;  %v11263_v2 = vunpack.i.l.bf16 %v15773_v49  ;;  %v11524_v58 = vunpack.i.h.bf16 %v11522_v62 }
 0x482   : > { %v16058_v1 = vadd.f32 %v4731_v3, %v4507_v28  ;;  %6412 = vmatmul.mubr.f32.vlgmr.msra.gmra.mrb[104].mxu1 %v6080_v37  ;;  %v11343_v32 = vunpack.i.l.bf16 %v15837_v9  ;;  %v4517_v28 = vadd.f32 %v15927_v25, %v4516_v56  ;;  %v6049_v0 = vsel %vm2020_vm1, %v6017_v35, %v11339_v39  ;;  %v4962_v35 = vld [vmem:[#allocation2 + $0x27] sm:$0xff] }
 0x483   : > { %v4521_v26 = vpop.f32.mrb[106].mxu0  ;;  %v9833_v29 = vpop.f32.mrb[92].mxu1  ;;  %6416 = vmatprep.mubr.f32.mxu1 %v6177_v27  ;;  %v6146_v38 = vsel %vm2020_vm1, %v6114_v51, %v11523_v45  ;;  %v11423_v49 = vunpack.i.l.bf16 %v15920_v8  ;;  %v11508_v62 = vunpack.i.l.bf16 %v16023_v50  ;;  %v6081_v45 = vsel %vm2053_vm2, %v6049_v0, %v11419_v47 }
 0x484   : > { %v4522_v60 = vadd.f32 %v15927_v25, %v4521_v26  ;;  %v16068_v55 = vpop.permute.xlu1 %11531  ;;  %v16070_v18 = vpop.permute.xlu0 %11536  ;;  %v6115_v3 = vsel %vm385_vm0, %v5091_v7, %v11504_v21  ;;  %v11529_v56 = vunpack.i.h.bf16 %v16050_v12  ;;  %v6178_v39 = vsel %vm2053_vm2, %v6146_v38, %v11528_v48  ;;  %v4963_v38 = vld [vmem:[#allocation2 + $0x2f] sm:$0xff] }
 0x485   : > { %v4523_v30 = vpop.f32.mrb[107].mxu0  ;;  %v4741_v43 = vpop.f32.mrb[93].mxu1  ;;  %v11533_v27 = vunpack.i.l.bf16 %v16068_v55  ;;  %v6147_v47 = vsel %vm2020_vm1, %v6115_v3, %v11524_v58  ;;  %v11344_v21 = vunpack.i.h.bf16 %v15837_v9  ;;  %v11509_v0 = vunpack.i.h.bf16 %v16023_v50  ;;  %v5092_v9 = vld [vmem:[#allocation2 + $0x68] sm:$0xff] }
 0x486   : > { %v16078_v37 = vadd.f32 %v9833_v29, %v4522_v60  ;;  %v16080_v16 = vadd.f32 %v4741_v43, %v4517_v28  ;;  %6417 = vmatmul.mubr.f32.gmra.mrb[106].mxu1 %v6081_v45  ;;  %v6018_v30 = vsel %vm385_vm0, %v4962_v35, %v11263_v2  ;;  %v11424_v60 = vunpack.i.h.bf16 %v15920_v8 }
 0x487   : > { %v4526_v51 = vpop.f32.mrb[108].mxu0  ;;  %v9836_v26 = vpop.f32.mrb[94].mxu1  ;;  %6421 = vmatprep.mubr.f32.mxu1 %v6178_v39  ;;  %v6050_v48 = vsel %vm2020_vm1, %v6018_v30, %v11343_v32  ;;  %v6019_v58 = vsel %vm385_vm0, %v4963_v38, %v11264_v59  ;;  %v11538_v45 = vunpack.i.l.bf16 %v16070_v18  ;;  %v6179_v39 = vsel %vm2053_vm2, %v6147_v47, %v11529_v56 }
 0x488   : > { %18794 = vst [vmem:[#allocation110_spill] sm:$0xff] %v16078_v37  ;;  %v4527_v12 = vadd.f32 %v15927_v25, %v4526_v51  ;;  %v16088_v29 = vpop.permute.xlu1 %11541  ;;  %v16090_v28 = vpop.permute.xlu0 %11546  ;;  %v6082_v2 = vsel %vm2053_vm2, %v6050_v48, %v11423_v49  ;;  %v6116_v32 = vsel %vm385_vm0, %v5092_v9, %v11508_v62  ;;  %v11269_v8 = vunpack.i.h.bf16 %v15775_v61  ;;  %v5093_v48 = vld [vmem:[#allocation2 + $0x70] sm:$0xff] }
 0x489   : > { %v4528_v7 = vpop.f32.mrb[109].mxu0  ;;  %v4751_v43 = vpop.f32.mrb[95].mxu1  ;;  %v11268_v50 = vunpack.i.l.bf16 %v15775_v61  ;;  %v11534_v35 = vunpack.i.h.bf16 %v16068_v55  ;;  %v6148_v59 = vsel %vm2020_vm1, %v6116_v32, %v11533_v27  ;;  %v11273_v30 = vunpack.i.l.bf16 %v15780_v4 }
 0x48a   : > { %v16098_v3 = vadd.f32 %v4751_v43, %v4527_v12  ;;  %6422 = vmatmul.mubr.f32.gmra.mrb[108].mxu1 %v6082_v2  ;;  %v11348_v12 = vunpack.i.l.bf16 %v15839_v20  ;;  %v6051_v61 = vsel %vm2020_vm1, %v6019_v58, %v11344_v21  ;;  %v11428_v55 = vunpack.i.l.bf16 %v15922_v13  ;;  %v4965_v21 = vld [vmem:[#allocation2 + $0x4f] sm:$0xff] }
 0x48b   : > { %v4531_v51 = vpop.f32.mrb[110].mxu0  ;;  %v16105_v49 = vpop.f32.mrb[96].mxu1  ;;  %6426 = vmatprep.mubr.f32.mxu1 %v6179_v39  ;;  %v6083_v43 = vsel %vm2053_vm2, %v6051_v61, %v11424_v60  ;;  %v6117_v27 = vsel %vm385_vm0, %v5093_v48, %v11509_v0  ;;  %v11539_v2 = vunpack.i.h.bf16 %v16070_v18  ;;  %v11543_v9 = vunpack.i.l.bf16 %v16088_v29  ;;  %v4966_v61 = vld [vmem:[#allocation2 + $0x67] sm:$0xff] }
 0x48c   : > { %v4532_v56 = vadd.f32 %v15927_v25, %v4531_v51  ;;  %v16111_v47 = vpop.permute.xlu1 %11551  ;;  %v16113_v62 = vpop.permute.xlu0 %11556  ;;  %v6180_v32 = vsel %vm2053_vm2, %v6148_v59, %v11538_v45  ;;  %v4964_v51 = vld [vmem:[#allocation2 + $0x47] sm:$0xff]  ;;  %v11349_v58 = vunpack.i.h.bf16 %v15839_v20  ;;  %v6149_v0 = vsel %vm2020_vm1, %v6117_v27, %v11534_v35 }
 0x48d   : > { %v4533_v38 = vpop.f32.mrb[111].mxu0  ;;  %v4761_v7 = vpop.f32.mrb[97].mxu1  ;;  %v6020_v60 = vsel %vm385_vm0, %v4964_v51, %v11268_v50  ;;  %v6021_v18 = vsel %vm385_vm0, %v4965_v21, %v11269_v8  ;;  %v6022_v48 = vsel %vm385_vm0, %v4966_v61, %v11273_v30  ;;  %v4562_v50 = vadd.f32 %v15927_v25, %v15893_v6 }
 0x48e   : > { %v16121_v39 = vadd.f32 %v9836_v26, %v4532_v56  ;;  %6427 = vmatmul.mubr.f32.gmra.mrb[110].mxu1 %v6083_v43  ;;  %v11429_v26 = vunpack.i.h.bf16 %v15922_v13  ;;  %v6052_v20 = vsel %vm2020_vm1, %v6020_v60, %v11348_v12  ;;  %v11544_v35 = vunpack.i.h.bf16 %v16088_v29 }
 0x48f   : > { %v4536_v37 = vpop.f32.mrb[112].mxu0  ;;  %v16125_v38 = vpop.f32.mrb[98].mxu1  ;;  %6431 = vmatprep.mubr.f32.mxu1 %v6180_v32  ;;  %v11548_v8 = vunpack.i.l.bf16 %v16090_v28  ;;  %v6084_v13 = vsel %vm2053_vm2, %v6052_v20, %v11428_v55  ;;  %v11553_v32 = vunpack.i.l.bf16 %v16111_v47  ;;  %v6181_v12 = vsel %vm2053_vm2, %v6149_v0, %v11539_v2  ;;  %v5095_v20 = vld [vmem:[#allocation2 + $0x90] sm:$0xff] }
 0x490   : > { %18795 = vst [vmem:[#allocation81_spill] sm:$0xff] %v16121_v39  ;;  %v4537_v56 = vadd.f32 %v15927_v25, %v4536_v37  ;;  %v16132_v45 = vpop.permute.xlu1 %11561  ;;  %v16134_v59 = vpop.permute.xlu0 %11566  ;;  %v5094_v37 = vld [vmem:[#allocation2 + $0x88] sm:$0xff]  ;;  %v11353_v6 = vunpack.i.l.bf16 %v15847_v22  ;;  %v4557_v29 = vadd.f32 %v15927_v25, %v15882_v23  ;;  %v4572_v21 = vadd.f32 %v15927_v25, %v15918_v53 }
 0x491   : > { %v4538_v43 = vpop.f32.mrb[113].mxu0  ;;  %v4771_v27 = vpop.f32.mrb[99].mxu1  ;;  %v6118_v30 = vsel %vm385_vm0, %v5094_v37, %v11543_v9  ;;  %v6053_v61 = vsel %vm2020_vm1, %v6021_v18, %v11349_v58  ;;  %v11433_v53 = vunpack.i.l.bf16 %v15938_v57  ;;  %v11558_v18 = vunpack.i.l.bf16 %v16113_v62 }
 0x492   : > { %v16144_v51 = vadd.f32 %v4761_v7, %v4537_v56  ;;  %6432 = vmatmul.mubr.f32.gmra.mrb[112].mxu1 %v6084_v13  ;;  %v11549_v7 = vunpack.i.h.bf16 %v16090_v28  ;;  %v6085_v23 = vsel %vm2053_vm2, %v6053_v61, %v11429_v26  ;;  %v11554_v43 = vunpack.i.h.bf16 %v16111_v47 }
 0x493   : > { %v4541_v60 = vpop.f32.mrb[114].mxu0  ;;  %v9845_v55 = vpop.f32.mrb[100].mxu1  ;;  %6436 = vmatprep.mubr.f32.mxu1 %v6181_v12  ;;  %v6150_v58 = vsel %vm2020_vm1, %v6118_v30, %v11548_v8  ;;  %v6119_v28 = vsel %vm385_vm0, %v5095_v20, %v11544_v35  ;;  %v11354_v47 = vunpack.i.h.bf16 %v15847_v22  ;;  %v6054_v35 = vsel %vm2020_vm1, %v6022_v48, %v11353_v6  ;;  %v5096_v6 = vld [vmem:[#allocation2 + $0xa8] sm:$0xff] }
 0x494   : > { %v4542_v56 = vadd.f32 %v15927_v25, %v4541_v60  ;;  %v16156_v2 = vadd.f32 %v9845_v55, %v4562_v50  ;;  %v16158_v9 = vpop.permute.xlu1 %11571  ;;  %v16160_v0 = vpop.permute.xlu0 %11576  ;;  %v6182_v26 = vsel %vm2053_vm2, %v6150_v58, %v11553_v32  ;;  %v11274_v60 = vunpack.i.h.bf16 %v15780_v4 }
 0x495   : > { %v4543_v13 = vpop.f32.mrb[115].mxu0  ;;  %v4781_v37 = vpop.f32.mrb[101].mxu1  ;;  %v11563_v55 = vunpack.i.l.bf16 %v16132_v45  ;;  %v6151_v4 = vsel %vm2020_vm1, %v6119_v28, %v11549_v7  ;;  %v11434_v22 = vunpack.i.h.bf16 %v15938_v57  ;;  %v6086_v48 = vsel %vm2053_vm2, %v6054_v35, %v11433_v53 }
 0x496   : > { %18796 = vst [vmem:[#allocation90_spill] sm:$0xff] %v16156_v2  ;;  %v16169_v50 = vadd.f32 %v16105_v49, %v4542_v56  ;;  %v16171_v12 = vadd.f32 %v4781_v37, %v4557_v29  ;;  %6437 = vmatmul.mubr.f32.gmra.mrb[114].mxu1 %v6085_v23  ;;  %v4567_v49 = vadd.f32 %v15927_v25, %v15907_v44  ;;  %v11559_v23 = vunpack.i.h.bf16 %v16113_v62  ;;  %v18808_v2 = vld [vmem:[#allocation60_spill] sm:$0xff] }
 0x497   : > { %v4546_v61 = vpop.f32.mrb[116].mxu0  ;;  %v9848_v8 = vpop.f32.mrb[102].mxu1  ;;  %6441 = vmatprep.mubr.f32.mxu1 %v6182_v26  ;;  %v6183_v44 = vsel %vm2053_vm2, %v6151_v4, %v11554_v43  ;;  %v4967_v26 = vld [vmem:[#allocation2 + $0x6f] sm:$0xff]  ;;  %v6120_v7 = vsel %vm385_vm0, %v5096_v6, %v11558_v18  ;;  %v11278_v57 = vunpack.i.l.bf16 %v15782_v14  ;;  %v11564_v62 = vunpack.i.h.bf16 %v16132_v45 }
 0x498   : > { %18797 = vst [vmem:[#allocation95_spill] sm:$0xff] %v16169_v50  ;;  %18798 = vst [vmem:[#allocation36_spill] sm:$0xff] %v16171_v12  ;;  %v4547_v30 = vadd.f32 %v15927_v25, %v4546_v61  ;;  %v16181_v29 = vadd.f32 %v9848_v8, %v4572_v21  ;;  %v16183_v56 = vpop.permute.xlu1 %11581  ;;  %v16185_v32 = vpop.permute.xlu0 %11586  ;;  %v11568_v21 = vunpack.i.l.bf16 %v16134_v59  ;;  %v6023_v53 = vsel %vm385_vm0, %v4967_v26, %v11274_v60  ;;  %v4982_v50 = vld [vmem:[#allocation2 + $0x167] sm:$0xff] }
 0x499   : > { %v4548_v20 = vpop.f32.mrb[117].mxu0  ;;  %v4791_v13 = vpop.f32.mrb[103].mxu1  ;;  %v6152_v43 = vsel %vm2020_vm1, %v6120_v7, %v11563_v55  ;;  %v11358_v61 = vunpack.i.l.bf16 %v15849_v31  ;;  %v6055_v35 = vsel %vm2020_vm1, %v6023_v53, %v11354_v47  ;;  %v11438_v18 = vunpack.i.l.bf16 %v15940_v11 }
 0x49a   : > { %18799 = vst [vmem:[#allocation86_spill] sm:$0xff] %v16181_v29  ;;  %v16193_v37 = vadd.f32 %v4771_v27, %v4547_v30  ;;  %v16195_v58 = vadd.f32 %v4791_v13, %v4567_v49  ;;  %6442 = vmatmul.mubr.f32.gmra.mrb[116].mxu1 %v6086_v48  ;;  %v5097_v49 = vld [vmem:[#allocation2 + $0xb0] sm:$0xff]  ;;  %v6087_v45 = vsel %vm2053_vm2, %v6055_v35, %v11434_v22  ;;  %v11569_v60 = vunpack.i.h.bf16 %v16134_v59  ;;  %v4968_v13 = vld [vmem:[#allocation2 + $0x87] sm:$0xff] }
 0x49b   : > { %v4551_v28 = vpop.f32.mrb[118].mxu0  ;;  %6446 = vmatprep.mubr.f32.mxu1 %v6183_v44  ;;  %v6121_v4 = vsel %vm385_vm0, %v5097_v49, %v11559_v23  ;;  %v11573_v55 = vunpack.i.l.bf16 %v16158_v9  ;;  %v11279_v47 = vunpack.i.h.bf16 %v15782_v14  ;;  %v6024_v22 = vsel %vm385_vm0, %v4968_v13, %v11278_v57 }
 0x49c   : > { %18800 = vst [vmem:[#allocation88_spill] sm:$0xff] %v16193_v37  ;;  %18801 = vst [vmem:[#allocation91_spill] sm:$0xff] %v16195_v58  ;;  %v4552_v27 = vadd.f32 %v15927_v25, %v4551_v28  ;;  %v16204_v8 = vpop.permute.xlu1 %11591  ;;  %v4553_v30 = vpop.f32.mrb[119].mxu0  ;;  %v6184_v25 = vsel %vm2053_vm2, %v6152_v43, %v11568_v21  ;;  %v6153_v59 = vsel %vm2020_vm1, %v6121_v4, %v11564_v62  ;;  %v11359_v23 = vunpack.i.h.bf16 %v15849_v31  ;;  %v5098_v28 = vld [vmem:[#allocation2 + $0xc8] sm:$0xff] }
 0x49d   : > { %v16217_v48 = vpop.permute.xlu0 %11596  ;;  %v11439_v6 = vunpack.i.h.bf16 %v15940_v11  ;;  %v11578_v21 = vunpack.i.l.bf16 %v16160_v0  ;;  %v11574_v53 = vunpack.i.h.bf16 %v16158_v9  ;;  %v11583_v57 = vunpack.i.l.bf16 %v16183_v56  ;;  %v4969_v62 = vld [vmem:[#allocation2 + $0x8f] sm:$0xff] }
 0x49e   : > { %v16213_v20 = vadd.f32 %v16125_v38, %v4552_v27  ;;  %6447 = vmatmul.mubr.f32.gmra.mrb[118].mxu1 %v6087_v45  ;;  %v6056_v38 = vsel %vm2020_vm1, %v6024_v22, %v11358_v61  ;;  %v6185_v31 = vsel %vm2053_vm2, %v6153_v59, %v11569_v60  ;;  %v6122_v43 = vsel %vm385_vm0, %v5098_v28, %v11573_v55  ;;  %v5099_v55 = vld [vmem:[#allocation2 + $0xd0] sm:$0xff]  ;;  %v4970_v22 = vld [vmem:[#allocation2 + $0xa7] sm:$0xff] }
 0x49f   : > { %6451 = vmatprep.mubr.f32.mxu1 %v6184_v25  ;;  %v16219_v44 = vpop.f32.mrb[120].mxu0  ;;  %v6088_v7 = vsel %vm2053_vm2, %v6056_v38, %v11438_v18  ;;  %v11283_v11 = vunpack.i.l.bf16 %v15787_v42  ;;  %v6025_v27 = vsel %vm385_vm0, %v4969_v62, %v11279_v47  ;;  %v11363_v35 = vunpack.i.l.bf16 %v15856_v34 }
 0x4a0   : > { %18802 = vst [vmem:[#allocation101_spill] sm:$0xff] %v16213_v20  ;;  %v16227_v26 = vpop.permute.xlu1 %11601  ;;  %v16229_v14 = vpop.f32.mrb[121].mxu0  ;;  %v6057_v49 = vsel %vm2020_vm1, %v6025_v27, %v11359_v23  ;;  %v11443_v9 = vunpack.i.l.bf16 %v15954_v24  ;;  %v11579_v18 = vunpack.i.h.bf16 %v16160_v0  ;;  %v6154_v60 = vsel %vm2020_vm1, %v6122_v43, %v11578_v21  ;;  %v4971_v27 = vld [vmem:[#allocation2 + $0xaf] sm:$0xff] }
 0x4a1   : > { %v16244_v30 = vpop.permute.xlu0 %11606  ;;  %v6089_v4 = vsel %vm2053_vm2, %v6057_v49, %v11439_v6  ;;  %v11584_v25 = vunpack.i.h.bf16 %v16183_v56  ;;  %v11588_v13 = vunpack.i.l.bf16 %v16185_v32  ;;  %v6186_v47 = vsel %vm2053_vm2, %v6154_v60, %v11583_v57  ;;  %v18809_v20 = vld [vmem:[#allocation64_spill] sm:$0xff] }
 0x4a2   : > { %6452 = vmatmul.mubr.f32.gmra.mrb[120].mxu1 %v6088_v7  ;;  %v6123_v59 = vsel %vm385_vm0, %v5099_v55, %v11574_v53  ;;  %v11284_v0 = vunpack.i.h.bf16 %v15787_v42  ;;  %v11593_v23 = vunpack.i.l.bf16 %v16204_v8  ;;  %v6026_v21 = vsel %vm385_vm0, %v4970_v22, %v11283_v11 }
 0x4a3   : > { %6456 = vmatprep.mubr.f32.mxu1 %v6185_v31  ;;  %v16237_v61 = vpop.f32.mrb[122].mxu0  ;;  %v11364_v56 = vunpack.i.h.bf16 %v15856_v34  ;;  %v6058_v7 = vsel %vm2020_vm1, %v6026_v21, %v11363_v35  ;;  %v11444_v28 = vunpack.i.h.bf16 %v15954_v24  ;;  %v6155_v42 = vsel %vm2020_vm1, %v6123_v59, %v11579_v18  ;;  %v5100_v31 = vld [vmem:[#allocation2 + $0xe8] sm:$0xff] }
 0x4a4   : > { %v16246_v45 = vpop.f32.mrb[123].mxu0  ;;  %v16256_v38 = vpop.permute.xlu1 %11611  ;;  %v6090_v53 = vsel %vm2053_vm2, %v6058_v7, %v11443_v9  ;;  %v11589_v62 = vunpack.i.h.bf16 %v16185_v32  ;;  %v11598_v43 = vunpack.i.l.bf16 %v16217_v48  ;;  %v6187_v11 = vsel %vm2053_vm2, %v6155_v42, %v11584_v25 }
 0x4a5   : > { %v6124_v34 = vsel %vm385_vm0, %v5100_v31, %v11588_v13  ;;  %v11288_v35 = vunpack.i.l.bf16 %v15789_v15  ;;  %v11594_v24 = vunpack.i.h.bf16 %v16204_v8  ;;  %v16274_v49 = vpop.permute.xlu0 %11616  ;;  %v6027_v18 = vsel %vm385_vm0, %v4971_v27, %v11284_v0  ;;  %v5102_v27 = vld [vmem:[#allocation2 + $0x108] sm:$0xff] }
 0x4a6   : > { %6457 = vmatmul.mubr.f32.gmra.mrb[122].mxu1 %v6089_v4  ;;  %v6156_v32 = vsel %vm2020_vm1, %v6124_v34, %v11593_v23  ;;  %v11368_v4 = vunpack.i.l.bf16 %v15858_v41  ;;  %v6059_v60 = vsel %vm2020_vm1, %v6027_v18, %v11364_v56  ;;  %v11448_v55 = vunpack.i.l.bf16 %v15956_v33  ;;  %v4972_v23 = vld [vmem:[#allocation2 + $0xc7] sm:$0xff] }
 0x4a7   : > { %6461 = vmatprep.mubr.f32.mxu1 %v6186_v47  ;;  %v16258_v6 = vpop.f32.mrb[124].mxu0  ;;  %v6091_v8 = vsel %vm2053_vm2, %v6059_v60, %v11444_v28  ;;  %v5101_v47 = vld [vmem:[#allocation2 + $0xf0] sm:$0xff]  ;;  %v11599_v22 = vunpack.i.h.bf16 %v16217_v48  ;;  %v11603_v59 = vunpack.i.l.bf16 %v16227_v26  ;;  %v6188_v0 = vsel %vm2053_vm2, %v6156_v32, %v11598_v43 }
 0x4a8   : > { %v16264_v57 = vpop.f32.mrb[125].mxu0  ;;  %v16283_v25 = vpop.permute.xlu1 %11621  ;;  %v6125_v21 = vsel %vm385_vm0, %v5101_v47, %v11589_v62  ;;  %v11289_v56 = vunpack.i.h.bf16 %v15789_v15  ;;  %v11369_v42 = vunpack.i.h.bf16 %v15858_v41  ;;  %v11449_v31 = vunpack.i.h.bf16 %v15956_v33 }
 0x4a9   : > { %v6157_v28 = vsel %vm2020_vm1, %v6125_v21, %v11594_v24  ;;  %v11608_v43 = vunpack.i.l.bf16 %v16244_v30  ;;  %v11604_v34 = vunpack.i.h.bf16 %v16227_v26  ;;  %v4973_v24 = vld [vmem:[#allocation2 + $0xcf] sm:$0xff]  ;;  %v6126_v18 = vsel %vm385_vm0, %v5102_v27, %v11603_v59 }
 0x4aa   : > { %6462 = vmatmul.mubr.f32.gmra.mrb[124].mxu1 %v6090_v53  ;;  %v6028_v53 = vsel %vm385_vm0, %v4972_v23, %v11288_v35  ;;  %v11613_v35 = vunpack.i.l.bf16 %v16256_v38  ;;  %v6189_v41 = vsel %vm2053_vm2, %v6157_v28, %v11599_v22  ;;  %v11293_v33 = vunpack.i.l.bf16 %v15795_v46  ;;  %v5103_v23 = vld [vmem:[#allocation2 + $0x110] sm:$0xff]  ;;  %v4974_v28 = vld [vmem:[#allocation2 + $0xe7] sm:$0xff] }
 0x4ab   : > { %6466 = vmatprep.mubr.f32.mxu1 %v6187_v11  ;;  %v16276_v9 = vpop.f32.mrb[126].mxu0  ;;  %v6060_v48 = vsel %vm2020_vm1, %v6028_v53, %v11368_v4  ;;  %v16301_v11 = vpop.permute.xlu0 %11626  ;;  %v6029_v60 = vsel %vm385_vm0, %v4973_v24, %v11289_v56  ;;  %v11609_v47 = vunpack.i.h.bf16 %v16244_v30  ;;  %v11614_v21 = vunpack.i.h.bf16 %v16256_v38 }
 0x4ac   : > { %v16285_v13 = vpop.f32.mrb[127].mxu0  ;;  %v6092_v15 = vsel %vm2053_vm2, %v6060_v48, %v11448_v55  ;;  %v16311_v32 = vpop.permute.xlu1 %11631  ;;  %v11373_v55 = vunpack.i.l.bf16 %v15865_v40  ;;  %v6061_v26 = vsel %vm2020_vm1, %v6029_v60, %v11369_v42  ;;  %v11618_v53 = vunpack.i.l.bf16 %v16274_v49 }
 0x4ad   : > { %v6093_v59 = vsel %vm2053_vm2, %v6061_v26, %v11449_v31  ;;  %v6127_v42 = vsel %vm385_vm0, %v5103_v23, %v11604_v34  ;;  %v11294_v48 = vunpack.i.h.bf16 %v15795_v46  ;;  %v11623_v30 = vunpack.i.l.bf16 %v16283_v25 }
 0x4ae   : > { %6467 = vmatmul.mubr.f32.gmra.mrb[126].mxu1 %v6091_v8  ;;  %v11453_v8 = vunpack.i.l.bf16 %v15967_v52  ;;  %v11374_v38 = vunpack.i.h.bf16 %v15865_v40  ;;  %v6159_v24 = vsel %vm2020_vm1, %v6127_v42, %v11609_v47  ;;  %v11619_v60 = vunpack.i.h.bf16 %v16274_v49 }
 0x4af   : > { %6471 = vmatprep.mubr.f32.mxu1 %v6188_v0  ;;  %v16293_v7 = vpop.f32.mrb[128].mxu0  ;;  %v6158_v0 = vsel %vm2020_vm1, %v6126_v18, %v11608_v43  ;;  %v6030_v43 = vsel %vm385_vm0, %v4974_v28, %v11293_v33  ;;  %v5104_v18 = vld [vmem:[#allocation2 + $0x128] sm:$0xff]  ;;  %v11628_v26 = vunpack.i.l.bf16 %v16301_v11  ;;  %v6191_v40 = vsel %vm2053_vm2, %v6159_v24, %v11614_v21 }
 0x4b0   : > { %v16303_v62 = vpop.f32.mrb[129].mxu0  ;;  %v6190_v56 = vsel %vm2053_vm2, %v6158_v0, %v11613_v35  ;;  %v6062_v27 = vsel %vm2020_vm1, %v6030_v43, %v11373_v55  ;;  %v11454_v35 = vunpack.i.h.bf16 %v15967_v52  ;;  %v4975_v33 = vld [vmem:[#allocation2 + $0xef] sm:$0xff]  ;;  %v6128_v55 = vsel %vm385_vm0, %v5104_v18, %v11618_v53 }
 0x4b1   : > { %v6094_v46 = vsel %vm2053_vm2, %v6062_v27, %v11453_v8  ;;  %v11298_v52 = vunpack.i.l.bf16 %v15797_v19  ;;  %v6031_v8 = vsel %vm385_vm0, %v4975_v33, %v11294_v48  ;;  %v6160_v47 = vsel %vm2020_vm1, %v6128_v55, %v11623_v30  ;;  %v4976_v30 = vld [vmem:[#allocation2 + $0x107] sm:$0xff] }
 0x4b2   : > { %6472 = vmatmul.mubr.f32.gmra.mrb[128].mxu1 %v6092_v15  ;;  %v16330_v15 = vpop.permute.xlu0 %11636  ;;  %v11378_v49 = vunpack.i.l.bf16 %v15867_v17  ;;  %v6063_v23 = vsel %vm2020_vm1, %v6031_v8, %v11374_v38  ;;  %v11458_v21 = vunpack.i.l.bf16 %v15969_v63  ;;  %v11629_v42 = vunpack.i.h.bf16 %v16301_v11  ;;  %v5106_v55 = vld [vmem:[#allocation2 + $0x148] sm:$0xff] }
 0x4b3   : > { %6476 = vmatprep.mubr.f32.mxu1 %v6189_v41  ;;  %v16313_v4 = vpop.f32.mrb[130].mxu0  ;;  %v16338_v41 = vpop.permute.xlu1 %11641  ;;  %v6095_v28 = vsel %vm2053_vm2, %v6063_v23, %v11454_v35  ;;  %v11633_v43 = vunpack.i.l.bf16 %v16311_v32  ;;  %v6192_v48 = vsel %vm2053_vm2, %v6160_v47, %v11628_v26  ;;  %v11299_v38 = vunpack.i.h.bf16 %v15797_v19 }
 0x4b4   : > { %v16320_v22 = vpop.f32.mrb[131].mxu0  ;;  %v6032_v35 = vsel %vm385_vm0, %v4976_v30, %v11298_v52  ;;  %v11379_v11 = vunpack.i.h.bf16 %v15867_v17  ;;  %v11459_v26 = vunpack.i.h.bf16 %v15969_v63  ;;  %v11638_v33 = vunpack.i.l.bf16 %v16330_v15 }
 0x4b5   : > { %v11634_v8 = vunpack.i.h.bf16 %v16311_v32  ;;  %v11643_v47 = vunpack.i.l.bf16 %v16338_v41  ;;  %v6130_v17 = vsel %vm385_vm0, %v5106_v55, %v11633_v43 }
 0x4b6   : > { %6477 = vmatmul.mubr.f32.gmra.mrb[130].mxu1 %v6093_v59  ;;  %v11624_v59 = vunpack.i.h.bf16 %v16283_v25  ;;  %v5105_v25 = vld [vmem:[#allocation2 + $0x130] sm:$0xff] }
 0x4b7   : > { %6481 = vmatprep.mubr.f32.mxu1 %v6190_v56  ;;  %v16332_v31 = vpop.f32.mrb[132].mxu0  ;;  %v16357_v56 = vpop.permute.xlu0 %11646  ;;  %v6129_v27 = vsel %vm385_vm0, %v5105_v25, %v11619_v60  ;;  %v18803_v25 = vld [vmem:[#allocation71_spill] sm:$0xff] }
 0x4b8   : > { %v16340_v34 = vpop.f32.mrb[133].mxu0  ;;  %v6161_v18 = vsel %vm2020_vm1, %v6129_v27, %v11624_v59  ;;  %v4977_v59 = vld [vmem:[#allocation2 + $0x10f] sm:$0xff] }
 0x4b9   : > { %v6193_v52 = vsel %vm2053_vm2, %v6161_v18, %v11629_v42  ;;  %v11639_v42 = vunpack.i.h.bf16 %v16330_v15  ;;  %v5107_v18 = vld [vmem:[#allocation2 + $0x150] sm:$0xff]  ;;  %v11304_v15 = vunpack.i.h.bf16 %v15802_v54 }
 0x4ba   : > { %6482 = vmatmul.mubr.f32.gmra.mrb[132].mxu1 %v6094_v46  ;;  %v16367_v46 = vpop.permute.xlu1 %11651  ;;  %v6131_v55 = vsel %vm385_vm0, %v5107_v18, %v11634_v8 }
 0x4bb   : > { %6486 = vmatprep.mubr.f32.mxu1 %v6191_v40  ;;  %v16350_v0 = vpop.f32.mrb[134].mxu0  ;;  %v6064_v40 = vsel %vm2020_vm1, %v6032_v35, %v11378_v49  ;;  %v11303_v49 = vunpack.i.l.bf16 %v15802_v54  ;;  %v16385_v63 = vpop.permute.xlu0 %11656  ;;  %v6162_v35 = vsel %vm2020_vm1, %v6130_v17, %v11638_v33  ;;  %v11384_v33 = vunpack.i.h.bf16 %v15875_v10 }
 0x4bc   : > { %v16359_v53 = vpop.f32.mrb[135].mxu0  ;;  %v6096_v19 = vsel %vm2053_vm2, %v6064_v40, %v11458_v21  ;;  %v6033_v21 = vsel %vm385_vm0, %v4977_v59, %v11299_v38  ;;  %v11644_v40 = vunpack.i.h.bf16 %v16338_v41  ;;  %v11648_v38 = vunpack.i.l.bf16 %v16357_v56 }
 0x4bd   : > { %v6065_v32 = vsel %vm2020_vm1, %v6033_v21, %v11379_v11  ;;  %v6194_v11 = vsel %vm2053_vm2, %v6162_v35, %v11643_v47  ;;  %v11464_v17 = vunpack.i.h.bf16 %v18803_v25  ;;  %v6163_v54 = vsel %vm2020_vm1, %v6131_v55, %v11639_v42  ;;  %v18805_v55 = vld [vmem:[#allocation58_spill] sm:$0xff] }
 0x4be   : > { %6487 = vmatmul.mubr.f32.gmra.mrb[134].mxu1 %v6095_v28  ;;  %v11383_v28 = vunpack.i.l.bf16 %v15875_v10  ;;  %v16394_v30 = vpop.permute.xlu1 %11661  ;;  %v6097_v27 = vsel %vm2053_vm2, %v6065_v32, %v11459_v26  ;;  %v5108_v32 = vld [vmem:[#allocation2 + $0x168] sm:$0xff]  ;;  %v11658_v35 = vunpack.i.l.bf16 %v16385_v63  ;;  %v6195_v10 = vsel %vm2053_vm2, %v6163_v54, %v11644_v40 }
 0x4bf   : > { %6491 = vmatprep.mubr.f32.mxu1 %v6192_v48  ;;  %v16369_v24 = vpop.f32.mrb[136].mxu0  ;;  %v11463_v48 = vunpack.i.l.bf16 %v18803_v25  ;;  %v16412_v21 = vpop.permute.xlu0 %11666  ;;  %v18804_v25 = vld [vmem:[#allocation47_spill] sm:$0xff] }
 0x4c0   : > { %v16377_v60 = vpop.f32.mrb[137].mxu0  ;;  %v11308_v18 = vunpack.i.l.bf16 %v18804_v25 }
 0x4c2   : > { %6492 = vmatmul.mubr.f32.gmra.mrb[136].mxu1 %v6096_v19  ;;  %v4978_v19 = vld [vmem:[#allocation2 + $0x127] sm:$0xff] }
 0x4c3   : > { %6496 = vmatprep.mubr.f32.mxu1 %v6193_v52  ;;  %v16387_v23 = vpop.f32.mrb[138].mxu0  ;;  %v11653_v52 = vunpack.i.l.bf16 %v16367_v46  ;;  %v6034_v26 = vsel %vm385_vm0, %v4978_v19, %v11303_v49  ;;  %v4979_v49 = vld [vmem:[#allocation2 + $0x12f] sm:$0xff]  ;;  %v16424_v19 = vpop.permute.xlu1 %11671 }
 0x4c4   : > { %v16396_v43 = vpop.f32.mrb[139].mxu0  ;;  %v6066_v41 = vsel %vm2020_vm1, %v6034_v26, %v11383_v28  ;;  %v6132_v28 = vsel %vm385_vm0, %v5108_v32, %v11648_v38  ;;  %v6035_v42 = vsel %vm385_vm0, %v4979_v49, %v11304_v15  ;;  %v11388_v26 = vunpack.i.l.bf16 %v18805_v55  ;;  %v4980_v49 = vld [vmem:[#allocation2 + $0x147] sm:$0xff] }
 0x4c5   : > { %v6098_v8 = vsel %vm2053_vm2, %v6066_v41, %v11463_v48  ;;  %v6067_v40 = vsel %vm2020_vm1, %v6035_v42, %v11384_v33  ;;  %v18806_v41 = vld [vmem:[#allocation126_spill] sm:$0xff]  ;;  %v11659_v32 = vunpack.i.h.bf16 %v16385_v63  ;;  %v16441_v33 = vpop.permute.xlu0 %11676  ;;  %v11389_v63 = vunpack.i.h.bf16 %v18805_v55  ;;  %v4981_v55 = vld [vmem:[#allocation2 + $0x14f] sm:$0xff] }
 0x4c6   : > { %6497 = vmatmul.mubr.f32.gmra.mrb[138].mxu1 %v6097_v27  ;;  %v11649_v27 = vunpack.i.h.bf16 %v16357_v56  ;;  %v6164_v56 = vsel %vm2020_vm1, %v6132_v28, %v11653_v52  ;;  %v6099_v54 = vsel %vm2053_vm2, %v6067_v40, %v11464_v17  ;;  %v11309_v28 = vunpack.i.h.bf16 %v18804_v25 }
 0x4c7   : > { %6501 = vmatprep.mubr.f32.mxu1 %v6194_v11  ;;  %v16406_v59 = vpop.f32.mrb[140].mxu0  ;;  %v11654_v11 = vunpack.i.h.bf16 %v16367_v46  ;;  %v5109_v46 = vld [vmem:[#allocation2 + $0x170] sm:$0xff]  ;;  %v6196_v15 = vsel %vm2053_vm2, %v6164_v56, %v11658_v35  ;;  %v6036_v17 = vsel %vm385_vm0, %v4980_v49, %v11308_v18  ;;  %v11469_v56 = vunpack.i.h.bf16 %v18806_v41  ;;  %v16453_v25 = vpop.permute.xlu1 %11681 }
 0x4c8   : > { %v16414_v47 = vpop.f32.mrb[141].mxu0  ;;  %v6133_v52 = vsel %vm385_vm0, %v5109_v46, %v11649_v27  ;;  %v6068_v35 = vsel %vm2020_vm1, %v6036_v17, %v11388_v26  ;;  %v11668_v27 = vunpack.i.l.bf16 %v16412_v21  ;;  %v5110_v46 = vld [vmem:[#allocation2 + $0x188] sm:$0xff]  ;;  %v11673_v18 = vunpack.i.l.bf16 %v16424_v19  ;;  %v18807_v26 = vld [vmem:[#allocation54_spill] sm:$0xff] }
 0x4c9   : > { %v6165_v40 = vsel %vm2020_vm1, %v6133_v52, %v11654_v11  ;;  %v11313_v52 = vunpack.i.l.bf16 %v18807_v26  ;;  %v6037_v17 = vsel %vm385_vm0, %v4981_v55, %v11309_v28  ;;  %v11674_v58 = vunpack.i.h.bf16 %v16424_v19 }
 0x4ca   : > { %6502 = vmatmul.mubr.f32.gmra.mrb[140].mxu1 %v6098_v8  ;;  %v11468_v8 = vunpack.i.l.bf16 %v18806_v41  ;;  %v6197_v11 = vsel %vm2053_vm2, %v6165_v40, %v11659_v32  ;;  %v11669_v32 = vunpack.i.h.bf16 %v16412_v21  ;;  %v16470_v40 = vpop.permute.xlu0 %11686  ;;  %v11678_v28 = vunpack.i.l.bf16 %v16441_v33 }
 0x4cb   : > { %6506 = vmatprep.mubr.f32.mxu1 %v6195_v10  ;;  %v16426_v48 = vpop.f32.mrb[142].mxu0  ;;  %v11663_v10 = vunpack.i.l.bf16 %v16394_v30  ;;  %v11683_v21 = vunpack.i.l.bf16 %v16453_v25  ;;  %v16480_v12 = vpop.permute.xlu1 %11691  ;;  %v11394_v19 = vunpack.i.h.bf16 %v18808_v2 }
 0x4cc   : > { %v16433_v38 = vpop.f32.mrb[143].mxu0 }
 0x4cd   : > { %v6134_v49 = vsel %vm385_vm0, %v5110_v46, %v11663_v10 }
 0x4ce   : > { %6507 = vmatmul.mubr.f32.gmra.mrb[142].mxu1 %v6099_v54  ;;  %v6100_v54 = vsel %vm2053_vm2, %v6068_v35, %v11468_v8  ;;  %v11393_v8 = vunpack.i.l.bf16 %v18808_v2  ;;  %v6166_v46 = vsel %vm2020_vm1, %v6134_v49, %v11668_v27  ;;  %v6038_v27 = vsel %vm385_vm0, %v4982_v50, %v11313_v52  ;;  %v4983_v52 = vld [vmem:[#allocation2 + $0x16f] sm:$0xff] }
 0x4cf   : > { %6511 = vmatprep.mubr.f32.mxu1 %v6196_v15  ;;  %v16443_v42 = vpop.f32.mrb[144].mxu0  ;;  %v11664_v15 = vunpack.i.h.bf16 %v16394_v30  ;;  %v6069_v30 = vsel %vm2020_vm1, %v6037_v17, %v11389_v63  ;;  %v6198_v55 = vsel %vm2053_vm2, %v6166_v46, %v11673_v18  ;;  %v11314_v17 = vunpack.i.h.bf16 %v18807_v26 }
 0x4d0   : > { %v16448_v29 = vpop.f32.mrb[145].mxu0  ;;  %v6101_v10 = vsel %vm2053_vm2, %v6069_v30, %v11469_v56  ;;  %v6070_v18 = vsel %vm2020_vm1, %v6038_v27, %v11393_v8  ;;  %v11474_v30 = vunpack.i.h.bf16 %v18809_v20  ;;  %v11679_v46 = vunpack.i.h.bf16 %v16441_v33  ;;  %v18811_v33 = vld [vmem:[#allocation98_spill] sm:$0xff] }
 0x4d1   : > { %v11684_v8 = vunpack.i.h.bf16 %v16453_v25  ;;  %v11689_v25 = vunpack.i.h.bf16 %v16470_v40 }
 0x4d2   : > { %6512 = vmatmul.mubr.f32.gmra.mrb[144].mxu1 %v6100_v54  ;;  %v11473_v54 = vunpack.i.l.bf16 %v18809_v20  ;;  %v16498_v20 = vpop.permute.xlu0 %11696 }
 0x4d3   : > { %6516 = vmatprep.mubr.f32.mxu1 %v6197_v11  ;;  %v16461_v41 = vpop.f32.mrb[146].mxu0  ;;  %v5111_v11 = vld [vmem:[#allocation2 + $0x190] sm:$0xff] }
 0x4d4   : > { %v16465_v35 = vpop.f32.mrb[147].mxu0  ;;  %v6135_v63 = vsel %vm385_vm0, %v5111_v11, %v11664_v15  ;;  %v6102_v15 = vsel %vm2053_vm2, %v6070_v18, %v11473_v54  ;;  %v11688_v11 = vunpack.i.l.bf16 %v16470_v40  ;;  %v6039_v54 = vsel %vm385_vm0, %v4983_v52, %v11314_v17  ;;  %v18812_v18 = vld [vmem:[#allocation72_spill] sm:$0xff] }
 0x4d5   : > { %v6167_v26 = vsel %vm2020_vm1, %v6135_v63, %v11669_v32  ;;  %v11398_v63 = vunpack.i.l.bf16 %v18811_v33  ;;  %v6071_v27 = vsel %vm2020_vm1, %v6039_v54, %v11394_v19  ;;  %v11479_v40 = vunpack.i.h.bf16 %v18812_v18 }
 0x4d6   : > { %6517 = vmatmul.mubr.f32.gmra.mrb[146].mxu1 %v6101_v10  ;;  %v5112_v10 = vld [vmem:[#allocation2 + $0x1a8] sm:$0xff]  ;;  %v6199_v50 = vsel %vm2053_vm2, %v6167_v26, %v11674_v58  ;;  %v11478_v58 = vunpack.i.l.bf16 %v18812_v18  ;;  %v5113_v26 = vld [vmem:[#allocation2 + $0x1b0] sm:$0xff] }
 0x4d7   : > { %6521 = vmatprep.mubr.f32.mxu1 %v6198_v55  ;;  %v16482_v56 = vpop.f32.mrb[148].mxu0  ;;  %v6136_v2 = vsel %vm385_vm0, %v5112_v10, %v11678_v28  ;;  %v18810_v55 = vld [vmem:[#allocation92_spill] sm:$0xff]  ;;  %v6103_v28 = vsel %vm2053_vm2, %v6071_v27, %v11474_v30  ;;  %v11693_v10 = vunpack.i.l.bf16 %v16480_v12  ;;  %v11399_v30 = vunpack.i.h.bf16 %v18811_v33 }
 0x4d8   : > { %v16486_v49 = vpop.f32.mrb[149].mxu0  ;;  %v11318_v39 = vunpack.i.l.bf16 %v18810_v55  ;;  %v6168_v32 = vsel %vm2020_vm1, %v6136_v2, %v11683_v21  ;;  %v6137_v21 = vsel %vm385_vm0, %v5113_v26, %v11679_v46  ;;  %v11319_v52 = vunpack.i.h.bf16 %v18810_v55  ;;  %v5114_v46 = vld [vmem:[#allocation2 + $0x1c8] sm:$0xff] }
 0x4d9   : > { %v6200_v17 = vsel %vm2053_vm2, %v6168_v32, %v11688_v11  ;;  %v6169_v2 = vsel %vm2020_vm1, %v6137_v21, %v11684_v8  ;;  %v11698_v27 = vunpack.i.l.bf16 %v16498_v20  ;;  %v11694_v55 = vunpack.i.h.bf16 %v16480_v12  ;;  %v4985_v8 = vld [vmem:[#allocation2 + $0x18f] sm:$0xff] }
 0x4da   : > { %6522 = vmatmul.mubr.f32.gmra.mrb[148].mxu1 %v6102_v15  ;;  %v16505_v15 = vpop.permute.xlu1 %11701  ;;  %v6138_v33 = vsel %vm385_vm0, %v5114_v46, %v11693_v10  ;;  %v18815_v12 = vld [vmem:[#allocation48_spill] sm:$0xff] }
 0x4db   : > { %6526 = vmatprep.mubr.f32.mxu1 %v6199_v50  ;;  %v4984_v50 = vld [vmem:[#allocation2 + $0x187] sm:$0xff]  ;;  %v11703_v32 = vunpack.i.l.bf16 %v16505_v15  ;;  %v5115_v10 = vld [vmem:[#allocation2 + $0x1d0] sm:$0xff] }
 0x4dc   : > { %v6040_v19 = vsel %vm385_vm0, %v4984_v50, %v11318_v39  ;;  %v6201_v39 = vsel %vm2053_vm2, %v6169_v2, %v11689_v25  ;;  %v18814_v50 = vld [vmem:[#allocation106_spill] sm:$0xff]  ;;  %v6170_v2 = vsel %vm2020_vm1, %v6138_v33, %v11698_v27  ;;  %v6893_v33 = vld [vmem:[#allocation2 + $0x8] sm:$0xff] }
 0x4dd   : > { %v6072_v54 = vsel %vm2020_vm1, %v6040_v19, %v11398_v63  ;;  %v18813_v63 = vld [vmem:[#allocation55_spill] sm:$0xff]  ;;  %v11483_v19 = vunpack.i.l.bf16 %v18815_v12  ;;  %v11404_v27 = vunpack.i.h.bf16 %v18814_v50 }
 0x4de   : > { %6527 = vmatmul.mubr.f32.gmra.mrb[150].mxu1 %v6103_v28  ;;  %v16519_v28 = vpop.permute.xlu0 %11706  ;;  %v6104_v11 = vsel %vm2053_vm2, %v6072_v54, %v11478_v58  ;;  %v11323_v26 = vunpack.i.l.bf16 %v18813_v63  ;;  %v16527_v18 = vpop.permute.xlu1 %11711  ;;  %v11403_v58 = vunpack.i.l.bf16 %v18814_v50  ;;  %v11699_v54 = vunpack.i.h.bf16 %v16498_v20  ;;  %v4987_v50 = vld [vmem:[#allocation2 + $0x1af] sm:$0xff] }
 0x4df   : > { %6531 = vmatprep.mubr.f32.mxu1 %v6200_v17  ;;  %v6041_v17 = vsel %vm385_vm0, %v4985_v8, %v11319_v52  ;;  %v11708_v46 = vunpack.i.l.bf16 %v16519_v28  ;;  %v6202_v52 = vsel %vm2053_vm2, %v6170_v2, %v11703_v32  ;;  %v6139_v8 = vsel %vm385_vm0, %v5115_v10, %v11694_v55  ;;  %v5116_v2 = vld [vmem:[#allocation2 + $0x1e8] sm:$0xff] }
 0x4e0   : > { %v6073_v21 = vsel %vm2020_vm1, %v6041_v17, %v11399_v30  ;;  %v11324_v30 = vunpack.i.h.bf16 %v18813_v63  ;;  %v11713_v17 = vunpack.i.l.bf16 %v16527_v18  ;;  %v6171_v63 = vsel %vm2020_vm1, %v6139_v8, %v11699_v54  ;;  %v18817_v8 = vld [vmem:[#allocation109_spill] sm:$0xff] }
 0x4e1   : > { %v6105_v25 = vsel %vm2053_vm2, %v6073_v21, %v11479_v40  ;;  %v6894_v21 = vld [vmem:[#allocation2 + $0x10] sm:$0xff] }
 0x4e2   : > { %6532 = vmatmul.mubr.f32.gmra.mrb[152].mxu1 %v6104_v11  ;;  %v11704_v11 = vunpack.i.h.bf16 %v16505_v15  ;;  %v11717_v20 = vpop.permute.xlu0 %11716  ;;  %v16546_v32 = vpop.permute.xlu1 %11721  ;;  %v11735_v10 = vpack.i.bf16 %v6894_v21, %v6893_v33  ;;  %v6925_v33 = vld [vmem:[#allocation2 + $0x9] sm:$0xff] }
 0x4e3   : > { %6536 = vmatprep.mubr.f32.mxu1 %v6201_v39  ;;  %v4986_v39 = vld [vmem:[#allocation2 + $0x1a7] sm:$0xff]  ;;  %v11718_v37 = vunpack.i.l.bf16 %v11717_v20 }
 0x4e4   : > { %v6042_v40 = vsel %vm385_vm0, %v4986_v39, %v11323_v26  ;;  %v6203_v26 = vsel %vm2053_vm2, %v6171_v63, %v11704_v11  ;;  %v18816_v39 = vld [vmem:[#allocation56_spill] sm:$0xff]  ;;  %11736 = vrot.lane.b32.xlu0 %v11735_v10, %s12283_s13 }
 0x4e5   : > { %v6074_v15 = vsel %vm2020_vm1, %v6042_v40, %v11403_v58  ;;  %v6140_v58 = vsel %vm385_vm0, %v5116_v2, %v11708_v46  ;;  %v11328_v40 = vunpack.i.l.bf16 %v18816_v39  ;;  %v6926_v11 = vld [vmem:[#allocation2 + $0x11] sm:$0xff]  ;;  %v11329_v21 = vunpack.i.h.bf16 %v18816_v39 }
 0x4e6   : > { %6537 = vmatmul.mubr.f32.gmra.mrb[154].mxu1 %v6105_v25  ;;  %v11484_v25 = vunpack.i.h.bf16 %v18815_v12  ;;  %v6106_v55 = vsel %vm2053_vm2, %v6074_v15, %v11483_v19  ;;  %v11714_v12 = vunpack.i.h.bf16 %v16527_v18  ;;  %v6043_v19 = vsel %vm385_vm0, %v4987_v50, %v11324_v30  ;;  %v18818_v46 = vld [vmem:[#allocation100_spill] sm:$0xff]  ;;  %v4988_v50 = vld [vmem:[#allocation2 + $0x1c7] sm:$0xff] }
 0x4e7   : > { %6541 = vmatprep.mubr.f32.mxu1 %v6202_v52  ;;  %v11709_v52 = vunpack.i.h.bf16 %v16519_v28  ;;  %v6172_v54 = vsel %vm2020_vm1, %v6140_v58, %v11713_v17  ;;  %v11408_v28 = vunpack.i.l.bf16 %v18817_v8  ;;  %v6075_v15 = vsel %vm2020_vm1, %v6043_v19, %v11404_v27  ;;  %v5117_v18 = vld [vmem:[#allocation2 + $0x1f0] sm:$0xff]  ;;  %v11727_v17 = vpop.permute.xlu0 %11726  ;;  %v11732_v19 = vpop.permute.xlu1 %11731 }
 0x4e8   : > { %v6107_v63 = vsel %vm2053_vm2, %v6075_v15, %v11484_v25  ;;  %v11740_v2 = vpack.i.bf16 %v6926_v11, %v6925_v33  ;;  %v11723_v30 = vunpack.i.l.bf16 %v16546_v32  ;;  %v6204_v10 = vsel %vm2053_vm2, %v6172_v54, %v11718_v37  ;;  %v4989_v33 = vld [vmem:[#allocation2 + $0x1cf] sm:$0xff]  ;;  %v8141_v37 = vld [vmem:[%s18157_s9 + $0x100] sm:$0xff] }
 0x4e9   : > { %v6141_v27 = vsel %vm385_vm0, %v5117_v18, %v11709_v52  ;;  %v11409_v58 = vunpack.i.h.bf16 %v18817_v8  ;;  %v6044_v39 = vsel %vm385_vm0, %v4988_v50, %v11328_v40  ;;  %v8142_v52 = vld [vmem:[%s18157_s9 + $0x108] sm:$0xff]  ;;  %v11728_v54 = vunpack.i.l.bf16 %v11727_v17 }
 0x4ea   : > { %6542 = vmatmul.mubr.f32.gmra.mrb[156].mxu1 %v6106_v55  ;;  %v11488_v55 = vunpack.i.l.bf16 %v18818_v46  ;;  %v6173_v25 = vsel %vm2020_vm1, %v6141_v27, %v11714_v12  ;;  %11741 = vrot.lane.b32.xlu0 %v11740_v2, %s12284_s0  ;;  %v6076_v15 = vsel %vm2020_vm1, %v6044_v39, %v11408_v28  ;;  %v6045_v12 = vsel %vm385_vm0, %v4989_v33, %v11329_v21  ;;  %v5118_v8 = vld [vmem:[#allocation2 + $0x208] sm:$0xff]  ;;  %v18819_v2 = vld [vmem:[#allocation104_spill] sm:$0xff]  ;;  %v18820_v27 = vld [vmem:[#allocation57_spill] sm:$0xff] }
 0x4eb   : > { %6546 = vmatprep.mubr.f32.mxu1 %v6203_v26  ;;  %v11719_v26 = vunpack.i.h.bf16 %v11717_v20  ;;  %v11489_v20 = vunpack.i.h.bf16 %v18818_v46  ;;  %v10209_v11 = vpack.c.bf16 %v8142_v52, %v8141_v37  ;;  %v11724_v46 = vunpack.i.h.bf16 %v16546_v32  ;;  %v8143_v32 = vld [vmem:[%s18157_s9 + $0x110] sm:$0xff]  ;;  %v4990_v52 = vld [vmem:[#allocation2 + $0x1e7] sm:$0xff] }
 0x4ec   : > { %v6108_v40 = vsel %vm2053_vm2, %v6076_v15, %v11488_v55  ;;  %v6142_v18 = vsel %vm385_vm0, %v5118_v8, %v11723_v30  ;;  %v6077_v50 = vsel %vm2020_vm1, %v6045_v12, %v11409_v58  ;;  %v11413_v55 = vunpack.i.l.bf16 %v18820_v27  ;;  %v18821_v30 = vld [vmem:[#allocation44_spill] sm:$0xff] }
 0x4ed   : > { %v6205_v28 = vsel %vm2053_vm2, %v6173_v25, %v11719_v26  ;;  %10210 = vmatprep.subr.bf16.mxu1 %v10209_v11  ;;  %v6109_v21 = vsel %vm2053_vm2, %v6077_v50, %v11489_v20  ;;  %v8144_v26 = vld [vmem:[%s18157_s9 + $0x118] sm:$0xff]  ;;  %v11493_v39 = vunpack.i.l.bf16 %v18821_v30  ;;  %v11729_v25 = vunpack.i.h.bf16 %v11727_v17  ;;  %v5119_v58 = vld [vmem:[#allocation2 + $0x210] sm:$0xff]  ;;  %v8109_v50 = vld [vmem:[%s18157_s9] sm:$0xff] }
 0x4ee   : > { %6547 = vmatmul.mubr.f32.gmra.mrb[158].mxu1 %v6107_v63  ;;  %v11733_v63 = vunpack.i.l.bf16 %v11732_v19  ;;  %v6174_v15 = vsel %vm2020_vm1, %v6142_v18, %v11728_v54  ;;  %v10213_v33 = vpack.c.bf16 %v8144_v26, %v8143_v32  ;;  %v11734_v37 = vunpack.i.h.bf16 %v11732_v19  ;;  %v8111_v32 = vld [vmem:[%s18157_s9 + $0x10] sm:$0xff]  ;;  %v8112_v26 = vld [vmem:[%s18157_s9 + $0x18] sm:$0xff] }
 0x4ef   : > { %6551 = vmatprep.mubr.f32.mxu1 %v6204_v10  ;;  %v11333_v10 = vunpack.i.l.bf16 %v18819_v2  ;;  %10212 = vmatpush3.bf16.msra.mxu1 %v10209_v11  ;;  %v11334_v12 = vunpack.i.h.bf16 %v18819_v2  ;;  %v11414_v11 = vunpack.i.h.bf16 %v18820_v27  ;;  %v11494_v54 = vunpack.i.h.bf16 %v18821_v30  ;;  %v8110_v27 = vld [vmem:[%s18157_s9 + $0x8] sm:$0xff] }
 0x4f0   : > { %v6206_v20 = vsel %vm2053_vm2, %v6174_v15, %v11733_v63  ;;  %10214 = vmatprep.subr.bf16.mxu1 %v10213_v33  ;;  %v10165_v30 = vpack.c.bf16 %v8112_v26, %v8111_v32  ;;  %v8127_v32 = vld [vmem:[%s18157_s9 + $0x90] sm:$0xff]  ;;  %v8128_v26 = vld [vmem:[%s18157_s9 + $0x98] sm:$0xff] }
 0x4f1   : > { %v6046_v8 = vsel %vm385_vm0, %v4990_v52, %v11333_v10  ;;  %v8118_v52 = vld [vmem:[%s18157_s9 + $0x48] sm:$0xff] }
 0x4f2   : > { %6552 = vmatmul.mubr.f32.gmra.mrb[160].mxu1 %v6108_v40  ;;  %v6143_v40 = vsel %vm385_vm0, %v5119_v58, %v11724_v46  ;;  %v6078_v17 = vsel %vm2020_vm1, %v6046_v8, %v11413_v55  ;;  %v10162_v55 = vpack.c.bf16 %v8110_v27, %v8109_v50  ;;  %v8115_v58 = vld [vmem:[%s18157_s9 + $0x30] sm:$0xff]  ;;  %v8120_v8 = vld [vmem:[%s18157_s9 + $0x58] sm:$0xff] }
 0x4f3   : > { %6556 = vmatprep.mubr.f32.mxu1 %v6205_v28  ;;  %10216 = vmatpush3.bf16.msra.mxu1 %v10213_v33  ;;  %v6110_v19 = vsel %vm2053_vm2, %v6078_v17, %v11493_v39  ;;  %v6175_v63 = vsel %vm2020_vm1, %v6143_v40, %v11729_v25  ;;  %v4991_v28 = vld [vmem:[#allocation2 + $0x1ef] sm:$0xff]  ;;  %v8113_v39 = vld [vmem:[%s18157_s9 + $0x20] sm:$0xff]  ;;  %v8116_v33 = vld [vmem:[%s18157_s9 + $0x38] sm:$0xff] }
 0x4f4   : > { %v6207_v46 = vsel %vm2053_vm2, %v6175_v63, %v11734_v37  ;;  %v6047_v18 = vsel %vm385_vm0, %v4991_v28, %v11334_v12  ;;  %10163 = vmatpush1.bf16.msra.mxu0 %v10162_v55  ;;  %v8114_v25 = vld [vmem:[%s18157_s9 + $0x28] sm:$0xff]  ;;  %v10171_v37 = vpack.c.bf16 %v8116_v33, %v8115_v58  ;;  %v8119_v12 = vld [vmem:[%s18157_s9 + $0x50] sm:$0xff]  ;;  %v8121_v17 = vld [vmem:[%s18157_s9 + $0x60] sm:$0xff] }
 0x4f5   : > { %v6079_v2 = vsel %vm2020_vm1, %v6047_v18, %v11414_v11  ;;  %v10168_v15 = vpack.c.bf16 %v8114_v25, %v8113_v39  ;;  %v10177_v11 = vpack.c.bf16 %v8120_v8, %v8119_v12  ;;  %v8123_v63 = vld [vmem:[%s18157_s9 + $0x70] sm:$0xff]  ;;  %v8125_v18 = vld [vmem:[%s18157_s9 + $0x80] sm:$0xff]  ;;  %v10189_v39 = vpack.c.bf16 %v8128_v26, %v8127_v32  ;;  %v8136_v26 = vld [vmem:[%s18157_s9 + $0xd8] sm:$0xff] }
 0x4f6   : > { %6557 = vmatmul.mubr.f32.gmra.mrb[162].mxu1 %v6109_v21  ;;  %v6111_v10 = vsel %vm2053_vm2, %v6079_v2, %v11494_v54  ;;  %v18822_v21 = vmov 0.0|0.0   ;;  %v8122_v54 = vld [vmem:[%s18157_s9 + $0x68] sm:$0xff]  ;;  %v16677_v55 = vld [vmem:[%s18156_s8] ss:$0 sm:$0xff]  ;;  %v8135_v32 = vld [vmem:[%s18157_s9 + $0xd0] sm:$0xff] }
 0x4f7   : > { %6561 = vmatprep.mubr.f32.mxu1 %v6206_v20  ;;  %10164 = vmatprep.subr.bf16.mxu0 %v18822_v21  ;;  %v8117_v20 = vld [vmem:[%s18157_s9 + $0x40] sm:$0xff]  ;;  %v8126_v2 = vld [vmem:[%s18157_s9 + $0x88] sm:$0xff] }
 0x4f8   : > { %10166 = vmatpush1.bf16.msra.mxu0 %v10165_v30  ;;  %v10174_v40 = vpack.c.bf16 %v8118_v52, %v8117_v20  ;;  %v10186_v50 = vpack.c.bf16 %v8126_v2, %v8125_v18  ;;  %v8129_v33 = vld [vmem:[%s18157_s9 + $0xa0] sm:$0xff] }
 0x4f9   : > { %10167 = vmatprep.subr.bf16.mxu0 %v18822_v21 }
 0x4fa   : > { %6562 = vmatmul.mubr.f32.gmra.mrb[164].mxu1 %v6110_v19  ;;  %v10180_v19 = vpack.c.bf16 %v8122_v54, %v8121_v17 }
 0x4fb   : > { %6566 = vmatprep.mubr.f32.mxu1 %v6207_v46  ;;  %v8124_v46 = vld [vmem:[%s18157_s9 + $0x78] sm:$0xff] }
 0x4fc   : > { %10169 = vmatpush1.bf16.msra.mxu0 %v10168_v15  ;;  %v10183_v28 = vpack.c.bf16 %v8124_v46, %v8123_v63  ;;  %v8134_v63 = vld [vmem:[%s18157_s9 + $0xc8] sm:$0xff] }
 0x4fd   : > { %10170 = vmatprep.subr.bf16.mxu0 %v18822_v21 }
 0x4fe   : > { %6567 = vmatmul.mubr.f32.gmra.mrb[166].mxu1 %v6111_v10 }
 0x500   : > { %10172 = vmatpush1.bf16.msra.mxu0 %v10171_v37  ;;  %v8130_v37 = vld [vmem:[%s18157_s9 + $0xa8] sm:$0xff] }
 0x501   : > { %10173 = vmatprep.subr.bf16.mxu0 %v18822_v21  ;;  %v10192_v52 = vpack.c.bf16 %v8130_v37, %v8129_v33  ;;  %v8137_v33 = vld [vmem:[%s18157_s9 + $0xe0] sm:$0xff]  ;;  %v8138_v37 = vld [vmem:[%s18157_s9 + $0xe8] sm:$0xff] }
 0x504   : > { %10175 = vmatpush1.bf16.msra.mxu0 %v10174_v40  ;;  %v8131_v40 = vld [vmem:[%s18157_s9 + $0xb0] sm:$0xff] }
 0x505   : > { %10176 = vmatprep.subr.bf16.mxu0 %v18822_v21 }
 0x508   : > { %10178 = vmatpush1.bf16.msra.mxu0 %v10177_v11 }
 0x509   : > { %10179 = vmatprep.subr.bf16.mxu0 %v18822_v21 }
 0x50c   : > { %10181 = vmatpush1.bf16.msra.mxu0 %v10180_v19  ;;  %v8133_v19 = vld [vmem:[%s18157_s9 + $0xc0] sm:$0xff] }
 0x50d   : > { %10182 = vmatprep.subr.bf16.mxu0 %v18822_v21 }
 0x510   : > { %10184 = vmatpush1.bf16.msra.mxu0 %v10183_v28 }
 0x511   : > { %10185 = vmatprep.subr.bf16.mxu0 %v18822_v21 }
 0x514   : > { %10187 = vmatpush1.bf16.msra.mxu0 %v10186_v50  ;;  %v10198_v50 = vpack.c.bf16 %v8134_v63, %v8133_v19 }
 0x515   : > { %10188 = vmatprep.subr.bf16.mxu0 %v18822_v21 }
 0x518   : > { %10190 = vmatpush1.bf16.msra.mxu0 %v10189_v39 }
 0x519   : > { %10191 = vmatprep.subr.bf16.mxu0 %v18822_v21 }
 0x51c   : > { %10193 = vmatpush1.bf16.msra.mxu0 %v10192_v52 }
 0x51d   : > { %10194 = vmatprep.subr.bf16.mxu0 %v18822_v21 }
 0x54b   : > { %v16670_v10 = vpop.f32.mrb[150].mxu0 }
 0x54c   : > { %v16672_v27 = vpop.f32.mrb[151].mxu0 }
 0x555   : > { %v6413_v30 = vpop.f32.mrb[104].mxu1 }
 0x556   : > { %v6414_v25 = vadd.f32 %v16677_v55, %v6413_v30  ;;  %v6415_v15 = vpop.f32.mrb[105].mxu1 }
 0x558   : > { %v6639_v58 = vadd.f32 %v16229_v14, %v6414_v25  ;;  %v8132_v14 = vld [vmem:[%s18157_s9 + $0xb8] sm:$0xff] }
 0x559   : > { %v6418_v20 = vpop.f32.mrb[106].mxu1  ;;  %v10195_v17 = vpack.c.bf16 %v8132_v14, %v8131_v40 }
 0x55a   : > { %v6797_v12 = vmax.f32 %v6639_v58, 0.0  ;;  %v6419_v8 = vadd.f32 %v16677_v55, %v6418_v20  ;;  %v6420_v11 = vpop.f32.mrb[107].mxu1  ;;  %v10201_v58 = vpack.c.bf16 %v8136_v26, %v8135_v32 }
 0x55b   : > { %10196 = vmatpush1.bf16.msra.mxu0 %v10195_v17 }
 0x55c   : > { %6829 = vst.msk [vmem:[#allocation2 + $0x28] sm:$0xff] %vm385_vm0, %v6797_v12  ;;  %v6644_v54 = vadd.f32 %v16219_v44, %v6419_v8  ;;  %10197 = vmatprep.subr.bf16.mxu0 %v18822_v21 }
 0x55d   : > { %v6423_v46 = vpop.f32.mrb[108].mxu1 }
 0x55e   : > { %v6798_v28 = vmax.f32 %v6644_v54, 0.0  ;;  %v6424_v18 = vadd.f32 %v16677_v55, %v6423_v46  ;;  %v6425_v2 = vpop.f32.mrb[109].mxu1  ;;  %v8139_v46 = vld [vmem:[%s18157_s9 + $0xf0] sm:$0xff] }
 0x55f   : > { %10199 = vmatpush1.bf16.msra.mxu0 %v10198_v50 }
 0x560   : > { %6830 = vst.msk [vmem:[#allocation2 + $0x30] sm:$0xff] %vm385_vm0, %v6798_v28  ;;  %v6649_v44 = vadd.f32 %v16246_v45, %v6424_v18  ;;  %10200 = vmatprep.subr.bf16.mxu0 %v18822_v21  ;;  %v8140_v28 = vld [vmem:[%s18157_s9 + $0xf8] sm:$0xff] }
 0x561   : > { %v6428_v30 = vpop.f32.mrb[110].mxu1  ;;  %v10207_v26 = vpack.c.bf16 %v8140_v28, %v8139_v46 }
 0x562   : > { %v6799_v39 = vmax.f32 %v6649_v44, 0.0  ;;  %v6429_v25 = vadd.f32 %v16677_v55, %v6428_v30  ;;  %v6430_v15 = vpop.f32.mrb[111].mxu1 }
 0x563   : > { %v6895_v12 = vld [vmem:[#allocation2 + $0x28] sm:$0xff]  ;;  %10202 = vmatpush1.bf16.msra.mxu0 %v10201_v58 }
 0x564   : > { %6831 = vst.msk [vmem:[#allocation2 + $0x48] sm:$0xff] %vm385_vm0, %v6799_v39  ;;  %v6654_v45 = vadd.f32 %v16237_v61, %v6429_v25  ;;  %v10204_v61 = vpack.c.bf16 %v8138_v37, %v8137_v33  ;;  %10203 = vmatprep.subr.bf16.mxu0 %v18822_v21 }
 0x565   : > { %v6433_v20 = vpop.f32.mrb[112].mxu1 }
 0x566   : > { %v6800_v52 = vmax.f32 %v6654_v45, 0.0  ;;  %v6434_v40 = vadd.f32 %v16677_v55, %v6433_v20  ;;  %v6435_v14 = vpop.f32.mrb[113].mxu1 }
 0x567   : > { %v7021_v8 = vld [vmem:[#allocation2 + $0x29] sm:$0xff]  ;;  %v7022_v11 = vld [vmem:[#allocation2 + $0x31] sm:$0xff]  ;;  %10205 = vmatpush1.bf16.msra.mxu0 %v10204_v61 }
 0x568   : > { %v6896_v17 = vld [vmem:[#allocation2 + $0x30] sm:$0xff]  ;;  %6832 = vst.msk [vmem:[#allocation2 + $0x50] sm:$0xff] %vm385_vm0, %v6800_v52  ;;  %v6659_v54 = vadd.f32 %v16264_v57, %v6434_v40  ;;  %v11755_v19 = vpack.i.bf16 %v7022_v11, %v7021_v8  ;;  %v6957_v57 = vld [vmem:[#allocation2 + $0x27] sm:$0xff]  ;;  %10206 = vmatprep.subr.bf16.mxu0 %v18822_v21 }
 0x569   : > { %v11745_v63 = vpack.i.bf16 %v6896_v17, %v6895_v12  ;;  %v6438_v18 = vpop.f32.mrb[114].mxu1 }
 0x56a   : > { %v6801_v2 = vmax.f32 %v6659_v54, 0.0  ;;  %v6439_v50 = vadd.f32 %v16677_v55, %v6438_v18  ;;  %v6440_v44 = vpop.f32.mrb[115].mxu1  ;;  %11756 = vrot.lane.b32.xlu0 %v11755_v19, %s12283_s13  ;;  %v6958_v54 = vld [vmem:[#allocation2 + $0x2f] sm:$0xff] }
 0x56b   : > { %11746 = vrot.lane.b32.xlu1 %v11745_v63, %s12283_s13  ;;  %v7085_v32 = vld [vmem:[#allocation2 + $0x48] sm:$0xff]  ;;  %10208 = vmatpush1.bf16.msra.mxu0 %v10207_v26 }
 0x56c   : > { %6833 = vst.msk [vmem:[#allocation2 + $0x68] sm:$0xff] %vm385_vm0, %v6801_v2  ;;  %v6664_v30 = vadd.f32 %v16258_v6, %v6439_v50  ;;  %v11760_v39 = vpack.i.bf16 %v6957_v57, %v7085_v32  ;;  %v7053_v52 = vld [vmem:[#allocation2 + $0x47] sm:$0xff] }
 0x56d   : > { %v6443_v25 = vpop.f32.mrb[116].mxu1 }
 0x56e   : > { %v6802_v15 = vmax.f32 %v6664_v30, 0.0  ;;  %v6444_v58 = vadd.f32 %v16677_v55, %v6443_v25  ;;  %v6445_v45 = vpop.f32.mrb[117].mxu1  ;;  %11761 = vrot.lane.b32.xlu0 %v11760_v39, %s12285_s25 }
 0x56f   : > { %11751 = vrot.lane.b32.xlu1 %v11755_v19, %s12284_s0  ;;  %v7117_v33 = vld [vmem:[#allocation2 + $0x49] sm:$0xff]  ;;  %v7118_v37 = vld [vmem:[#allocation2 + $0x51] sm:$0xff] }
 0x570   : > { %v6898_v20 = vld [vmem:[#allocation2 + $0x50] sm:$0xff]  ;;  %6834 = vst.msk [vmem:[#allocation2 + $0x70] sm:$0xff] %vm385_vm0, %v6802_v15  ;;  %v6669_v6 = vadd.f32 %v16285_v13, %v6444_v58  ;;  %9913 = vmatprep.mubr.msk.f32.mxu1 %vm385_vm0, %v7117_v33  ;;  %v11770_v61 = vpack.i.bf16 %v7118_v37, %v7117_v33 }
 0x571   : > { %v11765_v21 = vpack.i.bf16 %v6898_v20, %v7085_v32  ;;  %v16753_v40 = vld [vmem:[#allocation2 + $0x4f] sm:$0xff]  ;;  %v6448_v14 = vpop.f32.mrb[118].mxu1  ;;  %9914 = vmatmul.mubr.msk.f32.vlgmr.msra.gmra.mrb[168].mxu1 %vm385_vm0, %v7118_v37  ;;  %v11780_v63 = vpack.i.bf16 %v6958_v54, %v6898_v20 }
 0x572   : > { %v11775_v12 = vpack.i.bf16 %v16753_v40, %v7053_v52  ;;  %v6803_v8 = vmax.f32 %v6669_v6, 0.0  ;;  %v6449_v11 = vadd.f32 %v16677_v55, %v6448_v14  ;;  %v6450_v17 = vpop.f32.mrb[119].mxu1 }
 0x573   : > { %11766 = vrot.lane.b32.xlu0 %v11765_v21, %s12283_s13  ;;  %v6899_v2 = vld [vmem:[#allocation2 + $0x68] sm:$0xff] }
 0x574   : > { %11776 = vrot.lane.b32.xlu1 %v11775_v12, %s12284_s0  ;;  %6835 = vst.msk [vmem:[#allocation2 + $0x88] sm:$0xff] %vm385_vm0, %v6803_v8  ;;  %v6674_v13 = vadd.f32 %v16276_v9, %v6449_v11  ;;  %v11790_v58 = vpack.i.bf16 %v7053_v52, %v6899_v2 }
 0x575   : > { %v6453_v19 = vpop.f32.mrb[120].mxu1 }
 0x576   : > { %v6804_v46 = vmax.f32 %v6674_v13, 0.0  ;;  %v6454_v28 = vadd.f32 %v16677_v55, %v6453_v19  ;;  %v6455_v18 = vpop.f32.mrb[121].mxu1 }
 0x577   : > { %11771 = vrot.lane.b32.xlu0 %v11770_v61, %s12284_s0  ;;  %v7119_v50 = vld [vmem:[#allocation2 + $0x69] sm:$0xff]  ;;  %v7120_v44 = vld [vmem:[#allocation2 + $0x71] sm:$0xff] }
 0x578   : > { %11781 = vrot.lane.b32.xlu1 %v11780_v63, %s12285_s25  ;;  %v6900_v57 = vld [vmem:[#allocation2 + $0x70] sm:$0xff]  ;;  %6836 = vst.msk [vmem:[#allocation2 + $0x90] sm:$0xff] %vm385_vm0, %v6804_v46  ;;  %v6679_v9 = vadd.f32 %v16303_v62, %v6454_v28  ;;  %9916 = vmatprep.mubr.msk.f32.mxu1 %vm385_vm0, %v7119_v50  ;;  %v11800_v45 = vpack.i.bf16 %v7120_v44, %v7119_v50 }
 0x579   : > { %v11795_v32 = vpack.i.bf16 %v6900_v57, %v6899_v2  ;;  %v6458_v26 = vpop.f32.mrb[122].mxu1  ;;  %9917 = vmatmul.mubr.msk.f32.gmra.mrb[170].mxu1 %vm385_vm0, %v7120_v44  ;;  %v7056_v6 = vld [vmem:[#allocation2 + $0x6f] sm:$0xff]  ;;  %v11810_v63 = vpack.i.bf16 %v16753_v40, %v6900_v57 }
 0x57a   : > { %v6805_v30 = vmax.f32 %v6679_v9, 0.0  ;;  %v6459_v39 = vadd.f32 %v16677_v55, %v6458_v26  ;;  %v6460_v25 = vpop.f32.mrb[123].mxu1 }
 0x57b   : > { %11786 = vrot.lane.b32.xlu0 %v11770_v61, %s12283_s13  ;;  %v7089_v11 = vld [vmem:[#allocation2 + $0x88] sm:$0xff] }
 0x57c   : > { %11796 = vrot.lane.b32.xlu1 %v11795_v32, %s12283_s13  ;;  %6837 = vst.msk [vmem:[#allocation2 + $0xa8] sm:$0xff] %vm385_vm0, %v6805_v30  ;;  %v6684_v15 = vadd.f32 %v16293_v7, %v6459_v39  ;;  %v7055_v7 = vld [vmem:[#allocation2 + $0x67] sm:$0xff] }
 0x57d   : > { %v6463_v62 = vpop.f32.mrb[124].mxu1  ;;  %v11805_v8 = vpack.i.bf16 %v7056_v6, %v7055_v7  ;;  %v11820_v54 = vpack.i.bf16 %v7055_v7, %v7089_v11  ;;  %v7057_v57 = vld [vmem:[#allocation2 + $0x87] sm:$0xff] }
 0x57e   : > { %v6806_v33 = vmax.f32 %v6684_v15, 0.0  ;;  %v6464_v37 = vadd.f32 %v16677_v55, %v6463_v62  ;;  %v6465_v20 = vpop.f32.mrb[125].mxu1 }
 0x57f   : > { %11791 = vrot.lane.b32.xlu0 %v11790_v58, %s12285_s25  ;;  %v7121_v21 = vld [vmem:[#allocation2 + $0x89] sm:$0xff]  ;;  %v7122_v14 = vld [vmem:[#allocation2 + $0x91] sm:$0xff] }
 0x580   : > { %11801 = vrot.lane.b32.xlu1 %v11800_v45, %s12284_s0  ;;  %6838 = vst.msk [vmem:[#allocation2 + $0xb0] sm:$0xff] %vm385_vm0, %v6806_v33  ;;  %v6689_v12 = vadd.f32 %v16320_v22, %v6464_v37  ;;  %9919 = vmatprep.mubr.msk.f32.mxu1 %vm385_vm0, %v7121_v21  ;;  %v6902_v46 = vld [vmem:[#allocation2 + $0x90] sm:$0xff]  ;;  %v11830_v15 = vpack.i.bf16 %v7122_v14, %v7121_v21 }
 0x581   : > { %v6468_v52 = vpop.f32.mrb[126].mxu1  ;;  %9920 = vmatmul.mubr.msk.f32.gmra.mrb[172].mxu1 %vm385_vm0, %v7122_v14  ;;  %v16789_v50 = vld [vmem:[#allocation2 + $0x8f] sm:$0xff]  ;;  %v11825_v40 = vpack.i.bf16 %v6902_v46, %v7089_v11  ;;  %v11840_v62 = vpack.i.bf16 %v7056_v6, %v6902_v46 }
 0x582   : > { %v6807_v17 = vmax.f32 %v6689_v12, 0.0  ;;  %v6469_v13 = vadd.f32 %v16677_v55, %v6468_v52  ;;  %v6470_v61 = vpop.f32.mrb[127].mxu1  ;;  %v11835_v26 = vpack.i.bf16 %v16789_v50, %v7057_v57 }
 0x583   : > { %11816 = vrot.lane.b32.xlu0 %v11800_v45, %s12283_s13  ;;  %v6903_v6 = vld [vmem:[#allocation2 + $0xa8] sm:$0xff] }
 0x584   : > { %11806 = vrot.lane.b32.xlu1 %v11805_v8, %s12284_s0  ;;  %6839 = vst.msk [vmem:[#allocation2 + $0xc8] sm:$0xff] %vm385_vm0, %v6807_v17  ;;  %v6694_v22 = vadd.f32 %v16313_v4, %v6469_v13  ;;  %v11850_v17 = vpack.i.bf16 %v7057_v57, %v6903_v6 }
 0x585   : > { %v6473_v19 = vpop.f32.mrb[128].mxu1 }
 0x586   : > { %v6808_v28 = vmax.f32 %v6694_v22, 0.0  ;;  %v6474_v18 = vadd.f32 %v16677_v55, %v6473_v19  ;;  %v6475_v2 = vpop.f32.mrb[129].mxu1 }
 0x587   : > { %11821 = vrot.lane.b32.xlu0 %v11820_v54, %s12285_s25  ;;  %v7123_v44 = vld [vmem:[#allocation2 + $0xa9] sm:$0xff]  ;;  %v7124_v9 = vld [vmem:[#allocation2 + $0xb1] sm:$0xff] }
 0x588   : > { %11811 = vrot.lane.b32.xlu1 %v11810_v63, %s12285_s25  ;;  %6840 = vst.msk [vmem:[#allocation2 + $0xd0] sm:$0xff] %vm385_vm0, %v6808_v28  ;;  %v6699_v4 = vadd.f32 %v16340_v34, %v6474_v18  ;;  %9922 = vmatprep.mubr.msk.f32.mxu1 %vm385_vm0, %v7123_v44  ;;  %v6904_v20 = vld [vmem:[#allocation2 + $0xb0] sm:$0xff]  ;;  %v11860_v61 = vpack.i.bf16 %v7124_v9, %v7123_v44  ;;  %v7059_v18 = vld [vmem:[#allocation2 + $0xa7] sm:$0xff] }
 0x589   : > { %v6478_v32 = vpop.f32.mrb[130].mxu1  ;;  %9923 = vmatmul.mubr.msk.f32.gmra.mrb[174].mxu1 %vm385_vm0, %v7124_v9  ;;  %v11855_v14 = vpack.i.bf16 %v6904_v20, %v6903_v6  ;;  %v7060_v63 = vld [vmem:[#allocation2 + $0xaf] sm:$0xff] }
 0x58a   : > { %v6809_v30 = vmax.f32 %v6699_v4, 0.0  ;;  %v6479_v39 = vadd.f32 %v16677_v55, %v6478_v32  ;;  %v6480_v25 = vpop.f32.mrb[131].mxu1  ;;  %v11865_v44 = vpack.i.bf16 %v7060_v63, %v7059_v18 }
 0x58b   : > { %11826 = vrot.lane.b32.xlu0 %v11825_v40, %s12283_s13  ;;  %v7093_v9 = vld [vmem:[#allocation2 + $0xc8] sm:$0xff] }
 0x58c   : > { %11836 = vrot.lane.b32.xlu1 %v11835_v26, %s12284_s0  ;;  %6841 = vst.msk [vmem:[#allocation2 + $0xe8] sm:$0xff] %vm385_vm0, %v6809_v30  ;;  %v6704_v34 = vadd.f32 %v16332_v31, %v6479_v39  ;;  %v11880_v32 = vpack.i.bf16 %v7059_v18, %v7093_v9  ;;  %v11870_v30 = vpack.i.bf16 %v16789_v50, %v6904_v20 }
 0x58d   : > { %v6483_v58 = vpop.f32.mrb[132].mxu1 }
 0x58e   : > { %v6810_v45 = vmax.f32 %v6704_v34, 0.0  ;;  %v6484_v33 = vadd.f32 %v16677_v55, %v6483_v58  ;;  %v6485_v37 = vpop.f32.mrb[133].mxu1 }
 0x58f   : > { %11831 = vrot.lane.b32.xlu0 %v11830_v15, %s12284_s0  ;;  %v16805_v12 = vld [vmem:[#allocation2 + $0xc9] sm:$0xff]  ;;  %v16807_v7 = vld [vmem:[#allocation2 + $0xd1] sm:$0xff] }
 0x590   : > { %11841 = vrot.lane.b32.xlu1 %v11840_v62, %s12285_s25  ;;  %6842 = vst.msk [vmem:[#allocation2 + $0xf0] sm:$0xff] %vm385_vm0, %v6810_v45  ;;  %v6709_v31 = vadd.f32 %v16359_v53, %v6484_v33  ;;  %9925 = vmatprep.mubr.msk.f32.mxu1 %vm385_vm0, %v16805_v12  ;;  %v6906_v39 = vld [vmem:[#allocation2 + $0xd0] sm:$0xff]  ;;  %v7061_v33 = vld [vmem:[#allocation2 + $0xc7] sm:$0xff] }
 0x591   : > { %v6488_v21 = vpop.f32.mrb[134].mxu1  ;;  %9926 = vmatmul.mubr.msk.f32.gmra.mrb[176].mxu1 %vm385_vm0, %v16807_v7  ;;  %v16841_v58 = vld [vmem:[#allocation2 + $0xcf] sm:$0xff]  ;;  %v11885_v50 = vpack.i.bf16 %v6906_v39, %v7093_v9 }
 0x592   : > { %v6811_v52 = vmax.f32 %v6709_v31, 0.0  ;;  %v6489_v8 = vadd.f32 %v16677_v55, %v6488_v21  ;;  %v6490_v11 = vpop.f32.mrb[135].mxu1  ;;  %v11895_v20 = vpack.i.bf16 %v16841_v58, %v7061_v33 }
 0x593   : > { %11846 = vrot.lane.b32.xlu0 %v11830_v15, %s12283_s13 }
 0x594   : > { %11856 = vrot.lane.b32.xlu1 %v11855_v14, %s12283_s13  ;;  %6843 = vst.msk [vmem:[#allocation2 + $0x108] sm:$0xff] %vm385_vm0, %v6811_v52  ;;  %v6714_v53 = vadd.f32 %v16350_v0, %v6489_v8  ;;  %v11890_v14 = vpack.i.bf16 %v16807_v7, %v16805_v12  ;;  %v11900_v8 = vpack.i.bf16 %v7060_v63, %v6906_v39  ;;  %v6907_v12 = vld [vmem:[#allocation2 + $0xe8] sm:$0xff] }
 0x595   : > { %v6493_v13 = vpop.f32.mrb[136].mxu1  ;;  %v11910_v18 = vpack.i.bf16 %v7061_v33, %v6907_v12 }
 0x596   : > { %v6812_v22 = vmax.f32 %v6714_v53, 0.0  ;;  %v6494_v54 = vadd.f32 %v16677_v55, %v6493_v13  ;;  %v6495_v19 = vpop.f32.mrb[137].mxu1 }
 0x597   : > { %11851 = vrot.lane.b32.xlu0 %v11850_v17, %s12285_s25  ;;  %v16823_v46 = vld [vmem:[#allocation2 + $0xe9] sm:$0xff]  ;;  %v16825_v28 = vld [vmem:[#allocation2 + $0xf1] sm:$0xff] }
 0x598   : > { %11861 = vrot.lane.b32.xlu1 %v11860_v61, %s12284_s0  ;;  %6844 = vst.msk [vmem:[#allocation2 + $0x110] sm:$0xff] %vm385_vm0, %v6812_v22  ;;  %v6719_v0 = vadd.f32 %v16377_v60, %v6494_v54  ;;  %9928 = vmatprep.mubr.msk.f32.mxu1 %vm385_vm0, %v16823_v46  ;;  %v6908_v13 = vld [vmem:[#allocation2 + $0xf0] sm:$0xff] }
 0x599   : > { %v6498_v2 = vpop.f32.mrb[138].mxu1  ;;  %9929 = vmatmul.mubr.msk.f32.gmra.mrb[178].mxu1 %vm385_vm0, %v16825_v28  ;;  %v11915_v54 = vpack.i.bf16 %v6908_v13, %v6907_v12 }
 0x59a   : > { %v6813_v4 = vmax.f32 %v6719_v0, 0.0  ;;  %v6499_v40 = vadd.f32 %v16677_v55, %v6498_v2  ;;  %v6500_v57 = vpop.f32.mrb[139].mxu1 }
 0x59b   : > { %11876 = vrot.lane.b32.xlu0 %v11860_v61, %s12283_s13  ;;  %v7064_v57 = vld [vmem:[#allocation2 + $0xef] sm:$0xff] }
 0x59c   : > { %11866 = vrot.lane.b32.xlu1 %v11865_v44, %s12284_s0  ;;  %6845 = vst.msk [vmem:[#allocation2 + $0x128] sm:$0xff] %vm385_vm0, %v6813_v4  ;;  %v6724_v60 = vadd.f32 %v16369_v24, %v6499_v40  ;;  %v11920_v44 = vpack.i.bf16 %v16825_v28, %v16823_v46  ;;  %v7063_v46 = vld [vmem:[#allocation2 + $0xe7] sm:$0xff] }
 0x59d   : > { %v6503_v26 = vpop.f32.mrb[140].mxu1 }
 0x59e   : > { %v6814_v25 = vmax.f32 %v6724_v60, 0.0  ;;  %v6504_v34 = vadd.f32 %v16677_v55, %v6503_v26  ;;  %v6505_v15 = vpop.f32.mrb[141].mxu1  ;;  %v11925_v26 = vpack.i.bf16 %v7064_v57, %v7063_v46 }
 0x59f   : > { %11881 = vrot.lane.b32.xlu0 %v11880_v32, %s12285_s25  ;;  %v16844_v62 = vld [vmem:[#allocation2 + $0x109] sm:$0xff]  ;;  %v16846_v45 = vld [vmem:[#allocation2 + $0x111] sm:$0xff] }
 0x5a0   : > { %11871 = vrot.lane.b32.xlu1 %v11870_v30, %s12285_s25  ;;  %6846 = vst.msk [vmem:[#allocation2 + $0x130] sm:$0xff] %vm385_vm0, %v6814_v25  ;;  %v6729_v24 = vadd.f32 %v16396_v43, %v6504_v34  ;;  %9931 = vmatprep.mubr.msk.f32.mxu1 %vm385_vm0, %v16844_v62  ;;  %v7097_v30 = vld [vmem:[#allocation2 + $0x108] sm:$0xff]  ;;  %v6910_v33 = vld [vmem:[#allocation2 + $0x110] sm:$0xff] }
 0x5a1   : > { %v6508_v37 = vpop.f32.mrb[142].mxu1  ;;  %9932 = vmatmul.mubr.msk.f32.gmra.mrb[180].mxu1 %vm385_vm0, %v16846_v45  ;;  %v11940_v15 = vpack.i.bf16 %v7063_v46, %v7097_v30  ;;  %v11960_v12 = vpack.i.bf16 %v7064_v57, %v6910_v33 }
 0x5a2   : > { %v6815_v31 = vmax.f32 %v6729_v24, 0.0  ;;  %v6509_v6 = vadd.f32 %v16677_v55, %v6508_v37  ;;  %v6510_v21 = vpop.f32.mrb[143].mxu1 }
 0x5a3   : > { %11886 = vrot.lane.b32.xlu0 %v11885_v50, %s12283_s13  ;;  %v11930_v50 = vpack.i.bf16 %v16841_v58, %v6908_v13  ;;  %v11945_v58 = vpack.i.bf16 %v6910_v33, %v7097_v30  ;;  %v11950_v13 = vpack.i.bf16 %v16846_v45, %v16844_v62  ;;  %v6911_v62 = vld [vmem:[#allocation2 + $0x128] sm:$0xff] }
 0x5a4   : > { %11896 = vrot.lane.b32.xlu1 %v11895_v20, %s12284_s0  ;;  %6847 = vst.msk [vmem:[#allocation2 + $0x148] sm:$0xff] %vm385_vm0, %v6815_v31  ;;  %v6734_v43 = vadd.f32 %v16387_v23, %v6509_v6  ;;  %v16903_v6 = vld [vmem:[#allocation2 + $0x10f] sm:$0xff] }
 0x5a5   : > { %v6513_v52 = vpop.f32.mrb[144].mxu1 }
 0x5a6   : > { %v6816_v11 = vmax.f32 %v6734_v43, 0.0  ;;  %v6514_v53 = vadd.f32 %v16677_v55, %v6513_v52  ;;  %v6515_v17 = vpop.f32.mrb[145].mxu1 }
 0x5a7   : > { %11891 = vrot.lane.b32.xlu0 %v11890_v14, %s12284_s0  ;;  %v16865_v61 = vld [vmem:[#allocation2 + $0x129] sm:$0xff]  ;;  %v16867_v22 = vld [vmem:[#allocation2 + $0x131] sm:$0xff] }
 0x5a8   : > { %11901 = vrot.lane.b32.xlu1 %v11900_v8, %s12285_s25  ;;  %6848 = vst.msk [vmem:[#allocation2 + $0x150] sm:$0xff] %vm385_vm0, %v6816_v11  ;;  %v6739_v23 = vadd.f32 %v16414_v47, %v6514_v53  ;;  %9934 = vmatprep.mubr.msk.f32.mxu1 %vm385_vm0, %v16865_v61  ;;  %v11980_v57 = vpack.i.bf16 %v16867_v22, %v16865_v61  ;;  %v7067_v61 = vld [vmem:[#allocation2 + $0x127] sm:$0xff] }
 0x5a9   : > { %v6518_v7 = vpop.f32.mrb[146].mxu1  ;;  %9935 = vmatmul.mubr.msk.f32.gmra.mrb[182].mxu1 %vm385_vm0, %v16867_v22 }
 0x5aa   : > { %v6817_v19 = vmax.f32 %v6739_v23, 0.0  ;;  %v6519_v63 = vadd.f32 %v16677_v55, %v6518_v7  ;;  %v6520_v0 = vpop.f32.mrb[147].mxu1 }
 0x5ab   : > { %11906 = vrot.lane.b32.xlu0 %v11890_v14, %s12283_s13  ;;  %v7065_v14 = vld [vmem:[#allocation2 + $0x107] sm:$0xff] }
 0x5ac   : > { %11916 = vrot.lane.b32.xlu1 %v11915_v54, %s12283_s13  ;;  %6849 = vst.msk [vmem:[#allocation2 + $0x168] sm:$0xff] %vm385_vm0, %v6817_v19  ;;  %v6744_v47 = vadd.f32 %v16406_v59, %v6519_v63  ;;  %v11955_v8 = vpack.i.bf16 %v16903_v6, %v7065_v14  ;;  %v6912_v63 = vld [vmem:[#allocation2 + $0x130] sm:$0xff] }
 0x5ad   : > { %v6523_v2 = vpop.f32.mrb[148].mxu1 }
 0x5ae   : > { %v6818_v9 = vmax.f32 %v6744_v47, 0.0  ;;  %v6524_v4 = vadd.f32 %v16677_v55, %v6523_v2  ;;  %v6525_v40 = vpop.f32.mrb[149].mxu1 }
 0x5af   : > { %11911 = vrot.lane.b32.xlu0 %v11910_v18, %s12285_s25  ;;  %v16885_v60 = vld [vmem:[#allocation2 + $0x149] sm:$0xff]  ;;  %v16887_v32 = vld [vmem:[#allocation2 + $0x151] sm:$0xff]  ;;  %v11975_v18 = vpack.i.bf16 %v6912_v63, %v6911_v62 }
 0x5b0   : > { %11921 = vrot.lane.b32.xlu1 %v11920_v44, %s12284_s0  ;;  %6850 = vst.msk [vmem:[#allocation2 + $0x170] sm:$0xff] %vm385_vm0, %v6818_v9  ;;  %v6749_v59 = vadd.f32 %v16433_v38, %v6524_v4  ;;  %9937 = vmatprep.mubr.msk.f32.mxu1 %vm385_vm0, %v16885_v60  ;;  %v11970_v4 = vpack.i.bf16 %v7065_v14, %v6911_v62  ;;  %v16965_v14 = vld [vmem:[#allocation2 + $0x14f] sm:$0xff] }
 0x5b1   : > { %v6528_v28 = vpop.f32.mrb[150].mxu1  ;;  %9938 = vmatmul.mubr.msk.f32.gmra.mrb[184].mxu1 %vm385_vm0, %v16887_v32 }
 0x5b2   : > { %v6819_v39 = vmax.f32 %v6749_v59, 0.0  ;;  %v6529_v25 = vadd.f32 %v16677_v55, %v6528_v28  ;;  %v6530_v34 = vpop.f32.mrb[151].mxu1 }
 0x5b3   : > { %11936 = vrot.lane.b32.xlu0 %v11920_v44, %s12283_s13  ;;  %v7101_v34 = vld [vmem:[#allocation2 + $0x148] sm:$0xff] }
 0x5b4   : > { %11926 = vrot.lane.b32.xlu1 %v11925_v26, %s12284_s0  ;;  %6851 = vst.msk [vmem:[#allocation2 + $0x188] sm:$0xff] %vm385_vm0, %v6819_v39  ;;  %v6754_v38 = vadd.f32 %v16426_v48, %v6529_v25  ;;  %v7068_v26 = vld [vmem:[#allocation2 + $0x12f] sm:$0xff] }
 0x5b5   : > { %v6533_v24 = vpop.f32.mrb[152].mxu1  ;;  %v11985_v25 = vpack.i.bf16 %v7068_v26, %v7067_v61 }
 0x5b6   : > { %v6820_v37 = vmax.f32 %v6754_v38, 0.0  ;;  %v6534_v20 = vadd.f32 %v16677_v55, %v6533_v24  ;;  %v6535_v31 = vpop.f32.mrb[153].mxu1 }
 0x5b7   : > { %11941 = vrot.lane.b32.xlu0 %v11940_v15, %s12285_s25  ;;  %v16906_v21 = vld [vmem:[#allocation2 + $0x169] sm:$0xff]  ;;  %v16908_v43 = vld [vmem:[#allocation2 + $0x171] sm:$0xff] }
 0x5b8   : > { %11931 = vrot.lane.b32.xlu1 %v11930_v50, %s12285_s25  ;;  %6852 = vst.msk [vmem:[#allocation2 + $0x190] sm:$0xff] %vm385_vm0, %v6820_v37  ;;  %v6759_v48 = vadd.f32 %v16448_v29, %v6534_v20  ;;  %9940 = vmatprep.mubr.msk.f32.mxu1 %vm385_vm0, %v16906_v21  ;;  %v12000_v50 = vpack.i.bf16 %v7067_v61, %v7101_v34  ;;  %v6914_v20 = vld [vmem:[#allocation2 + $0x150] sm:$0xff] }
 0x5b9   : > { %v6538_v52 = vpop.f32.mrb[154].mxu1  ;;  %9941 = vmatmul.mubr.msk.f32.gmra.mrb[186].mxu1 %vm385_vm0, %v16908_v43  ;;  %v11990_v37 = vpack.i.bf16 %v16903_v6, %v6912_v63  ;;  %v12005_v6 = vpack.i.bf16 %v6914_v20, %v7101_v34 }
 0x5ba   : > { %v6821_v11 = vmax.f32 %v6759_v48, 0.0  ;;  %v6539_v53 = vadd.f32 %v16677_v55, %v6538_v52  ;;  %v6540_v17 = vpop.f32.mrb[155].mxu1 }
 0x5bb   : > { %11946 = vrot.lane.b32.xlu0 %v11945_v58, %s12283_s13 }
 0x5bc   : > { %11956 = vrot.lane.b32.xlu1 %v11955_v8, %s12284_s0  ;;  %6853 = vst.msk [vmem:[#allocation2 + $0x1a8] sm:$0xff] %vm385_vm0, %v6821_v11  ;;  %v6764_v29 = vadd.f32 %v16443_v42, %v6539_v53  ;;  %v7069_v11 = vld [vmem:[#allocation2 + $0x147] sm:$0xff]  ;;  %v16976_v53 = vpop.permute.xlu0 %11736 }
 0x5bd   : > { %v6543_v23 = vpop.f32.mrb[156].mxu1  ;;  %v11739_v61 = vunpack.i.h.bf16 %v16976_v53 }
 0x5be   : > { %v6822_v7 = vmax.f32 %v6764_v29, 0.0  ;;  %v6544_v54 = vadd.f32 %v16677_v55, %v6543_v23  ;;  %v6545_v19 = vpop.f32.mrb[157].mxu1  ;;  %v12015_v29 = vpack.i.bf16 %v16965_v14, %v7069_v11 }
 0x5bf   : > { %11951 = vrot.lane.b32.xlu0 %v11950_v13, %s12284_s0  ;;  %v16927_v0 = vld [vmem:[#allocation2 + $0x189] sm:$0xff]  ;;  %v16929_v47 = vld [vmem:[#allocation2 + $0x191] sm:$0xff] }
 0x5c0   : > { %11961 = vrot.lane.b32.xlu1 %v11960_v12, %s12285_s25  ;;  %6854 = vst.msk [vmem:[#allocation2 + $0x1b0] sm:$0xff] %vm385_vm0, %v6822_v7  ;;  %v6769_v42 = vadd.f32 %v16465_v35, %v6544_v54  ;;  %9943 = vmatprep.mubr.msk.f32.mxu1 %vm385_vm0, %v16927_v0  ;;  %v12010_v7 = vpack.i.bf16 %v16887_v32, %v16885_v60  ;;  %v16989_v63 = vpop.permute.xlu0 %11741 }
 0x5c1   : > { %v6548_v45 = vpop.f32.mrb[158].mxu1  ;;  %9944 = vmatmul.mubr.msk.f32.gmra.mrb[188].mxu1 %vm385_vm0, %v16929_v47  ;;  %v12020_v54 = vpack.i.bf16 %v7068_v26, %v6914_v20  ;;  %v6862_v20 = vld [vmem:[#allocation2 + $0xf] sm:$0xff] }
 0x5c2   : > { %v6823_v2 = vmax.f32 %v6769_v42, 0.0  ;;  %v6549_v44 = vadd.f32 %v16677_v55, %v6548_v45  ;;  %v6550_v9 = vpop.f32.mrb[159].mxu1  ;;  %v6916_v42 = vld [vmem:[#allocation2 + $0x170] sm:$0xff] }
 0x5c3   : > { %11966 = vrot.lane.b32.xlu0 %v11950_v13, %s12283_s13  ;;  %v12050_v34 = vpack.i.bf16 %v16965_v14, %v6916_v42  ;;  %v11744_v14 = vunpack.i.h.bf16 %v16989_v63 }
 0x5c4   : > { %11976 = vrot.lane.b32.xlu1 %v11975_v18, %s12283_s13  ;;  %6855 = vst.msk [vmem:[#allocation2 + $0x1c8] sm:$0xff] %vm385_vm0, %v6823_v2  ;;  %v6774_v35 = vadd.f32 %v16461_v41, %v6549_v44  ;;  %v12040_v2 = vpack.i.bf16 %v16908_v43, %v16906_v21  ;;  %v17008_v44 = vld [vmem:[#allocation2 + $0x16f] sm:$0xff] }
 0x5c5   : > { %v6553_v40 = vpop.f32.mrb[160].mxu1  ;;  %v7105_v43 = vld [vmem:[#allocation2 + $0x188] sm:$0xff] }
 0x5c6   : > { %v6824_v59 = vmax.f32 %v6774_v35, 0.0  ;;  %v6554_v46 = vadd.f32 %v16677_v55, %v6553_v40  ;;  %v6555_v28 = vpop.f32.mrb[161].mxu1 }
 0x5c7   : > { %11971 = vrot.lane.b32.xlu0 %v11970_v4, %s12285_s25  ;;  %v16947_v30 = vld [vmem:[#allocation2 + $0x1a9] sm:$0xff]  ;;  %v16949_v39 = vld [vmem:[#allocation2 + $0x1b1] sm:$0xff] }
 0x5c8   : > { %11981 = vrot.lane.b32.xlu1 %v11980_v57, %s12284_s0  ;;  %6856 = vst.msk [vmem:[#allocation2 + $0x1d0] sm:$0xff] %vm385_vm0, %v6824_v59  ;;  %v6779_v41 = vadd.f32 %v16486_v49, %v6554_v46  ;;  %9946 = vmatprep.mubr.msk.f32.mxu1 %vm385_vm0, %v16947_v30  ;;  %v11738_v59 = vunpack.i.l.bf16 %v16976_v53  ;;  %v6861_v46 = vld [vmem:[#allocation2 + $0x7] sm:$0xff] }
 0x5c9   : > { %v6558_v22 = vpop.f32.mrb[162].mxu1  ;;  %9947 = vmatmul.mubr.msk.f32.gmra.mrb[190].mxu1 %vm385_vm0, %v16949_v39  ;;  %v7073_v53 = vld [vmem:[#allocation2 + $0x187] sm:$0xff] }
 0x5ca   : > { %v6825_v38 = vmax.f32 %v6779_v41, 0.0  ;;  %v6559_v15 = vadd.f32 %v16677_v55, %v6558_v22  ;;  %v6560_v24 = vpop.f32.mrb[163].mxu1  ;;  %v11743_v22 = vunpack.i.l.bf16 %v16989_v63 }
 0x5cb   : > { %11996 = vrot.lane.b32.xlu0 %v11980_v57, %s12283_s13  ;;  %v7071_v57 = vld [vmem:[#allocation2 + $0x167] sm:$0xff] }
 0x5cc   : > { %11986 = vrot.lane.b32.xlu1 %v11985_v25, %s12284_s0  ;;  %6857 = vst.msk [vmem:[#allocation2 + $0x1e8] sm:$0xff] %vm385_vm0, %v6825_v38  ;;  %v6784_v49 = vadd.f32 %v16482_v56, %v6559_v15  ;;  %v12045_v21 = vpack.i.bf16 %v17008_v44, %v7071_v57  ;;  %v12060_v41 = vpack.i.bf16 %v7071_v57, %v7105_v43  ;;  %v6918_v38 = vld [vmem:[#allocation2 + $0x190] sm:$0xff]  ;;  %v7107_v57 = vld [vmem:[#allocation2 + $0x1a8] sm:$0xff] }
 0x5cd   : > { %v6563_v33 = vpop.f32.mrb[164].mxu1  ;;  %v7917_v15 = vsel %vm385_vm0, %v6861_v46, %v11738_v59  ;;  %v12085_v46 = vpack.i.bf16 %v7073_v53, %v7107_v57 }
 0x5ce   : > { %v6826_v31 = vmax.f32 %v6784_v49, 0.0  ;;  %v6564_v48 = vadd.f32 %v16677_v55, %v6563_v33  ;;  %v6565_v58 = vpop.f32.mrb[165].mxu1  ;;  %v6989_v33 = vld [vmem:[#allocation2 + $0x28] sm:$0xff] }
 0x5cf   : > { %12001 = vrot.lane.b32.xlu0 %v12000_v50, %s12285_s25  ;;  %v16968_v52 = vld [vmem:[#allocation2 + $0x1c9] sm:$0xff]  ;;  %v16970_v8 = vld [vmem:[#allocation2 + $0x1d1] sm:$0xff] }
 0x5d0   : > { %11991 = vrot.lane.b32.xlu1 %v11990_v37, %s12285_s25  ;;  %6858 = vst.msk [vmem:[#allocation2 + $0x1f0] sm:$0xff] %vm385_vm0, %v6826_v31  ;;  %v6789_v56 = vadd.f32 %v16672_v27, %v6564_v48  ;;  %9949 = vmatprep.mubr.msk.f32.mxu1 %vm385_vm0, %v16968_v52  ;;  %v17032_v37 = vld [vmem:[#allocation2 + $0x18f] sm:$0xff] }
 0x5d1   : > { %v6568_v17 = vpop.f32.mrb[166].mxu1  ;;  %9950 = vmatmul.mubr.msk.f32.gmra.mrb[192].mxu1 %vm385_vm0, %v16970_v8 }
 0x5d2   : > { %v6827_v13 = vmax.f32 %v6789_v56, 0.0  ;;  %v6569_v23 = vadd.f32 %v16677_v55, %v6568_v17  ;;  %v6570_v12 = vpop.f32.mrb[167].mxu1 }
 0x5d3   : > { %12006 = vrot.lane.b32.xlu0 %v12005_v6, %s12283_s13  ;;  %v6990_v12 = vld [vmem:[#allocation2 + $0x30] sm:$0xff] }
 0x5d4   : > { %12016 = vrot.lane.b32.xlu1 %v12015_v29, %s12284_s0  ;;  %6859 = vst.msk [vmem:[#allocation2 + $0x208] sm:$0xff] %vm385_vm0, %v6827_v13  ;;  %v6794_v27 = vadd.f32 %v16670_v10, %v6569_v23  ;;  %v6915_v10 = vld [vmem:[#allocation2 + $0x168] sm:$0xff]  ;;  %v12070_v13 = vpack.i.bf16 %v17032_v37, %v7073_v53  ;;  %v7949_v23 = vsel %vm2020_vm1, %v7917_v15, %v11743_v22 }
 0x5d5   : > { %v12035_v60 = vpack.i.bf16 %v6916_v42, %v6915_v10  ;;  %v12030_v18 = vpack.i.bf16 %v7069_v11, %v6915_v10  ;;  %v12065_v11 = vpack.i.bf16 %v6918_v38, %v7105_v43  ;;  %v6920_v43 = vld [vmem:[#allocation2 + $0x1b0] sm:$0xff] }
 0x5d6   : > { %v6828_v19 = vmax.f32 %v6794_v27, 0.0  ;;  %v7918_v27 = vsel %vm385_vm0, %v6862_v20, %v11739_v61  ;;  %v17062_v61 = vld [vmem:[#allocation2 + $0x1af] sm:$0xff] }
 0x5d7   : > { %12011 = vrot.lane.b32.xlu0 %v12010_v7, %s12284_s0  ;;  %v16992_v55 = vld [vmem:[#allocation2 + $0x1e9] sm:$0xff]  ;;  %v16994_v62 = vld [vmem:[#allocation2 + $0x1f1] sm:$0xff] }
 0x5d8   : > { %12021 = vrot.lane.b32.xlu1 %v12020_v54, %s12285_s25  ;;  %6860 = vst.msk [vmem:[#allocation2 + $0x210] sm:$0xff] %vm385_vm0, %v6828_v19  ;;  %9952 = vmatprep.mubr.msk.f32.mxu1 %vm385_vm0, %v16992_v55 }
 0x5d9   : > { %9953 = vmatmul.mubr.msk.f32.gmra.mrb[194].mxu1 %vm385_vm0, %v16994_v62 }
 0x5db   : > { %12026 = vrot.lane.b32.xlu0 %v12010_v7, %s12283_s13 }
 0x5dc   : > { %12036 = vrot.lane.b32.xlu1 %v12035_v60, %s12283_s13  ;;  %v11757_v32 = vpop.permute.xlu0 %11756 }
 0x5dd   : > { %v17003_v45 = vpop.permute.xlu1 %11746  ;;  %v11758_v28 = vunpack.i.l.bf16 %v11757_v32  ;;  %v11759_v24 = vunpack.i.h.bf16 %v11757_v32  ;;  %v12080_v32 = vpack.i.bf16 %v16929_v47, %v16927_v0 }
 0x5de   : > { %v11748_v22 = vunpack.i.l.bf16 %v17003_v45  ;;  %v11749_v53 = vunpack.i.h.bf16 %v17003_v45 }
 0x5df   : > { %12031 = vrot.lane.b32.xlu0 %v12030_v18, %s12285_s25  ;;  %v17011_v9 = vld [vmem:[#allocation2 + $0x209] sm:$0xff]  ;;  %v17013_v35 = vld [vmem:[#allocation2 + $0x211] sm:$0xff]  ;;  %v8013_v58 = vsel %vm385_vm0, %v6989_v33, %v11758_v28  ;;  %v8014_v63 = vsel %vm385_vm0, %v6990_v12, %v11759_v24 }
 0x5e0   : > { %12041 = vrot.lane.b32.xlu1 %v12040_v2, %s12284_s0  ;;  %9955 = vmatprep.mubr.msk.f32.mxu1 %vm385_vm0, %v17011_v9  ;;  %v11762_v4 = vpop.permute.xlu0 %11761 }
 0x5e1   : > { %v17017_v40 = vpop.permute.xlu1 %11751  ;;  %9956 = vmatmul.mubr.msk.f32.gmra.mrb[196].mxu1 %vm385_vm0, %v17013_v35  ;;  %v11764_v49 = vunpack.i.h.bf16 %v11762_v4  ;;  %v11763_v31 = vunpack.i.l.bf16 %v11762_v4  ;;  %v7950_v4 = vsel %vm2020_vm1, %v7918_v27, %v11744_v14 }
 0x5e2   : > { %v11753_v15 = vunpack.i.l.bf16 %v17017_v40  ;;  %v11754_v12 = vunpack.i.h.bf16 %v17017_v40 }
 0x5e3   : > { %12056 = vrot.lane.b32.xlu0 %v12040_v2, %s12283_s13  ;;  %v7981_v19 = vsel %vm2053_vm2, %v7949_v23, %v11764_v49  ;;  %v12075_v2 = vpack.i.bf16 %v17008_v44, %v6918_v38  ;;  %v7075_v38 = vld [vmem:[#allocation2 + $0x1a7] sm:$0xff] }
 0x5e4   : > { %12046 = vrot.lane.b32.xlu1 %v12045_v21, %s12284_s0  ;;  %v12095_v49 = vpack.i.bf16 %v17062_v61, %v7075_v38 }
 0x5e5   : > { %v17025_v26 = vpop.permute.xlu0 %11766 }
 0x5e6   : > { %v11777_v25 = vpop.permute.xlu1 %11776 }
 0x5e7   : > { %v11778_v50 = vunpack.i.l.bf16 %v11777_v25  ;;  %12061 = vrot.lane.b32.xlu0 %v12060_v41, %s12285_s25  ;;  %v11779_v48 = vunpack.i.h.bf16 %v11777_v25  ;;  %v12090_v41 = vpack.i.bf16 %v6920_v43, %v7107_v57  ;;  %v11768_v57 = vunpack.i.l.bf16 %v17025_v26 }
 0x5e8   : > { %12051 = vrot.lane.b32.xlu1 %v12050_v34, %s12285_s25  ;;  %v12105_v34 = vpack.i.bf16 %v16949_v39, %v16947_v30 }
 0x5e9   : > { %v17037_v56 = vpop.permute.xlu0 %11771  ;;  %v8045_v6 = vsel %vm2020_vm1, %v8013_v58, %v11778_v50  ;;  %v8046_v42 = vsel %vm2020_vm1, %v8014_v63, %v11779_v48  ;;  %v7109_v50 = vld [vmem:[#allocation2 + $0x1c8] sm:$0xff]  ;;  %v6992_v63 = vld [vmem:[#allocation2 + $0x50] sm:$0xff] }
 0x5ea   : > { %v11782_v17 = vpop.permute.xlu1 %11781  ;;  %v8077_v29 = vsel %vm2053_vm2, %v8045_v6, %v11763_v31  ;;  %v6991_v48 = vld [vmem:[#allocation2 + $0x48] sm:$0xff] }
 0x5eb   : > { %v11784_v7 = vunpack.i.h.bf16 %v11782_v17  ;;  %v11783_v54 = vunpack.i.l.bf16 %v11782_v17  ;;  %8312 = vmatprep.mubr.f32.mxu0 %v8077_v29  ;;  %12066 = vrot.lane.b32.xlu0 %v12065_v11, %s12283_s13  ;;  %v6863_v11 = vld [vmem:[#allocation2 + $0x27] sm:$0xff] }
 0x5ec   : > { %12071 = vrot.lane.b32.xlu1 %v12070_v13, %s12284_s0  ;;  %8313 = vmatmul.mubr.f32.vlgmr.msra.gmra.mrb[152].mxu0 %v7981_v19  ;;  %v12115_v13 = vpack.i.bf16 %v7075_v38, %v7109_v50  ;;  %v7919_v23 = vsel %vm385_vm0, %v6863_v11, %v11748_v22 }
 0x5ed   : > { %v11787_v10 = vpop.permute.xlu0 %11786  ;;  %v8078_v60 = vsel %vm2053_vm2, %v8046_v42, %v11783_v54  ;;  %v7982_v21 = vsel %vm2053_vm2, %v7950_v4, %v11784_v7  ;;  %v12100_v54 = vpack.i.bf16 %v17032_v37, %v6920_v43  ;;  %v7951_v19 = vsel %vm2020_vm1, %v7919_v23, %v11753_v15  ;;  %v6922_v42 = vld [vmem:[#allocation2 + $0x1d0] sm:$0xff] }
 0x5ee   : > { %v17052_v18 = vpop.permute.xlu1 %11796  ;;  %8317 = vmatprep.mubr.f32.mxu0 %v8078_v60  ;;  %v11788_v44 = vunpack.i.l.bf16 %v11787_v10  ;;  %v11789_v33 = vunpack.i.h.bf16 %v11787_v10  ;;  %v6864_v4 = vld [vmem:[#allocation2 + $0x2f] sm:$0xff] }
 0x5ef   : > { %12081 = vrot.lane.b32.xlu0 %v12080_v32, %s12283_s13 }
 0x5f0   : > { %12076 = vrot.lane.b32.xlu1 %v12075_v2, %s12285_s25  ;;  %8318 = vmatmul.mubr.f32.gmra.mrb[154].mxu0 %v7982_v21  ;;  %v8015_v6 = vsel %vm385_vm0, %v6991_v48, %v11788_v44  ;;  %v8016_v32 = vsel %vm385_vm0, %v6992_v63, %v11789_v33  ;;  %v17087_v2 = vld [vmem:[#allocation2 + $0x1c7] sm:$0xff]  ;;  %v17105_v33 = vld [vmem:[#allocation2 + $0x1cf] sm:$0xff] }
 0x5f1   : > { %v11792_v59 = vpop.permute.xlu0 %11791  ;;  %v12110_v22 = vpack.i.bf16 %v16927_v0, %v17087_v2  ;;  %v6865_v48 = vld [vmem:[#allocation2 + $0x47] sm:$0xff] }
 0x5f2   : > { %v17059_v28 = vpop.permute.xlu1 %11801  ;;  %v11794_v20 = vunpack.i.h.bf16 %v11792_v59  ;;  %v11793_v58 = vunpack.i.l.bf16 %v11792_v59  ;;  %v12120_v59 = vpack.i.bf16 %v6922_v42, %v7109_v50  ;;  %v6993_v50 = vld [vmem:[#allocation2 + $0x68] sm:$0xff]  ;;  %v7921_v11 = vsel %vm385_vm0, %v6865_v48, %v11768_v57 }
 0x5f3   : > { %12086 = vrot.lane.b32.xlu0 %v12085_v46, %s12285_s25  ;;  %v7920_v46 = vsel %vm385_vm0, %v6864_v4, %v11749_v53  ;;  %v11774_v53 = vunpack.i.h.bf16 %v17037_v56  ;;  %v7111_v4 = vld [vmem:[#allocation2 + $0x1e8] sm:$0xff] }
 0x5f4   : > { %12091 = vrot.lane.b32.xlu1 %v12090_v41, %s12283_s13  ;;  %v7983_v60 = vsel %vm2053_vm2, %v7951_v19, %v11794_v20  ;;  %v11773_v41 = vunpack.i.l.bf16 %v17037_v56 }
 0x5f5   : > { %v17066_v25 = vpop.permute.xlu0 %11816 }
 0x5f6   : > { %v11807_v24 = vpop.permute.xlu1 %11806  ;;  %v11818_v40 = vunpack.i.l.bf16 %v17066_v25  ;;  %v11819_v38 = vunpack.i.h.bf16 %v17066_v25  ;;  %v11769_v25 = vunpack.i.h.bf16 %v17025_v26  ;;  %v7953_v23 = vsel %vm2020_vm1, %v7921_v11, %v11773_v41  ;;  %v17121_v26 = vld [vmem:[#allocation2 + $0x1e7] sm:$0xff] }
 0x5f7   : > { %v11808_v31 = vunpack.i.l.bf16 %v11807_v24  ;;  %12106 = vrot.lane.b32.xlu0 %v12105_v34, %s12283_s13  ;;  %v11809_v14 = vunpack.i.h.bf16 %v11807_v24  ;;  %v7952_v34 = vsel %vm2020_vm1, %v7920_v46, %v11754_v12  ;;  %v6994_v12 = vld [vmem:[#allocation2 + $0x70] sm:$0xff] }
 0x5f8   : > { %12096 = vrot.lane.b32.xlu1 %v12095_v49, %s12284_s0  ;;  %v8017_v0 = vsel %vm385_vm0, %v6993_v50, %v11818_v40  ;;  %v8018_v56 = vsel %vm385_vm0, %v6994_v12, %v11819_v38  ;;  %v17137_v40 = vld [vmem:[#allocation2 + $0x1ef] sm:$0xff]  ;;  %v11803_v38 = vunpack.i.l.bf16 %v17059_v28 }
 0x5f9   : > { %v17076_v17 = vpop.permute.xlu0 %11821  ;;  %v8047_v29 = vsel %vm2020_vm1, %v8015_v6, %v11808_v31  ;;  %v8048_v37 = vsel %vm2020_vm1, %v8016_v32, %v11809_v14  ;;  %v12130_v6 = vpack.i.bf16 %v17062_v61, %v6922_v42  ;;  %v12140_v42 = vpack.i.bf16 %v16947_v30, %v17121_v26  ;;  %v6924_v46 = vld [vmem:[#allocation2 + $0x1f0] sm:$0xff] }
 0x5fa   : > { %v11812_v27 = vpop.permute.xlu1 %11811  ;;  %v8079_v7 = vsel %vm2053_vm2, %v8047_v29, %v11793_v58  ;;  %v11824_v15 = vunpack.i.h.bf16 %v17076_v17  ;;  %v11823_v20 = vunpack.i.l.bf16 %v17076_v17  ;;  %v12155_v57 = vpack.i.bf16 %v16949_v39, %v17137_v40 }
 0x5fb   : > { %v11814_v10 = vunpack.i.h.bf16 %v11812_v27  ;;  %v11813_v45 = vunpack.i.l.bf16 %v11812_v27  ;;  %8322 = vmatprep.mubr.f32.mxu0 %v8079_v7  ;;  %12116 = vrot.lane.b32.xlu0 %v12115_v13, %s12285_s25  ;;  %v12125_v13 = vpack.i.bf16 %v16929_v47, %v17105_v33  ;;  %v6866_v47 = vld [vmem:[#allocation2 + $0x4f] sm:$0xff]  ;;  %v12160_v12 = vpack.i.bf16 %v17105_v33, %v6924_v46 }
 0x5fc   : > { %12101 = vrot.lane.b32.xlu1 %v12100_v54, %s12285_s25  ;;  %8323 = vmatmul.mubr.f32.gmra.mrb[156].mxu0 %v7983_v60  ;;  %v7985_v61 = vsel %vm2053_vm2, %v7953_v23, %v11824_v15  ;;  %v12135_v60 = vpack.i.bf16 %v16970_v8, %v16968_v52  ;;  %v12150_v15 = vpack.i.bf16 %v6924_v46, %v7111_v4 }
 0x5fd   : > { %v17093_v21 = vpop.permute.xlu0 %11826  ;;  %v8080_v43 = vsel %vm2053_vm2, %v8048_v37, %v11813_v45  ;;  %v7984_v49 = vsel %vm2053_vm2, %v7952_v34, %v11814_v10  ;;  %v7922_v10 = vsel %vm385_vm0, %v6866_v47, %v11769_v25  ;;  %v12165_v34 = vpack.i.bf16 %v16994_v62, %v16992_v55  ;;  %v6867_v25 = vld [vmem:[#allocation2 + $0x67] sm:$0xff] }
 0x5fe   : > { %v11837_v44 = vpop.permute.xlu1 %11836  ;;  %8327 = vmatprep.mubr.f32.mxu0 %v8080_v43  ;;  %v7954_v32 = vsel %vm2020_vm1, %v7922_v10, %v11774_v53  ;;  %v17171_v47 = vld [vmem:[#allocation2 + $0x207] sm:$0xff] }
 0x5ff   : > { %v11838_v24 = vunpack.i.l.bf16 %v11837_v44  ;;  %12121 = vrot.lane.b32.xlu0 %v12120_v59, %s12283_s13  ;;  %v11839_v31 = vunpack.i.h.bf16 %v11837_v44  ;;  %v12145_v59 = vpack.i.bf16 %v17087_v2, %v7111_v4  ;;  %v11798_v44 = vunpack.i.l.bf16 %v17052_v18 }
 0x600   : > { %12111 = vrot.lane.b32.xlu1 %v12110_v22, %s12284_s0  ;;  %8328 = vmatmul.mubr.f32.gmra.mrb[158].mxu0 %v7984_v49 }
 0x601   : > { %v17111_v58 = vpop.permute.xlu0 %11831  ;;  %v8049_v14 = vsel %vm2020_vm1, %v8017_v0, %v11838_v24  ;;  %v8050_v54 = vsel %vm2020_vm1, %v8018_v56, %v11839_v31  ;;  %v7113_v24 = vld [vmem:[#allocation2 + $0x208] sm:$0xff] }
 0x602   : > { %v11842_v17 = vpop.permute.xlu1 %11841  ;;  %v8081_v29 = vsel %vm2053_vm2, %v8049_v14, %v11823_v20  ;;  %v6995_v20 = vld [vmem:[#allocation2 + $0x88] sm:$0xff]  ;;  %v11799_v14 = vunpack.i.h.bf16 %v17052_v18  ;;  %v12175_v53 = vpack.i.bf16 %v17121_v26, %v7113_v24 }
 0x603   : > { %v11844_v27 = vunpack.i.h.bf16 %v11842_v17  ;;  %v11843_v7 = vunpack.i.l.bf16 %v11842_v17  ;;  %8332 = vmatprep.mubr.f32.mxu0 %v8081_v29  ;;  %12131 = vrot.lane.b32.xlu0 %v12130_v6, %s12285_s25  ;;  %v7923_v17 = vsel %vm385_vm0, %v6867_v25, %v11798_v44  ;;  %v11804_v29 = vunpack.i.h.bf16 %v17059_v28  ;;  %v6869_v24 = vld [vmem:[#allocation2 + $0x87] sm:$0xff] }
 0x604   : > { %12126 = vrot.lane.b32.xlu1 %v12125_v13, %s12284_s0  ;;  %8333 = vmatmul.mubr.f32.gmra.mrb[160].mxu0 %v7985_v61  ;;  %v7114_v61 = vld [vmem:[#allocation2 + $0x210] sm:$0xff] }
 0x605   : > { %v11847_v19 = vpop.permute.xlu0 %11846  ;;  %v8082_v63 = vsel %vm2053_vm2, %v8050_v54, %v11843_v7  ;;  %v7986_v37 = vsel %vm2053_vm2, %v7954_v32, %v11844_v27  ;;  %v7955_v27 = vsel %vm2020_vm1, %v7923_v17, %v11803_v38  ;;  %v6996_v7 = vld [vmem:[#allocation2 + $0x90] sm:$0xff] }
 0x606   : > { %v17132_v45 = vpop.permute.xlu1 %11856  ;;  %8337 = vmatprep.mubr.f32.mxu0 %v8082_v63  ;;  %v11848_v41 = vunpack.i.l.bf16 %v11847_v19  ;;  %v11849_v49 = vunpack.i.h.bf16 %v11847_v19  ;;  %v6868_v19 = vld [vmem:[#allocation2 + $0x6f] sm:$0xff]  ;;  %v11828_v63 = vunpack.i.l.bf16 %v17093_v21 }
 0x607   : > { %12141 = vrot.lane.b32.xlu0 %v12140_v42, %s12284_s0  ;;  %v7924_v32 = vsel %vm385_vm0, %v6868_v19, %v11799_v14  ;;  %v17190_v38 = vld [vmem:[#allocation2 + $0x20f] sm:$0xff] }
 0x608   : > { %12136 = vrot.lane.b32.xlu1 %v12135_v60, %s12283_s13  ;;  %8338 = vmatmul.mubr.f32.gmra.mrb[162].mxu0 %v7986_v37  ;;  %v8019_v48 = vsel %vm385_vm0, %v6995_v20, %v11848_v41  ;;  %v8020_v54 = vsel %vm385_vm0, %v6996_v7, %v11849_v49  ;;  %v12185_v60 = vpack.i.bf16 %v17137_v40, %v7114_v61  ;;  %v11833_v37 = vunpack.i.l.bf16 %v17111_v58 }
 0x609   : > { %v11852_v30 = vpop.permute.xlu0 %11851  ;;  %v7925_v20 = vsel %vm385_vm0, %v6869_v24, %v11828_v63  ;;  %v12180_v25 = vpack.i.bf16 %v16970_v8, %v17190_v38  ;;  %v11859_v24 = vunpack.i.h.bf16 %v17132_v45 }
 0x60a   : > { %v17144_v43 = vpop.permute.xlu1 %11861  ;;  %v11854_v2 = vunpack.i.h.bf16 %v11852_v30  ;;  %v11853_v31 = vunpack.i.l.bf16 %v11852_v30  ;;  %v12170_v30 = vpack.i.bf16 %v16968_v52, %v17171_v47  ;;  %v7957_v14 = vsel %vm2020_vm1, %v7925_v20, %v11833_v37 }
 0x60b   : > { %12156 = vrot.lane.b32.xlu0 %v12155_v57, %s12284_s0  ;;  %v7956_v57 = vsel %vm2020_vm1, %v7924_v32, %v11804_v29  ;;  %v7148_v29 = vld [vmem:[#allocation2 + $0x231] sm:$0xff]  ;;  %v11858_v32 = vunpack.i.l.bf16 %v17132_v45 }
 0x60c   : > { %12146 = vrot.lane.b32.xlu1 %v12145_v59, %s12285_s25  ;;  %v7987_v26 = vsel %vm2053_vm2, %v7955_v27, %v11854_v2  ;;  %v7083_v59 = vld [vmem:[#allocation2 + $0x227] sm:$0xff] }
 0x60d   : > { %v17150_v22 = vpop.permute.xlu0 %11876 }
 0x60e   : > { %v11867_v39 = vpop.permute.xlu1 %11866  ;;  %v11878_v28 = vunpack.i.l.bf16 %v17150_v22  ;;  %v11879_v46 = vunpack.i.h.bf16 %v17150_v22  ;;  %v11829_v22 = vunpack.i.h.bf16 %v17093_v21  ;;  %v7084_v21 = vld [vmem:[#allocation2 + $0x22f] sm:$0xff] }
 0x60f   : > { %v11868_v50 = vunpack.i.l.bf16 %v11867_v39  ;;  %12166 = vrot.lane.b32.xlu0 %v12165_v34, %s12283_s13  ;;  %v11869_v0 = vunpack.i.h.bf16 %v11867_v39  ;;  %v6997_v34 = vld [vmem:[#allocation2 + $0xa8] sm:$0xff]  ;;  %v12205_v27 = vpack.i.bf16 %v16994_v62, %v7084_v21  ;;  %v18823_v62 = vld [vmem:[#allocation121_spill] sm:$0xff] }
 0x610   : > { %12151 = vrot.lane.b32.xlu1 %v12150_v15, %s12283_s13  ;;  %v8021_v52 = vsel %vm385_vm0, %v6997_v34, %v11878_v28  ;;  %v2771_v28 = vmax.f32 %v18823_v62, 0.0 }
 0x611   : > { %v17159_v6 = vpop.permute.xlu0 %11881  ;;  %v8051_v11 = vsel %vm2020_vm1, %v8019_v48, %v11868_v50  ;;  %v8052_v33 = vsel %vm2020_vm1, %v8020_v54, %v11869_v0  ;;  %v12190_v50 = vpack.i.bf16 %v16992_v55, %v7083_v59  ;;  %v7115_v54 = vld [vmem:[#allocation2 + $0x228] sm:$0xff] }
 0x612   : > { %v11872_v13 = vpop.permute.xlu1 %11871  ;;  %v8083_v23 = vsel %vm2053_vm2, %v8051_v11, %v11853_v31  ;;  %v11884_v41 = vunpack.i.h.bf16 %v17159_v6  ;;  %v11883_v39 = vunpack.i.l.bf16 %v17159_v6  ;;  %v11834_v31 = vunpack.i.h.bf16 %v17111_v58  ;;  %v6998_v6 = vld [vmem:[#allocation2 + $0xb0] sm:$0xff] }
 0x613   : > { %v11874_v18 = vunpack.i.h.bf16 %v11872_v13  ;;  %v11873_v56 = vunpack.i.l.bf16 %v11872_v13  ;;  %8342 = vmatprep.mubr.f32.mxu0 %v8083_v23  ;;  %12176 = vrot.lane.b32.xlu0 %v12175_v53, %s12285_s25  ;;  %v8022_v17 = vsel %vm385_vm0, %v6998_v6, %v11879_v46  ;;  %v7147_v58 = vld [vmem:[#allocation2 + $0x229] sm:$0xff]  ;;  %v12200_v63 = vpack.i.bf16 %v17171_v47, %v7115_v54 }
 0x614   : > { %12161 = vrot.lane.b32.xlu1 %v12160_v12, %s12285_s25  ;;  %8343 = vmatmul.mubr.f32.gmra.mrb[164].mxu0 %v7987_v26  ;;  %v7989_v55 = vsel %vm2053_vm2, %v7957_v14, %v11884_v41  ;;  %v6870_v13 = vld [vmem:[#allocation2 + $0x8f] sm:$0xff] }
 0x615   : > { %v17177_v42 = vpop.permute.xlu0 %11886  ;;  %v8084_v10 = vsel %vm2053_vm2, %v8052_v33, %v11873_v56  ;;  %v7988_v40 = vsel %vm2053_vm2, %v7956_v57, %v11874_v18  ;;  %v7926_v7 = vsel %vm385_vm0, %v6870_v13, %v11829_v22  ;;  %9958 = vmatprep.mubr.msk.f32.mxu1 %vm385_vm0, %v7147_v58  ;;  %v12195_v18 = vpack.i.bf16 %v17013_v35, %v17011_v9  ;;  %v7116_v9 = vld [vmem:[#allocation2 + $0x230] sm:$0xff]  ;;  %v6999_v41 = vld [vmem:[#allocation2 + $0xc8] sm:$0xff] }
 0x616   : > { %v11897_v4 = vpop.permute.xlu1 %11896  ;;  %8347 = vmatprep.mubr.f32.mxu0 %v8084_v10  ;;  %v7958_v56 = vsel %vm2020_vm1, %v7926_v7, %v11834_v31  ;;  %9959 = vmatmul.mubr.msk.f32.gmra.mrb[198].mxu1 %vm385_vm0, %v7148_v29  ;;  %v18824_v10 = vld [vmem:[#allocation123_spill] sm:$0xff]  ;;  %v12210_v57 = vpack.i.bf16 %v17190_v38, %v7116_v9  ;;  %v11864_v31 = vunpack.i.h.bf16 %v17144_v43  ;;  %v7000_v14 = vld [vmem:[#allocation2 + $0xd0] sm:$0xff]  ;;  %v11888_v29 = vunpack.i.l.bf16 %v17177_v42 }
 0x617   : > { %v11898_v44 = vunpack.i.l.bf16 %v11897_v4  ;;  %12186 = vrot.lane.b32.xlu0 %v12185_v60, %s12285_s25  ;;  %v11899_v15 = vunpack.i.h.bf16 %v11897_v4  ;;  %v2773_v60 = vmax.f32 %v18824_v10, 0.0  ;;  %v11863_v4 = vunpack.i.l.bf16 %v17144_v43  ;;  %v6873_v10 = vld [vmem:[#allocation2 + $0xc7] sm:$0xff] }
 0x618   : > { %12171 = vrot.lane.b32.xlu1 %v12170_v30, %s12284_s0  ;;  %8348 = vmatmul.mubr.f32.gmra.mrb[166].mxu0 %v7988_v40 }
 0x619   : > { %v17196_v49 = vpop.permute.xlu0 %11891  ;;  %v8053_v2 = vsel %vm2020_vm1, %v8021_v52, %v11898_v44  ;;  %v8054_v8 = vsel %vm2020_vm1, %v8022_v17, %v11899_v15  ;;  %v18825_v15 = vld [vmem:[#allocation83_spill] sm:$0xff]  ;;  %v18827_v17 = vld [vmem:[#allocation82_spill] sm:$0xff] }
 0x61a   : > { %v11902_v0 = vpop.permute.xlu1 %11901  ;;  %v8085_v48 = vsel %vm2053_vm2, %v8053_v2, %v11883_v39  ;;  %v6871_v39 = vld [vmem:[#allocation2 + $0xa7] sm:$0xff]  ;;  %v2775_v52 = vmax.f32 %v18825_v15, 0.0  ;;  %v2777_v58 = vmax.f32 %v18827_v17, 0.0  ;;  %v11893_v7 = vunpack.i.l.bf16 %v17196_v49  ;;  %v18835_v17 = vld [vmem:[#allocation69_spill] sm:$0xff] }
 0x61b   : > { %v11904_v11 = vunpack.i.h.bf16 %v11902_v0  ;;  %v11903_v53 = vunpack.i.l.bf16 %v11902_v0  ;;  %8352 = vmatprep.mubr.f32.mxu0 %v8085_v48  ;;  %12191 = vrot.lane.b32.xlu0 %v12190_v50, %s12284_s0  ;;  %v7927_v2 = vsel %vm385_vm0, %v6871_v39, %v11858_v32  ;;  %v18826_v50 = vld [vmem:[#allocation122_spill] sm:$0xff] }
 0x61c   : > { %12181 = vrot.lane.b32.xlu1 %v12180_v25, %s12284_s0  ;;  %8353 = vmatmul.mubr.f32.gmra.mrb[168].mxu0 %v7989_v55  ;;  %v2772_v20 = vmax.f32 %v18826_v50, 0.0  ;;  %v7959_v25 = vsel %vm2020_vm1, %v7927_v2, %v11863_v4  ;;  %v6872_v55 = vld [vmem:[#allocation2 + $0xaf] sm:$0xff]  ;;  %v11889_v4 = vunpack.i.h.bf16 %v17177_v42 }
 0x61d   : > { %v11907_v23 = vpop.permute.xlu0 %11906  ;;  %v8086_v12 = vsel %vm2053_vm2, %v8054_v8, %v11903_v53  ;;  %v7990_v26 = vsel %vm2053_vm2, %v7958_v56, %v11904_v11 }
 0x61e   : > { %v17215_v61 = vpop.permute.xlu1 %11916  ;;  %8357 = vmatprep.mubr.f32.mxu0 %v8086_v12  ;;  %v11908_v35 = vunpack.i.l.bf16 %v11907_v23  ;;  %v11909_v59 = vunpack.i.h.bf16 %v11907_v23  ;;  %v7928_v23 = vsel %vm385_vm0, %v6872_v55, %v11859_v24  ;;  %v18828_v12 = vld [vmem:[#allocation125_spill] sm:$0xff]  ;;  %v6874_v24 = vld [vmem:[#allocation2 + $0xcf] sm:$0xff] }
 0x61f   : > { %12206 = vrot.lane.b32.xlu0 %v12205_v27, %s12284_s0  ;;  %v2774_v27 = vmax.f32 %v18828_v12, 0.0  ;;  %v7960_v56 = vsel %vm2020_vm1, %v7928_v23, %v11864_v31  ;;  %v18832_v31 = vld [vmem:[#allocation87_spill] sm:$0xff] }
 0x620   : > { %12196 = vrot.lane.b32.xlu1 %v12195_v18, %s12283_s13  ;;  %8358 = vmatmul.mubr.f32.gmra.mrb[170].mxu0 %v7990_v26  ;;  %v8023_v34 = vsel %vm385_vm0, %v6999_v41, %v11908_v35  ;;  %v8024_v11 = vsel %vm385_vm0, %v7000_v14, %v11909_v59  ;;  %v18830_v59 = vld [vmem:[#allocation79_spill] sm:$0xff] }
 0x621   : > { %v11912_v33 = vpop.permute.xlu0 %11911  ;;  %v18836_v23 = vld [vmem:[#allocation99_spill] sm:$0xff] }
 0x622   : > { %v17225_v19 = vpop.permute.xlu1 %11921  ;;  %v11914_v46 = vunpack.i.h.bf16 %v11912_v33  ;;  %v11913_v44 = vunpack.i.l.bf16 %v11912_v33  ;;  %v7001_v33 = vld [vmem:[#allocation2 + $0xe8] sm:$0xff]  ;;  %v2782_v12 = vmax.f32 %v18836_v23, 0.0 }
 0x623   : > { %8762 = vrot.lane.b32.xlu0 %v2771_v28, %s12283_s13  ;;  %v6877_v23 = vld [vmem:[#allocation2 + $0x107] sm:$0xff] }
 0x624   : > { %12201 = vrot.lane.b32.xlu1 %v12200_v63, %s12285_s25  ;;  %v7991_v45 = vsel %vm2053_vm2, %v7959_v25, %v11914_v46  ;;  %v2776_v46 = vmax.f32 %v18830_v59, 0.0  ;;  %v11924_v59 = vunpack.i.h.bf16 %v17225_v19 }
 0x625   : > { %v17232_v37 = vpop.permute.xlu0 %11936 }
 0x626   : > { %v11927_v30 = vpop.permute.xlu1 %11926  ;;  %v11938_v53 = vunpack.i.l.bf16 %v17232_v37  ;;  %v11939_v26 = vunpack.i.h.bf16 %v17232_v37 }
 0x627   : > { %v11928_v47 = vunpack.i.l.bf16 %v11927_v30  ;;  %8766 = vrot.lane.b32.xlu0 %v2773_v60, %s12283_s13  ;;  %v11929_v40 = vunpack.i.h.bf16 %v11927_v30  ;;  %v18829_v60 = vld [vmem:[#allocation34_spill] sm:$0xff] }
 0x628   : > { %12211 = vrot.lane.b32.xlu1 %v12210_v57, %s12285_s25  ;;  %v8025_v35 = vsel %vm385_vm0, %v7001_v33, %v11938_v53  ;;  %v2779_v32 = vmax.f32 %v18829_v60, 0.0  ;;  %v7929_v57 = vsel %vm385_vm0, %v6873_v10, %v11888_v29  ;;  %v11918_v29 = vunpack.i.l.bf16 %v17215_v61 }
 0x629   : > { %v11942_v22 = vpop.permute.xlu0 %11941  ;;  %v8055_v38 = vsel %vm2020_vm1, %v8023_v34, %v11928_v47  ;;  %v8056_v43 = vsel %vm2020_vm1, %v8024_v11, %v11929_v40  ;;  %v11894_v47 = vunpack.i.h.bf16 %v17196_v49  ;;  %v7961_v40 = vsel %vm2020_vm1, %v7929_v57, %v11893_v7  ;;  %v7002_v34 = vld [vmem:[#allocation2 + $0xf0] sm:$0xff]  ;;  %v18834_v11 = vld [vmem:[#allocation105_spill] sm:$0xff] }
 0x62a   : > { %v11932_v0 = vpop.permute.xlu1 %11931  ;;  %v8087_v48 = vsel %vm2053_vm2, %v8055_v38, %v11913_v44  ;;  %v11944_v54 = vunpack.i.h.bf16 %v11942_v22  ;;  %v11943_v63 = vunpack.i.l.bf16 %v11942_v22  ;;  %v18831_v22 = vld [vmem:[#allocation37_spill] sm:$0xff]  ;;  %v2780_v53 = vmax.f32 %v18834_v11, 0.0 }
 0x62b   : > { %v11934_v6 = vunpack.i.h.bf16 %v11932_v0  ;;  %v11933_v21 = vunpack.i.l.bf16 %v11932_v0  ;;  %8362 = vmatprep.mubr.f32.mxu0 %v8087_v48  ;;  %8770 = vrot.lane.b32.xlu0 %v2775_v52, %s12283_s13  ;;  %v8026_v52 = vsel %vm385_vm0, %v7002_v34, %v11939_v26  ;;  %v2781_v38 = vmax.f32 %v18831_v22, 0.0 }
 0x62c   : > { %8363 = vmatmul.mubr.f32.gmra.mrb[172].mxu0 %v7991_v45  ;;  %8764 = vrot.lane.b32.xlu1 %v2772_v20, %s12283_s13  ;;  %v7993_v42 = vsel %vm2053_vm2, %v7961_v40, %v11944_v54  ;;  %v7930_v20 = vsel %vm385_vm0, %v6874_v24, %v11889_v4  ;;  %v2778_v0 = vmax.f32 %v18832_v31, 0.0  ;;  %v7003_v54 = vld [vmem:[#allocation2 + $0x108] sm:$0xff]  ;;  %v11919_v10 = vunpack.i.h.bf16 %v17215_v61 }
 0x62d   : > { %v17255_v8 = vpop.permute.xlu0 %11946  ;;  %v8088_v13 = vsel %vm2053_vm2, %v8056_v43, %v11933_v21  ;;  %v7992_v28 = vsel %vm2053_vm2, %v7960_v56, %v11934_v6  ;;  %v7962_v25 = vsel %vm2020_vm1, %v7930_v20, %v11894_v47  ;;  %v18833_v6 = vld [vmem:[#allocation113_spill] sm:$0xff]  ;;  %v18840_v20 = vld [vmem:[#allocation42_spill] sm:$0xff] }
 0x62e   : > { %v11957_v18 = vpop.permute.xlu1 %11956  ;;  %8367 = vmatprep.mubr.f32.mxu0 %v8088_v13  ;;  %v2783_v21 = vmax.f32 %v18833_v6, 0.0  ;;  %v11948_v24 = vunpack.i.l.bf16 %v17255_v8  ;;  %v2786_v31 = vmax.f32 %v18840_v20, 0.0 }
 0x62f   : > { %v11958_v62 = vunpack.i.l.bf16 %v11957_v18  ;;  %8774 = vrot.lane.b32.xlu0 %v2777_v58, %s12283_s13  ;;  %v11959_v9 = vunpack.i.h.bf16 %v11957_v18  ;;  %v2785_v58 = vmax.f32 %v18835_v17, 0.0 }
 0x630   : > { %8368 = vmatmul.mubr.f32.gmra.mrb[174].mxu0 %v7992_v28  ;;  %8768 = vrot.lane.b32.xlu1 %v2774_v27, %s12283_s13  ;;  %v11923_v27 = vunpack.i.l.bf16 %v17225_v19 }
 0x631   : > { %v17269_v37 = vpop.permute.xlu0 %11951  ;;  %v8057_v30 = vsel %vm2020_vm1, %v8025_v35, %v11958_v62  ;;  %v8058_v49 = vsel %vm2020_vm1, %v8026_v52, %v11959_v9  ;;  %v18837_v9 = vld [vmem:[#allocation46_spill] sm:$0xff]  ;;  %v18839_v52 = vld [vmem:[#allocation75_spill] sm:$0xff] }
 0x632   : > { %v11962_v41 = vpop.permute.xlu1 %11961  ;;  %v8089_v44 = vsel %vm2053_vm2, %v8057_v30, %v11943_v63  ;;  %v6875_v63 = vld [vmem:[#allocation2 + $0xe7] sm:$0xff]  ;;  %v2787_v35 = vmax.f32 %v18837_v9, 0.0  ;;  %v7006_v9 = vld [vmem:[#allocation2 + $0x130] sm:$0xff] }
 0x633   : > { %v11964_v39 = vunpack.i.h.bf16 %v11962_v41  ;;  %v11963_v15 = vunpack.i.l.bf16 %v11962_v41  ;;  %8372 = vmatprep.mubr.f32.mxu0 %v8089_v44  ;;  %8778 = vrot.lane.b32.xlu0 %v2779_v32, %s12283_s13  ;;  %v7931_v4 = vsel %vm385_vm0, %v6875_v63, %v11918_v29  ;;  %v18838_v30 = vld [vmem:[#allocation114_spill] sm:$0xff]  ;;  %v7004_v44 = vld [vmem:[#allocation2 + $0x110] sm:$0xff] }
 0x634   : > { %8373 = vmatmul.mubr.f32.gmra.mrb[176].mxu0 %v7993_v42  ;;  %8772 = vrot.lane.b32.xlu1 %v2776_v46, %s12283_s13  ;;  %v2784_v57 = vmax.f32 %v18838_v30, 0.0  ;;  %v7963_v41 = vsel %vm2020_vm1, %v7931_v4, %v11923_v27  ;;  %v6876_v42 = vld [vmem:[#allocation2 + $0xef] sm:$0xff]  ;;  %v18843_v4 = vld [vmem:[#allocation78_spill] sm:$0xff] }
 0x635   : > { %v11967_v2 = vpop.permute.xlu0 %11966  ;;  %v8090_v50 = vsel %vm2053_vm2, %v8058_v49, %v11963_v15  ;;  %v7994_v14 = vsel %vm2053_vm2, %v7962_v25, %v11964_v39  ;;  %v2789_v49 = vmax.f32 %v18839_v52, 0.0  ;;  %v2793_v30 = vmax.f32 %v18843_v4, 0.0  ;;  %v18846_v52 = vld [vmem:[#allocation77_spill] sm:$0xff] }
 0x636   : > { %v17286_v48 = vpop.permute.xlu1 %11976  ;;  %8377 = vmatprep.mubr.f32.mxu0 %v8090_v50  ;;  %v11968_v55 = vunpack.i.l.bf16 %v11967_v2  ;;  %v11969_v18 = vunpack.i.h.bf16 %v11967_v2  ;;  %v7932_v50 = vsel %vm385_vm0, %v6876_v42, %v11919_v10 }
 0x637   : > { %8782 = vrot.lane.b32.xlu0 %v2781_v38, %s12283_s13  ;;  %v7964_v6 = vsel %vm2020_vm1, %v7932_v50, %v11924_v59  ;;  %v18847_v50 = vld [vmem:[#allocation84_spill] sm:$0xff] }
 0x638   : > { %8378 = vmatmul.mubr.f32.gmra.mrb[178].mxu0 %v7994_v14  ;;  %8776 = vrot.lane.b32.xlu1 %v2778_v0, %s12283_s13  ;;  %v8027_v33 = vsel %vm385_vm0, %v7003_v54, %v11968_v55  ;;  %v8028_v39 = vsel %vm385_vm0, %v7004_v44, %v11969_v18  ;;  %v11953_v0 = vunpack.i.l.bf16 %v17269_v37  ;;  %v7005_v55 = vld [vmem:[#allocation2 + $0x128] sm:$0xff]  ;;  %v2797_v20 = vmax.f32 %v18847_v50, 0.0 }
 0x639   : > { %v11972_v45 = vpop.permute.xlu0 %11971 }
 0x63a   : > { %v17294_v43 = vpop.permute.xlu1 %11981  ;;  %v11974_v56 = vunpack.i.h.bf16 %v11972_v45  ;;  %v11973_v62 = vunpack.i.l.bf16 %v11972_v45 }
 0x63b   : > { %8786 = vrot.lane.b32.xlu0 %v2783_v21, %s12283_s13 }
 0x63c   : > { %8780 = vrot.lane.b32.xlu1 %v2780_v53, %s12283_s13  ;;  %v7995_v61 = vsel %vm2053_vm2, %v7963_v41, %v11974_v56  ;;  %v7933_v56 = vsel %vm385_vm0, %v6877_v23, %v11948_v24  ;;  %v18844_v41 = vld [vmem:[#allocation89_spill] sm:$0xff] }
 0x63d   : > { %v17300_v13 = vpop.permute.xlu0 %11996  ;;  %v7965_v63 = vsel %vm2020_vm1, %v7933_v56, %v11953_v0  ;;  %v2790_v44 = vmax.f32 %v18844_v41, 0.0 }
 0x63e   : > { %v11987_v7 = vpop.permute.xlu1 %11986  ;;  %v11998_v15 = vunpack.i.l.bf16 %v17300_v13  ;;  %v11999_v21 = vunpack.i.h.bf16 %v17300_v13 }
 0x63f   : > { %v11988_v26 = vunpack.i.l.bf16 %v11987_v7  ;;  %8790 = vrot.lane.b32.xlu0 %v2785_v58, %s12283_s13  ;;  %v11989_v28 = vunpack.i.h.bf16 %v11987_v7  ;;  %v11949_v7 = vunpack.i.h.bf16 %v17255_v8 }
 0x640   : > { %8784 = vrot.lane.b32.xlu1 %v2782_v12, %s12283_s13  ;;  %v8029_v29 = vsel %vm385_vm0, %v7005_v55, %v11998_v15  ;;  %v18841_v12 = vld [vmem:[#allocation76_spill] sm:$0xff]  ;;  %v18845_v15 = vld [vmem:[#allocation45_spill] sm:$0xff] }
 0x641   : > { %v12002_v60 = vpop.permute.xlu0 %12001  ;;  %v8059_v32 = vsel %vm2020_vm1, %v8027_v33, %v11988_v26  ;;  %v8060_v19 = vsel %vm2020_vm1, %v8028_v39, %v11989_v28  ;;  %v2791_v27 = vmax.f32 %v18841_v12, 0.0  ;;  %v18842_v26 = vld [vmem:[#allocation43_spill] sm:$0xff] }
 0x642   : > { %v11992_v46 = vpop.permute.xlu1 %11991  ;;  %v8091_v47 = vsel %vm2053_vm2, %v8059_v32, %v11973_v62  ;;  %v12004_v45 = vunpack.i.h.bf16 %v12002_v60  ;;  %v12003_v17 = vunpack.i.l.bf16 %v12002_v60  ;;  %v2788_v54 = vmax.f32 %v18842_v26, 0.0  ;;  %v6878_v32 = vld [vmem:[#allocation2 + $0x10f] sm:$0xff] }
 0x643   : > { %v11994_v40 = vunpack.i.h.bf16 %v11992_v46  ;;  %v11993_v34 = vunpack.i.l.bf16 %v11992_v46  ;;  %8382 = vmatprep.mubr.f32.mxu0 %v8091_v47  ;;  %8794 = vrot.lane.b32.xlu0 %v2787_v35, %s12283_s13  ;;  %v11954_v62 = vunpack.i.h.bf16 %v17269_v37  ;;  %v8030_v60 = vsel %vm385_vm0, %v7006_v9, %v11999_v21 }
 0x644   : > { %8383 = vmatmul.mubr.f32.gmra.mrb[180].mxu0 %v7995_v61  ;;  %8788 = vrot.lane.b32.xlu1 %v2784_v57, %s12283_s13  ;;  %v17323_v22 = vpop.f32.mrb[168].mxu1  ;;  %v7997_v8 = vsel %vm2053_vm2, %v7965_v63, %v12004_v45  ;;  %v7934_v47 = vsel %vm385_vm0, %v6878_v32, %v11949_v7  ;;  %v11983_v45 = vunpack.i.l.bf16 %v17294_v43  ;;  %v6879_v7 = vld [vmem:[#allocation2 + $0x127] sm:$0xff]  ;;  %v11979_v26 = vunpack.i.h.bf16 %v17286_v48 }
 0x645   : > { %v17325_v38 = vpop.permute.xlu0 %12006  ;;  %v8092_v2 = vsel %vm2053_vm2, %v8060_v19, %v11993_v34  ;;  %v17331_v14 = vpop.f32.mrb[169].mxu1  ;;  %v7996_v53 = vsel %vm2053_vm2, %v7964_v6, %v11994_v40  ;;  %v7966_v61 = vsel %vm2020_vm1, %v7934_v47, %v11954_v62  ;;  %v2795_v19 = vmax.f32 %v18845_v15, 0.0  ;;  %v18848_v6 = vld [vmem:[#allocation49_spill] sm:$0xff] }
 0x646   : > { %v12017_v25 = vpop.permute.xlu1 %12016  ;;  %8387 = vmatprep.mubr.f32.mxu0 %v8092_v2  ;;  %v2794_v21 = vmax.f32 %v18848_v6, 0.0  ;;  %v11984_v9 = vunpack.i.h.bf16 %v17294_v43  ;;  %v12008_v41 = vunpack.i.l.bf16 %v17325_v38 }
 0x647   : > { %v12018_v11 = vunpack.i.l.bf16 %v12017_v25  ;;  %8798 = vrot.lane.b32.xlu0 %v2789_v49, %s12283_s13  ;;  %v12019_v58 = vunpack.i.h.bf16 %v12017_v25  ;;  %v2792_v49 = vmax.f32 %v18846_v52, 0.0 }
 0x648   : > { %8388 = vmatmul.mubr.f32.gmra.mrb[182].mxu0 %v7996_v53  ;;  %8792 = vrot.lane.b32.xlu1 %v2786_v31, %s12283_s13  ;;  %v11978_v31 = vunpack.i.l.bf16 %v17286_v48 }
 0x649   : > { %v17341_v13 = vpop.permute.xlu0 %12011  ;;  %v8061_v18 = vsel %vm2020_vm1, %v8029_v29, %v12018_v11  ;;  %v8062_v37 = vsel %vm2020_vm1, %v8030_v60, %v12019_v58  ;;  %v7007_v29 = vld [vmem:[#allocation2 + $0x148] sm:$0xff]  ;;  %v7008_v60 = vld [vmem:[#allocation2 + $0x150] sm:$0xff] }
 0x64a   : > { %v12022_v28 = vpop.permute.xlu1 %12021  ;;  %v8093_v33 = vsel %vm2053_vm2, %v8061_v18, %v12003_v17  ;;  %v18849_v18 = vld [vmem:[#allocation52_spill] sm:$0xff]  ;;  %v12013_v52 = vunpack.i.l.bf16 %v17341_v13 }
 0x64b   : > { %v12024_v35 = vunpack.i.h.bf16 %v12022_v28  ;;  %v12023_v10 = vunpack.i.l.bf16 %v12022_v28  ;;  %8392 = vmatprep.mubr.f32.mxu0 %v8093_v33  ;;  %8802 = vrot.lane.b32.xlu0 %v2791_v27, %s12283_s13  ;;  %v2799_v56 = vmax.f32 %v18849_v18, 0.0  ;;  %v7935_v28 = vsel %vm385_vm0, %v6879_v7, %v11978_v31  ;;  %v18850_v33 = vld [vmem:[#allocation50_spill] sm:$0xff] }
 0x64c   : > { %8393 = vmatmul.mubr.f32.gmra.mrb[184].mxu0 %v7997_v8  ;;  %8796 = vrot.lane.b32.xlu1 %v2788_v54, %s12283_s13  ;;  %v17355_v57 = vpop.f32.mrb[170].mxu1  ;;  %v2796_v63 = vmax.f32 %v18850_v33, 0.0  ;;  %v7967_v8 = vsel %vm2020_vm1, %v7935_v28, %v11983_v45  ;;  %v7009_v45 = vld [vmem:[#allocation2 + $0x168] sm:$0xff]  ;;  %v18854_v18 = vld [vmem:[#allocation102_spill] sm:$0xff]  ;;  %v7010_v33 = vld [vmem:[#allocation2 + $0x170] sm:$0xff] }
 0x64d   : > { %v12027_v59 = vpop.permute.xlu0 %12026  ;;  %v8094_v46 = vsel %vm2053_vm2, %v8062_v37, %v12023_v10  ;;  %v17362_v34 = vpop.f32.mrb[171].mxu1  ;;  %v7998_v39 = vsel %vm2053_vm2, %v7966_v61, %v12024_v35 }
 0x64e   : > { %v17360_v40 = vpop.permute.xlu1 %12036  ;;  %8397 = vmatprep.mubr.f32.mxu0 %v8094_v46  ;;  %v12028_v2 = vunpack.i.l.bf16 %v12027_v59  ;;  %v12029_v55 = vunpack.i.h.bf16 %v12027_v59  ;;  %v6880_v59 = vld [vmem:[#allocation2 + $0x12f] sm:$0xff]  ;;  %v18851_v46 = vld [vmem:[#allocation53_spill] sm:$0xff] }
 0x64f   : > { %8806 = vrot.lane.b32.xlu0 %v2793_v30, %s12283_s13  ;;  %v2801_v47 = vmax.f32 %v18851_v46, 0.0  ;;  %v7936_v15 = vsel %vm385_vm0, %v6880_v59, %v11979_v26  ;;  %v12014_v26 = vunpack.i.h.bf16 %v17341_v13 }
 0x650   : > { %8398 = vmatmul.mubr.f32.gmra.mrb[186].mxu0 %v7998_v39  ;;  %8800 = vrot.lane.b32.xlu1 %v2790_v44, %s12283_s13  ;;  %v8031_v27 = vsel %vm385_vm0, %v7007_v29, %v12028_v2  ;;  %v8032_v4 = vsel %vm385_vm0, %v7008_v60, %v12029_v55  ;;  %v7968_v50 = vsel %vm2020_vm1, %v7936_v15, %v11984_v9  ;;  %v18853_v29 = vld [vmem:[#allocation74_spill] sm:$0xff]  ;;  %v18857_v15 = vld [vmem:[#allocation67_spill] sm:$0xff] }
 0x651   : > { %v12032_v42 = vpop.permute.xlu0 %12031 }
 0x652   : > { %v17370_v24 = vpop.permute.xlu1 %12041  ;;  %v12034_v17 = vunpack.i.h.bf16 %v12032_v42  ;;  %v12033_v23 = vunpack.i.l.bf16 %v12032_v42 }
 0x653   : > { %8810 = vrot.lane.b32.xlu0 %v2795_v19, %s12283_s13  ;;  %v18852_v19 = vld [vmem:[#allocation85_spill] sm:$0xff] }
 0x654   : > { %8804 = vrot.lane.b32.xlu1 %v2792_v49, %s12283_s13  ;;  %v17376_v0 = vpop.f32.mrb[172].mxu1  ;;  %v7999_v48 = vsel %vm2053_vm2, %v7967_v8, %v12034_v17  ;;  %v2798_v42 = vmax.f32 %v18852_v19, 0.0  ;;  %v18855_v8 = vld [vmem:[#allocation108_spill] sm:$0xff]  ;;  %v4804_v19 = vmax.f32 %v18857_v15, 0.0 }
 0x655   : > { %v17378_v25 = vpop.permute.xlu0 %12056  ;;  %v17382_v53 = vpop.f32.mrb[173].mxu1  ;;  %v4802_v60 = vmax.f32 %v18855_v8, 0.0 }
 0x656   : > { %v12047_v11 = vpop.permute.xlu1 %12046  ;;  %v12058_v30 = vunpack.i.l.bf16 %v17378_v25 }
 0x657   : > { %v12048_v58 = vunpack.i.l.bf16 %v12047_v11  ;;  %8814 = vrot.lane.b32.xlu0 %v2797_v20, %s12283_s13  ;;  %v12049_v12 = vunpack.i.h.bf16 %v12047_v11  ;;  %v12059_v20 = vunpack.i.h.bf16 %v17378_v25 }
 0x658   : > { %8808 = vrot.lane.b32.xlu1 %v2794_v21, %s12283_s13  ;;  %v8033_v17 = vsel %vm385_vm0, %v7009_v45, %v12058_v30  ;;  %v18856_v30 = vld [vmem:[#allocation51_spill] sm:$0xff] }
 0x659   : > { %v12062_v54 = vpop.permute.xlu0 %12061  ;;  %v8063_v62 = vsel %vm2020_vm1, %v8031_v27, %v12048_v58  ;;  %v8064_v43 = vsel %vm2020_vm1, %v8032_v4, %v12049_v12  ;;  %v6881_v58 = vld [vmem:[#allocation2 + $0x147] sm:$0xff]  ;;  %v12009_v12 = vunpack.i.h.bf16 %v17325_v38 }
 0x65a   : > { %v12052_v35 = vpop.permute.xlu1 %12051  ;;  %v8095_v10 = vsel %vm2053_vm2, %v8063_v62, %v12033_v23  ;;  %v12064_v31 = vunpack.i.h.bf16 %v12062_v54  ;;  %v12063_v11 = vunpack.i.l.bf16 %v12062_v54  ;;  %v4800_v23 = vmax.f32 %v18853_v29, 0.0 }
 0x65b   : > { %v12054_v37 = vunpack.i.h.bf16 %v12052_v35  ;;  %v12053_v32 = vunpack.i.l.bf16 %v12052_v35  ;;  %8402 = vmatprep.mubr.f32.mxu0 %v8095_v10  ;;  %8818 = vrot.lane.b32.xlu0 %v2799_v56, %s12283_s13  ;;  %v7937_v7 = vsel %vm385_vm0, %v6881_v58, %v12008_v41  ;;  %v2800_v56 = vmax.f32 %v18854_v18, 0.0  ;;  %v6882_v10 = vld [vmem:[#allocation2 + $0x14f] sm:$0xff] }
 0x65c   : > { %8403 = vmatmul.mubr.f32.gmra.mrb[188].mxu0 %v7999_v48  ;;  %8812 = vrot.lane.b32.xlu1 %v2796_v63, %s12283_s13  ;;  %v17403_v44 = vpop.f32.mrb[174].mxu1  ;;  %v7969_v28 = vsel %vm2020_vm1, %v7937_v7, %v12013_v52  ;;  %v8034_v35 = vsel %vm385_vm0, %v7010_v33, %v12059_v20  ;;  %v7938_v4 = vsel %vm385_vm0, %v6882_v10, %v12009_v12  ;;  %v12043_v20 = vunpack.i.l.bf16 %v17370_v24  ;;  %v6883_v12 = vld [vmem:[#allocation2 + $0x167] sm:$0xff] }
 0x65d   : > { %v17405_v61 = vpop.permute.xlu0 %12066  ;;  %v8096_v39 = vsel %vm2053_vm2, %v8064_v43, %v12053_v32  ;;  %v17411_v2 = vpop.f32.mrb[175].mxu1  ;;  %v8000_v21 = vsel %vm2053_vm2, %v7968_v50, %v12054_v37  ;;  %v8001_v38 = vsel %vm2053_vm2, %v7969_v28, %v12064_v31  ;;  %v2802_v43 = vmax.f32 %v18856_v30, 0.0 }
 0x65e   : > { %v12072_v49 = vpop.permute.xlu1 %12071  ;;  %8407 = vmatprep.mubr.f32.mxu0 %v8096_v39  ;;  %v12039_v18 = vunpack.i.h.bf16 %v17360_v40  ;;  %v12068_v28 = vunpack.i.l.bf16 %v17405_v61  ;;  %v12069_v15 = vunpack.i.h.bf16 %v17405_v61 }
 0x65f   : > { %v12073_v6 = vunpack.i.l.bf16 %v12072_v49  ;;  %8822 = vrot.lane.b32.xlu0 %v2801_v47, %s12283_s13  ;;  %v12074_v55 = vunpack.i.h.bf16 %v12072_v49  ;;  %v7970_v47 = vsel %vm2020_vm1, %v7938_v4, %v12014_v26  ;;  %v18858_v49 = vld [vmem:[#allocation118_spill] sm:$0xff] }
 0x660   : > { %8408 = vmatmul.mubr.f32.gmra.mrb[190].mxu0 %v8000_v21  ;;  %8816 = vrot.lane.b32.xlu1 %v2798_v42, %s12283_s13  ;;  %v12038_v42 = vunpack.i.l.bf16 %v17360_v40  ;;  %v4801_v50 = vmax.f32 %v18858_v49, 0.0  ;;  %v6885_v49 = vld [vmem:[#allocation2 + $0x187] sm:$0xff] }
 0x661   : > { %v17421_v25 = vpop.permute.xlu0 %12081  ;;  %v8065_v27 = vsel %vm2020_vm1, %v8033_v17, %v12073_v6  ;;  %v8066_v13 = vsel %vm2020_vm1, %v8034_v35, %v12074_v55  ;;  %v18859_v55 = vld [vmem:[#allocation62_spill] sm:$0xff]  ;;  %v7012_v35 = vld [vmem:[#allocation2 + $0x190] sm:$0xff] }
 0x662   : > { %v12077_v54 = vpop.permute.xlu1 %12076  ;;  %v8097_v62 = vsel %vm2053_vm2, %v8065_v27, %v12063_v11  ;;  %v12083_v39 = vunpack.i.l.bf16 %v17421_v25  ;;  %v12084_v6 = vunpack.i.h.bf16 %v17421_v25  ;;  %v7011_v11 = vld [vmem:[#allocation2 + $0x188] sm:$0xff]  ;;  %v4803_v17 = vmax.f32 %v18859_v55, 0.0  ;;  %v18860_v27 = vld [vmem:[#allocation33_spill] sm:$0xff] }
 0x663   : > { %v12079_v63 = vunpack.i.h.bf16 %v12077_v54  ;;  %v12078_v9 = vunpack.i.l.bf16 %v12077_v54  ;;  %8412 = vmatprep.mubr.f32.mxu0 %v8097_v62  ;;  %8890 = vrot.lane.b32.xlu0 %v4800_v23, %s12284_s0  ;;  %v4806_v7 = vmax.f32 %v18860_v27, 0.0  ;;  %v7939_v54 = vsel %vm385_vm0, %v6883_v12, %v12038_v42 }
 0x664   : > { %8413 = vmatmul.mubr.f32.gmra.mrb[192].mxu0 %v8001_v38  ;;  %8820 = vrot.lane.b32.xlu1 %v2800_v56, %s12283_s13  ;;  %v17435_v37 = vpop.f32.mrb[176].mxu1  ;;  %v8035_v23 = vsel %vm385_vm0, %v7011_v11, %v12083_v39  ;;  %v12044_v62 = vunpack.i.h.bf16 %v17370_v24  ;;  %v7971_v38 = vsel %vm2020_vm1, %v7939_v54, %v12043_v20  ;;  %v8036_v8 = vsel %vm385_vm0, %v7012_v35, %v12084_v6  ;;  %v7013_v6 = vld [vmem:[#allocation2 + $0x1a8] sm:$0xff] }
 0x665   : > { %v12087_v32 = vpop.permute.xlu0 %12086  ;;  %v8098_v48 = vsel %vm2053_vm2, %v8066_v13, %v12078_v9  ;;  %v17442_v46 = vpop.f32.mrb[177].mxu1  ;;  %v8002_v41 = vsel %vm2053_vm2, %v7970_v47, %v12079_v63  ;;  %v6886_v35 = vld [vmem:[#allocation2 + $0x18f] sm:$0xff] }
 0x666   : > { %v17440_v59 = vpop.permute.xlu1 %12091  ;;  %8417 = vmatprep.mubr.f32.mxu0 %v8098_v48  ;;  %v12089_v21 = vunpack.i.h.bf16 %v12087_v32  ;;  %v12088_v58 = vunpack.i.l.bf16 %v12087_v32  ;;  %v6884_v32 = vld [vmem:[#allocation2 + $0x16f] sm:$0xff]  ;;  %v18861_v48 = vld [vmem:[#allocation66_spill] sm:$0xff] }
 0x667   : > { %8894 = vrot.lane.b32.xlu0 %v4802_v60, %s12284_s0  ;;  %v4808_v4 = vmax.f32 %v18861_v48, 0.0  ;;  %v7940_v47 = vsel %vm385_vm0, %v6884_v32, %v12039_v18  ;;  %v18866_v48 = vld [vmem:[#allocation68_spill] sm:$0xff] }
 0x668   : > { %8418 = vmatmul.mubr.f32.gmra.mrb[194].mxu0 %v8002_v41  ;;  %8824 = vrot.lane.b32.xlu1 %v2802_v43, %s12283_s13  ;;  %v8003_v10 = vsel %vm2053_vm2, %v7971_v38, %v12089_v21  ;;  %v18862_v41 = vld [vmem:[#allocation115_spill] sm:$0xff]  ;;  %v7972_v42 = vsel %vm2020_vm1, %v7940_v47, %v12044_v62  ;;  %v7941_v21 = vsel %vm385_vm0, %v6885_v49, %v12068_v28  ;;  %v7014_v38 = vld [vmem:[#allocation2 + $0x1b0] sm:$0xff]  ;;  %s12287_s13 = smov [#allocation3]  }
 0x669   : > { %v17451_v52 = vpop.permute.xlu0 %12106  ;;  %v4805_v39 = vmax.f32 %v18862_v41, 0.0  ;;  %v7015_v49 = vld [vmem:[#allocation2 + $0x1c8] sm:$0xff] }
 0x66a   : > { %v12097_v31 = vpop.permute.xlu1 %12096  ;;  %v12108_v24 = vunpack.i.l.bf16 %v17451_v52 }
 0x66b   : > { %v12098_v45 = vunpack.i.l.bf16 %v12097_v31  ;;  %8898 = vrot.lane.b32.xlu0 %v4804_v19, %s12284_s0  ;;  %v12099_v29 = vunpack.i.h.bf16 %v12097_v31 }
 0x66c   : > { %8892 = vrot.lane.b32.xlu1 %v4801_v50, %s12284_s0  ;;  %v17462_v56 = vpop.f32.mrb[178].mxu1  ;;  %v8037_v61 = vsel %vm385_vm0, %v7013_v6, %v12108_v24 }
 0x66d   : > { %v12117_v25 = vpop.permute.xlu0 %12116  ;;  %v8067_v26 = vsel %vm2020_vm1, %v8035_v23, %v12098_v45  ;;  %v17469_v9 = vpop.f32.mrb[179].mxu1  ;;  %v8068_v60 = vsel %vm2020_vm1, %v8036_v8, %v12099_v29  ;;  %v12109_v45 = vunpack.i.h.bf16 %v17451_v52  ;;  %v18864_v29 = vld [vmem:[#allocation96_spill] sm:$0xff] }
 0x66e   : > { %v12102_v33 = vpop.permute.xlu1 %12101  ;;  %v8099_v63 = vsel %vm2053_vm2, %v8067_v26, %v12088_v58  ;;  %v12119_v11 = vunpack.i.h.bf16 %v12117_v25  ;;  %v12118_v55 = vunpack.i.l.bf16 %v12117_v25  ;;  %v4810_v23 = vmax.f32 %v18864_v29, 0.0 }
 0x66f   : > { %v12104_v40 = vunpack.i.h.bf16 %v12102_v33  ;;  %v12103_v13 = vunpack.i.l.bf16 %v12102_v33  ;;  %8422 = vmatprep.mubr.f32.mxu0 %v8099_v63  ;;  %8902 = vrot.lane.b32.xlu0 %v4806_v7, %s12284_s0 }
 0x670   : > { %8423 = vmatmul.mubr.f32.gmra.mrb[196].mxu0 %v8003_v10  ;;  %8896 = vrot.lane.b32.xlu1 %v4803_v17, %s12284_s0  ;;  %v18863_v17 = vld [vmem:[#allocation120_spill] sm:$0xff] }
 0x671   : > { %v17479_v30 = vpop.permute.xlu0 %12121  ;;  %v8100_v43 = vsel %vm2053_vm2, %v8068_v60, %v12103_v13  ;;  %v8004_v31 = vsel %vm2053_vm2, %v7972_v42, %v12104_v40  ;;  %v4807_v58 = vmax.f32 %v18863_v17, 0.0  ;;  %v8038_v40 = vsel %vm385_vm0, %v7014_v38, %v12109_v45  ;;  %v18865_v10 = vld [vmem:[#allocation80_spill] sm:$0xff]  ;;  %v6887_v17 = vld [vmem:[#allocation2 + $0x1a7] sm:$0xff] }
 0x672   : > { %v12112_v19 = vpop.permute.xlu1 %12111  ;;  %8427 = vmatprep.mubr.f32.mxu0 %v8100_v43  ;;  %v7942_v13 = vsel %vm385_vm0, %v6886_v35, %v12069_v15  ;;  %v4812_v8 = vmax.f32 %v18865_v10, 0.0  ;;  %v18868_v45 = vld [vmem:[#allocation124_spill] sm:$0xff] }
 0x673   : > { %v12114_v50 = vunpack.i.h.bf16 %v12112_v19  ;;  %v12113_v20 = vunpack.i.l.bf16 %v12112_v19  ;;  %8906 = vrot.lane.b32.xlu0 %v4808_v4, %s12284_s0  ;;  %v4809_v4 = vmax.f32 %v18866_v48, 0.0  ;;  %v7016_v48 = vld [vmem:[#allocation2 + $0x1d0] sm:$0xff] }
 0x674   : > { %8428 = vmatmul.mubr.f32.gmra.mrb[198].mxu0 %v8004_v31  ;;  %8900 = vrot.lane.b32.xlu1 %v4805_v39, %s12284_s0  ;;  %v17494_v12 = vpop.f32.mrb[180].mxu1  ;;  %v12093_v39 = vunpack.i.l.bf16 %v17440_v59 }
 0x675   : > { %v12132_v27 = vpop.permute.xlu0 %12131  ;;  %v8069_v7 = vsel %vm2020_vm1, %v8037_v61, %v12113_v20  ;;  %v7973_v18 = vsel %vm2020_vm1, %v7941_v21, %v12114_v50  ;;  %v17499_v62 = vpop.f32.mrb[181].mxu1  ;;  %v18867_v50 = vld [vmem:[#allocation70_spill] sm:$0xff] }
 0x676   : > { %v12134_v26 = vunpack.i.h.bf16 %v12132_v27  ;;  %v12133_v52 = vunpack.i.l.bf16 %v12132_v27  ;;  %v12127_v54 = vpop.permute.xlu1 %12126  ;;  %v8101_v25 = vsel %vm2053_vm2, %v8069_v7, %v12118_v55  ;;  %v8005_v28 = vsel %vm2053_vm2, %v7973_v18, %v12119_v11 }
 0x677   : > { %v12129_v33 = vunpack.i.h.bf16 %v12127_v54  ;;  %v12128_v63 = vunpack.i.l.bf16 %v12127_v54  ;;  %8432 = vmatprep.mubr.f32.mxu0 %v8101_v25  ;;  %8910 = vrot.lane.b32.xlu0 %v4810_v23, %s12284_s0  ;;  %v4814_v20 = vmax.f32 %v18867_v50, 0.0  ;;  %v4811_v11 = vmax.f32 %v18868_v45, 0.0  ;;  %v18869_v25 = vld [vmem:[#allocation116_spill] sm:$0xff] }
 0x678   : > { %8433 = vmatmul.mubr.f32.gmra.mrb[200].mxu0 %v8005_v28  ;;  %8904 = vrot.lane.b32.xlu1 %v4807_v58, %s12284_s0  ;;  %v7943_v23 = vsel %vm385_vm0, %v6887_v17, %v12093_v39  ;;  %v4816_v18 = vmax.f32 %v16041_v36, 0.0  ;;  %v4813_v28 = vmax.f32 %v18869_v25, 0.0  ;;  %v4818_v36 = vmax.f32 %v16058_v1, 0.0 }
 0x679   : > { %v12142_v24 = vpop.permute.xlu0 %12141  ;;  %v8070_v60 = vsel %vm2020_vm1, %v8038_v40, %v12128_v63  ;;  %v7974_v32 = vsel %vm2020_vm1, %v7942_v13, %v12129_v33  ;;  %v12094_v33 = vunpack.i.h.bf16 %v17440_v59 }
 0x67a   : > { %v12137_v43 = vpop.permute.xlu1 %12136  ;;  %v8102_v47 = vsel %vm2053_vm2, %v8070_v60, %v12133_v52  ;;  %v8006_v41 = vsel %vm2053_vm2, %v7974_v32, %v12134_v26  ;;  %v12144_v15 = vunpack.i.h.bf16 %v12142_v24  ;;  %v12143_v42 = vunpack.i.l.bf16 %v12142_v24  ;;  %v18870_v24 = vld [vmem:[#allocation107_spill] sm:$0xff] }
 0x67b   : > { %v12138_v19 = vunpack.i.l.bf16 %v12137_v43  ;;  %8437 = vmatprep.mubr.f32.mxu0 %v8102_v47  ;;  %8914 = vrot.lane.b32.xlu0 %v4812_v8, %s12284_s0  ;;  %v12139_v38 = vunpack.i.h.bf16 %v12137_v43  ;;  %v6888_v8 = vld [vmem:[#allocation2 + $0x1af] sm:$0xff]  ;;  %v4815_v60 = vmax.f32 %v18870_v24, 0.0  ;;  %v12123_v43 = vunpack.i.l.bf16 %v17479_v30 }
 0x67c   : > { %8438 = vmatmul.mubr.f32.gmra.mrb[202].mxu0 %v8006_v41  ;;  %8908 = vrot.lane.b32.xlu1 %v4809_v4, %s12284_s0  ;;  %v17516_v31 = vpop.f32.mrb[182].mxu1  ;;  %v7975_v7 = vsel %vm2020_vm1, %v7943_v23, %v12144_v15  ;;  %v7944_v4 = vsel %vm385_vm0, %v6888_v8, %v12094_v33  ;;  %v4819_v33 = vmax.f32 %v16048_v5, 0.0  ;;  %v6890_v8 = vld [vmem:[#allocation2 + $0x1cf] sm:$0xff] }
 0x67d   : > { %v12157_v6 = vpop.permute.xlu0 %12156  ;;  %v8039_v21 = vsel %vm385_vm0, %v7015_v49, %v12138_v19  ;;  %v17520_v61 = vpop.f32.mrb[183].mxu1  ;;  %v8040_v1 = vsel %vm385_vm0, %v7016_v48, %v12139_v38  ;;  %v4824_v48 = vmax.f32 %v16144_v51, 0.0  ;;  %v7019_v51 = vld [vmem:[#allocation2 + $0x208] sm:$0xff] }
 0x67e   : > { %v12147_v55 = vpop.permute.xlu1 %12146  ;;  %v8071_v27 = vsel %vm2020_vm1, %v8039_v21, %v12143_v42  ;;  %v12159_v35 = vunpack.i.h.bf16 %v12157_v6  ;;  %v12158_v40 = vunpack.i.l.bf16 %v12157_v6  ;;  %v4820_v42 = vmax.f32 %v16080_v16, 0.0  ;;  %v18871_v6 = vld [vmem:[#allocation73_spill] sm:$0xff] }
 0x67f   : > { %v12149_v58 = vunpack.i.h.bf16 %v12147_v55  ;;  %v12148_v29 = vunpack.i.l.bf16 %v12147_v55  ;;  %8918 = vrot.lane.b32.xlu0 %v4814_v20, %s12284_s0  ;;  %v4817_v21 = vmax.f32 %v18871_v6, 0.0  ;;  %v12124_v55 = vunpack.i.h.bf16 %v17479_v30 }
 0x680   : > { %8912 = vrot.lane.b32.xlu1 %v4811_v11, %s12284_s0  ;;  %v8072_v19 = vsel %vm2020_vm1, %v8040_v1, %v12158_v40  ;;  %v7976_v15 = vsel %vm2020_vm1, %v7944_v4, %v12159_v35  ;;  %v6889_v11 = vld [vmem:[#allocation2 + $0x1c7] sm:$0xff] }
 0x681   : > { %v17528_v26 = vpop.permute.xlu0 %12166  ;;  %v8103_v52 = vsel %vm2053_vm2, %v8071_v27, %v12148_v29  ;;  %v8007_v54 = vsel %vm2053_vm2, %v7975_v7, %v12149_v58  ;;  %v7017_v29 = vld [vmem:[#allocation2 + $0x1e8] sm:$0xff]  ;;  %v7945_v16 = vsel %vm385_vm0, %v6889_v11, %v12123_v43 }
 0x682   : > { %v17534_v63 = vpop.permute.xlu1 %12151  ;;  %8442 = vmatprep.mubr.f32.mxu0 %v8103_v52  ;;  %v12168_v39 = vunpack.i.l.bf16 %v17528_v26  ;;  %v12169_v23 = vunpack.i.h.bf16 %v17528_v26  ;;  %v4822_v52 = vmax.f32 %v16098_v3, 0.0  ;;  %v7018_v3 = vld [vmem:[#allocation2 + $0x1f0] sm:$0xff] }
 0x683   : > { %8443 = vmatmul.mubr.f32.gmra.mrb[204].mxu0 %v8007_v54  ;;  %8922 = vrot.lane.b32.xlu0 %v4816_v18, %s12284_s0 }
 0x684   : > { %8916 = vrot.lane.b32.xlu1 %v4813_v28, %s12284_s0  ;;  %v17539_v13 = vpop.f32.mrb[184].mxu1  ;;  %v8041_v18 = vsel %vm385_vm0, %v7017_v29, %v12168_v39  ;;  %v8042_v5 = vsel %vm385_vm0, %v7018_v3, %v12169_v23 }
 0x685   : > { %v12177_v10 = vpop.permute.xlu0 %12176  ;;  %v17542_v32 = vpop.f32.mrb[185].mxu1 }
 0x686   : > { %v12162_v59 = vpop.permute.xlu1 %12161  ;;  %v12179_v27 = vunpack.i.h.bf16 %v12177_v10  ;;  %v12178_v7 = vunpack.i.l.bf16 %v12177_v10 }
 0x687   : > { %v12164_v47 = vunpack.i.h.bf16 %v12162_v59  ;;  %v12163_v41 = vunpack.i.l.bf16 %v12162_v59  ;;  %8926 = vrot.lane.b32.xlu0 %v4818_v36, %s12284_s0  ;;  %v7946_v59 = vsel %vm385_vm0, %v6890_v8, %v12124_v55 }
 0x688   : > { %8920 = vrot.lane.b32.xlu1 %v4815_v60, %s12284_s0 }
 0x689   : > { %v12187_v49 = vpop.permute.xlu0 %12186  ;;  %v8104_v50 = vsel %vm2053_vm2, %v8072_v19, %v12163_v41  ;;  %v8008_v20 = vsel %vm2053_vm2, %v7976_v15, %v12164_v47  ;;  %v18872_v41 = vld [vmem:[#allocation110_spill] sm:$0xff] }
 0x68a   : > { %v12172_v45 = vpop.permute.xlu1 %12171  ;;  %8447 = vmatprep.mubr.f32.mxu0 %v8104_v50  ;;  %v12189_v24 = vunpack.i.h.bf16 %v12187_v49  ;;  %v12188_v60 = vunpack.i.l.bf16 %v12187_v49  ;;  %v4821_v1 = vmax.f32 %v18872_v41, 0.0 }
 0x68b   : > { %v12174_v17 = vunpack.i.h.bf16 %v12172_v45  ;;  %v12173_v58 = vunpack.i.l.bf16 %v12172_v45  ;;  %8448 = vmatmul.mubr.f32.gmra.mrb[206].mxu0 %v8008_v20  ;;  %8930 = vrot.lane.b32.xlu0 %v4820_v42, %s12284_s0  ;;  %v12153_v42 = vunpack.i.l.bf16 %v17534_v63  ;;  %v18873_v20 = vld [vmem:[#allocation88_spill] sm:$0xff] }
 0x68c   : > { %8924 = vrot.lane.b32.xlu1 %v4817_v21, %s12284_s0  ;;  %v17563_v54 = vpop.f32.mrb[186].mxu1  ;;  %v4826_v6 = vmax.f32 %v18873_v20, 0.0 }
 0x68d   : > { %v12192_v30 = vpop.permute.xlu0 %12191  ;;  %v8073_v25 = vsel %vm2020_vm1, %v8041_v18, %v12173_v58  ;;  %v7977_v28 = vsel %vm2020_vm1, %v7945_v16, %v12174_v17  ;;  %v17569_v35 = vpop.f32.mrb[187].mxu1  ;;  %v18875_v17 = vld [vmem:[#allocation81_spill] sm:$0xff] }
 0x68e   : > { %v12182_v38 = vpop.permute.xlu1 %12181  ;;  %v8105_v26 = vsel %vm2053_vm2, %v8073_v25, %v12178_v7  ;;  %v8009_v40 = vsel %vm2053_vm2, %v7977_v28, %v12179_v27  ;;  %v12194_v50 = vunpack.i.h.bf16 %v12192_v30  ;;  %v4823_v58 = vmax.f32 %v18875_v17, 0.0  ;;  %v6891_v27 = vld [vmem:[#allocation2 + $0x1e7] sm:$0xff] }
 0x68f   : > { %v12184_v36 = vunpack.i.h.bf16 %v12182_v38  ;;  %v12183_v10 = vunpack.i.l.bf16 %v12182_v38  ;;  %8452 = vmatprep.mubr.f32.mxu0 %v8105_v26  ;;  %8934 = vrot.lane.b32.xlu0 %v4822_v52, %s12284_s0  ;;  %v12193_v29 = vunpack.i.l.bf16 %v12192_v30  ;;  %v12154_v7 = vunpack.i.h.bf16 %v17534_v63  ;;  %v7020_v26 = vld [vmem:[#allocation2 + $0x210] sm:$0xff] }
 0x690   : > { %8453 = vmatmul.mubr.f32.gmra.mrb[208].mxu0 %v8009_v40  ;;  %8928 = vrot.lane.b32.xlu1 %v4819_v33, %s12284_s0  ;;  %v7947_v25 = vsel %vm385_vm0, %v6891_v27, %v12153_v42  ;;  %v18876_v40 = vld [vmem:[#allocation36_spill] sm:$0xff]  ;;  %v18884_v27 = vld [vmem:[#allocation86_spill] sm:$0xff] }
 0x691   : > { %v12207_v4 = vpop.permute.xlu0 %12206  ;;  %v8074_v43 = vsel %vm2020_vm1, %v8042_v5, %v12183_v10  ;;  %v7978_v47 = vsel %vm2020_vm1, %v7946_v59, %v12184_v36  ;;  %v7979_v30 = vsel %vm2020_vm1, %v7947_v25, %v12194_v50  ;;  %v4828_v36 = vmax.f32 %v18876_v40, 0.0  ;;  %v6892_v59 = vld [vmem:[#allocation2 + $0x1ef] sm:$0xff]  ;;  %v18880_v50 = vld [vmem:[#allocation101_spill] sm:$0xff] }
 0x692   : > { %v12197_v39 = vpop.permute.xlu1 %12196  ;;  %v8106_v19 = vsel %vm2053_vm2, %v8074_v43, %v12188_v60  ;;  %v8010_v15 = vsel %vm2053_vm2, %v7978_v47, %v12189_v24  ;;  %v12209_v28 = vunpack.i.h.bf16 %v12207_v4  ;;  %v12208_v33 = vunpack.i.l.bf16 %v12207_v4  ;;  %v18877_v24 = vld [vmem:[#allocation95_spill] sm:$0xff] }
 0x693   : > { %v12198_v49 = vunpack.i.l.bf16 %v12197_v39  ;;  %8457 = vmatprep.mubr.f32.mxu0 %v8106_v19  ;;  %8938 = vrot.lane.b32.xlu0 %v4824_v48, %s12284_s0  ;;  %v12199_v21 = vunpack.i.h.bf16 %v12197_v39  ;;  %v4825_v60 = vmax.f32 %v18877_v24, 0.0  ;;  %v7948_v43 = vsel %vm385_vm0, %v6892_v59, %v12154_v7 }
 0x694   : > { %8458 = vmatmul.mubr.f32.gmra.mrb[210].mxu0 %v8010_v15  ;;  %8932 = vrot.lane.b32.xlu1 %v4821_v1, %s12284_s0  ;;  %v17586_v45 = vpop.f32.mrb[188].mxu1  ;;  %v7980_v41 = vsel %vm2020_vm1, %v7948_v43, %v12209_v28  ;;  %v18878_v1 = vld [vmem:[#allocation91_spill] sm:$0xff]  ;;  %v4831_v7 = vmax.f32 %v18884_v27, 0.0 }
 0x695   : > { %18874 = vst [vmem:[#allocation97_spill] sm:$0xff] %v17586_v45  ;;  %v17588_v11 = vpop.permute.xlu0 %8762  ;;  %v8043_v55 = vsel %vm385_vm0, %v7019_v51, %v12198_v49  ;;  %v17592_v23 = vpop.f32.mrb[189].mxu1  ;;  %v8044_v8 = vsel %vm385_vm0, %v7020_v26, %v12199_v21  ;;  %v4830_v39 = vmax.f32 %v18878_v1, 0.0  ;;  %v4827_v51 = vmax.f32 %v18880_v50, 0.0 }
 0x696   : > { %v12202_v16 = vpop.permute.xlu1 %12201  ;;  %v8075_v38 = vsel %vm2020_vm1, %v8043_v55, %v12193_v29  ;;  %v8076_v47 = vsel %vm2020_vm1, %v8044_v8, %v12208_v33  ;;  %v18882_v55 = vld [vmem:[#allocation90_spill] sm:$0xff] }
 0x697   : > { %v12204_v18 = vunpack.i.h.bf16 %v12202_v16  ;;  %v12203_v52 = vunpack.i.l.bf16 %v12202_v16  ;;  %8942 = vrot.lane.b32.xlu0 %v4826_v6, %s12284_s0  ;;  %v4829_v17 = vmax.f32 %v18882_v55, 0.0 }
 0x698   : > { %8936 = vrot.lane.b32.xlu1 %v4823_v58, %s12284_s0 }
 0x699   : > { %v8107_v10 = vsel %vm2053_vm2, %v8075_v38, %v12203_v52  ;;  %v17602_v63 = vpop.permute.xlu0 %8766  ;;  %v8011_v3 = vsel %vm2053_vm2, %v7979_v30, %v12204_v18 }
 0x69a   : > { %v12212_v5 = vpop.permute.xlu1 %12211  ;;  %8462 = vmatprep.mubr.f32.mxu0 %v8107_v10 }
 0x69b   : > { %v12214_v48 = vunpack.i.h.bf16 %v12212_v5  ;;  %v12213_v4 = vunpack.i.l.bf16 %v12212_v5  ;;  %8463 = vmatmul.mubr.f32.gmra.mrb[212].mxu0 %v8011_v3  ;;  %8946 = vrot.lane.b32.xlu0 %v4828_v36, %s12284_s0 }
 0x69c   : > { %8940 = vrot.lane.b32.xlu1 %v4825_v60, %s12284_s0  ;;  %v17614_v15 = vpop.f32.mrb[190].mxu1 }
 0x69d   : > { %v8108_v19 = vsel %vm2053_vm2, %v8076_v47, %v12213_v4  ;;  %18879 = vst [vmem:[#allocation93_spill] sm:$0xff] %v17614_v15  ;;  %v17616_v42 = vpop.permute.xlu0 %8770  ;;  %v8012_v49 = vsel %vm2053_vm2, %v7980_v41, %v12214_v48  ;;  %v17622_v6 = vpop.f32.mrb[191].mxu1  ;;  %v17675_v48 = vld [vmem:[%s18158_s10] ss:$0 sm:$0xff] }
 0x69e   : > { %8467 = vmatprep.mubr.f32.mxu0 %v8108_v19  ;;  %v17620_v20 = vpop.permute.xlu1 %8764  ;;  %18881 = vst [vmem:[#allocation103_spill] sm:$0xff] %v17622_v6 }
 0x69f   : > { %8468 = vmatmul.mubr.f32.gmra.mrb[214].mxu0 %v8012_v49  ;;  %8950 = vrot.lane.b32.xlu0 %v4830_v39, %s12284_s0 }
 0x6a0   : > { %8944 = vrot.lane.b32.xlu1 %v4827_v51, %s12284_s0 }
 0x6a1   : > { %v17626_v21 = vpop.permute.xlu0 %8774 }
 0x6a2   : > { %v17629_v58 = vpop.permute.xlu1 %8768 }
 0x6a4   : > { %8948 = vrot.lane.b32.xlu1 %v4829_v17, %s12284_s0  ;;  %v17632_v29 = vpop.f32.mrb[192].mxu1 }
 0x6a5   : > { %18883 = vst [vmem:[#allocation94_spill] sm:$0xff] %v17632_v29  ;;  %v17634_v16 = vpop.permute.xlu0 %8778  ;;  %v17639_v52 = vpop.f32.mrb[193].mxu1 }
 0x6a6   : > { %v17637_v18 = vpop.permute.xlu1 %8772  ;;  %18885 = vst [vmem:[#allocation112_spill] sm:$0xff] %v17639_v52 }
 0x6a8   : > { %8952 = vrot.lane.b32.xlu1 %v4831_v7, %s12284_s0  ;;  %s12222_s0 = sshll.u32 %s12287_s13, 4  ;;  %s12223_s0 = int_to_ptr.vmem [resolvable:$false] %s12222_s0 }
 0x6a9   : > { %v17642_v25 = vpop.permute.xlu0 %8782  ;;  %s12224_s22 = scalar_lea.vmem %s12223_s0, 8192  ;;  %p12225_p0 = scmp.lt.s32.totalorder %s18100_s24, %s12223_s0 }
 0x6aa   : > { %v17644_v28 = vpop.permute.xlu1 %8776  ;;  %p12226_p1 = scmp.lt.s32.totalorder %s12224_s22, %s12218_s14 }
 0x6ac   : > { %v17646_v33 = vpop.f32.mrb[194].mxu1  ;;  %p12227_p2 = por %p12226_p1, %p12225_p0 }
 0x6ad   : > { %18886 = vst [vmem:[#allocation111_spill] sm:$0xff] %v17646_v33  ;;  %v17648_v38 = vpop.permute.xlu0 %8786  ;;  %v17652_v26 = vpop.f32.mrb[195].mxu1 }
 0x6ae   : > { %v17650_v30 = vpop.permute.xlu1 %8780  ;;  %18887 = vst [vmem:[#allocation63_spill] sm:$0xff] %v17652_v26  ;;  %p12228_p3 = pnand %p12227_p2, %p12221_p13 }
 0x6b1   : > { %v17654_v40 = vpop.permute.xlu0 %8790 }
 0x6b2   : > { %v17656_v36 = vpop.permute.xlu1 %8784 }
 0x6b4   : > { %v17658_v10 = vpop.f32.mrb[196].mxu1 }
 0x6b5   : > { %18888 = vst [vmem:[#allocation59_spill] sm:$0xff] %v17658_v10  ;;  %v17660_v3 = vpop.permute.xlu0 %8794  ;;  %v17664_v24 = vpop.f32.mrb[197].mxu1 }
 0x6b6   : > { %v17662_v8 = vpop.permute.xlu1 %8788  ;;  %18889 = vst [vmem:[#allocation117_spill] sm:$0xff] %v17664_v24 }
 0x6b9   : > { %v17666_v60 = vpop.permute.xlu0 %8798 }
 0x6ba   : > { %v17668_v5 = vpop.permute.xlu1 %8792 }
 0x6bd   : > { %v17670_v59 = vpop.permute.xlu0 %8802 }
 0x6be   : > { %v17677_v4 = vpop.permute.xlu1 %8796 }
 0x6bf   : > { %v8314_v43 = vpop.f32.mrb[152].mxu0 }
 0x6c0   : > { %v8315_v47 = vadd.f32 %v17675_v48, %v8314_v43  ;;  %v8316_v41 = vpop.f32.mrb[153].mxu0 }
 0x6c1   : > { %v17680_v1 = vpop.permute.xlu0 %8806 }
 0x6c2   : > { %v8540_v39 = vadd.f32 %v17331_v14, %v8315_v47  ;;  %v17683_v19 = vpop.permute.xlu1 %8800 }
 0x6c3   : > { %v8319_v49 = vpop.f32.mrb[154].mxu0 }
 0x6c4   : > { %v8698_v50 = vmax.f32 %v8540_v39, 0.0  ;;  %v8320_v51 = vadd.f32 %v17675_v48, %v8319_v49  ;;  %v8321_v55 = vpop.f32.mrb[155].mxu0 }
 0x6c5   : > { %v17686_v17 = vpop.permute.xlu0 %8810 }
 0x6c6   : > { %v8545_v27 = vadd.f32 %v17323_v22, %v8320_v51  ;;  %v17689_v7 = vpop.permute.xlu1 %8804  ;;  %9018 = vrot.lane.b32.xlu0 %v8698_v50, %s12285_s25 }
 0x6c8   : > { %v8699_v43 = vmax.f32 %v8545_v27, 0.0 }
 0x6c9   : > { %v17692_v41 = vpop.permute.xlu0 %8814 }
 0x6ca   : > { %9020 = vrot.lane.b32.xlu1 %v8699_v43, %s12285_s25  ;;  %v17695_v14 = vpop.permute.xlu1 %8808 }
 0x6cd   : > { %v17697_v47 = vpop.permute.xlu0 %8818 }
 0x6ce   : > { %v17699_v39 = vpop.permute.xlu1 %8812 }
 0x6cf   : > { %v8324_v49 = vpop.f32.mrb[156].mxu0 }
 0x6d0   : > { %v8325_v55 = vadd.f32 %v17675_v48, %v8324_v49  ;;  %v8326_v10 = vpop.f32.mrb[157].mxu0 }
 0x6d1   : > { %v17702_v22 = vpop.permute.xlu0 %8822 }
 0x6d2   : > { %v8550_v51 = vadd.f32 %v17362_v34, %v8325_v55  ;;  %v17705_v50 = vpop.permute.xlu1 %8816  ;;  %v18890_v55 = vld [vmem:[#allocation8_spill] sm:$0xff] }
 0x6d3   : > { %v8329_v27 = vpop.f32.mrb[158].mxu0 }
 0x6d4   : > { %v8700_v24 = vmax.f32 %v8550_v51, 0.0  ;;  %v8330_v43 = vadd.f32 %v17675_v48, %v8329_v27  ;;  %v8331_v33 = vpop.f32.mrb[159].mxu0  ;;  %v9116_v51 = vsel %vm385_vm0, %v18890_v55, %v17602_v63 }
 0x6d5   : > { %v17708_v26 = vpop.permute.xlu0 %8890 }
 0x6d6   : > { %v8555_v29 = vadd.f32 %v17355_v57, %v8330_v43  ;;  %v17711_v52 = vpop.permute.xlu1 %8820  ;;  %9022 = vrot.lane.b32.xlu0 %v8700_v24, %s12285_s25 }
 0x6d7   : > { %v8334_v10 = vpop.f32.mrb[160].mxu0 }
 0x6d8   : > { %v8701_v49 = vmax.f32 %v8555_v29, 0.0  ;;  %v8335_v15 = vadd.f32 %v17675_v48, %v8334_v10  ;;  %v8336_v34 = vpop.f32.mrb[161].mxu0 }
 0x6d9   : > { %v8895_v6 = vpop.permute.xlu0 %8894  ;;  %v18891_v34 = vld [vmem:[#allocation10_spill] sm:$0xff] }
 0x6da   : > { %v8560_v33 = vadd.f32 %v17382_v53, %v8335_v15  ;;  %9024 = vrot.lane.b32.xlu1 %v8701_v49, %s12285_s25  ;;  %v17720_v27 = vpop.permute.xlu1 %8824  ;;  %v17723_v57 = vsel %vm2020_vm1, %v9116_v51, %v8895_v6  ;;  %v9118_v45 = vsel %vm385_vm0, %v18891_v34, %v17616_v42  ;;  %v18892_v49 = vld [vmem:[#allocation12_spill] sm:$0xff] }
 0x6db   : > { %v8339_v24 = vpop.f32.mrb[162].mxu0  ;;  %v9120_v51 = vsel %vm385_vm0, %v18892_v49, %v17626_v21  ;;  %v18895_v21 = vld [vmem:[#allocation11_spill] sm:$0xff] }
 0x6dc   : > { %v8702_v43 = vmax.f32 %v8560_v33, 0.0  ;;  %v8340_v29 = vadd.f32 %v17675_v48, %v8339_v24  ;;  %v8341_v10 = vpop.f32.mrb[163].mxu0  ;;  %v18893_v24 = vld [vmem:[#allocation9_spill] sm:$0xff] }
 0x6dd   : > { %v8899_v63 = vpop.permute.xlu0 %8898  ;;  %v9117_v42 = vsel %vm385_vm0, %v18893_v24, %v17629_v58  ;;  %v18897_v24 = vld [vmem:[#allocation16_spill] sm:$0xff] }
 0x6de   : > { %v8565_v55 = vadd.f32 %v17376_v0, %v8340_v29  ;;  %v17730_v53 = vpop.permute.xlu1 %8892  ;;  %9026 = vrot.lane.b32.xlu0 %v8702_v43, %s12285_s25  ;;  %v17734_v15 = vsel %vm2020_vm1, %v9118_v45, %v8899_v63  ;;  %v18894_v45 = vld [vmem:[#allocation14_spill] sm:$0xff]  ;;  %v9119_v63 = vsel %vm385_vm0, %v18895_v21, %v17637_v18 }
 0x6df   : > { %v9122_v10 = vsel %vm385_vm0, %v18894_v45, %v17634_v16  ;;  %v9124_v16 = vsel %vm385_vm0, %v18897_v24, %v17642_v25  ;;  %v18899_v25 = vld [vmem:[#allocation18_spill] sm:$0xff] }
 0x6e0   : > { %v8703_v6 = vmax.f32 %v8565_v55, 0.0  ;;  %v9126_v24 = vsel %vm385_vm0, %v18899_v25, %v17648_v38 }
 0x6e1   : > { %v8903_v33 = vpop.permute.xlu0 %8902 }
 0x6e2   : > { %9028 = vrot.lane.b32.xlu1 %v8703_v6, %s12285_s25  ;;  %v8897_v0 = vpop.permute.xlu1 %8896  ;;  %v17744_v29 = vsel %vm2020_vm1, %v9120_v51, %v8903_v33 }
 0x6e3   : > { %v17747_v43 = vsel %vm2020_vm1, %v9117_v42, %v8897_v0  ;;  %v18898_v0 = vld [vmem:[#allocation13_spill] sm:$0xff] }
 0x6e4   : > { %v9121_v18 = vsel %vm385_vm0, %v18898_v0, %v17644_v28  ;;  %v18900_v28 = vld [vmem:[#allocation15_spill] sm:$0xff] }
 0x6e5   : > { %v8907_v34 = vpop.permute.xlu0 %8906 }
 0x6e6   : > { %v8901_v55 = vpop.permute.xlu1 %8900  ;;  %v17756_v58 = vsel %vm2020_vm1, %v9122_v10, %v8907_v34 }
 0x6e7   : > { %18896 = vst [vmem:[#allocation61_spill] sm:$0xff] %v17756_v58  ;;  %v17759_v6 = vsel %vm2020_vm1, %v9119_v63, %v8901_v55  ;;  %v8344_v49 = vpop.f32.mrb[164].mxu0 }
 0x6e8   : > { %v8345_v51 = vadd.f32 %v17675_v48, %v8344_v49  ;;  %v8346_v33 = vpop.f32.mrb[165].mxu0 }
 0x6e9   : > { %v8911_v42 = vpop.permute.xlu0 %8910 }
 0x6ea   : > { %v8570_v45 = vadd.f32 %v17411_v2, %v8345_v51  ;;  %v8905_v10 = vpop.permute.xlu1 %8904  ;;  %v17770_v34 = vsel %vm2020_vm1, %v9124_v16, %v8911_v42  ;;  %v9123_v2 = vsel %vm385_vm0, %v18900_v28, %v17650_v30 }
 0x6eb   : > { %v17773_v21 = vsel %vm2020_vm1, %v9121_v18, %v8905_v10  ;;  %v8349_v63 = vpop.f32.mrb[166].mxu0 }
 0x6ec   : > { %v8704_v55 = vmax.f32 %v8570_v45, 0.0  ;;  %v8350_v49 = vadd.f32 %v17675_v48, %v8349_v63  ;;  %v8351_v33 = vpop.f32.mrb[167].mxu0  ;;  %v18901_v63 = vld [vmem:[#allocation20_spill] sm:$0xff] }
 0x6ed   : > { %v8915_v58 = vpop.permute.xlu0 %8914  ;;  %v9128_v30 = vsel %vm385_vm0, %v18901_v63, %v17654_v40 }
 0x6ee   : > { %v8575_v51 = vadd.f32 %v17403_v44, %v8350_v49  ;;  %v8909_v16 = vpop.permute.xlu1 %8908  ;;  %9030 = vrot.lane.b32.xlu0 %v8704_v55, %s12285_s25  ;;  %v17785_v42 = vsel %vm2020_vm1, %v9126_v24, %v8915_v58  ;;  %v17794_v44 = vpop.f32.mrb[198].mxu1  ;;  %v18902_v55 = vld [vmem:[#allocation17_spill] sm:$0xff] }
 0x6ef   : > { %v17788_v0 = vsel %vm2020_vm1, %v9123_v2, %v8909_v16  ;;  %v8354_v18 = vpop.f32.mrb[168].mxu0  ;;  %v9125_v58 = vsel %vm385_vm0, %v18902_v55, %v17656_v36  ;;  %v17804_v28 = vpop.f32.mrb[199].mxu1  ;;  %v18903_v36 = vld [vmem:[#allocation22_spill] sm:$0xff] }
 0x6f0   : > { %v8705_v45 = vmax.f32 %v8575_v51, 0.0  ;;  %v8355_v38 = vadd.f32 %v17675_v48, %v8354_v18  ;;  %v8356_v10 = vpop.f32.mrb[169].mxu0 }
 0x6f1   : > { %v8919_v33 = vpop.permute.xlu0 %8918 }
 0x6f2   : > { %v8580_v49 = vadd.f32 %v17442_v46, %v8355_v38  ;;  %9032 = vrot.lane.b32.xlu1 %v8705_v45, %s12285_s25  ;;  %v8913_v25 = vpop.permute.xlu1 %8912  ;;  %v17802_v24 = vsel %vm2020_vm1, %v9128_v30, %v8919_v33  ;;  %v9130_v46 = vsel %vm385_vm0, %v18903_v36, %v17660_v3  ;;  %v18904_v45 = vld [vmem:[#allocation19_spill] sm:$0xff] }
 0x6f3   : > { %v17807_v2 = vsel %vm2020_vm1, %v9125_v58, %v8913_v25  ;;  %v8359_v40 = vpop.f32.mrb[170].mxu0  ;;  %v9127_v10 = vsel %vm385_vm0, %v18904_v45, %v17662_v8 }
 0x6f4   : > { %v8706_v51 = vmax.f32 %v8580_v49, 0.0  ;;  %v8360_v16 = vadd.f32 %v17675_v48, %v8359_v40  ;;  %v8361_v18 = vpop.f32.mrb[171].mxu0  ;;  %v18905_v49 = vld [vmem:[#allocation24_spill] sm:$0xff]  ;;  %v18906_v40 = vld [vmem:[#allocation21_spill] sm:$0xff] }
 0x6f5   : > { %v8923_v38 = vpop.permute.xlu0 %8922  ;;  %v9132_v3 = vsel %vm385_vm0, %v18905_v49, %v17666_v60  ;;  %v9129_v8 = vsel %vm385_vm0, %v18906_v40, %v17668_v5  ;;  %v18907_v18 = vld [vmem:[#allocation26_spill] sm:$0xff]  ;;  %v18908_v60 = vld [vmem:[#allocation23_spill] sm:$0xff]  ;;  %v18909_v49 = vld [vmem:[#allocation28_spill] sm:$0xff] }
 0x6f6   : > { %v8585_v63 = vadd.f32 %v17435_v37, %v8360_v16  ;;  %v8917_v30 = vpop.permute.xlu1 %8916  ;;  %9034 = vrot.lane.b32.xlu0 %v8706_v51, %s12285_s25  ;;  %v17819_v33 = vsel %vm2020_vm1, %v9130_v46, %v8923_v38  ;;  %v9134_v36 = vsel %vm385_vm0, %v18907_v18, %v17670_v59  ;;  %v9131_v38 = vsel %vm385_vm0, %v18908_v60, %v17677_v4 }
 0x6f7   : > { %v17822_v55 = vsel %vm2020_vm1, %v9127_v10, %v8917_v30  ;;  %v9136_v59 = vsel %vm385_vm0, %v18909_v49, %v17680_v1  ;;  %v18911_v1 = vld [vmem:[#allocation30_spill] sm:$0xff] }
 0x6f8   : > { %v8707_v58 = vmax.f32 %v8585_v63, 0.0 }
 0x6f9   : > { %v8927_v25 = vpop.permute.xlu0 %8926 }
 0x6fa   : > { %9036 = vrot.lane.b32.xlu1 %v8707_v58, %s12285_s25  ;;  %v8921_v37 = vpop.permute.xlu1 %8920  ;;  %v17832_v51 = vsel %vm2020_vm1, %v9132_v3, %v8927_v25  ;;  %v18910_v25 = vld [vmem:[#allocation25_spill] sm:$0xff] }
 0x6fb   : > { %v17835_v16 = vsel %vm2020_vm1, %v9129_v8, %v8921_v37  ;;  %v9133_v4 = vsel %vm385_vm0, %v18910_v25, %v17683_v19  ;;  %v18912_v19 = vld [vmem:[#allocation27_spill] sm:$0xff] }
 0x6fd   : > { %v8931_v46 = vpop.permute.xlu0 %8930 }
 0x6fe   : > { %v8925_v45 = vpop.permute.xlu1 %8924  ;;  %v17844_v5 = vsel %vm2020_vm1, %v9134_v36, %v8931_v46 }
 0x6ff   : > { %v17847_v10 = vsel %vm2020_vm1, %v9131_v38, %v8925_v45  ;;  %v8364_v63 = vpop.f32.mrb[172].mxu0  ;;  %v9138_v45 = vsel %vm385_vm0, %v18911_v1, %v17686_v17 }
 0x700   : > { %v8365_v30 = vadd.f32 %v17675_v48, %v8364_v63  ;;  %v8366_v58 = vpop.f32.mrb[173].mxu0 }
 0x701   : > { %v8935_v3 = vpop.permute.xlu0 %8934 }
 0x702   : > { %v8590_v40 = vadd.f32 %v17469_v9, %v8365_v30  ;;  %v8929_v8 = vpop.permute.xlu1 %8928  ;;  %v17858_v37 = vsel %vm2020_vm1, %v9136_v59, %v8935_v3  ;;  %v9135_v9 = vsel %vm385_vm0, %v18912_v19, %v17689_v7 }
 0x703   : > { %v17861_v18 = vsel %vm2020_vm1, %v9133_v4, %v8929_v8  ;;  %v8369_v36 = vpop.f32.mrb[174].mxu0 }
 0x704   : > { %v8708_v46 = vmax.f32 %v8590_v40, 0.0  ;;  %v8370_v60 = vadd.f32 %v17675_v48, %v8369_v36  ;;  %v8371_v38 = vpop.f32.mrb[175].mxu0  ;;  %v18913_v40 = vld [vmem:[#allocation32_spill] sm:$0xff] }
 0x705   : > { %v8939_v63 = vpop.permute.xlu0 %8938  ;;  %v9140_v7 = vsel %vm385_vm0, %v18913_v40, %v17692_v41 }
 0x706   : > { %v8595_v30 = vadd.f32 %v17462_v56, %v8370_v60  ;;  %v8933_v58 = vpop.permute.xlu1 %8932  ;;  %9038 = vrot.lane.b32.xlu0 %v8708_v46, %s12285_s25  ;;  %v17873_v49 = vsel %vm2020_vm1, %v9138_v45, %v8939_v63  ;;  %v18914_v56 = vld [vmem:[#allocation29_spill] sm:$0xff] }
 0x707   : > { %v17876_v59 = vsel %vm2020_vm1, %v9135_v9, %v8933_v58  ;;  %v8374_v3 = vpop.f32.mrb[176].mxu0  ;;  %v9137_v36 = vsel %vm385_vm0, %v18914_v56, %v17695_v14  ;;  %v18915_v9 = vld [vmem:[#allocation38_spill] sm:$0xff]  ;;  %v18918_v56 = vld [vmem:[#allocation35_spill] sm:$0xff] }
 0x708   : > { %v8709_v25 = vmax.f32 %v8595_v30, 0.0  ;;  %v8375_v17 = vadd.f32 %v17675_v48, %v8374_v3  ;;  %v8376_v4 = vpop.f32.mrb[177].mxu0  ;;  %v9142_v14 = vsel %vm385_vm0, %v18915_v9, %v17697_v47  ;;  %v18920_v9 = vld [vmem:[#allocation41_spill] sm:$0xff] }
 0x709   : > { %v8943_v8 = vpop.permute.xlu0 %8942 }
 0x70a   : > { %v8600_v46 = vadd.f32 %v17499_v62, %v8375_v17  ;;  %9040 = vrot.lane.b32.xlu1 %v8709_v25, %s12285_s25  ;;  %v8937_v60 = vpop.permute.xlu1 %8936  ;;  %v17888_v38 = vsel %vm2020_vm1, %v9140_v7, %v8943_v8  ;;  %v18916_v62 = vld [vmem:[#allocation31_spill] sm:$0xff]  ;;  %v18917_v7 = vld [vmem:[#allocation40_spill] sm:$0xff] }
 0x70b   : > { %v17891_v1 = vsel %vm2020_vm1, %v9137_v36, %v8937_v60  ;;  %v8379_v45 = vpop.f32.mrb[178].mxu0  ;;  %v9139_v58 = vsel %vm385_vm0, %v18916_v62, %v17699_v39  ;;  %v9144_v47 = vsel %vm385_vm0, %v18917_v7, %v17702_v22  ;;  %v9141_v39 = vsel %vm385_vm0, %v18918_v56, %v17705_v50  ;;  %v18919_v60 = vld [vmem:[#allocation39_spill] sm:$0xff] }
 0x70c   : > { %v8710_v63 = vmax.f32 %v8600_v46, 0.0  ;;  %v8380_v41 = vadd.f32 %v17675_v48, %v8379_v45  ;;  %v8381_v19 = vpop.f32.mrb[179].mxu0  ;;  %v9143_v45 = vsel %vm385_vm0, %v18919_v60, %v17711_v52 }
 0x70d   : > { %v8947_v30 = vpop.permute.xlu0 %8946 }
 0x70e   : > { %v8605_v3 = vadd.f32 %v17494_v12, %v8380_v41  ;;  %v8941_v25 = vpop.permute.xlu1 %8940  ;;  %9042 = vrot.lane.b32.xlu0 %v8710_v63, %s12285_s25  ;;  %v17903_v17 = vsel %vm2020_vm1, %v9142_v14, %v8947_v30  ;;  %v9145_v14 = vsel %vm385_vm0, %v18920_v9, %v17720_v27 }
 0x70f   : > { %v17906_v4 = vsel %vm2020_vm1, %v9139_v58, %v8941_v25 }
 0x710   : > { %v8711_v40 = vmax.f32 %v8605_v3, 0.0 }
 0x711   : > { %v8951_v8 = vpop.permute.xlu0 %8950 }
 0x712   : > { %9044 = vrot.lane.b32.xlu1 %v8711_v40, %s12285_s25  ;;  %v8945_v12 = vpop.permute.xlu1 %8944  ;;  %v17916_v36 = vsel %vm2020_vm1, %v9144_v47, %v8951_v8 }
 0x713   : > { %v17919_v46 = vsel %vm2020_vm1, %v9141_v39, %v8945_v12 }
 0x716   : > { %v8949_v63 = vpop.permute.xlu1 %8948 }
 0x717   : > { %v17925_v22 = vsel %vm2020_vm1, %v9143_v45, %v8949_v63  ;;  %v8384_v41 = vpop.f32.mrb[180].mxu0 }
 0x718   : > { %v8385_v50 = vadd.f32 %v17675_v48, %v8384_v41  ;;  %v8386_v19 = vpop.f32.mrb[181].mxu0 }
 0x71a   : > { %v8610_v30 = vadd.f32 %v17520_v61, %v8385_v50  ;;  %v8953_v62 = vpop.permute.xlu1 %8952 }
 0x71b   : > { %v17933_v58 = vsel %vm2020_vm1, %v9145_v14, %v8953_v62  ;;  %v8389_v3 = vpop.f32.mrb[182].mxu0 }
 0x71c   : > { %v8712_v52 = vmax.f32 %v8610_v30, 0.0  ;;  %v8390_v25 = vadd.f32 %v17675_v48, %v8389_v3  ;;  %v8391_v40 = vpop.f32.mrb[183].mxu0  ;;  %v18921_v3 = vld [vmem:[#allocation7_spill] sm:$0xff] }
 0x71e   : > { %v8615_v7 = vadd.f32 %v17516_v31, %v8390_v25  ;;  %9046 = vrot.lane.b32.xlu0 %v8712_v52, %s12285_s25  ;;  %v9114_v52 = vsel %vm385_vm0, %v18921_v3, %v17588_v11 }
 0x71f   : > { %v8394_v47 = vpop.f32.mrb[184].mxu0  ;;  %v9146_v40 = vsel %vm2020_vm1, %v9114_v52, %v17708_v26  ;;  %v18925_v52 = vld [vmem:[#allocation93_spill] sm:$0xff] }
 0x720   : > { %v8713_v8 = vmax.f32 %v8615_v7, 0.0  ;;  %v8395_v27 = vadd.f32 %v17675_v48, %v8394_v47  ;;  %v8396_v56 = vpop.f32.mrb[185].mxu0 }
 0x722   : > { %v8620_v61 = vadd.f32 %v17542_v32, %v8395_v27  ;;  %9048 = vrot.lane.b32.xlu1 %v8713_v8, %s12285_s25 }
 0x723   : > { %v8399_v39 = vpop.f32.mrb[186].mxu0 }
 0x724   : > { %v8714_v12 = vmax.f32 %v8620_v61, 0.0  ;;  %v8400_v60 = vadd.f32 %v17675_v48, %v8399_v39  ;;  %v8401_v45 = vpop.f32.mrb[187].mxu0 }
 0x726   : > { %v8625_v31 = vadd.f32 %v17539_v13, %v8400_v60  ;;  %9050 = vrot.lane.b32.xlu0 %v8714_v12, %s12285_s25 }
 0x728   : > { %v8715_v63 = vmax.f32 %v8625_v31, 0.0  ;;  %v18923_v31 = vld [vmem:[#allocation97_spill] sm:$0xff] }
 0x72a   : > { %9052 = vrot.lane.b32.xlu1 %v8715_v63, %s12285_s25 }
 0x72f   : > { %v8404_v41 = vpop.f32.mrb[188].mxu0 }
 0x730   : > { %v8405_v50 = vadd.f32 %v17675_v48, %v8404_v41  ;;  %v8406_v19 = vpop.f32.mrb[189].mxu0 }
 0x731   : > { %v18924_v19 = vld [vmem:[#allocation103_spill] sm:$0xff] }
 0x732   : > { %v8630_v32 = vadd.f32 %v17569_v35, %v8405_v50 }
 0x733   : > { %v8409_v9 = vpop.f32.mrb[190].mxu0 }
 0x734   : > { %v8716_v14 = vmax.f32 %v8630_v32, 0.0  ;;  %v8410_v30 = vadd.f32 %v17675_v48, %v8409_v9  ;;  %v8411_v62 = vpop.f32.mrb[191].mxu0 }
 0x736   : > { %v8635_v13 = vadd.f32 %v17563_v54, %v8410_v30  ;;  %9054 = vrot.lane.b32.xlu0 %v8716_v14, %s12285_s25  ;;  %v18922_v54 = vld [vmem:[#allocation6_spill] sm:$0xff] }
 0x737   : > { %v8414_v25 = vpop.f32.mrb[192].mxu0  ;;  %v9115_v11 = vsel %vm385_vm0, %v18922_v54, %v17620_v20 }
 0x738   : > { %v8717_v35 = vmax.f32 %v8635_v13, 0.0  ;;  %v8415_v7 = vadd.f32 %v17675_v48, %v8414_v25  ;;  %v8416_v47 = vpop.f32.mrb[193].mxu0  ;;  %v9019_v8 = vpop.permute.xlu0 %9018  ;;  %v9147_v61 = vsel %vm2020_vm1, %v9115_v11, %v17730_v53 }
 0x739   : > { %v9178_v27 = vsel %vm2053_vm2, %v9146_v40, %v9019_v8 }
 0x73a   : > { %v8640_v56 = vadd.f32 %v17592_v23, %v8415_v7  ;;  %9210 = vst [vmem:[%s17961_s16] sm:$0xff] %v9178_v27  ;;  %9056 = vrot.lane.b32.xlu1 %v8717_v35, %s12285_s25 }
 0x73b   : > { %v8419_v26 = vpop.f32.mrb[194].mxu0 }
 0x73c   : > { %v8718_v39 = vmax.f32 %v8640_v56, 0.0  ;;  %v8420_v12 = vadd.f32 %v17675_v48, %v8419_v26  ;;  %v8421_v60 = vpop.f32.mrb[195].mxu0  ;;  %v9021_v23 = vpop.permute.xlu1 %9020  ;;  %v18926_v56 = vld [vmem:[#allocation112_spill] sm:$0xff] }
 0x73d   : > { %v9179_v45 = vsel %vm2053_vm2, %v9147_v61, %v9021_v23  ;;  %v18927_v60 = vld [vmem:[#allocation94_spill] sm:$0xff] }
 0x73e   : > { %v8645_v63 = vadd.f32 %v18923_v31, %v8420_v12  ;;  %9211 = vst [vmem:[%s17961_s16 + $0x8] sm:$0xff] %v9179_v45  ;;  %9058 = vrot.lane.b32.xlu0 %v8718_v39, %s12285_s25 }
 0x740   : > { %v8719_v41 = vmax.f32 %v8645_v63, 0.0 }
 0x742   : > { %9060 = vrot.lane.b32.xlu1 %v8719_v41, %s12285_s25 }
 0x743   : > { %v8424_v20 = vpop.f32.mrb[196].mxu0 }
 0x744   : > { %v8425_v50 = vadd.f32 %v17675_v48, %v8424_v20  ;;  %v8426_v53 = vpop.f32.mrb[197].mxu0 }
 0x746   : > { %v8650_v32 = vadd.f32 %v18924_v19, %v8425_v50  ;;  %v18928_v50 = vld [vmem:[#allocation63_spill] sm:$0xff] }
 0x747   : > { %v8429_v9 = vpop.f32.mrb[198].mxu0 }
 0x748   : > { %v8720_v14 = vmax.f32 %v8650_v32, 0.0  ;;  %v8430_v30 = vadd.f32 %v17675_v48, %v8429_v9  ;;  %v8431_v62 = vpop.f32.mrb[199].mxu0  ;;  %v9023_v13 = vpop.permute.xlu0 %9022 }
 0x749   : > { %v9180_v3 = vsel %vm2053_vm2, %v17723_v57, %v9023_v13 }
 0x74a   : > { %v8655_v25 = vadd.f32 %v18925_v52, %v8430_v30  ;;  %9212 = vst [vmem:[%s17961_s16 + $0x10] sm:$0xff] %v9180_v3  ;;  %9062 = vrot.lane.b32.xlu0 %v8720_v14, %s12285_s25  ;;  %v18929_v30 = vld [vmem:[#allocation111_spill] sm:$0xff] }
 0x74b   : > { %v8434_v40 = vpop.f32.mrb[200].mxu0 }
 0x74c   : > { %v8721_v35 = vmax.f32 %v8655_v25, 0.0  ;;  %v8435_v7 = vadd.f32 %v17675_v48, %v8434_v40  ;;  %v8436_v47 = vpop.f32.mrb[201].mxu0  ;;  %v9025_v8 = vpop.permute.xlu1 %9024 }
 0x74d   : > { %v9181_v27 = vsel %vm2053_vm2, %v17747_v43, %v9025_v8 }
 0x74e   : > { %v8660_v54 = vadd.f32 %v18926_v56, %v8435_v7  ;;  %9213 = vst [vmem:[%s17961_s16 + $0x18] sm:$0xff] %v9181_v27  ;;  %9064 = vrot.lane.b32.xlu1 %v8721_v35, %s12285_s25  ;;  %v18930_v7 = vld [vmem:[#allocation117_spill] sm:$0xff] }
 0x74f   : > { %v8439_v57 = vpop.f32.mrb[202].mxu0 }
 0x750   : > { %v8722_v11 = vmax.f32 %v8660_v54, 0.0  ;;  %v8440_v26 = vadd.f32 %v17675_v48, %v8439_v57  ;;  %v8441_v61 = vpop.f32.mrb[203].mxu0  ;;  %v9027_v39 = vpop.permute.xlu0 %9026  ;;  %v18931_v57 = vld [vmem:[#allocation61_spill] sm:$0xff] }
 0x751   : > { %v9182_v12 = vsel %vm2053_vm2, %v17734_v15, %v9027_v39 }
 0x752   : > { %v8665_v23 = vadd.f32 %v18927_v60, %v8440_v26  ;;  %9214 = vst [vmem:[%s17961_s16 + $0x20] sm:$0xff] %v9182_v12  ;;  %9066 = vrot.lane.b32.xlu0 %v8722_v11, %s12285_s25  ;;  %v18932_v26 = vld [vmem:[#allocation59_spill] sm:$0xff] }
 0x754   : > { %v8723_v43 = vmax.f32 %v8665_v23, 0.0  ;;  %v9029_v45 = vpop.permute.xlu1 %9028 }
 0x755   : > { %v9183_v31 = vsel %vm2053_vm2, %v17759_v6, %v9029_v45 }
 0x756   : > { %9215 = vst [vmem:[%s17961_s16 + $0x28] sm:$0xff] %v9183_v31  ;;  %v8444_v63 = vpop.f32.mrb[204].mxu0  ;;  %9068 = vrot.lane.b32.xlu1 %v8723_v43, %s12285_s25 }
 0x757   : > { %v8445_v41 = vadd.f32 %v17675_v48, %v8444_v63  ;;  %v8446_v20 = vpop.f32.mrb[205].mxu0 }
 0x759   : > { %v8670_v15 = vadd.f32 %v18928_v50, %v8445_v41 }
 0x75b   : > { %v8724_v53 = vmax.f32 %v8670_v15, 0.0 }
 0x75d   : > { %9070 = vrot.lane.b32.xlu0 %v8724_v53, %s12285_s25 }
 0x75e   : > { %v8449_v19 = vpop.f32.mrb[206].mxu0 }
 0x75f   : > { %v8450_v32 = vadd.f32 %v17675_v48, %v8449_v19  ;;  %v8451_v9 = vpop.f32.mrb[207].mxu0 }
 0x760   : > { %v9031_v14 = vpop.permute.xlu0 %9030 }
 0x761   : > { %v8675_v6 = vadd.f32 %v18929_v30, %v8450_v32  ;;  %v9184_v62 = vsel %vm2053_vm2, %v17744_v29, %v9031_v14 }
 0x762   : > { %9216 = vst [vmem:[%s17961_s16 + $0x30] sm:$0xff] %v9184_v62 }
 0x763   : > { %v8725_v13 = vmax.f32 %v8675_v6, 0.0  ;;  %v8454_v3 = vpop.f32.mrb[208].mxu0 }
 0x764   : > { %v8455_v52 = vadd.f32 %v17675_v48, %v8454_v3  ;;  %v8456_v25 = vpop.f32.mrb[209].mxu0  ;;  %v9033_v40 = vpop.permute.xlu1 %9032 }
 0x765   : > { %v9185_v35 = vsel %vm2053_vm2, %v17773_v21, %v9033_v40  ;;  %9072 = vrot.lane.b32.xlu1 %v8725_v13, %s12285_s25 }
 0x766   : > { %v8680_v47 = vadd.f32 %v18930_v7, %v8455_v52  ;;  %9217 = vst [vmem:[%s17961_s16 + $0x38] sm:$0xff] %v9185_v35 }
 0x767   : > { %v8459_v8 = vpop.f32.mrb[210].mxu0 }
 0x768   : > { %v8726_v27 = vmax.f32 %v8680_v47, 0.0  ;;  %v8460_v29 = vadd.f32 %v17675_v48, %v8459_v8  ;;  %v8461_v56 = vpop.f32.mrb[211].mxu0  ;;  %v9035_v54 = vpop.permute.xlu0 %9034 }
 0x769   : > { %v9186_v11 = vsel %vm2053_vm2, %v18931_v57, %v9035_v54 }
 0x76a   : > { %v8685_v61 = vadd.f32 %v18932_v26, %v8460_v29  ;;  %9218 = vst [vmem:[%s17961_s16 + $0x40] sm:$0xff] %v9186_v11  ;;  %9074 = vrot.lane.b32.xlu0 %v8726_v27, %s12285_s25 }
 0x76c   : > { %v8727_v21 = vmax.f32 %v8685_v61, 0.0  ;;  %v9037_v39 = vpop.permute.xlu1 %9036 }
 0x76d   : > { %v9187_v12 = vsel %vm2053_vm2, %v17788_v0, %v9037_v39 }
 0x76e   : > { %9219 = vst [vmem:[%s17961_s16 + $0x48] sm:$0xff] %v9187_v12  ;;  %v8464_v60 = vpop.f32.mrb[212].mxu0  ;;  %9076 = vrot.lane.b32.xlu1 %v8727_v21, %s12285_s25 }
 0x76f   : > { %v8465_v23 = vadd.f32 %v17675_v48, %v8464_v60  ;;  %v8466_v43 = vpop.f32.mrb[213].mxu0 }
 0x771   : > { %v8690_v45 = vadd.f32 %v17804_v28, %v8465_v23 }
 0x772   : > { %v8469_v31 = vpop.f32.mrb[214].mxu0 }
 0x773   : > { %v8728_v63 = vmax.f32 %v8690_v45, 0.0  ;;  %v8470_v41 = vadd.f32 %v17675_v48, %v8469_v31  ;;  %v8471_v20 = vpop.f32.mrb[215].mxu0 }
 0x775   : > { %v8695_v0 = vadd.f32 %v17794_v44, %v8470_v41  ;;  %9078 = vrot.lane.b32.xlu0 %v8728_v63, %s12285_s25 }
 0x777   : > { %v8729_v50 = vmax.f32 %v8695_v0, 0.0 }
 0x778   : > { %v9039_v15 = vpop.permute.xlu0 %9038 }
 0x779   : > { %v9188_v53 = vsel %vm2053_vm2, %v17770_v34, %v9039_v15  ;;  %9080 = vrot.lane.b32.xlu1 %v8729_v50, %s12285_s25  ;;  %s9464_s25 = sshll.u32 %s12371_s21, 12  ;;  %s18107_s21 = scalar_lea.sflag [#allocation4], %s377_s15 }
 0x77a   : > { %9220 = vst [vmem:[%s17961_s16 + $0x50] sm:$0xff] %v9188_v53  ;;  %s18098_s12 = scalar_lea.hbm %s18159_s11, %s9464_s25 }
 0x77c   : > { %v9041_v28 = vpop.permute.xlu1 %9040 }
 0x77d   : > { %v9189_v48 = vsel %vm2053_vm2, %v17807_v2, %v9041_v28 }
 0x77e   : > { %9221 = vst [vmem:[%s17961_s16 + $0x58] sm:$0xff] %v9189_v48 }
 0x780   : > { %v9043_v19 = vpop.permute.xlu0 %9042 }
 0x781   : > { %v9190_v44 = vsel %vm2053_vm2, %v17785_v42, %v9043_v19 }
 0x782   : > { %9222 = vst [vmem:[%s17961_s16 + $0x60] sm:$0xff] %v9190_v44 }
 0x784   : > { %v9045_v32 = vpop.permute.xlu1 %9044 }
 0x785   : > { %v9191_v34 = vsel %vm2053_vm2, %v17822_v55, %v9045_v32 }
 0x786   : > { %9223 = vst [vmem:[%s17961_s16 + $0x68] sm:$0xff] %v9191_v34 }
 0x790   : > { %v9047_v9 = vpop.permute.xlu0 %9046 }
 0x791   : > { %v9192_v14 = vsel %vm2053_vm2, %v17802_v24, %v9047_v9 }
 0x792   : > { %9224 = vst [vmem:[%s17961_s16 + $0x70] sm:$0xff] %v9192_v14 }
 0x794   : > { %v9049_v2 = vpop.permute.xlu1 %9048 }
 0x795   : > { %v9193_v30 = vsel %vm2053_vm2, %v17835_v16, %v9049_v2 }
 0x796   : > { %9225 = vst [vmem:[%s17961_s16 + $0x78] sm:$0xff] %v9193_v30 }
 0x798   : > { %v9051_v42 = vpop.permute.xlu0 %9050 }
 0x799   : > { %v9194_v6 = vsel %vm2053_vm2, %v17819_v33, %v9051_v42 }
 0x79a   : > { %9226 = vst [vmem:[%s17961_s16 + $0x80] sm:$0xff] %v9194_v6 }
 0x79c   : > { %v9053_v55 = vpop.permute.xlu1 %9052 }
 0x79d   : > { %v9195_v62 = vsel %vm2053_vm2, %v17847_v10, %v9053_v55 }
 0x79e   : > { %9227 = vst [vmem:[%s17961_s16 + $0x88] sm:$0xff] %v9195_v62 }
 0x7a8   : > { %v9055_v24 = vpop.permute.xlu0 %9054 }
 0x7a9   : > { %v9196_v13 = vsel %vm2053_vm2, %v17832_v51, %v9055_v24 }
 0x7aa   : > { %9228 = vst [vmem:[%s17961_s16 + $0x90] sm:$0xff] %v9196_v13 }
 0x7ac   : > { %v9057_v16 = vpop.permute.xlu1 %9056 }
 0x7ad   : > { %v9197_v3 = vsel %vm2053_vm2, %v17861_v18, %v9057_v16 }
 0x7ae   : > { %9229 = vst [vmem:[%s17961_s16 + $0x98] sm:$0xff] %v9197_v3 }
 0x7b0   : > { %v9059_v33 = vpop.permute.xlu0 %9058 }
 0x7b1   : > { %v9198_v52 = vsel %vm2053_vm2, %v17844_v5, %v9059_v33 }
 0x7b2   : > { %9230 = vst [vmem:[%s17961_s16 + $0xa0] sm:$0xff] %v9198_v52 }
 0x7b4   : > { %v9061_v10 = vpop.permute.xlu1 %9060 }
 0x7b5   : > { %v9199_v25 = vsel %vm2053_vm2, %v17876_v59, %v9061_v10 }
 0x7b6   : > { %9231 = vst [vmem:[%s17961_s16 + $0xa8] sm:$0xff] %v9199_v25 }
 0x7bc   : > { %v9063_v51 = vpop.permute.xlu0 %9062 }
 0x7bd   : > { %v9200_v40 = vsel %vm2053_vm2, %v17858_v37, %v9063_v51 }
 0x7be   : > { %9232 = vst [vmem:[%s17961_s16 + $0xb0] sm:$0xff] %v9200_v40 }
 0x7c0   : > { %v9065_v18 = vpop.permute.xlu1 %9064 }
 0x7c1   : > { %v9201_v35 = vsel %vm2053_vm2, %v17891_v1, %v9065_v18 }
 0x7c2   : > { %9233 = vst [vmem:[%s17961_s16 + $0xb8] sm:$0xff] %v9201_v35 }
 0x7c4   : > { %v9067_v5 = vpop.permute.xlu0 %9066 }
 0x7c5   : > { %v9202_v7 = vsel %vm2053_vm2, %v17873_v49, %v9067_v5 }
 0x7c6   : > { %9234 = vst [vmem:[%s17961_s16 + $0xc0] sm:$0xff] %v9202_v7 }
 0x7c8   : > { %v9069_v59 = vpop.permute.xlu1 %9068 }
 0x7c9   : > { %v9203_v47 = vsel %vm2053_vm2, %v17906_v4, %v9069_v59 }
 0x7ca   : > { %9235 = vst [vmem:[%s17961_s16 + $0xc8] sm:$0xff] %v9203_v47 }
 0x7cf   : > { %v9071_v37 = vpop.permute.xlu0 %9070 }
 0x7d0   : > { %v9204_v1 = vsel %vm2053_vm2, %v17888_v38, %v9071_v37 }
 0x7d1   : > { %9236 = vst [vmem:[%s17961_s16 + $0xd0] sm:$0xff] %v9204_v1 }
 0x7d7   : > { %v9073_v8 = vpop.permute.xlu1 %9072 }
 0x7d8   : > { %v9205_v27 = vsel %vm2053_vm2, %v17919_v46, %v9073_v8 }
 0x7d9   : > { %9237 = vst [vmem:[%s17961_s16 + $0xd8] sm:$0xff] %v9205_v27 }
 0x7dc   : > { %v9075_v49 = vpop.permute.xlu0 %9074 }
 0x7dd   : > { %v9206_v29 = vsel %vm2053_vm2, %v17903_v17, %v9075_v49 }
 0x7de   : > { %9238 = vst [vmem:[%s17961_s16 + $0xe0] sm:$0xff] %v9206_v29 }
 0x7e0   : > { %v9077_v4 = vpop.permute.xlu1 %9076 }
 0x7e1   : > { %v9207_v56 = vsel %vm2053_vm2, %v17925_v22, %v9077_v4 }
 0x7e2   : > { %9239 = vst [vmem:[%s17961_s16 + $0xe8] sm:$0xff] %v9207_v56 }
 0x7e7   : > { %v9079_v38 = vpop.permute.xlu0 %9078 }
 0x7e8   : > { %v9208_v46 = vsel %vm2053_vm2, %v17916_v36, %v9079_v38 }
 0x7e9   : > { %9240 = vst [vmem:[%s17961_s16 + $0xf0] sm:$0xff] %v9208_v46 }
 0x7eb   : > { %v9081_v17 = vpop.permute.xlu1 %9080 }
 0x7ec   : > { %v9209_v22 = vsel %vm2053_vm2, %v17933_v58, %v9081_v17 }
 0x7ed   : > { %9241 = vst [vmem:[%s17961_s16 + $0xf8] sm:$0xff] %v9209_v22 }
 0x7ee   : > { %12231 = shalt.err (!%p12228_p3)
}
 0x7ef   : > { %s12232_s15 = scalar_lea.hbm %s18098_s12, 4096  ;;  %s12236_s29 = scalar_lea.hbm %s18159_s11, 8192 }
 0x7f0   : > { %p12233_p4 = scmp.ne.s32.totalorder %s18098_s12, %s12232_s15  ;;  %p12237_p9 = scmp.lt.u32.totalorder %s18098_s12, %s18159_s11 }
 0x7f1   : > { %p12238_p10 = scmp.lt.u32.totalorder %s12236_s29, %s12232_s15  ;;  %p12240_p12 = scmp.lt.u32.totalorder %s12232_s15, %s18098_s12 }
 0x7f2   : > { %p12234_p7 = pnand %p12233_p4, %p12388_p5 }
 0x7f3   : > { %p12239_p11 = por %p12238_p10, %p12237_p9 }
 0x7f4   : > { %p12235_p8 = pneg %p12234_p7 }
 0x7f5   : > { %p12241_p13 = por %p12240_p12, %p12239_p11 }
 0x7f7   : > { %p12242_p0 = pnand %p12241_p13, %p12235_p8 }
 0x7f9   : > { %12245 = shalt.err (!%p12242_p0)
}
 0x7fa   : > { %s12288_s14 = smov 128   ;;  %s12289_s0 = smov 8  }
 0x7fb   : > { %10249 = dma.vmem_to_hbm [thread:$0]  (%p12388_p5), %s18100_s24, 4096, %s18098_s12, %s18107_s21, %s12288_s14, %s12288_s14, %s12289_s0  }
 0x7fc PF: > { %p10255_p1 = scmp.ge.s32.totalorder %s12280_s20, 2  ;;  %s9271_s22 = sand.u32 1, %s12268_s17  }
 0x7fd   : > { %s9272_s15 = scalar_lea.sflag [#allocation4], %s9271_s22 }
 0x7fe   : > { %p10252_p2 = pnand %p10255_p1, %p12392_p6 }
 0x800   : > { %12263 = dma.done.wait (!%p10252_p2), %s9272_s15, 4096  }
 0x801   : > { %12265 = vsyncadd (!%p10252_p2), %s9272_s15, 4294963200  ;;  %p21_p3 = scmp.ge.s32.totalorder %s12375_s23, 4   ;;  %s18933_s17 = smov %s12272_s18 }
 0x802   : > { %s18934_s18 = smov %s12276_s19  ;;  %s18935_s19 = smov %s12386_s26 }
 0x803   : > { %s18936_s20 = smov %s12375_s23  ;;  %23 = sbr.rel (!%p21_p3) target bundleno = 5 (0x5), region = 101 }
 0x80a   :  { %9277 = vsyncpa [#allocation4], 1 }
 0x80b   :  { %9279 = vsyncpa [#allocation4 + $0x1], 1 }

</bundles_post_ra>
